<compile_context>
chip_gen: v7x
topology: tpu7x:2x2x1
jax: 0.10.0
libtpu: 0.0.40
codegen_flags: <defaults>
</compile_context>

<pallas_src>
import functools
import random

import jax
import jax.numpy as jnp
from jax.experimental import pallas as pl
from jax.experimental.pallas import tpu as pltpu

# ---- config from the module ----
CHANNELS = 16
BLOCKS = 2
LAYERS = 8
DIL_GROWTH = 2
KSIZE = 3
COND_PARS = 64
EMB_DIM = 64
NUM_EMB = 10  # synthetic "num_devices" (train_index.csv row count)

N_LAYERS = BLOCKS * LAYERS
MAX_DIL = DIL_GROWTH ** (LAYERS - 1)
PAD_MAX = (KSIZE - 1) * MAX_DIL            # 256 — lane aligned


# ----------------------------------------------------------------------------
# Fused Pallas kernel: in-conv + 16 GatedTCN-FiLM layers + out-conv
# ----------------------------------------------------------------------------
def _tcn_fused_kernel(x_ref, wtap_ref, bz_ref, wm_ref, bm_ref,
                      inw_ref, inb_ref, outw_ref, outb_ref,
                      out_ref, scr_ref, *,
                      bt, channels, ksize, layers_per_block, n_blocks,
                      dil_growth, pad_max, T):
    C = channels
    P = pad_max
    W = P + T

    in_w = inw_ref[...]                       # (C, 1)
    in_b = inb_ref[...]                       # (C, 1)

    # Causal-pad prefix (zeros, never overwritten by layers) + input 1x1 conv.
    # NOTE: done every grid step for every item (megacore-safe; do not gate on
    # program_id).
    for bi in range(bt):
        scr_ref[bi, :, 0:P] = jnp.zeros((C, P), jnp.float32)
        scr_ref[bi, :, P:W] = in_w * x_ref[bi] + in_b          # (C,1)*(1,T)+(C,1)

    # Gated dilated residual layers.  fori over the dilation blocks bounds
    # vreg live ranges; layers inside are unrolled so tap offsets stay static.
    def block_body(blk, carry):
        for li in range(layers_per_block):
            lidx = blk * layers_per_block + li                 # traced layer idx
            dil = dil_growth ** li                             # static
            pad = (ksize - 1) * dil

            # Per-layer weights loaded once, shared across the bt items.
            w_taps = [wtap_ref[lidx * ksize + k] for k in range(ksize)]  # (2C,C)
            b_z = bz_ref[lidx]                                 # (2C, 1) FiLM folded
            w_mix = wm_ref[lidx]                               # (C, C)
            b_mix = bm_ref[lidx]                               # (C, 1)

            for bi in range(bt):
                xfull = scr_ref[bi]                            # (C, W) aligned load
                # K causal taps as in-register shifted views of the single
                # resident window; tap K-1 is the un-shifted layer input.
                z = b_z
                tap_last = None
                for k in range(ksize):
                    off = P - pad + k * dil
                    tap = xfull[:, off:off + T]                # (C, T)
                    z = z + jnp.dot(w_taps[k], tap,
                                    preferred_element_type=jnp.float32)
                    tap_last = tap
                # Gated activation; sigmoid(x) == 0.5*(tanh(x/2)+1).
                gate = 0.5 * jnp.tanh(0.5 * z[C:, :]) + 0.5
                act = jnp.tanh(z[:C, :]) * gate                # (C, T)
                # 1x1 mix conv + residual.
                y = jnp.dot(w_mix, act,
                            preferred_element_type=jnp.float32) + b_mix + tap_last
                scr_ref[bi, :, P:W] = y
        return carry

    jax.lax.fori_loop(0, n_blocks, block_body, 0)

    # Output 1x1 conv (C -> 1) as an MXU dot (no cross-sublane reduction).
    out_w = outw_ref[...]                     # (1, C)
    out_b = outb_ref[...]                     # (1, 1)
    for bi in range(bt):
        h = scr_ref[bi, :, P:W]                                # (C, T)
        out_ref[bi] = jnp.dot(out_w, h,
                              preferred_element_type=jnp.float32) + out_b


def _pick_batch_tile(B):
    """Largest divisor of B that still leaves >= 2 parallel grid steps
    (feeds both v7x TensorCores) while minimizing grid length on 1-TC chips."""
    if B <= 1:
        return 1
    target = min(max(1, B // 2), 8)
    for bt in range(target, 0, -1):
        if B % bt == 0:
            return bt
    return 1


def tcn_pallas(x, wtap, bz, wm, bm, in_w, in_b, out_w, out_b, *, batch_tile=None):
    B, _, T = x.shape
    assert T % 128 == 0, "time length must be a multiple of 128 lanes"
    C = CHANNELS
    L = N_LAYERS
    bt = batch_tile if batch_tile is not None else _pick_batch_tile(B)
    assert B % bt == 0
    grid = (B // bt,)

    kernel = functools.partial(
        _tcn_fused_kernel, bt=bt, channels=C, ksize=KSIZE,
        layers_per_block=LAYERS, n_blocks=BLOCKS, dil_growth=DIL_GROWTH,
        pad_max=PAD_MAX, T=T)

    return pl.pallas_call(
        kernel,
        out_shape=jax.ShapeDtypeStruct((B, 1, T), jnp.float32),
        grid=grid,
        in_specs=[
            pl.BlockSpec((bt, 1, T), lambda g: (g, 0, 0)),        # x
            pl.BlockSpec((L * KSIZE, 2 * C, C), lambda g: (0, 0, 0)),  # per-tap w
            pl.BlockSpec((L, 2 * C, 1), lambda g: (0, 0, 0)),     # folded conv b
            pl.BlockSpec((L, C, C), lambda g: (0, 0, 0)),         # mix w
            pl.BlockSpec((L, C, 1), lambda g: (0, 0, 0)),         # mix b
            pl.BlockSpec((C, 1), lambda g: (0, 0)),               # in conv w
            pl.BlockSpec((C, 1), lambda g: (0, 0)),               # in conv b
            pl.BlockSpec((1, C), lambda g: (0, 0)),               # out conv w
            pl.BlockSpec((1, 1), lambda g: (0, 0)),               # out conv b
        ],
        out_specs=pl.BlockSpec((bt, 1, T), lambda g: (g, 0, 0)),
        scratch_shapes=[pltpu.VMEM((bt, C, PAD_MAX + T), jnp.float32)],
        compiler_params=pltpu.CompilerParams(
            dimension_semantics=("parallel",)),
    )(x, wtap, bz, wm, bm, in_w, in_b, out_w, out_b)


# ----------------------------------------------------------------------------
# Deterministic synthetic parameters (stand-in for model_weights_ep-6.pt)
# ----------------------------------------------------------------------------
def init_params(key):
    L = N_LAYERS
    ks = jax.random.split(key, 7)
    film_b = jnp.concatenate(
        [jnp.ones((2 * CHANNELS,), jnp.float32),
         jnp.zeros((2 * CHANNELS,), jnp.float32)])
    return {
        "emb": jax.random.normal(ks[0], (NUM_EMB, EMB_DIM)) * 0.1,
        "cond_w": jax.random.normal(ks[1], (EMB_DIM, COND_PARS))
                  / jnp.sqrt(EMB_DIM),
        "cond_b": jnp.zeros((COND_PARS,), jnp.float32),
        "in_w": jax.random.normal(ks[2], (CHANNELS, 1)) * 0.5,   # Conv1d(1,C,1)
        "in_b": jnp.zeros((CHANNELS, 1), jnp.float32),
        "out_w": jax.random.normal(ks[3], (1, CHANNELS))
                 / jnp.sqrt(CHANNELS),                           # Conv1d(C,1,1)
        "out_b": jnp.zeros((1, 1), jnp.float32),
        # per-layer params, stacked along a leading layer axis
        "w": jax.random.normal(ks[4], (L, KSIZE, 2 * CHANNELS, CHANNELS))
             / jnp.sqrt(CHANNELS * KSIZE),
        "b": jnp.zeros((L, 2 * CHANNELS), jnp.float32),
        "film_w": jax.random.normal(ks[5], (L, COND_PARS, 4 * CHANNELS))
                  / jnp.sqrt(COND_PARS) * 0.1,
        "film_b": jnp.tile(film_b[None, :], (L, 1)),
        "wm": jax.random.normal(ks[6], (L, CHANNELS, CHANNELS))
              / jnp.sqrt(CHANNELS) * 0.5,
        "bm": jnp.zeros((L, CHANNELS, 1), jnp.float32),
    }


def _fold_film(params, device_id):
    """Fold FiLM (per-device scale/shift of the conv pre-activation) into the
    conv weights:  gamma*(Wx+b)+beta == (gamma⊙W)x + (gamma⊙b + beta)."""
    emb = params["emb"][device_id]                                  # (EMB_DIM,)
    cond = jnp.tanh(emb @ params["cond_w"] + params["cond_b"])      # (COND_PARS,)
    film = jnp.einsum("p,lpf->lf", cond, params["film_w"]) + params["film_b"]
    gamma = film[:, :2 * CHANNELS]                                  # (L, 2C)
    beta = film[:, 2 * CHANNELS:]                                   # (L, 2C)

    wf = params["w"] * gamma[:, None, :, None]                      # (L, K, 2C, C)
    # Per-tap layout for the kernel: row l*K + k holds tap k of layer l.
    wtap = wf.reshape(N_LAYERS * KSIZE, 2 * CHANNELS, CHANNELS)
    bz = (gamma * params["b"] + beta)[..., None]                    # (L, 2C, 1)
    return wtap, bz


# ----------------------------------------------------------------------------
# TCN.proc_with_emb_id(x, device_id)
# ----------------------------------------------------------------------------
def tcn_forward(params, x, device_id):
    wtap, bz = _fold_film(params, device_id)
    return tcn_pallas(x, wtap, bz, params["wm"], params["bm"],
                      params["in_w"], params["in_b"],
                      params["out_w"], params["out_b"])              # (B, 1, T)


# ----------------------------------------------------------------------------
class RandomUniFxEffect:
    def __init__(self, seed=0):
        if seed is not None:
            random.seed(seed)
        self.params = init_params(jax.random.PRNGKey(1))
        self.num_devices = NUM_EMB
        self.device_ids = list(range(self.num_devices))
        random.shuffle(self.device_ids)
        self.current_idx = 0
        self._forward = jax.jit(tcn_forward)

    def __call__(self, x):
        device_id = self.device_ids[self.current_idx]
        self.current_idx = (self.current_idx + 1) % self.num_devices
        if self.current_idx == 0:
            random.shuffle(self.device_ids)
        return self._forward(self.params, x, jnp.int32(device_id))


if __name__ == "__main__":
    B, T = 4, 512
    key = jax.random.PRNGKey(0)
    x = jax.random.normal(key, (B, 1, T), jnp.float32)   # NCL mono audio

    effect = RandomUniFxEffect(seed=0)
    y = effect(x)
    y = jax.block_until_ready(y)

    assert y.shape == (B, 1, T), y.shape
    assert bool(jnp.all(jnp.isfinite(y)))
    print("KERNEL_OK")
</pallas_src>

<mosaic_0001>
module attributes {stable_mosaic.version = 11 : i64} {
  func.func @_tcn_fused_kernel(%arg0: i32, %arg1: memref<2x1x512xf32, #tpu.memory_space<vmem>>, %arg2: memref<48x32x16xf32, #tpu.memory_space<vmem>>, %arg3: memref<16x32x1xf32, #tpu.memory_space<vmem>>, %arg4: memref<16x16x16xf32, #tpu.memory_space<vmem>>, %arg5: memref<16x16x1xf32, #tpu.memory_space<vmem>>, %arg6: memref<16x1xf32, #tpu.memory_space<vmem>>, %arg7: memref<16x1xf32, #tpu.memory_space<vmem>>, %arg8: memref<1x16xf32, #tpu.memory_space<vmem>>, %arg9: memref<1x1xf32, #tpu.memory_space<vmem>>, %arg10: memref<2x1x512xf32, #tpu.memory_space<vmem>>, %arg11: memref<2x16x768xf32, #tpu.memory_space<vmem>>) attributes {dimension_semantics = [#tpu.dimension_semantics<parallel>], iteration_bounds = array<i64: 2>, scalar_prefetch = 0 : i64, scratch_operands = 1 : i64, tpu.core_type = #tpu.core_type<tc>, window_params = [{transform_indices = @transform_0, window_bounds = array<i64: 2, 1, 512>}, {pipeline_mode = #tpu.pipeline_mode<synchronous>, transform_indices = @transform_1, window_bounds = array<i64: 48, 32, 16>}, {pipeline_mode = #tpu.pipeline_mode<synchronous>, transform_indices = @transform_2, window_bounds = array<i64: 16, 32, 1>}, {pipeline_mode = #tpu.pipeline_mode<synchronous>, transform_indices = @transform_3, window_bounds = array<i64: 16, 16, 16>}, {pipeline_mode = #tpu.pipeline_mode<synchronous>, transform_indices = @transform_4, window_bounds = array<i64: 16, 16, 1>}, {pipeline_mode = #tpu.pipeline_mode<synchronous>, transform_indices = @transform_5, window_bounds = array<i64: 16, 1>}, {pipeline_mode = #tpu.pipeline_mode<synchronous>, transform_indices = @transform_6, window_bounds = array<i64: 16, 1>}, {pipeline_mode = #tpu.pipeline_mode<synchronous>, transform_indices = @transform_7, window_bounds = array<i64: 1, 16>}, {pipeline_mode = #tpu.pipeline_mode<synchronous>, transform_indices = @transform_8, window_bounds = array<i64: 1, 1>}, {transform_indices = @transform_9, window_bounds = array<i64: 2, 1, 512>}]} {
    %c0 = arith.constant 0 : index
    %c0_0 = arith.constant 0 : index
    %0 = vector.load %arg6[%c0, %c0_0] : memref<16x1xf32, #tpu.memory_space<vmem>>, vector<16x1xf32>
    %c0_1 = arith.constant 0 : index
    %c0_2 = arith.constant 0 : index
    %1 = vector.load %arg7[%c0_1, %c0_2] : memref<16x1xf32, #tpu.memory_space<vmem>>, vector<16x1xf32>
    %cst = arith.constant 0.000000e+00 : f32
    %2 = vector.broadcast %cst : f32 to vector<16x256xf32>
    %c0_3 = arith.constant 0 : index
    %c0_4 = arith.constant 0 : index
    %c0_5 = arith.constant 0 : index
    %3 = vector.load %arg11[%c0_3, %c0_4, %c0_5] : memref<2x16x768xf32, #tpu.memory_space<vmem>>, vector<1x16x256xf32>
    %4 = vector.shape_cast %3 : vector<1x16x256xf32> to vector<16x256xf32>
    %5 = vector.shape_cast %2 : vector<16x256xf32> to vector<1x16x256xf32>
    tpu.vector_store %arg11[%c0_3, %c0_4, %c0_5], %5 {strides = array<i32>} : memref<2x16x768xf32, #tpu.memory_space<vmem>>, vector<1x16x256xf32>,
    %c0_6 = arith.constant 0 : index
    %c0_7 = arith.constant 0 : index
    %c0_8 = arith.constant 0 : index
    %6 = vector.load %arg1[%c0_6, %c0_7, %c0_8] : memref<2x1x512xf32, #tpu.memory_space<vmem>>, vector<1x1x512xf32>
    %7 = vector.shape_cast %6 : vector<1x1x512xf32> to vector<1x512xf32>
    %8 = vector.broadcast %0 : vector<16x1xf32> to vector<16x512xf32>
    %9 = vector.broadcast %7 : vector<1x512xf32> to vector<16x512xf32>
    %10 = arith.mulf %8, %9 : vector<16x512xf32>
    %11 = vector.broadcast %1 : vector<16x1xf32> to vector<16x512xf32>
    %12 = arith.addf %10, %11 : vector<16x512xf32>
    %c0_9 = arith.constant 0 : index
    %c0_10 = arith.constant 0 : index
    %c256 = arith.constant 256 : index
    %13 = vector.load %arg11[%c0_9, %c0_10, %c256] : memref<2x16x768xf32, #tpu.memory_space<vmem>>, vector<1x16x512xf32>
    %14 = vector.shape_cast %13 : vector<1x16x512xf32> to vector<16x512xf32>
    %15 = vector.shape_cast %12 : vector<16x512xf32> to vector<1x16x512xf32>
    tpu.vector_store %arg11[%c0_9, %c0_10, %c256], %15 {strides = array<i32>} : memref<2x16x768xf32, #tpu.memory_space<vmem>>, vector<1x16x512xf32>,
    %cst_11 = arith.constant 0.000000e+00 : f32
    %16 = vector.broadcast %cst_11 : f32 to vector<16x256xf32>
    %c1 = arith.constant 1 : index
    %c0_12 = arith.constant 0 : index
    %c0_13 = arith.constant 0 : index
    %17 = vector.load %arg11[%c1, %c0_12, %c0_13] : memref<2x16x768xf32, #tpu.memory_space<vmem>>, vector<1x16x256xf32>
    %18 = vector.shape_cast %17 : vector<1x16x256xf32> to vector<16x256xf32>
    %19 = vector.shape_cast %16 : vector<16x256xf32> to vector<1x16x256xf32>
    tpu.vector_store %arg11[%c1, %c0_12, %c0_13], %19 {strides = array<i32>} : memref<2x16x768xf32, #tpu.memory_space<vmem>>, vector<1x16x256xf32>,
    %c1_14 = arith.constant 1 : index
    %c0_15 = arith.constant 0 : index
    %c0_16 = arith.constant 0 : index
    %20 = vector.load %arg1[%c1_14, %c0_15, %c0_16] : memref<2x1x512xf32, #tpu.memory_space<vmem>>, vector<1x1x512xf32>
    %21 = vector.shape_cast %20 : vector<1x1x512xf32> to vector<1x512xf32>
    %22 = vector.broadcast %0 : vector<16x1xf32> to vector<16x512xf32>
    %23 = vector.broadcast %21 : vector<1x512xf32> to vector<16x512xf32>
    %24 = arith.mulf %22, %23 : vector<16x512xf32>
    %25 = vector.broadcast %1 : vector<16x1xf32> to vector<16x512xf32>
    %26 = arith.addf %24, %25 : vector<16x512xf32>
    %c1_17 = arith.constant 1 : index
    %c0_18 = arith.constant 0 : index
    %c256_19 = arith.constant 256 : index
    %27 = vector.load %arg11[%c1_17, %c0_18, %c256_19] : memref<2x16x768xf32, #tpu.memory_space<vmem>>, vector<1x16x512xf32>
    %28 = vector.shape_cast %27 : vector<1x16x512xf32> to vector<16x512xf32>
    %29 = vector.shape_cast %26 : vector<16x512xf32> to vector<1x16x512xf32>
    tpu.vector_store %arg11[%c1_17, %c0_18, %c256_19], %29 {strides = array<i32>} : memref<2x16x768xf32, #tpu.memory_space<vmem>>, vector<1x16x512xf32>,
    %c0_i32 = arith.constant 0 : i32
    %c2_i32 = arith.constant 2 : i32
    %30 = arith.addi %c0_i32, %c2_i32 : i32
    %c1_i32 = arith.constant 1 : i32
    scf.for %arg12 = %c0_i32 to %30 step %c1_i32  : i32 {
      %c8_i32 = arith.constant 8 : i32
      %49 = arith.muli %arg12, %c8_i32 : i32
      %c0_i32_39 = arith.constant 0 : i32
      %50 = arith.addi %49, %c0_i32_39 : i32
      %c3_i32 = arith.constant 3 : i32
      %51 = arith.muli %50, %c3_i32 : i32
      %c0_i32_40 = arith.constant 0 : i32
      %52 = arith.addi %51, %c0_i32_40 : i32
      %53 = arith.index_cast %52 : i32 to index
      %c0_41 = arith.constant 0 : index
      %c0_42 = arith.constant 0 : index
      %54 = vector.load %arg2[%53, %c0_41, %c0_42] : memref<48x32x16xf32, #tpu.memory_space<vmem>>, vector<1x32x16xf32>
      %55 = vector.shape_cast %54 : vector<1x32x16xf32> to vector<32x16xf32>
      %c3_i32_43 = arith.constant 3 : i32
      %56 = arith.muli %50, %c3_i32_43 : i32
      %c1_i32_44 = arith.constant 1 : i32
      %57 = arith.addi %56, %c1_i32_44 : i32
      %58 = arith.index_cast %57 : i32 to index
      %c0_45 = arith.constant 0 : index
      %c0_46 = arith.constant 0 : index
      %59 = vector.load %arg2[%58, %c0_45, %c0_46] : memref<48x32x16xf32, #tpu.memory_space<vmem>>, vector<1x32x16xf32>
      %60 = vector.shape_cast %59 : vector<1x32x16xf32> to vector<32x16xf32>
      %c3_i32_47 = arith.constant 3 : i32
      %61 = arith.muli %50, %c3_i32_47 : i32
      %c2_i32_48 = arith.constant 2 : i32
      %62 = arith.addi %61, %c2_i32_48 : i32
      %63 = arith.index_cast %62 : i32 to index
      %c0_49 = arith.constant 0 : index
      %c0_50 = arith.constant 0 : index
      %64 = vector.load %arg2[%63, %c0_49, %c0_50] : memref<48x32x16xf32, #tpu.memory_space<vmem>>, vector<1x32x16xf32>
      %65 = vector.shape_cast %64 : vector<1x32x16xf32> to vector<32x16xf32>
      %66 = arith.index_cast %50 : i32 to index
      %c0_51 = arith.constant 0 : index
      %c0_52 = arith.constant 0 : index
      %67 = vector.load %arg3[%66, %c0_51, %c0_52] : memref<16x32x1xf32, #tpu.memory_space<vmem>>, vector<1x32x1xf32>
      %68 = vector.shape_cast %67 : vector<1x32x1xf32> to vector<32x1xf32>
      %69 = arith.index_cast %50 : i32 to index
      %c0_53 = arith.constant 0 : index
      %c0_54 = arith.constant 0 : index
      %70 = vector.load %arg4[%69, %c0_53, %c0_54] : memref<16x16x16xf32, #tpu.memory_space<vmem>>, vector<1x16x16xf32>
      %71 = vector.shape_cast %70 : vector<1x16x16xf32> to vector<16x16xf32>
      %72 = arith.index_cast %50 : i32 to index
      %c0_55 = arith.constant 0 : index
      %c0_56 = arith.constant 0 : index
      %73 = vector.load %arg5[%72, %c0_55, %c0_56] : memref<16x16x1xf32, #tpu.memory_space<vmem>>, vector<1x16x1xf32>
      %74 = vector.shape_cast %73 : vector<1x16x1xf32> to vector<16x1xf32>
      %c0_57 = arith.constant 0 : index
      %c0_58 = arith.constant 0 : index
      %c0_59 = arith.constant 0 : index
      %75 = vector.load %arg11[%c0_57, %c0_58, %c0_59] : memref<2x16x768xf32, #tpu.memory_space<vmem>>, vector<1x16x768xf32>
      %76 = vector.shape_cast %75 : vector<1x16x768xf32> to vector<16x768xf32>
      %77 = vector.extract_strided_slice %76 {offsets = [0, 254], sizes = [16, 512], strides = [1, 1]} : vector<16x768xf32> to vector<16x512xf32>
      %cst_60 = arith.constant dense<0.000000e+00> : vector<32x512xf32>
      %78 = tpu.matmul %55, %77, %cst_60 {dimension_numbers = #tpu.dot_dimension_numbers<[1], [0], [0], [1], [0, 0, 1, 1], [], []>} : vector<32x16xf32>, vector<16x512xf32>, vector<32x512xf32> -> vector<32x512xf32>
      %79 = vector.broadcast %68 : vector<32x1xf32> to vector<32x512xf32>
      %80 = arith.addf %79, %78 : vector<32x512xf32>
      %81 = vector.extract_strided_slice %76 {offsets = [0, 255], sizes = [16, 512], strides = [1, 1]} : vector<16x768xf32> to vector<16x512xf32>
      %cst_61 = arith.constant dense<0.000000e+00> : vector<32x512xf32>
      %82 = tpu.matmul %60, %81, %cst_61 {dimension_numbers = #tpu.dot_dimension_numbers<[1], [0], [0], [1], [0, 0, 1, 1], [], []>} : vector<32x16xf32>, vector<16x512xf32>, vector<32x512xf32> -> vector<32x512xf32>
      %83 = arith.addf %80, %82 : vector<32x512xf32>
      %84 = vector.extract_strided_slice %76 {offsets = [0, 256], sizes = [16, 512], strides = [1, 1]} : vector<16x768xf32> to vector<16x512xf32>
      %cst_62 = arith.constant dense<0.000000e+00> : vector<32x512xf32>
      %85 = tpu.matmul %65, %84, %cst_62 {dimension_numbers = #tpu.dot_dimension_numbers<[1], [0], [0], [1], [0, 0, 1, 1], [], []>} : vector<32x16xf32>, vector<16x512xf32>, vector<32x512xf32> -> vector<32x512xf32>
      %86 = arith.addf %83, %85 : vector<32x512xf32>
      %87 = vector.extract_strided_slice %86 {offsets = [16, 0], sizes = [16, 512], strides = [1, 1]} : vector<32x512xf32> to vector<16x512xf32>
      %cst_63 = arith.constant 5.000000e-01 : f32
      %88 = vector.broadcast %cst_63 : f32 to vector<16x512xf32>
      %89 = arith.mulf %88, %87 : vector<16x512xf32>
      %90 = math.tanh %89 : vector<16x512xf32>
      %cst_64 = arith.constant 5.000000e-01 : f32
      %91 = vector.broadcast %cst_64 : f32 to vector<16x512xf32>
      %92 = arith.mulf %91, %90 : vector<16x512xf32>
      %cst_65 = arith.constant 5.000000e-01 : f32
      %93 = vector.broadcast %cst_65 : f32 to vector<16x512xf32>
      %94 = arith.addf %92, %93 : vector<16x512xf32>
      %95 = vector.extract_strided_slice %86 {offsets = [0, 0], sizes = [16, 512], strides = [1, 1]} : vector<32x512xf32> to vector<16x512xf32>
      %96 = math.tanh %95 : vector<16x512xf32>
      %97 = arith.mulf %96, %94 : vector<16x512xf32>
      %cst_66 = arith.constant dense<0.000000e+00> : vector<16x512xf32>
      %98 = tpu.matmul %71, %97, %cst_66 {dimension_numbers = #tpu.dot_dimension_numbers<[1], [0], [0], [1], [0, 0, 1, 1], [], []>} : vector<16x16xf32>, vector<16x512xf32>, vector<16x512xf32> -> vector<16x512xf32>
      %99 = vector.broadcast %74 : vector<16x1xf32> to vector<16x512xf32>
      %100 = arith.addf %98, %99 : vector<16x512xf32>
      %101 = arith.addf %100, %84 : vector<16x512xf32>
      %c0_67 = arith.constant 0 : index
      %c0_68 = arith.constant 0 : index
      %c256_69 = arith.constant 256 : index
      %102 = vector.load %arg11[%c0_67, %c0_68, %c256_69] : memref<2x16x768xf32, #tpu.memory_space<vmem>>, vector<1x16x512xf32>
      %103 = vector.shape_cast %102 : vector<1x16x512xf32> to vector<16x512xf32>
      %104 = vector.shape_cast %101 : vector<16x512xf32> to vector<1x16x512xf32>
      tpu.vector_store %arg11[%c0_67, %c0_68, %c256_69], %104 {strides = array<i32>} : memref<2x16x768xf32, #tpu.memory_space<vmem>>, vector<1x16x512xf32>,
      %c1_70 = arith.constant 1 : index
      %c0_71 = arith.constant 0 : index
      %c0_72 = arith.constant 0 : index
      %105 = vector.load %arg11[%c1_70, %c0_71, %c0_72] : memref<2x16x768xf32, #tpu.memory_space<vmem>>, vector<1x16x768xf32>
      %106 = vector.shape_cast %105 : vector<1x16x768xf32> to vector<16x768xf32>
      %107 = vector.extract_strided_slice %106 {offsets = [0, 254], sizes = [16, 512], strides = [1, 1]} : vector<16x768xf32> to vector<16x512xf32>
      %cst_73 = arith.constant dense<0.000000e+00> : vector<32x512xf32>
      %108 = tpu.matmul %55, %107, %cst_73 {dimension_numbers = #tpu.dot_dimension_numbers<[1], [0], [0], [1], [0, 0, 1, 1], [], []>} : vector<32x16xf32>, vector<16x512xf32>, vector<32x512xf32> -> vector<32x512xf32>
      %109 = vector.broadcast %68 : vector<32x1xf32> to vector<32x512xf32>
      %110 = arith.addf %109, %108 : vector<32x512xf32>
      %111 = vector.extract_strided_slice %106 {offsets = [0, 255], sizes = [16, 512], strides = [1, 1]} : vector<16x768xf32> to vector<16x512xf32>
      %cst_74 = arith.constant dense<0.000000e+00> : vector<32x512xf32>
      %112 = tpu.matmul %60, %111, %cst_74 {dimension_numbers = #tpu.dot_dimension_numbers<[1], [0], [0], [1], [0, 0, 1, 1], [], []>} : vector<32x16xf32>, vector<16x512xf32>, vector<32x512xf32> -> vector<32x512xf32>
      %113 = arith.addf %110, %112 : vector<32x512xf32>
      %114 = vector.extract_strided_slice %106 {offsets = [0, 256], sizes = [16, 512], strides = [1, 1]} : vector<16x768xf32> to vector<16x512xf32>
      %cst_75 = arith.constant dense<0.000000e+00> : vector<32x512xf32>
      %115 = tpu.matmul %65, %114, %cst_75 {dimension_numbers = #tpu.dot_dimension_numbers<[1], [0], [0], [1], [0, 0, 1, 1], [], []>} : vector<32x16xf32>, vector<16x512xf32>, vector<32x512xf32> -> vector<32x512xf32>
      %116 = arith.addf %113, %115 : vector<32x512xf32>
      %117 = vector.extract_strided_slice %116 {offsets = [16, 0], sizes = [16, 512], strides = [1, 1]} : vector<32x512xf32> to vector<16x512xf32>
      %cst_76 = arith.constant 5.000000e-01 : f32
      %118 = vector.broadcast %cst_76 : f32 to vector<16x512xf32>
      %119 = arith.mulf %118, %117 : vector<16x512xf32>
      %120 = math.tanh %119 : vector<16x512xf32>
      %cst_77 = arith.constant 5.000000e-01 : f32
      %121 = vector.broadcast %cst_77 : f32 to vector<16x512xf32>
      %122 = arith.mulf %121, %120 : vector<16x512xf32>
      %cst_78 = arith.constant 5.000000e-01 : f32
      %123 = vector.broadcast %cst_78 : f32 to vector<16x512xf32>
      %124 = arith.addf %122, %123 : vector<16x512xf32>
      %125 = vector.extract_strided_slice %116 {offsets = [0, 0], sizes = [16, 512], strides = [1, 1]} : vector<32x512xf32> to vector<16x512xf32>
      %126 = math.tanh %125 : vector<16x512xf32>
      %127 = arith.mulf %126, %124 : vector<16x512xf32>
      %cst_79 = arith.constant dense<0.000000e+00> : vector<16x512xf32>
      %128 = tpu.matmul %71, %127, %cst_79 {dimension_numbers = #tpu.dot_dimension_numbers<[1], [0], [0], [1], [0, 0, 1, 1], [], []>} : vector<16x16xf32>, vector<16x512xf32>, vector<16x512xf32> -> vector<16x512xf32>
      %129 = vector.broadcast %74 : vector<16x1xf32> to vector<16x512xf32>
      %130 = arith.addf %128, %129 : vector<16x512xf32>
      %131 = arith.addf %130, %114 : vector<16x512xf32>
      %c1_80 = arith.constant 1 : index
      %c0_81 = arith.constant 0 : index
      %c256_82 = arith.constant 256 : index
      %132 = vector.load %arg11[%c1_80, %c0_81, %c256_82] : memref<2x16x768xf32, #tpu.memory_space<vmem>>, vector<1x16x512xf32>
      %133 = vector.shape_cast %132 : vector<1x16x512xf32> to vector<16x512xf32>
      %134 = vector.shape_cast %131 : vector<16x512xf32> to vector<1x16x512xf32>
      tpu.vector_store %arg11[%c1_80, %c0_81, %c256_82], %134 {strides = array<i32>} : memref<2x16x768xf32, #tpu.memory_space<vmem>>, vector<1x16x512xf32>,
      %c8_i32_83 = arith.constant 8 : i32
      %135 = arith.muli %arg12, %c8_i32_83 : i32
      %c1_i32_84 = arith.constant 1 : i32
      %136 = arith.addi %135, %c1_i32_84 : i32
      %c3_i32_85 = arith.constant 3 : i32
      %137 = arith.muli %136, %c3_i32_85 : i32
      %c0_i32_86 = arith.constant 0 : i32
      %138 = arith.addi %137, %c0_i32_86 : i32
      %139 = arith.index_cast %138 : i32 to index
      %c0_87 = arith.constant 0 : index
      %c0_88 = arith.constant 0 : index
      %140 = vector.load %arg2[%139, %c0_87, %c0_88] : memref<48x32x16xf32, #tpu.memory_space<vmem>>, vector<1x32x16xf32>
      %141 = vector.shape_cast %140 : vector<1x32x16xf32> to vector<32x16xf32>
      %c3_i32_89 = arith.constant 3 : i32
      %142 = arith.muli %136, %c3_i32_89 : i32
      %c1_i32_90 = arith.constant 1 : i32
      %143 = arith.addi %142, %c1_i32_90 : i32
      %144 = arith.index_cast %143 : i32 to index
      %c0_91 = arith.constant 0 : index
      %c0_92 = arith.constant 0 : index
      %145 = vector.load %arg2[%144, %c0_91, %c0_92] : memref<48x32x16xf32, #tpu.memory_space<vmem>>, vector<1x32x16xf32>
      %146 = vector.shape_cast %145 : vector<1x32x16xf32> to vector<32x16xf32>
      %c3_i32_93 = arith.constant 3 : i32
      %147 = arith.muli %136, %c3_i32_93 : i32
      %c2_i32_94 = arith.constant 2 : i32
      %148 = arith.addi %147, %c2_i32_94 : i32
      %149 = arith.index_cast %148 : i32 to index
      %c0_95 = arith.constant 0 : index
      %c0_96 = arith.constant 0 : index
      %150 = vector.load %arg2[%149, %c0_95, %c0_96] : memref<48x32x16xf32, #tpu.memory_space<vmem>>, vector<1x32x16xf32>
      %151 = vector.shape_cast %150 : vector<1x32x16xf32> to vector<32x16xf32>
      %152 = arith.index_cast %136 : i32 to index
      %c0_97 = arith.constant 0 : index
      %c0_98 = arith.constant 0 : index
      %153 = vector.load %arg3[%152, %c0_97, %c0_98] : memref<16x32x1xf32, #tpu.memory_space<vmem>>, vector<1x32x1xf32>
      %154 = vector.shape_cast %153 : vector<1x32x1xf32> to vector<32x1xf32>
      %155 = arith.index_cast %136 : i32 to index
      %c0_99 = arith.constant 0 : index
      %c0_100 = arith.constant 0 : index
      %156 = vector.load %arg4[%155, %c0_99, %c0_100] : memref<16x16x16xf32, #tpu.memory_space<vmem>>, vector<1x16x16xf32>
      %157 = vector.shape_cast %156 : vector<1x16x16xf32> to vector<16x16xf32>
      %158 = arith.index_cast %136 : i32 to index
      %c0_101 = arith.constant 0 : index
      %c0_102 = arith.constant 0 : index
      %159 = vector.load %arg5[%158, %c0_101, %c0_102] : memref<16x16x1xf32, #tpu.memory_space<vmem>>, vector<1x16x1xf32>
      %160 = vector.shape_cast %159 : vector<1x16x1xf32> to vector<16x1xf32>
      %c0_103 = arith.constant 0 : index
      %c0_104 = arith.constant 0 : index
      %c0_105 = arith.constant 0 : index
      %161 = vector.load %arg11[%c0_103, %c0_104, %c0_105] : memref<2x16x768xf32, #tpu.memory_space<vmem>>, vector<1x16x768xf32>
      %162 = vector.shape_cast %161 : vector<1x16x768xf32> to vector<16x768xf32>
      %163 = vector.extract_strided_slice %162 {offsets = [0, 252], sizes = [16, 512], strides = [1, 1]} : vector<16x768xf32> to vector<16x512xf32>
      %cst_106 = arith.constant dense<0.000000e+00> : vector<32x512xf32>
      %164 = tpu.matmul %141, %163, %cst_106 {dimension_numbers = #tpu.dot_dimension_numbers<[1], [0], [0], [1], [0, 0, 1, 1], [], []>} : vector<32x16xf32>, vector<16x512xf32>, vector<32x512xf32> -> vector<32x512xf32>
      %165 = vector.broadcast %154 : vector<32x1xf32> to vector<32x512xf32>
      %166 = arith.addf %165, %164 : vector<32x512xf32>
      %167 = vector.extract_strided_slice %162 {offsets = [0, 254], sizes = [16, 512], strides = [1, 1]} : vector<16x768xf32> to vector<16x512xf32>
      %cst_107 = arith.constant dense<0.000000e+00> : vector<32x512xf32>
      %168 = tpu.matmul %146, %167, %cst_107 {dimension_numbers = #tpu.dot_dimension_numbers<[1], [0], [0], [1], [0, 0, 1, 1], [], []>} : vector<32x16xf32>, vector<16x512xf32>, vector<32x512xf32> -> vector<32x512xf32>
      %169 = arith.addf %166, %168 : vector<32x512xf32>
      %170 = vector.extract_strided_slice %162 {offsets = [0, 256], sizes = [16, 512], strides = [1, 1]} : vector<16x768xf32> to vector<16x512xf32>
      %cst_108 = arith.constant dense<0.000000e+00> : vector<32x512xf32>
      %171 = tpu.matmul %151, %170, %cst_108 {dimension_numbers = #tpu.dot_dimension_numbers<[1], [0], [0], [1], [0, 0, 1, 1], [], []>} : vector<32x16xf32>, vector<16x512xf32>, vector<32x512xf32> -> vector<32x512xf32>
      %172 = arith.addf %169, %171 : vector<32x512xf32>
      %173 = vector.extract_strided_slice %172 {offsets = [16, 0], sizes = [16, 512], strides = [1, 1]} : vector<32x512xf32> to vector<16x512xf32>
      %cst_109 = arith.constant 5.000000e-01 : f32
      %174 = vector.broadcast %cst_109 : f32 to vector<16x512xf32>
      %175 = arith.mulf %174, %173 : vector<16x512xf32>
      %176 = math.tanh %175 : vector<16x512xf32>
      %cst_110 = arith.constant 5.000000e-01 : f32
      %177 = vector.broadcast %cst_110 : f32 to vector<16x512xf32>
      %178 = arith.mulf %177, %176 : vector<16x512xf32>
      %cst_111 = arith.constant 5.000000e-01 : f32
      %179 = vector.broadcast %cst_111 : f32 to vector<16x512xf32>
      %180 = arith.addf %178, %179 : vector<16x512xf32>
      %181 = vector.extract_strided_slice %172 {offsets = [0, 0], sizes = [16, 512], strides = [1, 1]} : vector<32x512xf32> to vector<16x512xf32>
      %182 = math.tanh %181 : vector<16x512xf32>
      %183 = arith.mulf %182, %180 : vector<16x512xf32>
      %cst_112 = arith.constant dense<0.000000e+00> : vector<16x512xf32>
      %184 = tpu.matmul %157, %183, %cst_112 {dimension_numbers = #tpu.dot_dimension_numbers<[1], [0], [0], [1], [0, 0, 1, 1], [], []>} : vector<16x16xf32>, vector<16x512xf32>, vector<16x512xf32> -> vector<16x512xf32>
      %185 = vector.broadcast %160 : vector<16x1xf32> to vector<16x512xf32>
      %186 = arith.addf %184, %185 : vector<16x512xf32>
      %187 = arith.addf %186, %170 : vector<16x512xf32>
      %c0_113 = arith.constant 0 : index
      %c0_114 = arith.constant 0 : index
      %c256_115 = arith.constant 256 : index
      %188 = vector.load %arg11[%c0_113, %c0_114, %c256_115] : memref<2x16x768xf32, #tpu.memory_space<vmem>>, vector<1x16x512xf32>
      %189 = vector.shape_cast %188 : vector<1x16x512xf32> to vector<16x512xf32>
      %190 = vector.shape_cast %187 : vector<16x512xf32> to vector<1x16x512xf32>
      tpu.vector_store %arg11[%c0_113, %c0_114, %c256_115], %190 {strides = array<i32>} : memref<2x16x768xf32, #tpu.memory_space<vmem>>, vector<1x16x512xf32>,
      %c1_116 = arith.constant 1 : index
      %c0_117 = arith.constant 0 : index
      %c0_118 = arith.constant 0 : index
      %191 = vector.load %arg11[%c1_116, %c0_117, %c0_118] : memref<2x16x768xf32, #tpu.memory_space<vmem>>, vector<1x16x768xf32>
      %192 = vector.shape_cast %191 : vector<1x16x768xf32> to vector<16x768xf32>
      %193 = vector.extract_strided_slice %192 {offsets = [0, 252], sizes = [16, 512], strides = [1, 1]} : vector<16x768xf32> to vector<16x512xf32>
      %cst_119 = arith.constant dense<0.000000e+00> : vector<32x512xf32>
      %194 = tpu.matmul %141, %193, %cst_119 {dimension_numbers = #tpu.dot_dimension_numbers<[1], [0], [0], [1], [0, 0, 1, 1], [], []>} : vector<32x16xf32>, vector<16x512xf32>, vector<32x512xf32> -> vector<32x512xf32>
      %195 = vector.broadcast %154 : vector<32x1xf32> to vector<32x512xf32>
      %196 = arith.addf %195, %194 : vector<32x512xf32>
      %197 = vector.extract_strided_slice %192 {offsets = [0, 254], sizes = [16, 512], strides = [1, 1]} : vector<16x768xf32> to vector<16x512xf32>
      %cst_120 = arith.constant dense<0.000000e+00> : vector<32x512xf32>
      %198 = tpu.matmul %146, %197, %cst_120 {dimension_numbers = #tpu.dot_dimension_numbers<[1], [0], [0], [1], [0, 0, 1, 1], [], []>} : vector<32x16xf32>, vector<16x512xf32>, vector<32x512xf32> -> vector<32x512xf32>
      %199 = arith.addf %196, %198 : vector<32x512xf32>
      %200 = vector.extract_strided_slice %192 {offsets = [0, 256], sizes = [16, 512], strides = [1, 1]} : vector<16x768xf32> to vector<16x512xf32>
      %cst_121 = arith.constant dense<0.000000e+00> : vector<32x512xf32>
      %201 = tpu.matmul %151, %200, %cst_121 {dimension_numbers = #tpu.dot_dimension_numbers<[1], [0], [0], [1], [0, 0, 1, 1], [], []>} : vector<32x16xf32>, vector<16x512xf32>, vector<32x512xf32> -> vector<32x512xf32>
      %202 = arith.addf %199, %201 : vector<32x512xf32>
      %203 = vector.extract_strided_slice %202 {offsets = [16, 0], sizes = [16, 512], strides = [1, 1]} : vector<32x512xf32> to vector<16x512xf32>
      %cst_122 = arith.constant 5.000000e-01 : f32
      %204 = vector.broadcast %cst_122 : f32 to vector<16x512xf32>
      %205 = arith.mulf %204, %203 : vector<16x512xf32>
      %206 = math.tanh %205 : vector<16x512xf32>
      %cst_123 = arith.constant 5.000000e-01 : f32
      %207 = vector.broadcast %cst_123 : f32 to vector<16x512xf32>
      %208 = arith.mulf %207, %206 : vector<16x512xf32>
      %cst_124 = arith.constant 5.000000e-01 : f32
      %209 = vector.broadcast %cst_124 : f32 to vector<16x512xf32>
      %210 = arith.addf %208, %209 : vector<16x512xf32>
      %211 = vector.extract_strided_slice %202 {offsets = [0, 0], sizes = [16, 512], strides = [1, 1]} : vector<32x512xf32> to vector<16x512xf32>
      %212 = math.tanh %211 : vector<16x512xf32>
      %213 = arith.mulf %212, %210 : vector<16x512xf32>
      %cst_125 = arith.constant dense<0.000000e+00> : vector<16x512xf32>
      %214 = tpu.matmul %157, %213, %cst_125 {dimension_numbers = #tpu.dot_dimension_numbers<[1], [0], [0], [1], [0, 0, 1, 1], [], []>} : vector<16x16xf32>, vector<16x512xf32>, vector<16x512xf32> -> vector<16x512xf32>
      %215 = vector.broadcast %160 : vector<16x1xf32> to vector<16x512xf32>
      %216 = arith.addf %214, %215 : vector<16x512xf32>
      %217 = arith.addf %216, %200 : vector<16x512xf32>
      %c1_126 = arith.constant 1 : index
      %c0_127 = arith.constant 0 : index
      %c256_128 = arith.constant 256 : index
      %218 = vector.load %arg11[%c1_126, %c0_127, %c256_128] : memref<2x16x768xf32, #tpu.memory_space<vmem>>, vector<1x16x512xf32>
      %219 = vector.shape_cast %218 : vector<1x16x512xf32> to vector<16x512xf32>
      %220 = vector.shape_cast %217 : vector<16x512xf32> to vector<1x16x512xf32>
      tpu.vector_store %arg11[%c1_126, %c0_127, %c256_128], %220 {strides = array<i32>} : memref<2x16x768xf32, #tpu.memory_space<vmem>>, vector<1x16x512xf32>,
      %c8_i32_129 = arith.constant 8 : i32
      %221 = arith.muli %arg12, %c8_i32_129 : i32
      %c2_i32_130 = arith.constant 2 : i32
      %222 = arith.addi %221, %c2_i32_130 : i32
      %c3_i32_131 = arith.constant 3 : i32
      %223 = arith.muli %222, %c3_i32_131 : i32
      %c0_i32_132 = arith.constant 0 : i32
      %224 = arith.addi %223, %c0_i32_132 : i32
      %225 = arith.index_cast %224 : i32 to index
      %c0_133 = arith.constant 0 : index
      %c0_134 = arith.constant 0 : index
      %226 = vector.load %arg2[%225, %c0_133, %c0_134] : memref<48x32x16xf32, #tpu.memory_space<vmem>>, vector<1x32x16xf32>
      %227 = vector.shape_cast %226 : vector<1x32x16xf32> to vector<32x16xf32>
      %c3_i32_135 = arith.constant 3 : i32
      %228 = arith.muli %222, %c3_i32_135 : i32
      %c1_i32_136 = arith.constant 1 : i32
      %229 = arith.addi %228, %c1_i32_136 : i32
      %230 = arith.index_cast %229 : i32 to index
      %c0_137 = arith.constant 0 : index
      %c0_138 = arith.constant 0 : index
      %231 = vector.load %arg2[%230, %c0_137, %c0_138] : memref<48x32x16xf32, #tpu.memory_space<vmem>>, vector<1x32x16xf32>
      %232 = vector.shape_cast %231 : vector<1x32x16xf32> to vector<32x16xf32>
      %c3_i32_139 = arith.constant 3 : i32
      %233 = arith.muli %222, %c3_i32_139 : i32
      %c2_i32_140 = arith.constant 2 : i32
      %234 = arith.addi %233, %c2_i32_140 : i32
      %235 = arith.index_cast %234 : i32 to index
      %c0_141 = arith.constant 0 : index
      %c0_142 = arith.constant 0 : index
      %236 = vector.load %arg2[%235, %c0_141, %c0_142] : memref<48x32x16xf32, #tpu.memory_space<vmem>>, vector<1x32x16xf32>
      %237 = vector.shape_cast %236 : vector<1x32x16xf32> to vector<32x16xf32>
      %238 = arith.index_cast %222 : i32 to index
      %c0_143 = arith.constant 0 : index
      %c0_144 = arith.constant 0 : index
      %239 = vector.load %arg3[%238, %c0_143, %c0_144] : memref<16x32x1xf32, #tpu.memory_space<vmem>>, vector<1x32x1xf32>
      %240 = vector.shape_cast %239 : vector<1x32x1xf32> to vector<32x1xf32>
      %241 = arith.index_cast %222 : i32 to index
      %c0_145 = arith.constant 0 : index
      %c0_146 = arith.constant 0 : index
      %242 = vector.load %arg4[%241, %c0_145, %c0_146] : memref<16x16x16xf32, #tpu.memory_space<vmem>>, vector<1x16x16xf32>
      %243 = vector.shape_cast %242 : vector<1x16x16xf32> to vector<16x16xf32>
      %244 = arith.index_cast %222 : i32 to index
      %c0_147 = arith.constant 0 : index
      %c0_148 = arith.constant 0 : index
      %245 = vector.load %arg5[%244, %c0_147, %c0_148] : memref<16x16x1xf32, #tpu.memory_space<vmem>>, vector<1x16x1xf32>
      %246 = vector.shape_cast %245 : vector<1x16x1xf32> to vector<16x1xf32>
      %c0_149 = arith.constant 0 : index
      %c0_150 = arith.constant 0 : index
      %c0_151 = arith.constant 0 : index
      %247 = vector.load %arg11[%c0_149, %c0_150, %c0_151] : memref<2x16x768xf32, #tpu.memory_space<vmem>>, vector<1x16x768xf32>
      %248 = vector.shape_cast %247 : vector<1x16x768xf32> to vector<16x768xf32>
      %249 = vector.extract_strided_slice %248 {offsets = [0, 248], sizes = [16, 512], strides = [1, 1]} : vector<16x768xf32> to vector<16x512xf32>
      %cst_152 = arith.constant dense<0.000000e+00> : vector<32x512xf32>
      %250 = tpu.matmul %227, %249, %cst_152 {dimension_numbers = #tpu.dot_dimension_numbers<[1], [0], [0], [1], [0, 0, 1, 1], [], []>} : vector<32x16xf32>, vector<16x512xf32>, vector<32x512xf32> -> vector<32x512xf32>
      %251 = vector.broadcast %240 : vector<32x1xf32> to vector<32x512xf32>
      %252 = arith.addf %251, %250 : vector<32x512xf32>
      %253 = vector.extract_strided_slice %248 {offsets = [0, 252], sizes = [16, 512], strides = [1, 1]} : vector<16x768xf32> to vector<16x512xf32>
      %cst_153 = arith.constant dense<0.000000e+00> : vector<32x512xf32>
      %254 = tpu.matmul %232, %253, %cst_153 {dimension_numbers = #tpu.dot_dimension_numbers<[1], [0], [0], [1], [0, 0, 1, 1], [], []>} : vector<32x16xf32>, vector<16x512xf32>, vector<32x512xf32> -> vector<32x512xf32>
      %255 = arith.addf %252, %254 : vector<32x512xf32>
      %256 = vector.extract_strided_slice %248 {offsets = [0, 256], sizes = [16, 512], strides = [1, 1]} : vector<16x768xf32> to vector<16x512xf32>
      %cst_154 = arith.constant dense<0.000000e+00> : vector<32x512xf32>
      %257 = tpu.matmul %237, %256, %cst_154 {dimension_numbers = #tpu.dot_dimension_numbers<[1], [0], [0], [1], [0, 0, 1, 1], [], []>} : vector<32x16xf32>, vector<16x512xf32>, vector<32x512xf32> -> vector<32x512xf32>
      %258 = arith.addf %255, %257 : vector<32x512xf32>
      %259 = vector.extract_strided_slice %258 {offsets = [16, 0], sizes = [16, 512], strides = [1, 1]} : vector<32x512xf32> to vector<16x512xf32>
      %cst_155 = arith.constant 5.000000e-01 : f32
      %260 = vector.broadcast %cst_155 : f32 to vector<16x512xf32>
      %261 = arith.mulf %260, %259 : vector<16x512xf32>
      %262 = math.tanh %261 : vector<16x512xf32>
      %cst_156 = arith.constant 5.000000e-01 : f32
      %263 = vector.broadcast %cst_156 : f32 to vector<16x512xf32>
      %264 = arith.mulf %263, %262 : vector<16x512xf32>
      %cst_157 = arith.constant 5.000000e-01 : f32
      %265 = vector.broadcast %cst_157 : f32 to vector<16x512xf32>
      %266 = arith.addf %264, %265 : vector<16x512xf32>
      %267 = vector.extract_strided_slice %258 {offsets = [0, 0], sizes = [16, 512], strides = [1, 1]} : vector<32x512xf32> to vector<16x512xf32>
      %268 = math.tanh %267 : vector<16x512xf32>
      %269 = arith.mulf %268, %266 : vector<16x512xf32>
      %cst_158 = arith.constant dense<0.000000e+00> : vector<16x512xf32>
      %270 = tpu.matmul %243, %269, %cst_158 {dimension_numbers = #tpu.dot_dimension_numbers<[1], [0], [0], [1], [0, 0, 1, 1], [], []>} : vector<16x16xf32>, vector<16x512xf32>, vector<16x512xf32> -> vector<16x512xf32>
      %271 = vector.broadcast %246 : vector<16x1xf32> to vector<16x512xf32>
      %272 = arith.addf %270, %271 : vector<16x512xf32>
      %273 = arith.addf %272, %256 : vector<16x512xf32>
      %c0_159 = arith.constant 0 : index
      %c0_160 = arith.constant 0 : index
      %c256_161 = arith.constant 256 : index
      %274 = vector.load %arg11[%c0_159, %c0_160, %c256_161] : memref<2x16x768xf32, #tpu.memory_space<vmem>>, vector<1x16x512xf32>
      %275 = vector.shape_cast %274 : vector<1x16x512xf32> to vector<16x512xf32>
      %276 = vector.shape_cast %273 : vector<16x512xf32> to vector<1x16x512xf32>
      tpu.vector_store %arg11[%c0_159, %c0_160, %c256_161], %276 {strides = array<i32>} : memref<2x16x768xf32, #tpu.memory_space<vmem>>, vector<1x16x512xf32>,
      %c1_162 = arith.constant 1 : index
      %c0_163 = arith.constant 0 : index
      %c0_164 = arith.constant 0 : index
      %277 = vector.load %arg11[%c1_162, %c0_163, %c0_164] : memref<2x16x768xf32, #tpu.memory_space<vmem>>, vector<1x16x768xf32>
      %278 = vector.shape_cast %277 : vector<1x16x768xf32> to vector<16x768xf32>
      %279 = vector.extract_strided_slice %278 {offsets = [0, 248], sizes = [16, 512], strides = [1, 1]} : vector<16x768xf32> to vector<16x512xf32>
      %cst_165 = arith.constant dense<0.000000e+00> : vector<32x512xf32>
      %280 = tpu.matmul %227, %279, %cst_165 {dimension_numbers = #tpu.dot_dimension_numbers<[1], [0], [0], [1], [0, 0, 1, 1], [], []>} : vector<32x16xf32>, vector<16x512xf32>, vector<32x512xf32> -> vector<32x512xf32>
      %281 = vector.broadcast %240 : vector<32x1xf32> to vector<32x512xf32>
      %282 = arith.addf %281, %280 : vector<32x512xf32>
      %283 = vector.extract_strided_slice %278 {offsets = [0, 252], sizes = [16, 512], strides = [1, 1]} : vector<16x768xf32> to vector<16x512xf32>
      %cst_166 = arith.constant dense<0.000000e+00> : vector<32x512xf32>
      %284 = tpu.matmul %232, %283, %cst_166 {dimension_numbers = #tpu.dot_dimension_numbers<[1], [0], [0], [1], [0, 0, 1, 1], [], []>} : vector<32x16xf32>, vector<16x512xf32>, vector<32x512xf32> -> vector<32x512xf32>
      %285 = arith.addf %282, %284 : vector<32x512xf32>
      %286 = vector.extract_strided_slice %278 {offsets = [0, 256], sizes = [16, 512], strides = [1, 1]} : vector<16x768xf32> to vector<16x512xf32>
      %cst_167 = arith.constant dense<0.000000e+00> : vector<32x512xf32>
      %287 = tpu.matmul %237, %286, %cst_167 {dimension_numbers = #tpu.dot_dimension_numbers<[1], [0], [0], [1], [0, 0, 1, 1], [], []>} : vector<32x16xf32>, vector<16x512xf32>, vector<32x512xf32> -> vector<32x512xf32>
      %288 = arith.addf %285, %287 : vector<32x512xf32>
      %289 = vector.extract_strided_slice %288 {offsets = [16, 0], sizes = [16, 512], strides = [1, 1]} : vector<32x512xf32> to vector<16x512xf32>
      %cst_168 = arith.constant 5.000000e-01 : f32
      %290 = vector.broadcast %cst_168 : f32 to vector<16x512xf32>
      %291 = arith.mulf %290, %289 : vector<16x512xf32>
      %292 = math.tanh %291 : vector<16x512xf32>
      %cst_169 = arith.constant 5.000000e-01 : f32
      %293 = vector.broadcast %cst_169 : f32 to vector<16x512xf32>
      %294 = arith.mulf %293, %292 : vector<16x512xf32>
      %cst_170 = arith.constant 5.000000e-01 : f32
      %295 = vector.broadcast %cst_170 : f32 to vector<16x512xf32>
      %296 = arith.addf %294, %295 : vector<16x512xf32>
      %297 = vector.extract_strided_slice %288 {offsets = [0, 0], sizes = [16, 512], strides = [1, 1]} : vector<32x512xf32> to vector<16x512xf32>
      %298 = math.tanh %297 : vector<16x512xf32>
      %299 = arith.mulf %298, %296 : vector<16x512xf32>
      %cst_171 = arith.constant dense<0.000000e+00> : vector<16x512xf32>
      %300 = tpu.matmul %243, %299, %cst_171 {dimension_numbers = #tpu.dot_dimension_numbers<[1], [0], [0], [1], [0, 0, 1, 1], [], []>} : vector<16x16xf32>, vector<16x512xf32>, vector<16x512xf32> -> vector<16x512xf32>
      %301 = vector.broadcast %246 : vector<16x1xf32> to vector<16x512xf32>
      %302 = arith.addf %300, %301 : vector<16x512xf32>
      %303 = arith.addf %302, %286 : vector<16x512xf32>
      %c1_172 = arith.constant 1 : index
      %c0_173 = arith.constant 0 : index
      %c256_174 = arith.constant 256 : index
      %304 = vector.load %arg11[%c1_172, %c0_173, %c256_174] : memref<2x16x768xf32, #tpu.memory_space<vmem>>, vector<1x16x512xf32>
      %305 = vector.shape_cast %304 : vector<1x16x512xf32> to vector<16x512xf32>
      %306 = vector.shape_cast %303 : vector<16x512xf32> to vector<1x16x512xf32>
      tpu.vector_store %arg11[%c1_172, %c0_173, %c256_174], %306 {strides = array<i32>} : memref<2x16x768xf32, #tpu.memory_space<vmem>>, vector<1x16x512xf32>,
      %c8_i32_175 = arith.constant 8 : i32
      %307 = arith.muli %arg12, %c8_i32_175 : i32
      %c3_i32_176 = arith.constant 3 : i32
      %308 = arith.addi %307, %c3_i32_176 : i32
      %c3_i32_177 = arith.constant 3 : i32
      %309 = arith.muli %308, %c3_i32_177 : i32
      %c0_i32_178 = arith.constant 0 : i32
      %310 = arith.addi %309, %c0_i32_178 : i32
      %311 = arith.index_cast %310 : i32 to index
      %c0_179 = arith.constant 0 : index
      %c0_180 = arith.constant 0 : index
      %312 = vector.load %arg2[%311, %c0_179, %c0_180] : memref<48x32x16xf32, #tpu.memory_space<vmem>>, vector<1x32x16xf32>
      %313 = vector.shape_cast %312 : vector<1x32x16xf32> to vector<32x16xf32>
      %c3_i32_181 = arith.constant 3 : i32
      %314 = arith.muli %308, %c3_i32_181 : i32
      %c1_i32_182 = arith.constant 1 : i32
      %315 = arith.addi %314, %c1_i32_182 : i32
      %316 = arith.index_cast %315 : i32 to index
      %c0_183 = arith.constant 0 : index
      %c0_184 = arith.constant 0 : index
      %317 = vector.load %arg2[%316, %c0_183, %c0_184] : memref<48x32x16xf32, #tpu.memory_space<vmem>>, vector<1x32x16xf32>
      %318 = vector.shape_cast %317 : vector<1x32x16xf32> to vector<32x16xf32>
      %c3_i32_185 = arith.constant 3 : i32
      %319 = arith.muli %308, %c3_i32_185 : i32
      %c2_i32_186 = arith.constant 2 : i32
      %320 = arith.addi %319, %c2_i32_186 : i32
      %321 = arith.index_cast %320 : i32 to index
      %c0_187 = arith.constant 0 : index
      %c0_188 = arith.constant 0 : index
      %322 = vector.load %arg2[%321, %c0_187, %c0_188] : memref<48x32x16xf32, #tpu.memory_space<vmem>>, vector<1x32x16xf32>
      %323 = vector.shape_cast %322 : vector<1x32x16xf32> to vector<32x16xf32>
      %324 = arith.index_cast %308 : i32 to index
      %c0_189 = arith.constant 0 : index
      %c0_190 = arith.constant 0 : index
      %325 = vector.load %arg3[%324, %c0_189, %c0_190] : memref<16x32x1xf32, #tpu.memory_space<vmem>>, vector<1x32x1xf32>
      %326 = vector.shape_cast %325 : vector<1x32x1xf32> to vector<32x1xf32>
      %327 = arith.index_cast %308 : i32 to index
      %c0_191 = arith.constant 0 : index
      %c0_192 = arith.constant 0 : index
      %328 = vector.load %arg4[%327, %c0_191, %c0_192] : memref<16x16x16xf32, #tpu.memory_space<vmem>>, vector<1x16x16xf32>
      %329 = vector.shape_cast %328 : vector<1x16x16xf32> to vector<16x16xf32>
      %330 = arith.index_cast %308 : i32 to index
      %c0_193 = arith.constant 0 : index
      %c0_194 = arith.constant 0 : index
      %331 = vector.load %arg5[%330, %c0_193, %c0_194] : memref<16x16x1xf32, #tpu.memory_space<vmem>>, vector<1x16x1xf32>
      %332 = vector.shape_cast %331 : vector<1x16x1xf32> to vector<16x1xf32>
      %c0_195 = arith.constant 0 : index
      %c0_196 = arith.constant 0 : index
      %c0_197 = arith.constant 0 : index
      %333 = vector.load %arg11[%c0_195, %c0_196, %c0_197] : memref<2x16x768xf32, #tpu.memory_space<vmem>>, vector<1x16x768xf32>
      %334 = vector.shape_cast %333 : vector<1x16x768xf32> to vector<16x768xf32>
      %335 = vector.extract_strided_slice %334 {offsets = [0, 240], sizes = [16, 512], strides = [1, 1]} : vector<16x768xf32> to vector<16x512xf32>
      %cst_198 = arith.constant dense<0.000000e+00> : vector<32x512xf32>
      %336 = tpu.matmul %313, %335, %cst_198 {dimension_numbers = #tpu.dot_dimension_numbers<[1], [0], [0], [1], [0, 0, 1, 1], [], []>} : vector<32x16xf32>, vector<16x512xf32>, vector<32x512xf32> -> vector<32x512xf32>
      %337 = vector.broadcast %326 : vector<32x1xf32> to vector<32x512xf32>
      %338 = arith.addf %337, %336 : vector<32x512xf32>
      %339 = vector.extract_strided_slice %334 {offsets = [0, 248], sizes = [16, 512], strides = [1, 1]} : vector<16x768xf32> to vector<16x512xf32>
      %cst_199 = arith.constant dense<0.000000e+00> : vector<32x512xf32>
      %340 = tpu.matmul %318, %339, %cst_199 {dimension_numbers = #tpu.dot_dimension_numbers<[1], [0], [0], [1], [0, 0, 1, 1], [], []>} : vector<32x16xf32>, vector<16x512xf32>, vector<32x512xf32> -> vector<32x512xf32>
      %341 = arith.addf %338, %340 : vector<32x512xf32>
      %342 = vector.extract_strided_slice %334 {offsets = [0, 256], sizes = [16, 512], strides = [1, 1]} : vector<16x768xf32> to vector<16x512xf32>
      %cst_200 = arith.constant dense<0.000000e+00> : vector<32x512xf32>
      %343 = tpu.matmul %323, %342, %cst_200 {dimension_numbers = #tpu.dot_dimension_numbers<[1], [0], [0], [1], [0, 0, 1, 1], [], []>} : vector<32x16xf32>, vector<16x512xf32>, vector<32x512xf32> -> vector<32x512xf32>
      %344 = arith.addf %341, %343 : vector<32x512xf32>
      %345 = vector.extract_strided_slice %344 {offsets = [16, 0], sizes = [16, 512], strides = [1, 1]} : vector<32x512xf32> to vector<16x512xf32>
      %cst_201 = arith.constant 5.000000e-01 : f32
      %346 = vector.broadcast %cst_201 : f32 to vector<16x512xf32>
      %347 = arith.mulf %346, %345 : vector<16x512xf32>
      %348 = math.tanh %347 : vector<16x512xf32>
      %cst_202 = arith.constant 5.000000e-01 : f32
      %349 = vector.broadcast %cst_202 : f32 to vector<16x512xf32>
      %350 = arith.mulf %349, %348 : vector<16x512xf32>
      %cst_203 = arith.constant 5.000000e-01 : f32
      %351 = vector.broadcast %cst_203 : f32 to vector<16x512xf32>
      %352 = arith.addf %350, %351 : vector<16x512xf32>
      %353 = vector.extract_strided_slice %344 {offsets = [0, 0], sizes = [16, 512], strides = [1, 1]} : vector<32x512xf32> to vector<16x512xf32>
      %354 = math.tanh %353 : vector<16x512xf32>
      %355 = arith.mulf %354, %352 : vector<16x512xf32>
      %cst_204 = arith.constant dense<0.000000e+00> : vector<16x512xf32>
      %356 = tpu.matmul %329, %355, %cst_204 {dimension_numbers = #tpu.dot_dimension_numbers<[1], [0], [0], [1], [0, 0, 1, 1], [], []>} : vector<16x16xf32>, vector<16x512xf32>, vector<16x512xf32> -> vector<16x512xf32>
      %357 = vector.broadcast %332 : vector<16x1xf32> to vector<16x512xf32>
      %358 = arith.addf %356, %357 : vector<16x512xf32>
      %359 = arith.addf %358, %342 : vector<16x512xf32>
      %c0_205 = arith.constant 0 : index
      %c0_206 = arith.constant 0 : index
      %c256_207 = arith.constant 256 : index
      %360 = vector.load %arg11[%c0_205, %c0_206, %c256_207] : memref<2x16x768xf32, #tpu.memory_space<vmem>>, vector<1x16x512xf32>
      %361 = vector.shape_cast %360 : vector<1x16x512xf32> to vector<16x512xf32>
      %362 = vector.shape_cast %359 : vector<16x512xf32> to vector<1x16x512xf32>
      tpu.vector_store %arg11[%c0_205, %c0_206, %c256_207], %362 {strides = array<i32>} : memref<2x16x768xf32, #tpu.memory_space<vmem>>, vector<1x16x512xf32>,
      %c1_208 = arith.constant 1 : index
      %c0_209 = arith.constant 0 : index
      %c0_210 = arith.constant 0 : index
      %363 = vector.load %arg11[%c1_208, %c0_209, %c0_210] : memref<2x16x768xf32, #tpu.memory_space<vmem>>, vector<1x16x768xf32>
      %364 = vector.shape_cast %363 : vector<1x16x768xf32> to vector<16x768xf32>
      %365 = vector.extract_strided_slice %364 {offsets = [0, 240], sizes = [16, 512], strides = [1, 1]} : vector<16x768xf32> to vector<16x512xf32>
      %cst_211 = arith.constant dense<0.000000e+00> : vector<32x512xf32>
      %366 = tpu.matmul %313, %365, %cst_211 {dimension_numbers = #tpu.dot_dimension_numbers<[1], [0], [0], [1], [0, 0, 1, 1], [], []>} : vector<32x16xf32>, vector<16x512xf32>, vector<32x512xf32> -> vector<32x512xf32>
      %367 = vector.broadcast %326 : vector<32x1xf32> to vector<32x512xf32>
      %368 = arith.addf %367, %366 : vector<32x512xf32>
      %369 = vector.extract_strided_slice %364 {offsets = [0, 248], sizes = [16, 512], strides = [1, 1]} : vector<16x768xf32> to vector<16x512xf32>
      %cst_212 = arith.constant dense<0.000000e+00> : vector<32x512xf32>
      %370 = tpu.matmul %318, %369, %cst_212 {dimension_numbers = #tpu.dot_dimension_numbers<[1], [0], [0], [1], [0, 0, 1, 1], [], []>} : vector<32x16xf32>, vector<16x512xf32>, vector<32x512xf32> -> vector<32x512xf32>
      %371 = arith.addf %368, %370 : vector<32x512xf32>
      %372 = vector.extract_strided_slice %364 {offsets = [0, 256], sizes = [16, 512], strides = [1, 1]} : vector<16x768xf32> to vector<16x512xf32>
      %cst_213 = arith.constant dense<0.000000e+00> : vector<32x512xf32>
      %373 = tpu.matmul %323, %372, %cst_213 {dimension_numbers = #tpu.dot_dimension_numbers<[1], [0], [0], [1], [0, 0, 1, 1], [], []>} : vector<32x16xf32>, vector<16x512xf32>, vector<32x512xf32> -> vector<32x512xf32>
      %374 = arith.addf %371, %373 : vector<32x512xf32>
      %375 = vector.extract_strided_slice %374 {offsets = [16, 0], sizes = [16, 512], strides = [1, 1]} : vector<32x512xf32> to vector<16x512xf32>
      %cst_214 = arith.constant 5.000000e-01 : f32
      %376 = vector.broadcast %cst_214 : f32 to vector<16x512xf32>
      %377 = arith.mulf %376, %375 : vector<16x512xf32>
      %378 = math.tanh %377 : vector<16x512xf32>
      %cst_215 = arith.constant 5.000000e-01 : f32
      %379 = vector.broadcast %cst_215 : f32 to vector<16x512xf32>
      %380 = arith.mulf %379, %378 : vector<16x512xf32>
      %cst_216 = arith.constant 5.000000e-01 : f32
      %381 = vector.broadcast %cst_216 : f32 to vector<16x512xf32>
      %382 = arith.addf %380, %381 : vector<16x512xf32>
      %383 = vector.extract_strided_slice %374 {offsets = [0, 0], sizes = [16, 512], strides = [1, 1]} : vector<32x512xf32> to vector<16x512xf32>
      %384 = math.tanh %383 : vector<16x512xf32>
      %385 = arith.mulf %384, %382 : vector<16x512xf32>
      %cst_217 = arith.constant dense<0.000000e+00> : vector<16x512xf32>
      %386 = tpu.matmul %329, %385, %cst_217 {dimension_numbers = #tpu.dot_dimension_numbers<[1], [0], [0], [1], [0, 0, 1, 1], [], []>} : vector<16x16xf32>, vector<16x512xf32>, vector<16x512xf32> -> vector<16x512xf32>
      %387 = vector.broadcast %332 : vector<16x1xf32> to vector<16x512xf32>
      %388 = arith.addf %386, %387 : vector<16x512xf32>
      %389 = arith.addf %388, %372 : vector<16x512xf32>
      %c1_218 = arith.constant 1 : index
      %c0_219 = arith.constant 0 : index
      %c256_220 = arith.constant 256 : index
      %390 = vector.load %arg11[%c1_218, %c0_219, %c256_220] : memref<2x16x768xf32, #tpu.memory_space<vmem>>, vector<1x16x512xf32>
      %391 = vector.shape_cast %390 : vector<1x16x512xf32> to vector<16x512xf32>
      %392 = vector.shape_cast %389 : vector<16x512xf32> to vector<1x16x512xf32>
      tpu.vector_store %arg11[%c1_218, %c0_219, %c256_220], %392 {strides = array<i32>} : memref<2x16x768xf32, #tpu.memory_space<vmem>>, vector<1x16x512xf32>,
      %c8_i32_221 = arith.constant 8 : i32
      %393 = arith.muli %arg12, %c8_i32_221 : i32
      %c4_i32 = arith.constant 4 : i32
      %394 = arith.addi %393, %c4_i32 : i32
      %c3_i32_222 = arith.constant 3 : i32
      %395 = arith.muli %394, %c3_i32_222 : i32
      %c0_i32_223 = arith.constant 0 : i32
      %396 = arith.addi %395, %c0_i32_223 : i32
      %397 = arith.index_cast %396 : i32 to index
      %c0_224 = arith.constant 0 : index
      %c0_225 = arith.constant 0 : index
      %398 = vector.load %arg2[%397, %c0_224, %c0_225] : memref<48x32x16xf32, #tpu.memory_space<vmem>>, vector<1x32x16xf32>
      %399 = vector.shape_cast %398 : vector<1x32x16xf32> to vector<32x16xf32>
      %c3_i32_226 = arith.constant 3 : i32
      %400 = arith.muli %394, %c3_i32_226 : i32
      %c1_i32_227 = arith.constant 1 : i32
      %401 = arith.addi %400, %c1_i32_227 : i32
      %402 = arith.index_cast %401 : i32 to index
      %c0_228 = arith.constant 0 : index
      %c0_229 = arith.constant 0 : index
      %403 = vector.load %arg2[%402, %c0_228, %c0_229] : memref<48x32x16xf32, #tpu.memory_space<vmem>>, vector<1x32x16xf32>
      %404 = vector.shape_cast %403 : vector<1x32x16xf32> to vector<32x16xf32>
      %c3_i32_230 = arith.constant 3 : i32
      %405 = arith.muli %394, %c3_i32_230 : i32
      %c2_i32_231 = arith.constant 2 : i32
      %406 = arith.addi %405, %c2_i32_231 : i32
      %407 = arith.index_cast %406 : i32 to index
      %c0_232 = arith.constant 0 : index
      %c0_233 = arith.constant 0 : index
      %408 = vector.load %arg2[%407, %c0_232, %c0_233] : memref<48x32x16xf32, #tpu.memory_space<vmem>>, vector<1x32x16xf32>
      %409 = vector.shape_cast %408 : vector<1x32x16xf32> to vector<32x16xf32>
      %410 = arith.index_cast %394 : i32 to index
      %c0_234 = arith.constant 0 : index
      %c0_235 = arith.constant 0 : index
      %411 = vector.load %arg3[%410, %c0_234, %c0_235] : memref<16x32x1xf32, #tpu.memory_space<vmem>>, vector<1x32x1xf32>
      %412 = vector.shape_cast %411 : vector<1x32x1xf32> to vector<32x1xf32>
      %413 = arith.index_cast %394 : i32 to index
      %c0_236 = arith.constant 0 : index
      %c0_237 = arith.constant 0 : index
      %414 = vector.load %arg4[%413, %c0_236, %c0_237] : memref<16x16x16xf32, #tpu.memory_space<vmem>>, vector<1x16x16xf32>
      %415 = vector.shape_cast %414 : vector<1x16x16xf32> to vector<16x16xf32>
      %416 = arith.index_cast %394 : i32 to index
      %c0_238 = arith.constant 0 : index
      %c0_239 = arith.constant 0 : index
      %417 = vector.load %arg5[%416, %c0_238, %c0_239] : memref<16x16x1xf32, #tpu.memory_space<vmem>>, vector<1x16x1xf32>
      %418 = vector.shape_cast %417 : vector<1x16x1xf32> to vector<16x1xf32>
      %c0_240 = arith.constant 0 : index
      %c0_241 = arith.constant 0 : index
      %c0_242 = arith.constant 0 : index
      %419 = vector.load %arg11[%c0_240, %c0_241, %c0_242] : memref<2x16x768xf32, #tpu.memory_space<vmem>>, vector<1x16x768xf32>
      %420 = vector.shape_cast %419 : vector<1x16x768xf32> to vector<16x768xf32>
      %421 = vector.extract_strided_slice %420 {offsets = [0, 224], sizes = [16, 512], strides = [1, 1]} : vector<16x768xf32> to vector<16x512xf32>
      %cst_243 = arith.constant dense<0.000000e+00> : vector<32x512xf32>
      %422 = tpu.matmul %399, %421, %cst_243 {dimension_numbers = #tpu.dot_dimension_numbers<[1], [0], [0], [1], [0, 0, 1, 1], [], []>} : vector<32x16xf32>, vector<16x512xf32>, vector<32x512xf32> -> vector<32x512xf32>
      %423 = vector.broadcast %412 : vector<32x1xf32> to vector<32x512xf32>
      %424 = arith.addf %423, %422 : vector<32x512xf32>
      %425 = vector.extract_strided_slice %420 {offsets = [0, 240], sizes = [16, 512], strides = [1, 1]} : vector<16x768xf32> to vector<16x512xf32>
      %cst_244 = arith.constant dense<0.000000e+00> : vector<32x512xf32>
      %426 = tpu.matmul %404, %425, %cst_244 {dimension_numbers = #tpu.dot_dimension_numbers<[1], [0], [0], [1], [0, 0, 1, 1], [], []>} : vector<32x16xf32>, vector<16x512xf32>, vector<32x512xf32> -> vector<32x512xf32>
      %427 = arith.addf %424, %426 : vector<32x512xf32>
      %428 = vector.extract_strided_slice %420 {offsets = [0, 256], sizes = [16, 512], strides = [1, 1]} : vector<16x768xf32> to vector<16x512xf32>
      %cst_245 = arith.constant dense<0.000000e+00> : vector<32x512xf32>
      %429 = tpu.matmul %409, %428, %cst_245 {dimension_numbers = #tpu.dot_dimension_numbers<[1], [0], [0], [1], [0, 0, 1, 1], [], []>} : vector<32x16xf32>, vector<16x512xf32>, vector<32x512xf32> -> vector<32x512xf32>
      %430 = arith.addf %427, %429 : vector<32x512xf32>
      %431 = vector.extract_strided_slice %430 {offsets = [16, 0], sizes = [16, 512], strides = [1, 1]} : vector<32x512xf32> to vector<16x512xf32>
      %cst_246 = arith.constant 5.000000e-01 : f32
      %432 = vector.broadcast %cst_246 : f32 to vector<16x512xf32>
      %433 = arith.mulf %432, %431 : vector<16x512xf32>
      %434 = math.tanh %433 : vector<16x512xf32>
      %cst_247 = arith.constant 5.000000e-01 : f32
      %435 = vector.broadcast %cst_247 : f32 to vector<16x512xf32>
      %436 = arith.mulf %435, %434 : vector<16x512xf32>
      %cst_248 = arith.constant 5.000000e-01 : f32
      %437 = vector.broadcast %cst_248 : f32 to vector<16x512xf32>
      %438 = arith.addf %436, %437 : vector<16x512xf32>
      %439 = vector.extract_strided_slice %430 {offsets = [0, 0], sizes = [16, 512], strides = [1, 1]} : vector<32x512xf32> to vector<16x512xf32>
      %440 = math.tanh %439 : vector<16x512xf32>
      %441 = arith.mulf %440, %438 : vector<16x512xf32>
      %cst_249 = arith.constant dense<0.000000e+00> : vector<16x512xf32>
      %442 = tpu.matmul %415, %441, %cst_249 {dimension_numbers = #tpu.dot_dimension_numbers<[1], [0], [0], [1], [0, 0, 1, 1], [], []>} : vector<16x16xf32>, vector<16x512xf32>, vector<16x512xf32> -> vector<16x512xf32>
      %443 = vector.broadcast %418 : vector<16x1xf32> to vector<16x512xf32>
      %444 = arith.addf %442, %443 : vector<16x512xf32>
      %445 = arith.addf %444, %428 : vector<16x512xf32>
      %c0_250 = arith.constant 0 : index
      %c0_251 = arith.constant 0 : index
      %c256_252 = arith.constant 256 : index
      %446 = vector.load %arg11[%c0_250, %c0_251, %c256_252] : memref<2x16x768xf32, #tpu.memory_space<vmem>>, vector<1x16x512xf32>
      %447 = vector.shape_cast %446 : vector<1x16x512xf32> to vector<16x512xf32>
      %448 = vector.shape_cast %445 : vector<16x512xf32> to vector<1x16x512xf32>
      tpu.vector_store %arg11[%c0_250, %c0_251, %c256_252], %448 {strides = array<i32>} : memref<2x16x768xf32, #tpu.memory_space<vmem>>, vector<1x16x512xf32>,
      %c1_253 = arith.constant 1 : index
      %c0_254 = arith.constant 0 : index
      %c0_255 = arith.constant 0 : index
      %449 = vector.load %arg11[%c1_253, %c0_254, %c0_255] : memref<2x16x768xf32, #tpu.memory_space<vmem>>, vector<1x16x768xf32>
      %450 = vector.shape_cast %449 : vector<1x16x768xf32> to vector<16x768xf32>
      %451 = vector.extract_strided_slice %450 {offsets = [0, 224], sizes = [16, 512], strides = [1, 1]} : vector<16x768xf32> to vector<16x512xf32>
      %cst_256 = arith.constant dense<0.000000e+00> : vector<32x512xf32>
      %452 = tpu.matmul %399, %451, %cst_256 {dimension_numbers = #tpu.dot_dimension_numbers<[1], [0], [0], [1], [0, 0, 1, 1], [], []>} : vector<32x16xf32>, vector<16x512xf32>, vector<32x512xf32> -> vector<32x512xf32>
      %453 = vector.broadcast %412 : vector<32x1xf32> to vector<32x512xf32>
      %454 = arith.addf %453, %452 : vector<32x512xf32>
      %455 = vector.extract_strided_slice %450 {offsets = [0, 240], sizes = [16, 512], strides = [1, 1]} : vector<16x768xf32> to vector<16x512xf32>
      %cst_257 = arith.constant dense<0.000000e+00> : vector<32x512xf32>
      %456 = tpu.matmul %404, %455, %cst_257 {dimension_numbers = #tpu.dot_dimension_numbers<[1], [0], [0], [1], [0, 0, 1, 1], [], []>} : vector<32x16xf32>, vector<16x512xf32>, vector<32x512xf32> -> vector<32x512xf32>
      %457 = arith.addf %454, %456 : vector<32x512xf32>
      %458 = vector.extract_strided_slice %450 {offsets = [0, 256], sizes = [16, 512], strides = [1, 1]} : vector<16x768xf32> to vector<16x512xf32>
      %cst_258 = arith.constant dense<0.000000e+00> : vector<32x512xf32>
      %459 = tpu.matmul %409, %458, %cst_258 {dimension_numbers = #tpu.dot_dimension_numbers<[1], [0], [0], [1], [0, 0, 1, 1], [], []>} : vector<32x16xf32>, vector<16x512xf32>, vector<32x512xf32> -> vector<32x512xf32>
      %460 = arith.addf %457, %459 : vector<32x512xf32>
      %461 = vector.extract_strided_slice %460 {offsets = [16, 0], sizes = [16, 512], strides = [1, 1]} : vector<32x512xf32> to vector<16x512xf32>
      %cst_259 = arith.constant 5.000000e-01 : f32
      %462 = vector.broadcast %cst_259 : f32 to vector<16x512xf32>
      %463 = arith.mulf %462, %461 : vector<16x512xf32>
      %464 = math.tanh %463 : vector<16x512xf32>
      %cst_260 = arith.constant 5.000000e-01 : f32
      %465 = vector.broadcast %cst_260 : f32 to vector<16x512xf32>
      %466 = arith.mulf %465, %464 : vector<16x512xf32>
      %cst_261 = arith.constant 5.000000e-01 : f32
      %467 = vector.broadcast %cst_261 : f32 to vector<16x512xf32>
      %468 = arith.addf %466, %467 : vector<16x512xf32>
      %469 = vector.extract_strided_slice %460 {offsets = [0, 0], sizes = [16, 512], strides = [1, 1]} : vector<32x512xf32> to vector<16x512xf32>
      %470 = math.tanh %469 : vector<16x512xf32>
      %471 = arith.mulf %470, %468 : vector<16x512xf32>
      %cst_262 = arith.constant dense<0.000000e+00> : vector<16x512xf32>
      %472 = tpu.matmul %415, %471, %cst_262 {dimension_numbers = #tpu.dot_dimension_numbers<[1], [0], [0], [1], [0, 0, 1, 1], [], []>} : vector<16x16xf32>, vector<16x512xf32>, vector<16x512xf32> -> vector<16x512xf32>
      %473 = vector.broadcast %418 : vector<16x1xf32> to vector<16x512xf32>
      %474 = arith.addf %472, %473 : vector<16x512xf32>
      %475 = arith.addf %474, %458 : vector<16x512xf32>
      %c1_263 = arith.constant 1 : index
      %c0_264 = arith.constant 0 : index
      %c256_265 = arith.constant 256 : index
      %476 = vector.load %arg11[%c1_263, %c0_264, %c256_265] : memref<2x16x768xf32, #tpu.memory_space<vmem>>, vector<1x16x512xf32>
      %477 = vector.shape_cast %476 : vector<1x16x512xf32> to vector<16x512xf32>
      %478 = vector.shape_cast %475 : vector<16x512xf32> to vector<1x16x512xf32>
      tpu.vector_store %arg11[%c1_263, %c0_264, %c256_265], %478 {strides = array<i32>} : memref<2x16x768xf32, #tpu.memory_space<vmem>>, vector<1x16x512xf32>,
      %c8_i32_266 = arith.constant 8 : i32
      %479 = arith.muli %arg12, %c8_i32_266 : i32
      %c5_i32 = arith.constant 5 : i32
      %480 = arith.addi %479, %c5_i32 : i32
      %c3_i32_267 = arith.constant 3 : i32
      %481 = arith.muli %480, %c3_i32_267 : i32
      %c0_i32_268 = arith.constant 0 : i32
      %482 = arith.addi %481, %c0_i32_268 : i32
      %483 = arith.index_cast %482 : i32 to index
      %c0_269 = arith.constant 0 : index
      %c0_270 = arith.constant 0 : index
      %484 = vector.load %arg2[%483, %c0_269, %c0_270] : memref<48x32x16xf32, #tpu.memory_space<vmem>>, vector<1x32x16xf32>
      %485 = vector.shape_cast %484 : vector<1x32x16xf32> to vector<32x16xf32>
      %c3_i32_271 = arith.constant 3 : i32
      %486 = arith.muli %480, %c3_i32_271 : i32
      %c1_i32_272 = arith.constant 1 : i32
      %487 = arith.addi %486, %c1_i32_272 : i32
      %488 = arith.index_cast %487 : i32 to index
      %c0_273 = arith.constant 0 : index
      %c0_274 = arith.constant 0 : index
      %489 = vector.load %arg2[%488, %c0_273, %c0_274] : memref<48x32x16xf32, #tpu.memory_space<vmem>>, vector<1x32x16xf32>
      %490 = vector.shape_cast %489 : vector<1x32x16xf32> to vector<32x16xf32>
      %c3_i32_275 = arith.constant 3 : i32
      %491 = arith.muli %480, %c3_i32_275 : i32
      %c2_i32_276 = arith.constant 2 : i32
      %492 = arith.addi %491, %c2_i32_276 : i32
      %493 = arith.index_cast %492 : i32 to index
      %c0_277 = arith.constant 0 : index
      %c0_278 = arith.constant 0 : index
      %494 = vector.load %arg2[%493, %c0_277, %c0_278] : memref<48x32x16xf32, #tpu.memory_space<vmem>>, vector<1x32x16xf32>
      %495 = vector.shape_cast %494 : vector<1x32x16xf32> to vector<32x16xf32>
      %496 = arith.index_cast %480 : i32 to index
      %c0_279 = arith.constant 0 : index
      %c0_280 = arith.constant 0 : index
      %497 = vector.load %arg3[%496, %c0_279, %c0_280] : memref<16x32x1xf32, #tpu.memory_space<vmem>>, vector<1x32x1xf32>
      %498 = vector.shape_cast %497 : vector<1x32x1xf32> to vector<32x1xf32>
      %499 = arith.index_cast %480 : i32 to index
      %c0_281 = arith.constant 0 : index
      %c0_282 = arith.constant 0 : index
      %500 = vector.load %arg4[%499, %c0_281, %c0_282] : memref<16x16x16xf32, #tpu.memory_space<vmem>>, vector<1x16x16xf32>
      %501 = vector.shape_cast %500 : vector<1x16x16xf32> to vector<16x16xf32>
      %502 = arith.index_cast %480 : i32 to index
      %c0_283 = arith.constant 0 : index
      %c0_284 = arith.constant 0 : index
      %503 = vector.load %arg5[%502, %c0_283, %c0_284] : memref<16x16x1xf32, #tpu.memory_space<vmem>>, vector<1x16x1xf32>
      %504 = vector.shape_cast %503 : vector<1x16x1xf32> to vector<16x1xf32>
      %c0_285 = arith.constant 0 : index
      %c0_286 = arith.constant 0 : index
      %c0_287 = arith.constant 0 : index
      %505 = vector.load %arg11[%c0_285, %c0_286, %c0_287] : memref<2x16x768xf32, #tpu.memory_space<vmem>>, vector<1x16x768xf32>
      %506 = vector.shape_cast %505 : vector<1x16x768xf32> to vector<16x768xf32>
      %507 = vector.extract_strided_slice %506 {offsets = [0, 192], sizes = [16, 512], strides = [1, 1]} : vector<16x768xf32> to vector<16x512xf32>
      %cst_288 = arith.constant dense<0.000000e+00> : vector<32x512xf32>
      %508 = tpu.matmul %485, %507, %cst_288 {dimension_numbers = #tpu.dot_dimension_numbers<[1], [0], [0], [1], [0, 0, 1, 1], [], []>} : vector<32x16xf32>, vector<16x512xf32>, vector<32x512xf32> -> vector<32x512xf32>
      %509 = vector.broadcast %498 : vector<32x1xf32> to vector<32x512xf32>
      %510 = arith.addf %509, %508 : vector<32x512xf32>
      %511 = vector.extract_strided_slice %506 {offsets = [0, 224], sizes = [16, 512], strides = [1, 1]} : vector<16x768xf32> to vector<16x512xf32>
      %cst_289 = arith.constant dense<0.000000e+00> : vector<32x512xf32>
      %512 = tpu.matmul %490, %511, %cst_289 {dimension_numbers = #tpu.dot_dimension_numbers<[1], [0], [0], [1], [0, 0, 1, 1], [], []>} : vector<32x16xf32>, vector<16x512xf32>, vector<32x512xf32> -> vector<32x512xf32>
      %513 = arith.addf %510, %512 : vector<32x512xf32>
      %514 = vector.extract_strided_slice %506 {offsets = [0, 256], sizes = [16, 512], strides = [1, 1]} : vector<16x768xf32> to vector<16x512xf32>
      %cst_290 = arith.constant dense<0.000000e+00> : vector<32x512xf32>
      %515 = tpu.matmul %495, %514, %cst_290 {dimension_numbers = #tpu.dot_dimension_numbers<[1], [0], [0], [1], [0, 0, 1, 1], [], []>} : vector<32x16xf32>, vector<16x512xf32>, vector<32x512xf32> -> vector<32x512xf32>
      %516 = arith.addf %513, %515 : vector<32x512xf32>
      %517 = vector.extract_strided_slice %516 {offsets = [16, 0], sizes = [16, 512], strides = [1, 1]} : vector<32x512xf32> to vector<16x512xf32>
      %cst_291 = arith.constant 5.000000e-01 : f32
      %518 = vector.broadcast %cst_291 : f32 to vector<16x512xf32>
      %519 = arith.mulf %518, %517 : vector<16x512xf32>
      %520 = math.tanh %519 : vector<16x512xf32>
      %cst_292 = arith.constant 5.000000e-01 : f32
      %521 = vector.broadcast %cst_292 : f32 to vector<16x512xf32>
      %522 = arith.mulf %521, %520 : vector<16x512xf32>
      %cst_293 = arith.constant 5.000000e-01 : f32
      %523 = vector.broadcast %cst_293 : f32 to vector<16x512xf32>
      %524 = arith.addf %522, %523 : vector<16x512xf32>
      %525 = vector.extract_strided_slice %516 {offsets = [0, 0], sizes = [16, 512], strides = [1, 1]} : vector<32x512xf32> to vector<16x512xf32>
      %526 = math.tanh %525 : vector<16x512xf32>
      %527 = arith.mulf %526, %524 : vector<16x512xf32>
      %cst_294 = arith.constant dense<0.000000e+00> : vector<16x512xf32>
      %528 = tpu.matmul %501, %527, %cst_294 {dimension_numbers = #tpu.dot_dimension_numbers<[1], [0], [0], [1], [0, 0, 1, 1], [], []>} : vector<16x16xf32>, vector<16x512xf32>, vector<16x512xf32> -> vector<16x512xf32>
      %529 = vector.broadcast %504 : vector<16x1xf32> to vector<16x512xf32>
      %530 = arith.addf %528, %529 : vector<16x512xf32>
      %531 = arith.addf %530, %514 : vector<16x512xf32>
      %c0_295 = arith.constant 0 : index
      %c0_296 = arith.constant 0 : index
      %c256_297 = arith.constant 256 : index
      %532 = vector.load %arg11[%c0_295, %c0_296, %c256_297] : memref<2x16x768xf32, #tpu.memory_space<vmem>>, vector<1x16x512xf32>
      %533 = vector.shape_cast %532 : vector<1x16x512xf32> to vector<16x512xf32>
      %534 = vector.shape_cast %531 : vector<16x512xf32> to vector<1x16x512xf32>
      tpu.vector_store %arg11[%c0_295, %c0_296, %c256_297], %534 {strides = array<i32>} : memref<2x16x768xf32, #tpu.memory_space<vmem>>, vector<1x16x512xf32>,
      %c1_298 = arith.constant 1 : index
      %c0_299 = arith.constant 0 : index
      %c0_300 = arith.constant 0 : index
      %535 = vector.load %arg11[%c1_298, %c0_299, %c0_300] : memref<2x16x768xf32, #tpu.memory_space<vmem>>, vector<1x16x768xf32>
      %536 = vector.shape_cast %535 : vector<1x16x768xf32> to vector<16x768xf32>
      %537 = vector.extract_strided_slice %536 {offsets = [0, 192], sizes = [16, 512], strides = [1, 1]} : vector<16x768xf32> to vector<16x512xf32>
      %cst_301 = arith.constant dense<0.000000e+00> : vector<32x512xf32>
      %538 = tpu.matmul %485, %537, %cst_301 {dimension_numbers = #tpu.dot_dimension_numbers<[1], [0], [0], [1], [0, 0, 1, 1], [], []>} : vector<32x16xf32>, vector<16x512xf32>, vector<32x512xf32> -> vector<32x512xf32>
      %539 = vector.broadcast %498 : vector<32x1xf32> to vector<32x512xf32>
      %540 = arith.addf %539, %538 : vector<32x512xf32>
      %541 = vector.extract_strided_slice %536 {offsets = [0, 224], sizes = [16, 512], strides = [1, 1]} : vector<16x768xf32> to vector<16x512xf32>
      %cst_302 = arith.constant dense<0.000000e+00> : vector<32x512xf32>
      %542 = tpu.matmul %490, %541, %cst_302 {dimension_numbers = #tpu.dot_dimension_numbers<[1], [0], [0], [1], [0, 0, 1, 1], [], []>} : vector<32x16xf32>, vector<16x512xf32>, vector<32x512xf32> -> vector<32x512xf32>
      %543 = arith.addf %540, %542 : vector<32x512xf32>
      %544 = vector.extract_strided_slice %536 {offsets = [0, 256], sizes = [16, 512], strides = [1, 1]} : vector<16x768xf32> to vector<16x512xf32>
      %cst_303 = arith.constant dense<0.000000e+00> : vector<32x512xf32>
      %545 = tpu.matmul %495, %544, %cst_303 {dimension_numbers = #tpu.dot_dimension_numbers<[1], [0], [0], [1], [0, 0, 1, 1], [], []>} : vector<32x16xf32>, vector<16x512xf32>, vector<32x512xf32> -> vector<32x512xf32>
      %546 = arith.addf %543, %545 : vector<32x512xf32>
      %547 = vector.extract_strided_slice %546 {offsets = [16, 0], sizes = [16, 512], strides = [1, 1]} : vector<32x512xf32> to vector<16x512xf32>
      %cst_304 = arith.constant 5.000000e-01 : f32
      %548 = vector.broadcast %cst_304 : f32 to vector<16x512xf32>
      %549 = arith.mulf %548, %547 : vector<16x512xf32>
      %550 = math.tanh %549 : vector<16x512xf32>
      %cst_305 = arith.constant 5.000000e-01 : f32
      %551 = vector.broadcast %cst_305 : f32 to vector<16x512xf32>
      %552 = arith.mulf %551, %550 : vector<16x512xf32>
      %cst_306 = arith.constant 5.000000e-01 : f32
      %553 = vector.broadcast %cst_306 : f32 to vector<16x512xf32>
      %554 = arith.addf %552, %553 : vector<16x512xf32>
      %555 = vector.extract_strided_slice %546 {offsets = [0, 0], sizes = [16, 512], strides = [1, 1]} : vector<32x512xf32> to vector<16x512xf32>
      %556 = math.tanh %555 : vector<16x512xf32>
      %557 = arith.mulf %556, %554 : vector<16x512xf32>
      %cst_307 = arith.constant dense<0.000000e+00> : vector<16x512xf32>
      %558 = tpu.matmul %501, %557, %cst_307 {dimension_numbers = #tpu.dot_dimension_numbers<[1], [0], [0], [1], [0, 0, 1, 1], [], []>} : vector<16x16xf32>, vector<16x512xf32>, vector<16x512xf32> -> vector<16x512xf32>
      %559 = vector.broadcast %504 : vector<16x1xf32> to vector<16x512xf32>
      %560 = arith.addf %558, %559 : vector<16x512xf32>
      %561 = arith.addf %560, %544 : vector<16x512xf32>
      %c1_308 = arith.constant 1 : index
      %c0_309 = arith.constant 0 : index
      %c256_310 = arith.constant 256 : index
      %562 = vector.load %arg11[%c1_308, %c0_309, %c256_310] : memref<2x16x768xf32, #tpu.memory_space<vmem>>, vector<1x16x512xf32>
      %563 = vector.shape_cast %562 : vector<1x16x512xf32> to vector<16x512xf32>
      %564 = vector.shape_cast %561 : vector<16x512xf32> to vector<1x16x512xf32>
      tpu.vector_store %arg11[%c1_308, %c0_309, %c256_310], %564 {strides = array<i32>} : memref<2x16x768xf32, #tpu.memory_space<vmem>>, vector<1x16x512xf32>,
      %c8_i32_311 = arith.constant 8 : i32
      %565 = arith.muli %arg12, %c8_i32_311 : i32
      %c6_i32 = arith.constant 6 : i32
      %566 = arith.addi %565, %c6_i32 : i32
      %c3_i32_312 = arith.constant 3 : i32
      %567 = arith.muli %566, %c3_i32_312 : i32
      %c0_i32_313 = arith.constant 0 : i32
      %568 = arith.addi %567, %c0_i32_313 : i32
      %569 = arith.index_cast %568 : i32 to index
      %c0_314 = arith.constant 0 : index
      %c0_315 = arith.constant 0 : index
      %570 = vector.load %arg2[%569, %c0_314, %c0_315] : memref<48x32x16xf32, #tpu.memory_space<vmem>>, vector<1x32x16xf32>
      %571 = vector.shape_cast %570 : vector<1x32x16xf32> to vector<32x16xf32>
      %c3_i32_316 = arith.constant 3 : i32
      %572 = arith.muli %566, %c3_i32_316 : i32
      %c1_i32_317 = arith.constant 1 : i32
      %573 = arith.addi %572, %c1_i32_317 : i32
      %574 = arith.index_cast %573 : i32 to index
      %c0_318 = arith.constant 0 : index
      %c0_319 = arith.constant 0 : index
      %575 = vector.load %arg2[%574, %c0_318, %c0_319] : memref<48x32x16xf32, #tpu.memory_space<vmem>>, vector<1x32x16xf32>
      %576 = vector.shape_cast %575 : vector<1x32x16xf32> to vector<32x16xf32>
      %c3_i32_320 = arith.constant 3 : i32
      %577 = arith.muli %566, %c3_i32_320 : i32
      %c2_i32_321 = arith.constant 2 : i32
      %578 = arith.addi %577, %c2_i32_321 : i32
      %579 = arith.index_cast %578 : i32 to index
      %c0_322 = arith.constant 0 : index
      %c0_323 = arith.constant 0 : index
      %580 = vector.load %arg2[%579, %c0_322, %c0_323] : memref<48x32x16xf32, #tpu.memory_space<vmem>>, vector<1x32x16xf32>
      %581 = vector.shape_cast %580 : vector<1x32x16xf32> to vector<32x16xf32>
      %582 = arith.index_cast %566 : i32 to index
      %c0_324 = arith.constant 0 : index
      %c0_325 = arith.constant 0 : index
      %583 = vector.load %arg3[%582, %c0_324, %c0_325] : memref<16x32x1xf32, #tpu.memory_space<vmem>>, vector<1x32x1xf32>
      %584 = vector.shape_cast %583 : vector<1x32x1xf32> to vector<32x1xf32>
      %585 = arith.index_cast %566 : i32 to index
      %c0_326 = arith.constant 0 : index
      %c0_327 = arith.constant 0 : index
      %586 = vector.load %arg4[%585, %c0_326, %c0_327] : memref<16x16x16xf32, #tpu.memory_space<vmem>>, vector<1x16x16xf32>
      %587 = vector.shape_cast %586 : vector<1x16x16xf32> to vector<16x16xf32>
      %588 = arith.index_cast %566 : i32 to index
      %c0_328 = arith.constant 0 : index
      %c0_329 = arith.constant 0 : index
      %589 = vector.load %arg5[%588, %c0_328, %c0_329] : memref<16x16x1xf32, #tpu.memory_space<vmem>>, vector<1x16x1xf32>
      %590 = vector.shape_cast %589 : vector<1x16x1xf32> to vector<16x1xf32>
      %c0_330 = arith.constant 0 : index
      %c0_331 = arith.constant 0 : index
      %c0_332 = arith.constant 0 : index
      %591 = vector.load %arg11[%c0_330, %c0_331, %c0_332] : memref<2x16x768xf32, #tpu.memory_space<vmem>>, vector<1x16x768xf32>
      %592 = vector.shape_cast %591 : vector<1x16x768xf32> to vector<16x768xf32>
      %593 = vector.extract_strided_slice %592 {offsets = [0, 128], sizes = [16, 512], strides = [1, 1]} : vector<16x768xf32> to vector<16x512xf32>
      %cst_333 = arith.constant dense<0.000000e+00> : vector<32x512xf32>
      %594 = tpu.matmul %571, %593, %cst_333 {dimension_numbers = #tpu.dot_dimension_numbers<[1], [0], [0], [1], [0, 0, 1, 1], [], []>} : vector<32x16xf32>, vector<16x512xf32>, vector<32x512xf32> -> vector<32x512xf32>
      %595 = vector.broadcast %584 : vector<32x1xf32> to vector<32x512xf32>
      %596 = arith.addf %595, %594 : vector<32x512xf32>
      %597 = vector.extract_strided_slice %592 {offsets = [0, 192], sizes = [16, 512], strides = [1, 1]} : vector<16x768xf32> to vector<16x512xf32>
      %cst_334 = arith.constant dense<0.000000e+00> : vector<32x512xf32>
      %598 = tpu.matmul %576, %597, %cst_334 {dimension_numbers = #tpu.dot_dimension_numbers<[1], [0], [0], [1], [0, 0, 1, 1], [], []>} : vector<32x16xf32>, vector<16x512xf32>, vector<32x512xf32> -> vector<32x512xf32>
      %599 = arith.addf %596, %598 : vector<32x512xf32>
      %600 = vector.extract_strided_slice %592 {offsets = [0, 256], sizes = [16, 512], strides = [1, 1]} : vector<16x768xf32> to vector<16x512xf32>
      %cst_335 = arith.constant dense<0.000000e+00> : vector<32x512xf32>
      %601 = tpu.matmul %581, %600, %cst_335 {dimension_numbers = #tpu.dot_dimension_numbers<[1], [0], [0], [1], [0, 0, 1, 1], [], []>} : vector<32x16xf32>, vector<16x512xf32>, vector<32x512xf32> -> vector<32x512xf32>
      %602 = arith.addf %599, %601 : vector<32x512xf32>
      %603 = vector.extract_strided_slice %602 {offsets = [16, 0], sizes = [16, 512], strides = [1, 1]} : vector<32x512xf32> to vector<16x512xf32>
      %cst_336 = arith.constant 5.000000e-01 : f32
      %604 = vector.broadcast %cst_336 : f32 to vector<16x512xf32>
      %605 = arith.mulf %604, %603 : vector<16x512xf32>
      %606 = math.tanh %605 : vector<16x512xf32>
      %cst_337 = arith.constant 5.000000e-01 : f32
      %607 = vector.broadcast %cst_337 : f32 to vector<16x512xf32>
      %608 = arith.mulf %607, %606 : vector<16x512xf32>
      %cst_338 = arith.constant 5.000000e-01 : f32
      %609 = vector.broadcast %cst_338 : f32 to vector<16x512xf32>
      %610 = arith.addf %608, %609 : vector<16x512xf32>
      %611 = vector.extract_strided_slice %602 {offsets = [0, 0], sizes = [16, 512], strides = [1, 1]} : vector<32x512xf32> to vector<16x512xf32>
      %612 = math.tanh %611 : vector<16x512xf32>
      %613 = arith.mulf %612, %610 : vector<16x512xf32>
      %cst_339 = arith.constant dense<0.000000e+00> : vector<16x512xf32>
      %614 = tpu.matmul %587, %613, %cst_339 {dimension_numbers = #tpu.dot_dimension_numbers<[1], [0], [0], [1], [0, 0, 1, 1], [], []>} : vector<16x16xf32>, vector<16x512xf32>, vector<16x512xf32> -> vector<16x512xf32>
      %615 = vector.broadcast %590 : vector<16x1xf32> to vector<16x512xf32>
      %616 = arith.addf %614, %615 : vector<16x512xf32>
      %617 = arith.addf %616, %600 : vector<16x512xf32>
      %c0_340 = arith.constant 0 : index
      %c0_341 = arith.constant 0 : index
      %c256_342 = arith.constant 256 : index
      %618 = vector.load %arg11[%c0_340, %c0_341, %c256_342] : memref<2x16x768xf32, #tpu.memory_space<vmem>>, vector<1x16x512xf32>
      %619 = vector.shape_cast %618 : vector<1x16x512xf32> to vector<16x512xf32>
      %620 = vector.shape_cast %617 : vector<16x512xf32> to vector<1x16x512xf32>
      tpu.vector_store %arg11[%c0_340, %c0_341, %c256_342], %620 {strides = array<i32>} : memref<2x16x768xf32, #tpu.memory_space<vmem>>, vector<1x16x512xf32>,
      %c1_343 = arith.constant 1 : index
      %c0_344 = arith.constant 0 : index
      %c0_345 = arith.constant 0 : index
      %621 = vector.load %arg11[%c1_343, %c0_344, %c0_345] : memref<2x16x768xf32, #tpu.memory_space<vmem>>, vector<1x16x768xf32>
      %622 = vector.shape_cast %621 : vector<1x16x768xf32> to vector<16x768xf32>
      %623 = vector.extract_strided_slice %622 {offsets = [0, 128], sizes = [16, 512], strides = [1, 1]} : vector<16x768xf32> to vector<16x512xf32>
      %cst_346 = arith.constant dense<0.000000e+00> : vector<32x512xf32>
      %624 = tpu.matmul %571, %623, %cst_346 {dimension_numbers = #tpu.dot_dimension_numbers<[1], [0], [0], [1], [0, 0, 1, 1], [], []>} : vector<32x16xf32>, vector<16x512xf32>, vector<32x512xf32> -> vector<32x512xf32>
      %625 = vector.broadcast %584 : vector<32x1xf32> to vector<32x512xf32>
      %626 = arith.addf %625, %624 : vector<32x512xf32>
      %627 = vector.extract_strided_slice %622 {offsets = [0, 192], sizes = [16, 512], strides = [1, 1]} : vector<16x768xf32> to vector<16x512xf32>
      %cst_347 = arith.constant dense<0.000000e+00> : vector<32x512xf32>
      %628 = tpu.matmul %576, %627, %cst_347 {dimension_numbers = #tpu.dot_dimension_numbers<[1], [0], [0], [1], [0, 0, 1, 1], [], []>} : vector<32x16xf32>, vector<16x512xf32>, vector<32x512xf32> -> vector<32x512xf32>
      %629 = arith.addf %626, %628 : vector<32x512xf32>
      %630 = vector.extract_strided_slice %622 {offsets = [0, 256], sizes = [16, 512], strides = [1, 1]} : vector<16x768xf32> to vector<16x512xf32>
      %cst_348 = arith.constant dense<0.000000e+00> : vector<32x512xf32>
      %631 = tpu.matmul %581, %630, %cst_348 {dimension_numbers = #tpu.dot_dimension_numbers<[1], [0], [0], [1], [0, 0, 1, 1], [], []>} : vector<32x16xf32>, vector<16x512xf32>, vector<32x512xf32> -> vector<32x512xf32>
      %632 = arith.addf %629, %631 : vector<32x512xf32>
      %633 = vector.extract_strided_slice %632 {offsets = [16, 0], sizes = [16, 512], strides = [1, 1]} : vector<32x512xf32> to vector<16x512xf32>
      %cst_349 = arith.constant 5.000000e-01 : f32
      %634 = vector.broadcast %cst_349 : f32 to vector<16x512xf32>
      %635 = arith.mulf %634, %633 : vector<16x512xf32>
      %636 = math.tanh %635 : vector<16x512xf32>
      %cst_350 = arith.constant 5.000000e-01 : f32
      %637 = vector.broadcast %cst_350 : f32 to vector<16x512xf32>
      %638 = arith.mulf %637, %636 : vector<16x512xf32>
      %cst_351 = arith.constant 5.000000e-01 : f32
      %639 = vector.broadcast %cst_351 : f32 to vector<16x512xf32>
      %640 = arith.addf %638, %639 : vector<16x512xf32>
      %641 = vector.extract_strided_slice %632 {offsets = [0, 0], sizes = [16, 512], strides = [1, 1]} : vector<32x512xf32> to vector<16x512xf32>
      %642 = math.tanh %641 : vector<16x512xf32>
      %643 = arith.mulf %642, %640 : vector<16x512xf32>
      %cst_352 = arith.constant dense<0.000000e+00> : vector<16x512xf32>
      %644 = tpu.matmul %587, %643, %cst_352 {dimension_numbers = #tpu.dot_dimension_numbers<[1], [0], [0], [1], [0, 0, 1, 1], [], []>} : vector<16x16xf32>, vector<16x512xf32>, vector<16x512xf32> -> vector<16x512xf32>
      %645 = vector.broadcast %590 : vector<16x1xf32> to vector<16x512xf32>
      %646 = arith.addf %644, %645 : vector<16x512xf32>
      %647 = arith.addf %646, %630 : vector<16x512xf32>
      %c1_353 = arith.constant 1 : index
      %c0_354 = arith.constant 0 : index
      %c256_355 = arith.constant 256 : index
      %648 = vector.load %arg11[%c1_353, %c0_354, %c256_355] : memref<2x16x768xf32, #tpu.memory_space<vmem>>, vector<1x16x512xf32>
      %649 = vector.shape_cast %648 : vector<1x16x512xf32> to vector<16x512xf32>
      %650 = vector.shape_cast %647 : vector<16x512xf32> to vector<1x16x512xf32>
      tpu.vector_store %arg11[%c1_353, %c0_354, %c256_355], %650 {strides = array<i32>} : memref<2x16x768xf32, #tpu.memory_space<vmem>>, vector<1x16x512xf32>,
      %c8_i32_356 = arith.constant 8 : i32
      %651 = arith.muli %arg12, %c8_i32_356 : i32
      %c7_i32 = arith.constant 7 : i32
      %652 = arith.addi %651, %c7_i32 : i32
      %c3_i32_357 = arith.constant 3 : i32
      %653 = arith.muli %652, %c3_i32_357 : i32
      %c0_i32_358 = arith.constant 0 : i32
      %654 = arith.addi %653, %c0_i32_358 : i32
      %655 = arith.index_cast %654 : i32 to index
      %c0_359 = arith.constant 0 : index
      %c0_360 = arith.constant 0 : index
      %656 = vector.load %arg2[%655, %c0_359, %c0_360] : memref<48x32x16xf32, #tpu.memory_space<vmem>>, vector<1x32x16xf32>
      %657 = vector.shape_cast %656 : vector<1x32x16xf32> to vector<32x16xf32>
      %c3_i32_361 = arith.constant 3 : i32
      %658 = arith.muli %652, %c3_i32_361 : i32
      %c1_i32_362 = arith.constant 1 : i32
      %659 = arith.addi %658, %c1_i32_362 : i32
      %660 = arith.index_cast %659 : i32 to index
      %c0_363 = arith.constant 0 : index
      %c0_364 = arith.constant 0 : index
      %661 = vector.load %arg2[%660, %c0_363, %c0_364] : memref<48x32x16xf32, #tpu.memory_space<vmem>>, vector<1x32x16xf32>
      %662 = vector.shape_cast %661 : vector<1x32x16xf32> to vector<32x16xf32>
      %c3_i32_365 = arith.constant 3 : i32
      %663 = arith.muli %652, %c3_i32_365 : i32
      %c2_i32_366 = arith.constant 2 : i32
      %664 = arith.addi %663, %c2_i32_366 : i32
      %665 = arith.index_cast %664 : i32 to index
      %c0_367 = arith.constant 0 : index
      %c0_368 = arith.constant 0 : index
      %666 = vector.load %arg2[%665, %c0_367, %c0_368] : memref<48x32x16xf32, #tpu.memory_space<vmem>>, vector<1x32x16xf32>
      %667 = vector.shape_cast %666 : vector<1x32x16xf32> to vector<32x16xf32>
      %668 = arith.index_cast %652 : i32 to index
      %c0_369 = arith.constant 0 : index
      %c0_370 = arith.constant 0 : index
      %669 = vector.load %arg3[%668, %c0_369, %c0_370] : memref<16x32x1xf32, #tpu.memory_space<vmem>>, vector<1x32x1xf32>
      %670 = vector.shape_cast %669 : vector<1x32x1xf32> to vector<32x1xf32>
      %671 = arith.index_cast %652 : i32 to index
      %c0_371 = arith.constant 0 : index
      %c0_372 = arith.constant 0 : index
      %672 = vector.load %arg4[%671, %c0_371, %c0_372] : memref<16x16x16xf32, #tpu.memory_space<vmem>>, vector<1x16x16xf32>
      %673 = vector.shape_cast %672 : vector<1x16x16xf32> to vector<16x16xf32>
      %674 = arith.index_cast %652 : i32 to index
      %c0_373 = arith.constant 0 : index
      %c0_374 = arith.constant 0 : index
      %675 = vector.load %arg5[%674, %c0_373, %c0_374] : memref<16x16x1xf32, #tpu.memory_space<vmem>>, vector<1x16x1xf32>
      %676 = vector.shape_cast %675 : vector<1x16x1xf32> to vector<16x1xf32>
      %c0_375 = arith.constant 0 : index
      %c0_376 = arith.constant 0 : index
      %c0_377 = arith.constant 0 : index
      %677 = vector.load %arg11[%c0_375, %c0_376, %c0_377] : memref<2x16x768xf32, #tpu.memory_space<vmem>>, vector<1x16x768xf32>
      %678 = vector.shape_cast %677 : vector<1x16x768xf32> to vector<16x768xf32>
      %679 = vector.extract_strided_slice %678 {offsets = [0, 0], sizes = [16, 512], strides = [1, 1]} : vector<16x768xf32> to vector<16x512xf32>
      %cst_378 = arith.constant dense<0.000000e+00> : vector<32x512xf32>
      %680 = tpu.matmul %657, %679, %cst_378 {dimension_numbers = #tpu.dot_dimension_numbers<[1], [0], [0], [1], [0, 0, 1, 1], [], []>} : vector<32x16xf32>, vector<16x512xf32>, vector<32x512xf32> -> vector<32x512xf32>
      %681 = vector.broadcast %670 : vector<32x1xf32> to vector<32x512xf32>
      %682 = arith.addf %681, %680 : vector<32x512xf32>
      %683 = vector.extract_strided_slice %678 {offsets = [0, 128], sizes = [16, 512], strides = [1, 1]} : vector<16x768xf32> to vector<16x512xf32>
      %cst_379 = arith.constant dense<0.000000e+00> : vector<32x512xf32>
      %684 = tpu.matmul %662, %683, %cst_379 {dimension_numbers = #tpu.dot_dimension_numbers<[1], [0], [0], [1], [0, 0, 1, 1], [], []>} : vector<32x16xf32>, vector<16x512xf32>, vector<32x512xf32> -> vector<32x512xf32>
      %685 = arith.addf %682, %684 : vector<32x512xf32>
      %686 = vector.extract_strided_slice %678 {offsets = [0, 256], sizes = [16, 512], strides = [1, 1]} : vector<16x768xf32> to vector<16x512xf32>
      %cst_380 = arith.constant dense<0.000000e+00> : vector<32x512xf32>
      %687 = tpu.matmul %667, %686, %cst_380 {dimension_numbers = #tpu.dot_dimension_numbers<[1], [0], [0], [1], [0, 0, 1, 1], [], []>} : vector<32x16xf32>, vector<16x512xf32>, vector<32x512xf32> -> vector<32x512xf32>
      %688 = arith.addf %685, %687 : vector<32x512xf32>
      %689 = vector.extract_strided_slice %688 {offsets = [16, 0], sizes = [16, 512], strides = [1, 1]} : vector<32x512xf32> to vector<16x512xf32>
      %cst_381 = arith.constant 5.000000e-01 : f32
      %690 = vector.broadcast %cst_381 : f32 to vector<16x512xf32>
      %691 = arith.mulf %690, %689 : vector<16x512xf32>
      %692 = math.tanh %691 : vector<16x512xf32>
      %cst_382 = arith.constant 5.000000e-01 : f32
      %693 = vector.broadcast %cst_382 : f32 to vector<16x512xf32>
      %694 = arith.mulf %693, %692 : vector<16x512xf32>
      %cst_383 = arith.constant 5.000000e-01 : f32
      %695 = vector.broadcast %cst_383 : f32 to vector<16x512xf32>
      %696 = arith.addf %694, %695 : vector<16x512xf32>
      %697 = vector.extract_strided_slice %688 {offsets = [0, 0], sizes = [16, 512], strides = [1, 1]} : vector<32x512xf32> to vector<16x512xf32>
      %698 = math.tanh %697 : vector<16x512xf32>
      %699 = arith.mulf %698, %696 : vector<16x512xf32>
      %cst_384 = arith.constant dense<0.000000e+00> : vector<16x512xf32>
      %700 = tpu.matmul %673, %699, %cst_384 {dimension_numbers = #tpu.dot_dimension_numbers<[1], [0], [0], [1], [0, 0, 1, 1], [], []>} : vector<16x16xf32>, vector<16x512xf32>, vector<16x512xf32> -> vector<16x512xf32>
      %701 = vector.broadcast %676 : vector<16x1xf32> to vector<16x512xf32>
      %702 = arith.addf %700, %701 : vector<16x512xf32>
      %703 = arith.addf %702, %686 : vector<16x512xf32>
      %c0_385 = arith.constant 0 : index
      %c0_386 = arith.constant 0 : index
      %c256_387 = arith.constant 256 : index
      %704 = vector.load %arg11[%c0_385, %c0_386, %c256_387] : memref<2x16x768xf32, #tpu.memory_space<vmem>>, vector<1x16x512xf32>
      %705 = vector.shape_cast %704 : vector<1x16x512xf32> to vector<16x512xf32>
      %706 = vector.shape_cast %703 : vector<16x512xf32> to vector<1x16x512xf32>
      tpu.vector_store %arg11[%c0_385, %c0_386, %c256_387], %706 {strides = array<i32>} : memref<2x16x768xf32, #tpu.memory_space<vmem>>, vector<1x16x512xf32>,
      %c1_388 = arith.constant 1 : index
      %c0_389 = arith.constant 0 : index
      %c0_390 = arith.constant 0 : index
      %707 = vector.load %arg11[%c1_388, %c0_389, %c0_390] : memref<2x16x768xf32, #tpu.memory_space<vmem>>, vector<1x16x768xf32>
      %708 = vector.shape_cast %707 : vector<1x16x768xf32> to vector<16x768xf32>
      %709 = vector.extract_strided_slice %708 {offsets = [0, 0], sizes = [16, 512], strides = [1, 1]} : vector<16x768xf32> to vector<16x512xf32>
      %cst_391 = arith.constant dense<0.000000e+00> : vector<32x512xf32>
      %710 = tpu.matmul %657, %709, %cst_391 {dimension_numbers = #tpu.dot_dimension_numbers<[1], [0], [0], [1], [0, 0, 1, 1], [], []>} : vector<32x16xf32>, vector<16x512xf32>, vector<32x512xf32> -> vector<32x512xf32>
      %711 = vector.broadcast %670 : vector<32x1xf32> to vector<32x512xf32>
      %712 = arith.addf %711, %710 : vector<32x512xf32>
      %713 = vector.extract_strided_slice %708 {offsets = [0, 128], sizes = [16, 512], strides = [1, 1]} : vector<16x768xf32> to vector<16x512xf32>
      %cst_392 = arith.constant dense<0.000000e+00> : vector<32x512xf32>
      %714 = tpu.matmul %662, %713, %cst_392 {dimension_numbers = #tpu.dot_dimension_numbers<[1], [0], [0], [1], [0, 0, 1, 1], [], []>} : vector<32x16xf32>, vector<16x512xf32>, vector<32x512xf32> -> vector<32x512xf32>
      %715 = arith.addf %712, %714 : vector<32x512xf32>
      %716 = vector.extract_strided_slice %708 {offsets = [0, 256], sizes = [16, 512], strides = [1, 1]} : vector<16x768xf32> to vector<16x512xf32>
      %cst_393 = arith.constant dense<0.000000e+00> : vector<32x512xf32>
      %717 = tpu.matmul %667, %716, %cst_393 {dimension_numbers = #tpu.dot_dimension_numbers<[1], [0], [0], [1], [0, 0, 1, 1], [], []>} : vector<32x16xf32>, vector<16x512xf32>, vector<32x512xf32> -> vector<32x512xf32>
      %718 = arith.addf %715, %717 : vector<32x512xf32>
      %719 = vector.extract_strided_slice %718 {offsets = [16, 0], sizes = [16, 512], strides = [1, 1]} : vector<32x512xf32> to vector<16x512xf32>
      %cst_394 = arith.constant 5.000000e-01 : f32
      %720 = vector.broadcast %cst_394 : f32 to vector<16x512xf32>
      %721 = arith.mulf %720, %719 : vector<16x512xf32>
      %722 = math.tanh %721 : vector<16x512xf32>
      %cst_395 = arith.constant 5.000000e-01 : f32
      %723 = vector.broadcast %cst_395 : f32 to vector<16x512xf32>
      %724 = arith.mulf %723, %722 : vector<16x512xf32>
      %cst_396 = arith.constant 5.000000e-01 : f32
      %725 = vector.broadcast %cst_396 : f32 to vector<16x512xf32>
      %726 = arith.addf %724, %725 : vector<16x512xf32>
      %727 = vector.extract_strided_slice %718 {offsets = [0, 0], sizes = [16, 512], strides = [1, 1]} : vector<32x512xf32> to vector<16x512xf32>
      %728 = math.tanh %727 : vector<16x512xf32>
      %729 = arith.mulf %728, %726 : vector<16x512xf32>
      %cst_397 = arith.constant dense<0.000000e+00> : vector<16x512xf32>
      %730 = tpu.matmul %673, %729, %cst_397 {dimension_numbers = #tpu.dot_dimension_numbers<[1], [0], [0], [1], [0, 0, 1, 1], [], []>} : vector<16x16xf32>, vector<16x512xf32>, vector<16x512xf32> -> vector<16x512xf32>
      %731 = vector.broadcast %676 : vector<16x1xf32> to vector<16x512xf32>
      %732 = arith.addf %730, %731 : vector<16x512xf32>
      %733 = arith.addf %732, %716 : vector<16x512xf32>
      %c1_398 = arith.constant 1 : index
      %c0_399 = arith.constant 0 : index
      %c256_400 = arith.constant 256 : index
      %734 = vector.load %arg11[%c1_398, %c0_399, %c256_400] : memref<2x16x768xf32, #tpu.memory_space<vmem>>, vector<1x16x512xf32>
      %735 = vector.shape_cast %734 : vector<1x16x512xf32> to vector<16x512xf32>
      %736 = vector.shape_cast %733 : vector<16x512xf32> to vector<1x16x512xf32>
      tpu.vector_store %arg11[%c1_398, %c0_399, %c256_400], %736 {strides = array<i32>} : memref<2x16x768xf32, #tpu.memory_space<vmem>>, vector<1x16x512xf32>,
    }
    %c2_i32_20 = arith.constant 2 : i32
    %c0_21 = arith.constant 0 : index
    %c0_22 = arith.constant 0 : index
    %31 = vector.load %arg8[%c0_21, %c0_22] : memref<1x16xf32, #tpu.memory_space<vmem>>, vector<1x16xf32>
    %c0_23 = arith.constant 0 : index
    %c0_24 = arith.constant 0 : index
    %32 = vector.load %arg9[%c0_23, %c0_24] : memref<1x1xf32, #tpu.memory_space<vmem>>, vector<1x1xf32>
    %c0_25 = arith.constant 0 : index
    %c0_26 = arith.constant 0 : index
    %c256_27 = arith.constant 256 : index
    %33 = vector.load %arg11[%c0_25, %c0_26, %c256_27] : memref<2x16x768xf32, #tpu.memory_space<vmem>>, vector<1x16x512xf32>
    %34 = vector.shape_cast %33 : vector<1x16x512xf32> to vector<16x512xf32>
    %cst_28 = arith.constant dense<0.000000e+00> : vector<1x512xf32>
    %35 = tpu.matmul %31, %34, %cst_28 {dimension_numbers = #tpu.dot_dimension_numbers<[1], [0], [0], [1], [0, 0, 1, 1], [], []>} : vector<1x16xf32>, vector<16x512xf32>, vector<1x512xf32> -> vector<1x512xf32>
    %36 = vector.broadcast %32 : vector<1x1xf32> to vector<1x512xf32>
    %37 = arith.addf %35, %36 : vector<1x512xf32>
    %c0_29 = arith.constant 0 : index
    %c0_30 = arith.constant 0 : index
    %c0_31 = arith.constant 0 : index
    %38 = vector.load %arg10[%c0_29, %c0_30, %c0_31] : memref<2x1x512xf32, #tpu.memory_space<vmem>>, vector<1x1x512xf32>
    %39 = vector.shape_cast %38 : vector<1x1x512xf32> to vector<1x512xf32>
    %40 = vector.shape_cast %37 : vector<1x512xf32> to vector<1x1x512xf32>
    tpu.vector_store %arg10[%c0_29, %c0_30, %c0_31], %40 {strides = array<i32>} : memref<2x1x512xf32, #tpu.memory_space<vmem>>, vector<1x1x512xf32>,
    %c1_32 = arith.constant 1 : index
    %c0_33 = arith.constant 0 : index
    %c256_34 = arith.constant 256 : index
    %41 = vector.load %arg11[%c1_32, %c0_33, %c256_34] : memref<2x16x768xf32, #tpu.memory_space<vmem>>, vector<1x16x512xf32>
    %42 = vector.shape_cast %41 : vector<1x16x512xf32> to vector<16x512xf32>
    %cst_35 = arith.constant dense<0.000000e+00> : vector<1x512xf32>
    %43 = tpu.matmul %31, %42, %cst_35 {dimension_numbers = #tpu.dot_dimension_numbers<[1], [0], [0], [1], [0, 0, 1, 1], [], []>} : vector<1x16xf32>, vector<16x512xf32>, vector<1x512xf32> -> vector<1x512xf32>
    %44 = vector.broadcast %32 : vector<1x1xf32> to vector<1x512xf32>
    %45 = arith.addf %43, %44 : vector<1x512xf32>
    %c1_36 = arith.constant 1 : index
    %c0_37 = arith.constant 0 : index
    %c0_38 = arith.constant 0 : index
    %46 = vector.load %arg10[%c1_36, %c0_37, %c0_38] : memref<2x1x512xf32, #tpu.memory_space<vmem>>, vector<1x1x512xf32>
    %47 = vector.shape_cast %46 : vector<1x1x512xf32> to vector<1x512xf32>
    %48 = vector.shape_cast %45 : vector<1x512xf32> to vector<1x1x512xf32>
    tpu.vector_store %arg10[%c1_36, %c0_37, %c0_38], %48 {strides = array<i32>} : memref<2x1x512xf32, #tpu.memory_space<vmem>>, vector<1x1x512xf32>,
    return
  }
  func.func @transform_0(%arg0: i32) -> (i32, i32, i32) {
    %c0_i32 = arith.constant 0 : i32
    %c0_i32_0 = arith.constant 0 : i32
    %c0_i32_1 = arith.constant 0 : i32
    return %arg0, %c0_i32, %c0_i32_0 : i32, i32, i32
  }
  func.func @transform_1(%arg0: i32) -> (i32, i32, i32) {
    %c0_i32 = arith.constant 0 : i32
    %c0_i32_0 = arith.constant 0 : i32
    %c0_i32_1 = arith.constant 0 : i32
    %c0_i32_2 = arith.constant 0 : i32
    return %c0_i32, %c0_i32_0, %c0_i32_1 : i32, i32, i32
  }
  func.func @transform_2(%arg0: i32) -> (i32, i32, i32) {
    %c0_i32 = arith.constant 0 : i32
    %c0_i32_0 = arith.constant 0 : i32
    %c0_i32_1 = arith.constant 0 : i32
    %c0_i32_2 = arith.constant 0 : i32
    return %c0_i32, %c0_i32_0, %c0_i32_1 : i32, i32, i32
  }
  func.func @transform_3(%arg0: i32) -> (i32, i32, i32) {
    %c0_i32 = arith.constant 0 : i32
    %c0_i32_0 = arith.constant 0 : i32
    %c0_i32_1 = arith.constant 0 : i32
    %c0_i32_2 = arith.constant 0 : i32
    return %c0_i32, %c0_i32_0, %c0_i32_1 : i32, i32, i32
  }
  func.func @transform_4(%arg0: i32) -> (i32, i32, i32) {
    %c0_i32 = arith.constant 0 : i32
    %c0_i32_0 = arith.constant 0 : i32
    %c0_i32_1 = arith.constant 0 : i32
    %c0_i32_2 = arith.constant 0 : i32
    return %c0_i32, %c0_i32_0, %c0_i32_1 : i32, i32, i32
  }
  func.func @transform_5(%arg0: i32) -> (i32, i32) {
    %c0_i32 = arith.constant 0 : i32
    %c0_i32_0 = arith.constant 0 : i32
    %c0_i32_1 = arith.constant 0 : i32
    return %c0_i32, %c0_i32_0 : i32, i32
  }
  func.func @transform_6(%arg0: i32) -> (i32, i32) {
    %c0_i32 = arith.constant 0 : i32
    %c0_i32_0 = arith.constant 0 : i32
    %c0_i32_1 = arith.constant 0 : i32
    return %c0_i32, %c0_i32_0 : i32, i32
  }
  func.func @transform_7(%arg0: i32) -> (i32, i32) {
    %c0_i32 = arith.constant 0 : i32
    %c0_i32_0 = arith.constant 0 : i32
    %c0_i32_1 = arith.constant 0 : i32
    return %c0_i32, %c0_i32_0 : i32, i32
  }
  func.func @transform_8(%arg0: i32) -> (i32, i32) {
    %c0_i32 = arith.constant 0 : i32
    %c0_i32_0 = arith.constant 0 : i32
    %c0_i32_1 = arith.constant 0 : i32
    return %c0_i32, %c0_i32_0 : i32, i32
  }
  func.func @transform_9(%arg0: i32) -> (i32, i32, i32) {
    %c0_i32 = arith.constant 0 : i32
    %c0_i32_0 = arith.constant 0 : i32
    %c0_i32_1 = arith.constant 0 : i32
    return %arg0, %c0_i32, %c0_i32_0 : i32, i32, i32
  }
}

</mosaic_0001>

<bundles_post_ra>
// kernel: tcn_forward.1
= control target key start
LH: loop header
LB: loop body
LE: loop exit
PB: predicated region body
PF: predicated region fallthrough
CT: control target
= control target key end

     0   :  { %s22966_s0 = inlined_call_operand.vmem [shape: f32[4,1,512], index: 0, kind: input, shape index: {}]   ;;  %s22967_s1 = inlined_call_operand.vmem [shape: f32[48,32,16], index: 1, kind: input, shape index: {}]   ;;  %s22968_s2 = inlined_call_operand.vmem [shape: f32[16,32,1], index: 2, kind: input, shape index: {}]   ;;  %s22969_s3 = inlined_call_operand.vmem [shape: f32[16,16,16], index: 3, kind: input, shape index: {}]   ;;  %s22970_s4 = inlined_call_operand.vmem [shape: f32[16,16,1], index: 4, kind: input, shape index: {}]   ;;  %s22971_s5 = inlined_call_operand.vmem [shape: f32[16,1], index: 5, kind: input, shape index: {}]   ;;  %s22972_s6 = inlined_call_operand.vmem [shape: f32[16,1], index: 6, kind: input, shape index: {}]   ;;  %s22973_s7 = inlined_call_operand.vmem [shape: f32[1,16], index: 7, kind: input, shape index: {}]   ;;  %s22974_s8 = inlined_call_operand.<no memory space> [shape: f32[1,1], index: 8, kind: input, shape index: {}]   ;;  %s22975_s9 = inlined_call_operand.hbm [shape: f32[4,1,512], index: 9, kind: output, shape index: {}]  }
   0x1   :  { %v14_v0 = vstv %s22974_s8 }
   0x2   :  { %15 = vst [vmem:[#allocation3] sm:$0x1] %v14_v0 }
   0x3   :  { %16 = vsyncpa [#allocation5], 0 }
   0x4   :  { %18 = vsyncpa [#allocation5 + $0x1], 0  ;;  %s19447_s11 = smov 0   ;;  %s19449_s12 = smov 0  }
   0x5   :  { %s19451_s13 = smov 0   ;;  %s19453_s14 = smov 0  }
   0x6 LB: > { %s19468_s8 = sadd.s32 4294967295, %s19373_s14   ;;  %s16031_s15 = sadd.s32 4294967294, %s19373_s14   ;;  %s19373_s14 = sphi %s19453_s14, %s23068_s14   ;;  %s19369_s13 = sphi %s19451_s13, %s23067_s13   ;;  %s19365_s12 = sphi %s19449_s12, %s23066_s12   ;;  %s19361_s11 = sphi %s19447_s11, %s23065_s11  }
   0x7   : > { %s19472_s16 = sadd.s32 1, %s19373_s14   ;;  %s225_s17 = sadd.s32 1, %s19369_s13 }
   0x8   : > { %s222_s18 = ssub.s32 %s19373_s14, %s19472_s16  ;;  %p235_p0 = scmp.ne.s32.totalorder %s19369_s13, %s19365_s12 }
   0x9   : > { %p223_p1 = scmp.eq.s32.totalorder %s222_s18, 0  ;;  %p236_p2 = scmp.eq.s32.totalorder %s19468_s8, 1 }
   0xa   : > { %p241_p3 = scmp.ne.s32.totalorder %s19365_s12, %s19361_s11  ;;  %p242_p4 = scmp.eq.s32.totalorder %s16031_s15, 1 }
   0xb   : > { %s19483_s19 = scalar_select %p223_p1, %s19369_s13, %s225_s17  }
   0xc   : > { %p19485_p5 = por %p236_p2, %p235_p0  ;;  %p19489_p6 = por %p242_p4, %p241_p3 }
   0xd   : > { %p16034_p7 = scmp.ge.s32.totalorder %s19373_s14, 1  ;;  %p293_p8 = scmp.lt.s32.totalorder %s19373_s14, 3 }
   0xf   : > { %p294_p9 = pnand %p16034_p7, %p293_p8 }
  0x11   : > { %297 = sbr.rel (%p294_p9) target bundleno = 5725 (0x165d), region = 56 }
  0x18   : > { %v338_v1 = vld [vmem:[%s22972_s6] sm:$0xff]  ;;  %v22977_v3 = vmov 0   ;;  %v339_v4 = vld [vmem:[%s22972_s6 + $0x8] sm:$0xff]  ;;  %s326_s30 = sand.u32 1, %s19365_s12   ;;  %v22978_v6 = vmov 0.0   ;;  %s16036_s15 = sshll.u32 %s19468_s8, 1  ;;  %v22976_v7 = vlaneseq }
  0x19   : > { %v336_v2 = vld [vmem:[%s22971_s5] sm:$0xff]  ;;  %18133 = vset.pattern.permute.xlu1 %v22977_v3  ;;  %18132 = vset.pattern.permute.xlu0 %v22977_v3  ;;  %v337_v5 = vld [vmem:[%s22971_s5 + $0x8] sm:$0xff]  ;;  %s19512_s10 = sshll.u32 %s326_s30, 3  ;;  %340 = vst [vmem:[#allocation2] sm:$0xff] %v22978_v6  ;;  %341 = vst [vmem:[#allocation2 + $0x8] sm:$0xff] %v22978_v6  ;;  %p330_p10 = scmp.lt.s32.totalorder %s16036_s15, 3 }
  0x1a   : > { %386 = vperm.xlu1 %18133, %v338_v1   ;;  %347 = vperm.xlu0 %18132, %v336_v2   ;;  %342 = vst [vmem:[#allocation2 + $0x30] sm:$0xff] %v22978_v6  ;;  %343 = vst [vmem:[#allocation2 + $0x38] sm:$0xff] %v22978_v6  ;;  %v19524_v8 = vshrl.u32 %v22976_v7, 7  ;;  %s19538_s24 = scalar_lea.vmem [#allocation4], %s19512_s10  ;;  %s19540_s25 = smov 0  }
  0x1b   : > { %411 = vst [vmem:[#allocation2 + $0x60] sm:$0xff] %v22978_v6  ;;  %412 = vst [vmem:[#allocation2 + $0x68] sm:$0xff] %v22978_v6  ;;  %s23070_s15 = smov (!%p330_p10, %s16036_s15), 3 }
  0x1c   : > { %413 = vst [vmem:[#allocation2 + $0x90] sm:$0xff] %v22978_v6  ;;  %414 = vst [vmem:[#allocation2 + $0x98] sm:$0xff] %v22978_v6  ;;  %s16037_s17 = sshll.u32 %s23070_s15, 2  ;;  %v19530_v9 = vsub.s32 0, %v19524_v8  ;;  %v362_v10 = vsub.s32 1, %v19524_v8  ;;  %v366_v11 = vsub.s32 2, %v19524_v8 }
  0x1d   : > { %23013 = vst [vmem:[#allocation7_spill] sm:$0xff] %v19524_v8  ;;  %s333_s23 = scalar_lea.vmem %s22966_s0, %s16037_s17  ;;  %v370_v12 = vsub.s32 3, %v19524_v8 }
  0x1e   : > { %391 = vperm.xlu1 %18133, %v339_v4   ;;  %352 = vperm.xlu0 %18132, %v337_v5   ;;  %23014 = vst [vmem:[#allocation8_spill] sm:$0xff] %v19530_v9  ;;  %v344_v13 = vld [vmem:[%s333_s23] sm:$0xf]  ;;  %v16038_v14 = vld [vmem:[%s333_s23 + $0x4] sm:$0xf] }
  0x1f   : > { %v359_v15 = vrot.slane %v344_v13, %v19530_v9  ;;  %v363_v16 = vrot.slane %v344_v13, %v362_v10  ;;  %v367_v17 = vrot.slane %v344_v13, %v366_v11  ;;  %v371_v18 = vrot.slane %v344_v13, %v370_v12 }
  0x20   : > { %v421_v19 = vrot.slane %v16038_v14, %v19530_v9  ;;  %v425_v20 = vrot.slane %v16038_v14, %v362_v10  ;;  %v429_v21 = vrot.slane %v16038_v14, %v366_v11  ;;  %v433_v22 = vrot.slane %v16038_v14, %v370_v12 }
  0x99   : > { %v387_v23 = vpop.permute.xlu1 %386  ;;  %v348_v24 = vpop.permute.xlu0 %347 }
  0x9a   : > { %v376_v25 = vmul.f32 %v359_v15, %v348_v24  ;;  %v377_v26 = vmul.f32 %v363_v16, %v348_v24  ;;  %v378_v27 = vmul.f32 %v367_v17, %v348_v24  ;;  %v379_v28 = vmul.f32 %v371_v18, %v348_v24 }
  0x9b   : > { %v438_v29 = vmul.f32 %v421_v19, %v348_v24  ;;  %v439_v30 = vmul.f32 %v425_v20, %v348_v24  ;;  %v440_v31 = vmul.f32 %v429_v21, %v348_v24  ;;  %v441_v32 = vmul.f32 %v433_v22, %v348_v24 }
  0x9c   : > { %v394_v33 = vadd.f32 %v387_v23, %v376_v25  ;;  %v395_v34 = vadd.f32 %v387_v23, %v377_v26  ;;  %v396_v35 = vadd.f32 %v387_v23, %v378_v27  ;;  %v397_v36 = vadd.f32 %v387_v23, %v379_v28 }
  0x9d   : > { %v353_v37 = vpop.permute.xlu0 %352  ;;  %v446_v38 = vadd.f32 %v438_v29, %v387_v23  ;;  %v447_v39 = vadd.f32 %v439_v30, %v387_v23  ;;  %v448_v40 = vadd.f32 %v440_v31, %v387_v23  ;;  %v449_v41 = vadd.f32 %v441_v32, %v387_v23  ;;  %v392_v46 = vpop.permute.xlu1 %391 }
  0x9e   : > { %v380_v42 = vmul.f32 %v359_v15, %v353_v37  ;;  %v381_v43 = vmul.f32 %v363_v16, %v353_v37  ;;  %v382_v44 = vmul.f32 %v367_v17, %v353_v37  ;;  %v383_v45 = vmul.f32 %v371_v18, %v353_v37  ;;  %402 = vst [vmem:[#allocation2 + $0x10] sm:$0xff] %v394_v33 }
  0x9f   : > { %403 = vst [vmem:[#allocation2 + $0x18] sm:$0xff] %v395_v34  ;;  %404 = vst [vmem:[#allocation2 + $0x20] sm:$0xff] %v396_v35  ;;  %v442_v47 = vmul.f32 %v421_v19, %v353_v37  ;;  %v443_v48 = vmul.f32 %v425_v20, %v353_v37  ;;  %v444_v49 = vmul.f32 %v429_v21, %v353_v37 }
  0xa0   : > { %405 = vst [vmem:[#allocation2 + $0x28] sm:$0xff] %v397_v36  ;;  %v445_v50 = vmul.f32 %v433_v22, %v353_v37  ;;  %454 = vst [vmem:[#allocation2 + $0x70] sm:$0xff] %v446_v38  ;;  %v398_v51 = vadd.f32 %v392_v46, %v380_v42  ;;  %v399_v52 = vadd.f32 %v392_v46, %v381_v43 }
  0xa1   : > { %455 = vst [vmem:[#allocation2 + $0x78] sm:$0xff] %v447_v39  ;;  %456 = vst [vmem:[#allocation2 + $0x80] sm:$0xff] %v448_v40  ;;  %v400_v53 = vadd.f32 %v392_v46, %v382_v44  ;;  %v401_v54 = vadd.f32 %v392_v46, %v383_v45  ;;  %v450_v55 = vadd.f32 %v442_v47, %v392_v46 }
  0xa2   : > { %457 = vst [vmem:[#allocation2 + $0x88] sm:$0xff] %v449_v41  ;;  %v451_v56 = vadd.f32 %v443_v48, %v392_v46  ;;  %v452_v57 = vadd.f32 %v444_v49, %v392_v46  ;;  %v453_v58 = vadd.f32 %v445_v50, %v392_v46  ;;  %406 = vst [vmem:[#allocation2 + $0x40] sm:$0xff] %v398_v51 }
  0xa3   : > { %407 = vst [vmem:[#allocation2 + $0x48] sm:$0xff] %v399_v52  ;;  %408 = vst [vmem:[#allocation2 + $0x50] sm:$0xff] %v400_v53 }
  0xa4   : > { %409 = vst [vmem:[#allocation2 + $0x58] sm:$0xff] %v401_v54  ;;  %458 = vst [vmem:[#allocation2 + $0xa0] sm:$0xff] %v450_v55 }
  0xa5   : > { %459 = vst [vmem:[#allocation2 + $0xa8] sm:$0xff] %v451_v56  ;;  %460 = vst [vmem:[#allocation2 + $0xb0] sm:$0xff] %v452_v57 }
  0xa6   : > { %461 = vst [vmem:[#allocation2 + $0xb8] sm:$0xff] %v453_v58 }
  0xa7 LB: >> { %v19549_v61 = vld [vmem:[#allocation2 + $0x10] sm:$0xff]  ;;  %v19553_v63 = vld [vmem:[#allocation2 + $0x18] sm:$0xff]  ;;  %v19561_v4 = vld [vmem:[#allocation2 + $0x20] sm:$0xff]  ;;  %s19381_s26 = smov 2   ;;  %v22980_v12 = vmov 0.0   ;;  %s19383_s27 = smov 1   ;;  %s19377_s25 = sphi %s19540_s25, %s467_s25  }
  0xa8   : >> { %23017 = vst [vmem:[#allocation11_spill] sm:$0xff] %v19549_v61  ;;  %23018 = vst [vmem:[#allocation12_spill] sm:$0xff] %v19553_v63  ;;  %v18134_v2 = vpack.i.bf16 %v19553_v63, %v19549_v61  ;;  %v19563_v5 = vld [vmem:[#allocation2 + $0x28] sm:$0xff]  ;;  %726 = vmatprep.mubr.f32.mxu1 %v22980_v12  ;;  %v508_v14 = vld [vmem:[#allocation2 + $0x38] sm:$0xff]  ;;  %637 = vmatprep.mubr.f32.mxu0 %v22980_v12  ;;  %s16750_s28 = sshll.u32 %s19377_s25, 8  ;;  %v19384_v16 = vmov 0  }
  0xa9   : >> { %v19545_v59 = vld [vmem:[#allocation2 + $0x40] sm:$0xff]  ;;  %v18139_v11 = vpack.i.bf16 %v19563_v5, %v19561_v4  ;;  %v503_v13 = vld [vmem:[#allocation2 + $0x8] sm:$0xff]  ;;  %18185 = vset.pattern.permute.xlu1 %v19384_v16  ;;  %18184 = vset.pattern.permute.xlu0 %v19384_v16  ;;  %s19589_s15 = scalar_lea.vmem %s22968_s2, %s16750_s28  ;;  %v19597_v21 = vld [vmem:[#allocation2 + $0x70] sm:$0xff]  ;;  %s16751_s17 = sshll.u32 %s19377_s25, 7  ;;  %vm543_vm0 = vcmask 15360   ;;  %vm807_vm1 = vcmask 7168  }
  0xaa   : >> { %23015 = vst [vmem:[#allocation9_spill] sm:$0xff] %v19545_v59  ;;  %v19547_v60 = vld [vmem:[#allocation2 + $0x48] sm:$0xff]  ;;  %v19555_v0 = vld [vmem:[#allocation2 + $0x50] sm:$0xff]  ;;  %18135 = vrot.lane.b32.xlu0 %v18134_v2, %s19381_s26  ;;  %v19575_v15 = vpack.i.bf16 %v508_v14, %v503_v13  ;;  %v495_v17 = vld [vmem:[%s19589_s15 + $0x18] sm:$0xff]  ;;  %s19633_s23 = scalar_lea.vmem %s22970_s4, %s16751_s17  ;;  %vm560_vm2 = vcmask 130048   ;;  %vm2437_vm3 = vcmask 31744  }
  0xab   : >> { %23016 = vst [vmem:[#allocation10_spill] sm:$0xff] %v19547_v60  ;;  %v18144_v62 = vpack.i.bf16 %v19547_v60, %v19545_v59  ;;  %23019 = vst [vmem:[#allocation13_spill] sm:$0xff] %v19555_v0  ;;  %v19557_v1 = vld [vmem:[#allocation2 + $0x58] sm:$0xff]  ;;  %v494_v18 = vld [vmem:[%s19589_s15 + $0x10] sm:$0xff]  ;;  %vm4329_vm4 = vcmask 64512   ;;  %s19387_s28 = smov 16  }
  0xac   : >> { %23020 = vst [vmem:[#allocation14_spill] sm:$0xff] %v19557_v1  ;;  %v18149_v10 = vpack.i.bf16 %v19557_v1, %v19555_v0  ;;  %23021 = vst [vmem:[#allocation15_spill] sm:$0xff] %v19575_v15  ;;  %v19593_v19 = vld [vmem:[#allocation2 + $0x80] sm:$0xff]  ;;  %v19595_v20 = vld [vmem:[#allocation2 + $0x88] sm:$0xff]  ;;  %s19388_s29 = smov 32   ;;  %vm8112_vm5 = vcmask 261120  }
  0xad   : >> { %18145 = vrot.lane.b32.xlu1 %v18144_v62, %s19381_s26  ;;  %v493_v22 = vld [vmem:[%s19589_s15 + $0x8] sm:$0xff]  ;;  %v492_v23 = vld [vmem:[%s19589_s15] sm:$0xff]  ;;  %v19601_v24 = vld [vmem:[#allocation2 + $0x78] sm:$0xff]  ;;  %v18191_v25 = vpack.i.bf16 %v19595_v20, %v19593_v19  ;;  %s19389_s18 = smov 64   ;;  %vm10004_vm6 = vcmask 523264  }
  0xae   : >> { %18140 = vrot.lane.b32.xlu0 %v18139_v11, %s19381_s26  ;;  %v18186_v26 = vpack.i.bf16 %v19601_v24, %v19597_v21  ;;  %v19607_v27 = vld [vmem:[#allocation2 + $0xb0] sm:$0xff]  ;;  %v19609_v28 = vld [vmem:[#allocation2 + $0xb8] sm:$0xff]  ;;  %v19611_v29 = vld [vmem:[#allocation2 + $0xa0] sm:$0xff] }
  0xaf   : >> { %v19613_v30 = vld [vmem:[#allocation2 + $0xa8] sm:$0xff]  ;;  %v18201_v31 = vpack.i.bf16 %v19609_v28, %v19607_v27  ;;  %v1475_v34 = vld [vmem:[#allocation2 + $0x98] sm:$0xff]  ;;  %v501_v37 = vld [vmem:[%s19633_s23] sm:$0xff] }
  0xb0   : >> { %v18196_v32 = vpack.i.bf16 %v19613_v30, %v19611_v29  ;;  %v1470_v33 = vld [vmem:[#allocation2 + $0x68] sm:$0xff] }
  0xb1   : >> { %18150 = vrot.lane.b32.xlu1 %v18149_v10, %s19381_s26  ;;  %v18206_v35 = vpack.i.bf16 %v1475_v34, %v1470_v33  ;;  %v502_v36 = vld [vmem:[%s19633_s23 + $0x8] sm:$0xff] }
  0xb2   : >> { %18155 = vrot.lane.b32.xlu0 %v19575_v15, %s19381_s26 }
  0xb5   : >> { %18160 = vrot.lane.b32.xlu1 %v18134_v2, %s19383_s27 }
  0xb6   : >> { %18165 = vrot.lane.b32.xlu0 %v18139_v11, %s19383_s27 }
  0xb9   : >> { %18170 = vrot.lane.b32.xlu1 %v18144_v62, %s19383_s27 }
  0xba   : >> { %18175 = vrot.lane.b32.xlu0 %v18149_v10, %s19383_s27 }
  0xbd   : >> { %18180 = vrot.lane.b32.xlu1 %v19575_v15, %s19383_s27 }
  0xbe   : >> { %763 = vperm.xlu0 %18184, %v494_v18  }
  0xc1   : >> { %768 = vperm.xlu1 %18185, %v495_v17  }
  0xc2   : >> { %758 = vperm.xlu0 %18184, %v493_v22  }
  0xc5   : >> { %753 = vperm.xlu1 %18185, %v492_v23  }
  0xc6   : >> { %18192 = vrot.lane.b32.xlu0 %v18191_v25, %s19381_s26 }
  0xc9   : >> { %18187 = vrot.lane.b32.xlu1 %v18186_v26, %s19381_s26 }
  0xca   : >> { %18202 = vrot.lane.b32.xlu0 %v18201_v31, %s19381_s26 }
  0xcd   : >> { %18197 = vrot.lane.b32.xlu1 %v18196_v32, %s19381_s26 }
  0xce   : >> { %18212 = vrot.lane.b32.xlu0 %v18186_v26, %s19383_s27 }
  0xd1   : >> { %18207 = vrot.lane.b32.xlu1 %v18206_v35, %s19381_s26 }
  0xd2   : >> { %18222 = vrot.lane.b32.xlu0 %v18196_v32, %s19383_s27 }
  0xd5   : >> { %18217 = vrot.lane.b32.xlu1 %v18191_v25, %s19383_s27 }
  0xd6   : >> { %18232 = vrot.lane.b32.xlu0 %v18206_v35, %s19383_s27 }
  0xd9   : >> { %18227 = vrot.lane.b32.xlu1 %v18201_v31, %s19383_s27  ;;  %s16040_s27 = smul.u32 768, %s19377_s25  ;;  %s467_s25 = sadd.s32 1, %s19377_s25  }
  0xda   : >> { %1291 = vperm.xlu0 %18184, %v502_v36   ;;  %p464_p11 = scmp.ge.s32.totalorder %s467_s25, 2  }
  0xdb   : >> { %s19649_s10 = scalar_lea.vmem %s22967_s1, %s16040_s27  ;;  %s19859_s27 = scalar_lea.vmem %s22969_s3, %s16751_s17 }
  0xdc   : >> { %v19654_v22 = vld [vmem:[%s19649_s10] sm:$0xff]  ;;  %s19385_s17 = smov 4  }
  0xdd   : >> { %1286 = vperm.xlu1 %18185, %v501_v37   ;;  %v19662_v37 = vld [vmem:[%s19649_s10 + $0x8] sm:$0xff] }
 0x11c   : >> { %v18136_v41 = vpop.permute.xlu0 %18135 }
 0x11d   : >> { %v18138_v42 = vunpack.i.h.bf16 %v18136_v41  ;;  %v18137_v43 = vunpack.i.l.bf16 %v18136_v41 }
 0x11f   : >> { %v18146_v38 = vpop.permute.xlu1 %18145  ;;  %v545_v46 = vsel %vm543_vm0, %v18137_v43, %v18138_v42 }
 0x120   : >> { %v18148_v39 = vunpack.i.h.bf16 %v18146_v38  ;;  %v18147_v40 = vunpack.i.l.bf16 %v18146_v38  ;;  %v18141_v49 = vpop.permute.xlu0 %18140 }
 0x121   : >> { %v18143_v51 = vunpack.i.h.bf16 %v18141_v49  ;;  %v18142_v52 = vunpack.i.l.bf16 %v18141_v49  ;;  %v19676_v49 = vld [vmem:[%s19649_s10 + $0x10] sm:$0xff] }
 0x122   : >> { %v549_v44 = vsel %vm543_vm0, %v18147_v40, %v18148_v39 }
 0x123   : >> { %v18151_v45 = vpop.permute.xlu1 %18150  ;;  %v16775_v50 = vpack.c.bf16 %v549_v44, %v545_v46  ;;  %v547_v56 = vsel %vm543_vm0, %v18142_v52, %v18143_v51  ;;  %v546_v57 = vsel %vm543_vm0, %v18138_v42, %v18142_v52 }
 0x124   : >> { %v18153_v47 = vunpack.i.h.bf16 %v18151_v45  ;;  %v18152_v48 = vunpack.i.l.bf16 %v18151_v45  ;;  %v18156_v2 = vpop.permute.xlu0 %18155 }
 0x125   : >> { %16776 = vmatprep.subr.bf16.mxu0 %v16775_v50  ;;  %v18158_v13 = vunpack.i.h.bf16 %v18156_v2  ;;  %v18157_v14 = vunpack.i.l.bf16 %v18156_v2  ;;  %v16793_v2 = vpack.c.bf16 %v19545_v59, %v19549_v61 }
 0x126   : >> { %v551_v53 = vsel %vm543_vm0, %v18152_v48, %v18153_v47  ;;  %v550_v54 = vsel %vm543_vm0, %v18148_v39, %v18152_v48 }
 0x127   : >> { %v18161_v55 = vpop.permute.xlu1 %18160  ;;  %v16779_v10 = vpack.c.bf16 %v551_v53, %v547_v56  ;;  %v16781_v11 = vpack.c.bf16 %v550_v54, %v546_v57  ;;  %v544_v17 = vsel %vm543_vm0, %v18157_v14, %v18137_v43  ;;  %v548_v18 = vsel %vm543_vm0, %v18158_v13, %v18147_v40  ;;  %v19699_v57 = vld [vmem:[%s19649_s10 + $0x20] sm:$0xff]  ;;  %v19748_v14 = vld [vmem:[%s19649_s10 + $0x48] sm:$0xff] }
 0x128   : >> { %v18163_v58 = vunpack.i.h.bf16 %v18161_v55  ;;  %v18162_v62 = vunpack.i.l.bf16 %v18161_v55  ;;  %v18166_v26 = vpop.permute.xlu0 %18165  ;;  %v16777_v31 = vpack.c.bf16 %v548_v18, %v544_v17  ;;  %v16795_v54 = vpack.c.bf16 %v19557_v1, %v19563_v5  ;;  %v19687_v55 = vld [vmem:[%s19649_s10 + $0x18] sm:$0xff]  ;;  %v19739_v13 = vld [vmem:[%s19649_s10 + $0x40] sm:$0xff] }
 0x129   : >> { %16780 = vmatprep.subr.bf16.mxu1 %v16779_v10  ;;  %v18168_v33 = vunpack.i.h.bf16 %v18166_v26  ;;  %v18167_v34 = vunpack.i.l.bf16 %v18166_v26  ;;  %v16791_v56 = vpack.c.bf16 %v19547_v60, %v19553_v63  ;;  %v19721_v10 = vld [vmem:[%s19649_s10 + $0x30] sm:$0xff]  ;;  %v19766_v17 = vld [vmem:[%s19649_s10 + $0x58] sm:$0xff] }
 0x12a   : >> { %16782 = vmatpush1.bf16.msra.mxu1 %v16781_v11  ;;  %v809_v32 = vsel %vm807_vm1, %v18162_v62, %v18163_v58  ;;  %16778 = vmatpush1.bf16.msra.mxu0 %v16777_v31  ;;  %v19730_v11 = vld [vmem:[%s19649_s10 + $0x38] sm:$0xff] }
 0x12b   : >> { %v18171_v16 = vpop.permute.xlu1 %18170  ;;  %v810_v42 = vsel %vm807_vm1, %v18163_v58, %v18167_v34  ;;  %v811_v45 = vsel %vm807_vm1, %v18167_v34, %v18168_v33  ;;  %v16797_v58 = vpack.c.bf16 %v19555_v0, %v19561_v4 }
 0x12c   : >> { %v18173_v23 = vunpack.i.h.bf16 %v18171_v16  ;;  %v18172_v25 = vunpack.i.l.bf16 %v18171_v16  ;;  %v18176_v41 = vpop.permute.xlu0 %18175  ;;  %v19757_v16 = vld [vmem:[%s19649_s10 + $0x50] sm:$0xff] }
 0x12d   : >> { %16057 = vmatmul.mubr.msk.f32.vlgmr.msra.gmra.mrb[0].mxu1 %vm560_vm2, %v19654_v22  ;;  %v18178_v43 = vunpack.i.h.bf16 %v18176_v41  ;;  %v18177_v44 = vunpack.i.l.bf16 %v18176_v41  ;;  %16053 = vmatmul.mubr.msk.f32.vlgmr.msra.gmra.mrb[0].mxu0 %vm560_vm2, %v19654_v22 }
 0x12e   : >> { %v813_v35 = vsel %vm807_vm1, %v18172_v25, %v18173_v23  ;;  %732 = vmatprep.mubr.f32.mxu1 %v22980_v12  ;;  %643 = vmatprep.mubr.f32.mxu0 %v22980_v12 }
 0x12f   : >> { %v18181_v36 = vpop.permute.xlu1 %18180  ;;  %v16783_v38 = vpack.c.bf16 %v813_v35, %v809_v32  ;;  %v814_v48 = vsel %vm807_vm1, %v18173_v23, %v18177_v44  ;;  %v815_v51 = vsel %vm807_vm1, %v18177_v44, %v18178_v43 }
 0x130   : >> { %v18183_v39 = vunpack.i.h.bf16 %v18181_v36  ;;  %v18182_v40 = vunpack.i.l.bf16 %v18181_v36  ;;  %v16787_v52 = vpack.c.bf16 %v815_v51, %v811_v45  ;;  %v16789_v53 = vpack.c.bf16 %v814_v48, %v810_v42 }
 0x131   : >> { %16784 = vmatprep.subr.bf16.mxu0 %v16783_v38  ;;  %16058 = vmatmul.mubr.msk.f32.gmra.mrb[2].mxu1 %vm560_vm2, %v19662_v37 }
 0x132   : >> { %v812_v46 = vsel %vm807_vm1, %v18183_v39, %v18172_v25  ;;  %v808_v47 = vsel %vm807_vm1, %v18182_v40, %v18162_v62  ;;  %738 = vmatprep.mubr.f32.mxu1 %v22980_v12  ;;  %16054 = vmatmul.mubr.msk.f32.gmra.mrb[2].mxu0 %vm560_vm2, %v19662_v37  ;;  %v19710_v62 = vld [vmem:[%s19649_s10 + $0x28] sm:$0xff] }
 0x133   : >> { %v16785_v50 = vpack.c.bf16 %v812_v46, %v808_v47  ;;  %16788 = vmatprep.subr.bf16.mxu1 %v16787_v52  ;;  %649 = vmatprep.mubr.f32.mxu0 %v22980_v12 }
 0x134   : >> { %16790 = vmatpush1.bf16.msra.mxu1 %v16789_v53 }
 0x135   : >> { %16059 = vmatmul.mubr.msk.f32.gmra.mrb[4].mxu1 %vm560_vm2, %v19676_v49  ;;  %16786 = vmatpush1.bf16.msra.mxu0 %v16785_v50 }
 0x136   : >> { %744 = vmatprep.mubr.f32.mxu1 %v22980_v12  ;;  %16055 = vmatmul.mubr.msk.f32.gmra.mrb[4].mxu0 %vm560_vm2, %v19676_v49 }
 0x137   : >> { %16796 = vmatprep.subr.bf16.mxu1 %v16795_v54  ;;  %655 = vmatprep.mubr.f32.mxu0 %v22980_v12 }
 0x138   : >> { %16792 = vmatprep.subr.bf16.mxu0 %v16791_v56 }
 0x139   : >> { %16060 = vmatmul.mubr.msk.f32.gmra.mrb[6].mxu1 %vm560_vm2, %v19687_v55 }
 0x13a   : >> { %989 = vmatprep.mubr.f32.mxu1 %v22980_v12  ;;  %16056 = vmatmul.mubr.msk.f32.gmra.mrb[6].mxu0 %vm560_vm2, %v19687_v55 }
 0x13b   : >> { %900 = vmatprep.mubr.f32.mxu0 %v22980_v12 }
 0x13d   : >> { %16065 = vmatmul.mubr.msk.f32.vlgmr.msra.gmra.mrb[0].mxu1 %vm560_vm2, %v19699_v57  ;;  %v19781_v31 = vpop.permute.xlu0 %763 }
 0x13e   : >> { %995 = vmatprep.mubr.f32.mxu1 %v22980_v12  ;;  %16798 = vmatpush1.bf16.msra.mxu1 %v16797_v58  ;;  %23024 = vst [vmem:[#allocation18_spill] sm:$0xff] %v19781_v31 }
 0x13f   : >> { %16061 = vmatmul.mubr.msk.f32.vlgmr.msra.gmra.mrb[0].mxu0 %vm560_vm2, %v19699_v57 }
 0x140   : >> { %906 = vmatprep.mubr.f32.mxu0 %v22980_v12  ;;  %16794 = vmatpush1.bf16.msra.mxu0 %v16793_v2  ;;  %v19777_v18 = vpop.permute.xlu1 %768 }
 0x141   : >> { %16066 = vmatmul.mubr.msk.f32.gmra.mrb[2].mxu1 %vm560_vm2, %v19710_v62  ;;  %23022 = vst [vmem:[#allocation16_spill] sm:$0xff] %v19777_v18  ;;  %v19788_v44 = vpop.permute.xlu0 %758 }
 0x142   : >> { %1001 = vmatprep.mubr.f32.mxu1 %v22980_v12  ;;  %23025 = vst [vmem:[#allocation19_spill] sm:$0xff] %v19788_v44 }
 0x143   : >> { %16062 = vmatmul.mubr.msk.f32.gmra.mrb[2].mxu0 %vm560_vm2, %v19710_v62 }
 0x144   : >> { %912 = vmatprep.mubr.f32.mxu0 %v22980_v12  ;;  %v19779_v23 = vpop.permute.xlu1 %753 }
 0x145   : >> { %16067 = vmatmul.mubr.msk.f32.gmra.mrb[4].mxu1 %vm560_vm2, %v19721_v10  ;;  %23023 = vst [vmem:[#allocation17_spill] sm:$0xff] %v19779_v23 }
 0x146   : >> { %1007 = vmatprep.mubr.f32.mxu1 %v22980_v12 }
 0x147   : >> { %16063 = vmatmul.mubr.msk.f32.gmra.mrb[4].mxu0 %vm560_vm2, %v19721_v10 }
 0x148   : >> { %918 = vmatprep.mubr.f32.mxu0 %v22980_v12  ;;  %v19783_v35 = vpop.permute.xlu1 %18187 }
 0x149   : >> { %16068 = vmatmul.mubr.msk.f32.gmra.mrb[6].mxu1 %vm560_vm2, %v19730_v11 }
 0x14a   : >> { %1195 = vmatprep.mubr.f32.mxu1 %v22980_v12 }
 0x14b   : >> { %16064 = vmatmul.mubr.msk.f32.gmra.mrb[6].mxu0 %vm560_vm2, %v19730_v11 }
 0x14c   : >> { %1106 = vmatprep.mubr.f32.mxu0 %v22980_v12  ;;  %v19792_v48 = vpop.permute.xlu1 %18197 }
 0x14d   : >> { %16073 = vmatmul.mubr.msk.f32.vlgmr.msra.gmra.mrb[0].mxu1 %vm560_vm2, %v19739_v13 }
 0x14e   : >> { %1201 = vmatprep.mubr.f32.mxu1 %v22980_v12 }
 0x14f   : >> { %16069 = vmatmul.mubr.msk.f32.vlgmr.msra.gmra.mrb[0].mxu0 %vm560_vm2, %v19739_v13 }
 0x150   : >> { %1112 = vmatprep.mubr.f32.mxu0 %v22980_v12 }
 0x151   : >> { %16074 = vmatmul.mubr.msk.f32.gmra.mrb[2].mxu1 %vm560_vm2, %v19748_v14 }
 0x152   : >> { %1207 = vmatprep.mubr.f32.mxu1 %v22980_v12 }
 0x153   : >> { %16070 = vmatmul.mubr.msk.f32.gmra.mrb[2].mxu0 %vm560_vm2, %v19748_v14 }
 0x154   : >> { %1118 = vmatprep.mubr.f32.mxu0 %v22980_v12 }
 0x155   : >> { %16075 = vmatmul.mubr.msk.f32.gmra.mrb[4].mxu1 %vm560_vm2, %v19757_v16 }
 0x156   : >> { %1213 = vmatprep.mubr.f32.mxu1 %v22980_v12 }
 0x157   : >> { %16071 = vmatmul.mubr.msk.f32.gmra.mrb[4].mxu0 %vm560_vm2, %v19757_v16 }
 0x158   : >> { %1124 = vmatprep.mubr.f32.mxu0 %v22980_v12 }
 0x159   : >> { %16076 = vmatmul.mubr.msk.f32.gmra.mrb[6].mxu1 %vm560_vm2, %v19766_v17 }
 0x15a   : >> { %1441 = vmatprep.mubr.f32.mxu1 %v22980_v12 }
 0x15b   : >> { %16072 = vmatmul.mubr.msk.f32.gmra.mrb[6].mxu0 %vm560_vm2, %v19766_v17 }
 0x15c   : >> { %1364 = vmatprep.mubr.f32.mxu0 %v22980_v12 }
 0x220   : >> { %v1197_v25 = vpop.f32.mrb[0].mxu1 }
 0x221   : >> { %v1199_v26 = vpop.f32.mrb[1].mxu1  ;;  %v17311_v38 = vadd.f32 %v1197_v25, %v19779_v23 }
 0x222   : >> { %v1108_v32 = vpop.f32.mrb[0].mxu0  ;;  %v17312_v39 = vadd.f32 %v1199_v26, %v19779_v23 }
 0x223   : >> { %v1110_v33 = vpop.f32.mrb[1].mxu0  ;;  %v17303_v41 = vadd.f32 %v1108_v32, %v19779_v23  ;;  %18786 = vtanh.f32 %v17311_v38 }
 0x224   : >> { %v1203_v34 = vpop.f32.mrb[2].mxu1  ;;  %18788 = vtanh.f32 %v17312_v39  ;;  %v17304_v50 = vadd.f32 %v1110_v33, %v19779_v23  ;;  %v19799_v39 = vpop.permute.xlu0 %18192 }
 0x225   : >> { %v1205_v36 = vpop.f32.mrb[3].mxu1  ;;  %18790 = vtanh.f32 %v17303_v41 }
 0x226   : >> { %v1114_v40 = vpop.f32.mrb[2].mxu0 }
 0x227   : >> { %v1116_v42 = vpop.f32.mrb[3].mxu0 }
 0x228   : >> { %v1209_v43 = vpop.f32.mrb[4].mxu1 }
 0x229   : >> { %v17315_v45 = vadd.f32 %v1209_v43, %v19781_v31  ;;  %v1211_v46 = vpop.f32.mrb[5].mxu1 }
 0x22a   : >> { %v17316_v47 = vadd.f32 %v1211_v46, %v19781_v31  ;;  %v1120_v52 = vpop.f32.mrb[4].mxu0 }
 0x22b   : >> { %v1238_v51 = vmul.f32 0.5, %v17315_v45  ;;  %v17307_v54 = vadd.f32 %v1120_v52, %v19781_v31  ;;  %v1122_v56 = vpop.f32.mrb[5].mxu0  ;;  %v19803_v52 = vpop.permute.xlu1 %18207 }
 0x22c   : >> { %v1239_v53 = vmul.f32 0.5, %v17316_v47  ;;  %v1215_v58 = vpop.f32.mrb[6].mxu1  ;;  %v17308_v2 = vadd.f32 %v1122_v56, %v19781_v31  ;;  %v17314_v56 = vadd.f32 %v1205_v36, %v19788_v44  ;;  %v18210_v8 = vunpack.i.h.bf16 %v19803_v52 }
 0x22d   : >> { %18792 = vtanh.f32 %v1238_v51  ;;  %v17317_v25 = vadd.f32 %v1215_v58, %v19777_v18  ;;  %v1217_v26 = vpop.f32.mrb[7].mxu1  ;;  %v1236_v32 = vmul.f32 0.5, %v17307_v54  ;;  %v18787_v58 = vpop.eup %18786 }
 0x22e   : >> { %18794 = vtanh.f32 %v1239_v53  ;;  %v17318_v38 = vadd.f32 %v1217_v26, %v19777_v18  ;;  %v1237_v33 = vmul.f32 0.5, %v17308_v2  ;;  %v1126_v43 = vpop.f32.mrb[6].mxu0  ;;  %v17313_v53 = vadd.f32 %v1203_v34, %v19788_v44  ;;  %v19808_v26 = vpop.permute.xlu0 %18202 }
 0x22f   : >> { %18796 = vtanh.f32 %v17304_v50  ;;  %v1242_v41 = vmul.f32 0.5, %v17317_v25  ;;  %v17309_v46 = vadd.f32 %v1126_v43, %v19777_v18  ;;  %v1128_v47 = vpop.f32.mrb[7].mxu0  ;;  %v17305_v2 = vadd.f32 %v1114_v40, %v19788_v44  ;;  %v18789_v25 = vpop.eup %18788 }
 0x230   : >> { %18798 = vtanh.f32 %v1236_v32  ;;  %v1243_v45 = vmul.f32 0.5, %v17318_v38  ;;  %v17310_v51 = vadd.f32 %v1128_v47, %v19777_v18  ;;  %v17306_v32 = vadd.f32 %v1116_v42, %v19788_v44  ;;  %v18791_v38 = vpop.eup %18790 }
 0x231   : >> { %18800 = vtanh.f32 %v1237_v33  ;;  %v1240_v54 = vmul.f32 0.5, %v17309_v46  ;;  %v18194_v33 = vunpack.i.l.bf16 %v19799_v39  ;;  %v22982_v34 = vunpack.i.h.bf16 %v19783_v35 }
 0x232   : >> { %18802 = vtanh.f32 %v1242_v41  ;;  %v1241_v50 = vmul.f32 0.5, %v17310_v51  ;;  %v18204_v36 = vunpack.i.l.bf16 %v19808_v26  ;;  %v22987_v43 = vunpack.i.h.bf16 %v19792_v48 }
 0x233   : >> { %18804 = vtanh.f32 %v1243_v45  ;;  %v19815_v45 = vpop.permute.xlu1 %18217  ;;  %v18195_v42 = vunpack.i.h.bf16 %v19799_v39 }
 0x234   : >> { %18806 = vtanh.f32 %v1240_v54  ;;  %v18220_v39 = vunpack.i.h.bf16 %v19815_v45 }
 0x235   : >> { %18808 = vtanh.f32 %v1241_v50 }
 0x236   : >> { %18810 = vtanh.f32 %v17313_v53  ;;  %v19821_v53 = vsel %vm543_vm0, %v22982_v34, %v18194_v33 }
 0x237   : >> { %v18793_v41 = vpop.eup %18792  ;;  %18812 = vtanh.f32 %v17314_v56  ;;  %v18205_v56 = vunpack.i.h.bf16 %v19808_v26 }
 0x238   : >> { %v18795_v40 = vpop.eup %18794  ;;  %18814 = vtanh.f32 %v17305_v2  ;;  %v1254_v46 = vmul.f32 0.5, %v18793_v41  ;;  %v19828_v41 = vsel %vm543_vm0, %v22987_v43, %v18204_v36 }
 0x239   : >> { %v18797_v47 = vpop.eup %18796  ;;  %18816 = vtanh.f32 %v17306_v32  ;;  %v1255_v51 = vmul.f32 0.5, %v18795_v40  ;;  %v19831_v32 = vpop.permute.xlu0 %18212 }
 0x23a   : >> { %v18799_v54 = vpop.eup %18798  ;;  %v1262_v7 = vadd.f32 0.5, %v1254_v46 }
 0x23b   : >> { %v18801_v2 = vpop.eup %18800  ;;  %v1263_v40 = vadd.f32 0.5, %v1255_v51  ;;  %v1252_v3 = vmul.f32 0.5, %v18799_v54  ;;  %v19838_v51 = vpop.permute.xlu1 %18227 }
 0x23c   : >> { %v18803_v6 = vpop.eup %18802  ;;  %v1278_v34 = vmul.f32 %v18787_v58, %v1262_v7  ;;  %v1253_v26 = vmul.f32 0.5, %v18801_v2  ;;  %v18230_v7 = vunpack.i.h.bf16 %v19838_v51 }
 0x23d   : >> { %v18805_v46 = vpop.eup %18804  ;;  %v1260_v9 = vadd.f32 0.5, %v1252_v3  ;;  %v1258_v44 = vmul.f32 0.5, %v18803_v6  ;;  %v1279_v43 = vmul.f32 %v18789_v25, %v1263_v40  ;;  %v18229_v3 = vunpack.i.l.bf16 %v19838_v51  ;;  %v18223_v59 = vpop.permute.xlu0 %18222 }
 0x23e   : >> { %v18807_v18 = vpop.eup %18806  ;;  %v1261_v54 = vadd.f32 0.5, %v1253_v26  ;;  %v1259_v23 = vmul.f32 0.5, %v18805_v46  ;;  %v1513_v26 = vsel %vm543_vm0, %v18194_v33, %v18195_v42  ;;  %v1517_v46 = vsel %vm543_vm0, %v18204_v36, %v18205_v56 }
 0x23f   : >> { %v18809_v12 = vpop.eup %18808  ;;  %v1276_v15 = vmul.f32 %v18791_v38, %v1260_v9  ;;  %v1266_v58 = vadd.f32 0.5, %v1258_v44  ;;  %v1256_v2 = vmul.f32 0.5, %v18807_v18  ;;  %v18225_v38 = vunpack.i.h.bf16 %v18223_v59 }
 0x240   : >> { %v18811_v50 = vpop.eup %18810  ;;  %v1267_v6 = vadd.f32 0.5, %v1259_v23  ;;  %v1257_v25 = vmul.f32 0.5, %v18809_v12  ;;  %v1277_v40 = vmul.f32 %v18797_v47, %v1261_v54  ;;  %v18224_v0 = vunpack.i.l.bf16 %v18223_v59 }
 0x241   : >> { %v18813_v60 = vpop.eup %18812  ;;  %v1282_v31 = vmul.f32 %v18811_v50, %v1266_v58  ;;  %v1264_v1 = vadd.f32 0.5, %v1256_v2  ;;  %v23026_v12 = vunpack.i.h.bf16 %v19783_v35  ;;  %v23027_v23 = vunpack.i.l.bf16 %v19783_v35 }
 0x242   : >> { %v18815_v9 = vpop.eup %18814  ;;  %v1265_v44 = vadd.f32 0.5, %v1257_v25  ;;  %v1283_v18 = vmul.f32 %v18813_v60, %v1267_v6  ;;  %v23028_v50 = vunpack.i.h.bf16 %v19792_v48  ;;  %v23029_v33 = vunpack.i.l.bf16 %v19792_v48  ;;  %v19867_v6 = vld [vmem:[%s19859_s27] sm:$0xff] }
 0x243   : >> { %v18817_v63 = vpop.eup %18816  ;;  %v1280_v61 = vmul.f32 %v18815_v9, %v1264_v1  ;;  %v16805_v51 = vpack.c.bf16 %v1282_v31, %v1278_v34  ;;  %v1511_v47 = vsel %vm543_vm0, %v23027_v23, %v23026_v12  ;;  %v18209_v59 = vunpack.i.l.bf16 %v19803_v52 }
 0x244   : >> { %v1515_v36 = vsel %vm543_vm0, %v23029_v33, %v23028_v50  ;;  %v16803_v60 = vpack.c.bf16 %v1283_v18, %v1279_v43  ;;  %v1281_v1 = vmul.f32 %v18817_v63, %v1265_v44  ;;  %v16811_v31 = vpack.c.bf16 %v1517_v46, %v1513_v26  ;;  %v19887_v44 = vld [vmem:[%s19859_s27 + $0x8] sm:$0xff] }
 0x245   : >> { %v16801_v34 = vpack.c.bf16 %v1280_v61, %v1276_v15  ;;  %v23030_v42 = vunpack.i.l.bf16 %v19815_v45  ;;  %v1747_v54 = vsel %vm807_vm1, %v18229_v3, %v18230_v7  ;;  %v16807_v2 = vpack.c.bf16 %v1515_v36, %v1511_v47 }
 0x246   : >> { %16804 = vmatprep.subr.bf16.mxu1 %v16803_v60  ;;  %v16799_v58 = vpack.c.bf16 %v1281_v1, %v1277_v40  ;;  %v16813_v25 = vpack.c.bf16 %v19828_v41, %v19821_v53  ;;  %v23031_v52 = vunpack.i.h.bf16 %v19831_v32  ;;  %v23032_v63 = vunpack.i.l.bf16 %v19831_v32  ;;  %v18233_v41 = vpop.permute.xlu0 %18232 }
 0x247   : >> { %v1743_v56 = vsel %vm807_vm1, %v23030_v42, %v18220_v39  ;;  %16806 = vmatpush1.bf16.msra.mxu1 %v16805_v51  ;;  %v1745_v15 = vsel %vm807_vm1, %v18224_v0, %v18225_v38  ;;  %v23033_v43 = vmov %v23027_v23  ;;  %v23034_v7 = vmov %v23029_v33 }
 0x248   : >> { %v1741_v61 = vsel %vm807_vm1, %v23032_v63, %v23031_v52  ;;  %v1510_v39 = vsel %vm543_vm0, %v18209_v59, %v23033_v43  ;;  %v1514_v40 = vsel %vm543_vm0, %v18210_v8, %v23034_v7  ;;  %16800 = vmatprep.subr.bf16.mxu0 %v16799_v58  ;;  %16812 = vmatprep.subr.bf16.mxu1 %v16811_v31  ;;  %v18235_v26 = vunpack.i.h.bf16 %v18233_v41  ;;  %v23042_v31 = vld [vmem:[#allocation14_spill] sm:$0xff]  ;;  %v16131_v7 = vld [vmem:[%s19589_s15 + $0x20] sm:$0xff] }
 0x249   : >> { %v16819_v53 = vpack.c.bf16 %v1747_v54, %v1743_v56  ;;  %16802 = vmatpush1.bf16.msra.mxu0 %v16801_v34  ;;  %v18234_v46 = vunpack.i.l.bf16 %v18233_v41  ;;  %v16815_v9 = vpack.c.bf16 %v1745_v15, %v1741_v61  ;;  %v23035_v35 = vmov 0.0   ;;  %v23043_v54 = vld [vmem:[#allocation9_spill] sm:$0xff]  ;;  %v23045_v61 = vld [vmem:[#allocation15_spill] sm:$0xff] }
 0x24a   : >> { %16079 = vmatmul.mubr.msk.f32.vlgmr.msra.gmra.mrb[8].mxu1 %vm560_vm2, %v19867_v6  ;;  %16808 = vmatprep.subr.bf16.mxu0 %v16807_v2  ;;  %v16809_v48 = vpack.c.bf16 %v1514_v40, %v1510_v39  ;;  %v23036_v8 = vmov %v23030_v42  ;;  %v23037_v18 = vmov %v23031_v52  ;;  %v1746_v12 = vsel %vm807_vm1, %v18225_v38, %v18229_v3  ;;  %v23044_v2 = vld [vmem:[#allocation10_spill] sm:$0xff]  ;;  %v16134_v15 = vld [vmem:[%s19589_s15 + $0x38] sm:$0xff] }
 0x24b   : >> { %16814 = vmatpush1.bf16.msra.mxu1 %v16813_v25  ;;  %1447 = vmatprep.mubr.f32.mxu1 %v23035_v35  ;;  %v1742_v51 = vsel %vm807_vm1, %v23037_v18, %v23036_v8  ;;  %v23038_v23 = vmov %v23032_v63  ;;  %v1744_v50 = vsel %vm807_vm1, %v18235_v26, %v18224_v0  ;;  %v16827_v3 = vpack.c.bf16 %v19609_v28, %v19595_v20  ;;  %v16133_v43 = vld [vmem:[%s19589_s15 + $0x30] sm:$0xff]  ;;  %v16132_v39 = vld [vmem:[%s19589_s15 + $0x28] sm:$0xff] }
 0x24c   : >> { %16077 = vmatmul.mubr.msk.f32.vlgmr.msra.gmra.mrb[8].mxu0 %vm560_vm2, %v19867_v6  ;;  %16820 = vmatprep.subr.bf16.mxu1 %v16819_v53  ;;  %v1740_v47 = vsel %vm807_vm1, %v18234_v46, %v23038_v23  ;;  %v16821_v45 = vpack.c.bf16 %v1746_v12, %v1742_v51  ;;  %v16823_v0 = vpack.c.bf16 %v19613_v30, %v19601_v24 }
 0x24d   : >> { %16810 = vmatpush1.bf16.msra.mxu0 %v16809_v48  ;;  %1370 = vmatprep.mubr.f32.mxu0 %v23035_v35  ;;  %v16817_v32 = vpack.c.bf16 %v1744_v50, %v1740_v47  ;;  %v16829_v20 = vpack.c.bf16 %v19607_v27, %v19593_v19  ;;  %v16825_v24 = vpack.c.bf16 %v19611_v29, %v19597_v21  ;;  %v19988_v19 = vpop.permute.xlu1 %1286 }
 0x24e   : >> { %16080 = vmatmul.mubr.msk.f32.gmra.mrb[10].mxu1 %vm560_vm2, %v19887_v44  ;;  %16816 = vmatprep.subr.bf16.mxu0 %v16815_v9  ;;  %v23046_v9 = vld [vmem:[#allocation17_spill] sm:$0xff] }
 0x24f   : >> { %1679 = vmatprep.mubr.f32.mxu1 %v23035_v35 }
 0x250   : >> { %16078 = vmatmul.mubr.msk.f32.gmra.mrb[10].mxu0 %vm560_vm2, %v19887_v44 }
 0x251   : >> { %1590 = vmatprep.mubr.f32.mxu0 %v23035_v35 }
 0x252   : >> { %16085 = vmatmul.mubr.msk.f32.vlgmr.msra.gmra.mrb[12].mxu1 %vm560_vm2, %v19654_v22 }
 0x253   : >> { %1685 = vmatprep.mubr.f32.mxu1 %v23035_v35  ;;  %16822 = vmatpush1.bf16.msra.mxu1 %v16821_v45  ;;  %v23047_v45 = vld [vmem:[#allocation18_spill] sm:$0xff] }
 0x254   : >> { %16081 = vmatmul.mubr.msk.f32.vlgmr.msra.gmra.mrb[12].mxu0 %vm560_vm2, %v19654_v22  ;;  %16828 = vmatprep.subr.bf16.mxu1 %v16827_v3 }
 0x255   : >> { %1596 = vmatprep.mubr.f32.mxu0 %v23035_v35  ;;  %16818 = vmatpush1.bf16.msra.mxu0 %v16817_v32 }
 0x256   : >> { %16086 = vmatmul.mubr.msk.f32.gmra.mrb[14].mxu1 %vm560_vm2, %v19662_v37  ;;  %16824 = vmatprep.subr.bf16.mxu0 %v16823_v0 }
 0x257   : >> { %1691 = vmatprep.mubr.f32.mxu1 %v23035_v35 }
 0x258   : >> { %16082 = vmatmul.mubr.msk.f32.gmra.mrb[14].mxu0 %vm560_vm2, %v19662_v37 }
 0x259   : >> { %1602 = vmatprep.mubr.f32.mxu0 %v23035_v35 }
 0x25a   : >> { %16087 = vmatmul.mubr.msk.f32.gmra.mrb[16].mxu1 %vm560_vm2, %v19676_v49 }
 0x25b   : >> { %1697 = vmatprep.mubr.f32.mxu1 %v23035_v35 }
 0x25c   : >> { %16083 = vmatmul.mubr.msk.f32.gmra.mrb[16].mxu0 %vm560_vm2, %v19676_v49 }
 0x25d   : >> { %1608 = vmatprep.mubr.f32.mxu0 %v23035_v35 }
 0x25e   : >> { %16088 = vmatmul.mubr.msk.f32.gmra.mrb[18].mxu1 %vm560_vm2, %v19687_v55 }
 0x25f   : >> { %1909 = vmatprep.mubr.f32.mxu1 %v23035_v35 }
 0x260   : >> { %16084 = vmatmul.mubr.msk.f32.gmra.mrb[18].mxu0 %vm560_vm2, %v19687_v55  ;;  %v19996_v55 = vpop.permute.xlu0 %1291 }
 0x261   : >> { %1820 = vmatprep.mubr.f32.mxu0 %v23035_v35 }
 0x262   : >> { %16093 = vmatmul.mubr.msk.f32.vlgmr.msra.gmra.mrb[12].mxu1 %vm560_vm2, %v19699_v57 }
 0x263   : >> { %1915 = vmatprep.mubr.f32.mxu1 %v23035_v35  ;;  %16830 = vmatpush1.bf16.msra.mxu1 %v16829_v20 }
 0x264   : >> { %16089 = vmatmul.mubr.msk.f32.vlgmr.msra.gmra.mrb[12].mxu0 %vm560_vm2, %v19699_v57 }
 0x265   : >> { %1826 = vmatprep.mubr.f32.mxu0 %v23035_v35  ;;  %16826 = vmatpush1.bf16.msra.mxu0 %v16825_v24 }
 0x266   : >> { %16094 = vmatmul.mubr.msk.f32.gmra.mrb[14].mxu1 %vm560_vm2, %v19710_v62 }
 0x267   : >> { %1921 = vmatprep.mubr.f32.mxu1 %v23035_v35 }
 0x268   : >> { %16090 = vmatmul.mubr.msk.f32.gmra.mrb[14].mxu0 %vm560_vm2, %v19710_v62 }
 0x269   : >> { %1832 = vmatprep.mubr.f32.mxu0 %v23035_v35 }
 0x26a   : >> { %16095 = vmatmul.mubr.msk.f32.gmra.mrb[16].mxu1 %vm560_vm2, %v19721_v10 }
 0x26b   : >> { %1927 = vmatprep.mubr.f32.mxu1 %v23035_v35 }
 0x26c   : >> { %16091 = vmatmul.mubr.msk.f32.gmra.mrb[16].mxu0 %vm560_vm2, %v19721_v10 }
 0x26d   : >> { %1838 = vmatprep.mubr.f32.mxu0 %v23035_v35 }
 0x26e   : >> { %16096 = vmatmul.mubr.msk.f32.gmra.mrb[18].mxu1 %vm560_vm2, %v19730_v11 }
 0x26f   : >> { %2103 = vmatprep.mubr.f32.mxu1 %v23035_v35 }
 0x270   : >> { %16092 = vmatmul.mubr.msk.f32.gmra.mrb[18].mxu0 %vm560_vm2, %v19730_v11  ;;  %v23039_v11 = vld [vmem:[#allocation11_spill] sm:$0xff] }
 0x271   : >> { %2014 = vmatprep.mubr.f32.mxu0 %v23035_v35 }
 0x272   : >> { %16101 = vmatmul.mubr.msk.f32.vlgmr.msra.gmra.mrb[12].mxu1 %vm560_vm2, %v19739_v13 }
 0x273   : >> { %2109 = vmatprep.mubr.f32.mxu1 %v23035_v35 }
 0x274   : >> { %16097 = vmatmul.mubr.msk.f32.vlgmr.msra.gmra.mrb[12].mxu0 %vm560_vm2, %v19739_v13 }
 0x275   : >> { %2020 = vmatprep.mubr.f32.mxu0 %v23035_v35 }
 0x276   : >> { %16102 = vmatmul.mubr.msk.f32.gmra.mrb[14].mxu1 %vm560_vm2, %v19748_v14 }
 0x277   : >> { %2115 = vmatprep.mubr.f32.mxu1 %v23035_v35 }
 0x278   : >> { %16098 = vmatmul.mubr.msk.f32.gmra.mrb[14].mxu0 %vm560_vm2, %v19748_v14 }
 0x279   : >> { %2026 = vmatprep.mubr.f32.mxu0 %v23035_v35 }
 0x27a   : >> { %16103 = vmatmul.mubr.msk.f32.gmra.mrb[16].mxu1 %vm560_vm2, %v19757_v16 }
 0x27b   : >> { %2121 = vmatprep.mubr.f32.mxu1 %v23035_v35 }
 0x27c   : >> { %16099 = vmatmul.mubr.msk.f32.gmra.mrb[16].mxu0 %vm560_vm2, %v19757_v16 }
 0x27d   : >> { %2032 = vmatprep.mubr.f32.mxu0 %v23035_v35 }
 0x27e   : >> { %16104 = vmatmul.mubr.msk.f32.gmra.mrb[18].mxu1 %vm560_vm2, %v19766_v17 }
 0x27f   : >> { %2333 = vmatprep.mubr.f32.mxu1 %v23035_v35 }
 0x280   : >> { %16100 = vmatmul.mubr.msk.f32.gmra.mrb[18].mxu0 %vm560_vm2, %v19766_v17  ;;  %v23040_v17 = vld [vmem:[#allocation12_spill] sm:$0xff] }
 0x281   : >> { %2256 = vmatprep.mubr.f32.mxu0 %v23035_v35 }
 0x31d   : >> { %v1443_v21 = vpop.f32.mrb[8].mxu1 }
 0x31e   : >> { %v1444_v27 = vadd.f32 %v1443_v21, %v19988_v19  ;;  %v1445_v28 = vpop.f32.mrb[9].mxu1 }
 0x31f   : >> { %v1446_v29 = vadd.f32 %v1445_v28, %v19988_v19  ;;  %v1366_v30 = vpop.f32.mrb[8].mxu0 }
 0x320   : >> { %v19993_v22 = vadd.f32 %v1444_v27, %v19561_v4  ;;  %v1367_v37 = vadd.f32 %v1366_v30, %v19988_v19  ;;  %v1368_v49 = vpop.f32.mrb[9].mxu0 }
 0x321   : >> { %v19999_v57 = vadd.f32 %v1446_v29, %v19563_v5  ;;  %v1369_v62 = vadd.f32 %v1368_v49, %v19988_v19  ;;  %v1449_v10 = vpop.f32.mrb[10].mxu1  ;;  %v23041_v5 = vld [vmem:[#allocation13_spill] sm:$0xff]  ;;  %v23048_v49 = vld [vmem:[#allocation16_spill] sm:$0xff] }
 0x322   : >> { %v20003_v13 = vadd.f32 %v1367_v37, %v23039_v11  ;;  %v1450_v14 = vadd.f32 %v1449_v10, %v19996_v55  ;;  %v1451_v16 = vpop.f32.mrb[11].mxu1 }
 0x323   : >> { %v20007_v4 = vadd.f32 %v1369_v62, %v23040_v17  ;;  %v1452_v38 = vadd.f32 %v1451_v16, %v19996_v55  ;;  %v1372_v33 = vpop.f32.mrb[10].mxu0  ;;  %v18241_v36 = vpack.i.bf16 %v19999_v57, %v19993_v22 }
 0x324   : >> { %v20013_v59 = vadd.f32 %v1450_v14, %v23041_v5  ;;  %v1373_v60 = vadd.f32 %v1372_v33, %v19996_v55  ;;  %v1374_v1 = vpop.f32.mrb[11].mxu0 }
 0x325   : >> { %v20017_v34 = vadd.f32 %v1452_v38, %v23042_v31  ;;  %v1375_v42 = vadd.f32 %v1374_v1, %v19996_v55  ;;  %18242 = vrot.lane.b32.xlu0 %v18241_v36, %s19385_s17  ;;  %v18236_v56 = vpack.i.bf16 %v20007_v4, %v20003_v13 }
 0x326   : >> { %v20024_v58 = vadd.f32 %v1373_v60, %v23043_v54  ;;  %v23049_v60 = vld [vmem:[#allocation19_spill] sm:$0xff] }
 0x327   : >> { %v20027_v25 = vadd.f32 %v1375_v42, %v23044_v2  ;;  %18237 = vrot.lane.b32.xlu1 %v18236_v56, %s19385_s17  ;;  %v18251_v52 = vpack.i.bf16 %v20017_v34, %v20013_v59 }
 0x329   : >> { %18252 = vrot.lane.b32.xlu0 %v18251_v52, %s19385_s17  ;;  %v18246_v63 = vpack.i.bf16 %v20027_v25, %v20024_v58 }
 0x32b   : >> { %18247 = vrot.lane.b32.xlu1 %v18246_v63, %s19385_s17 }
 0x32d   : >> { %18262 = vrot.lane.b32.xlu0 %v18236_v56, %s19381_s26 }
 0x32f   : >> { %18257 = vrot.lane.b32.xlu1 %v23045_v61, %s19385_s17 }
 0x331   : >> { %18272 = vrot.lane.b32.xlu0 %v18246_v63, %s19381_s26 }
 0x333   : >> { %18267 = vrot.lane.b32.xlu1 %v18241_v36, %s19381_s26 }
 0x335   : >> { %18282 = vrot.lane.b32.xlu0 %v23045_v61, %s19381_s26 }
 0x337   : >> { %18277 = vrot.lane.b32.xlu1 %v18251_v52, %s19381_s26 }
 0x339   : >> { %2661 = vperm.xlu0 %18184, %v16134_v15  }
 0x33b   : >> { %2656 = vperm.xlu1 %18185, %v16133_v43  }
 0x33d   : >> { %2651 = vperm.xlu0 %18184, %v16132_v39  }
 0x33f   : >> { %2646 = vperm.xlu1 %18185, %v16131_v7  }
 0x345   : >> { %v2105_v40 = vpop.f32.mrb[12].mxu1 }
 0x346   : >> { %v2107_v53 = vpop.f32.mrb[13].mxu1  ;;  %v17327_v48 = vadd.f32 %v2105_v40, %v23046_v9 }
 0x347   : >> { %v2016_v41 = vpop.f32.mrb[12].mxu0  ;;  %v17328_v18 = vadd.f32 %v2107_v53, %v23046_v9 }
 0x348   : >> { %v2018_v26 = vpop.f32.mrb[13].mxu0  ;;  %v17319_v12 = vadd.f32 %v2016_v41, %v23046_v9  ;;  %18818 = vtanh.f32 %v17327_v48 }
 0x349   : >> { %v2111_v46 = vpop.f32.mrb[14].mxu1  ;;  %v17320_v47 = vadd.f32 %v2018_v26, %v23046_v9  ;;  %18820 = vtanh.f32 %v17328_v18 }
 0x34a   : >> { %v2113_v8 = vpop.f32.mrb[15].mxu1  ;;  %18822 = vtanh.f32 %v17319_v12  ;;  %v17329_v1 = vadd.f32 %v2111_v46, %v23049_v60 }
 0x34b   : >> { %v2022_v51 = vpop.f32.mrb[14].mxu0  ;;  %18824 = vtanh.f32 %v17320_v47  ;;  %v17330_v42 = vadd.f32 %v2113_v8, %v23049_v60 }
 0x34c   : >> { %v2024_v23 = vpop.f32.mrb[15].mxu0  ;;  %v17321_v2 = vadd.f32 %v2022_v51, %v23049_v60 }
 0x34d   : >> { %v2117_v50 = vpop.f32.mrb[16].mxu1  ;;  %v17322_v63 = vadd.f32 %v2024_v23, %v23049_v60 }
 0x34e   : >> { %v17331_v3 = vadd.f32 %v2117_v50, %v23047_v45  ;;  %v2119_v32 = vpop.f32.mrb[17].mxu1 }
 0x34f   : >> { %v17332_v0 = vadd.f32 %v2119_v32, %v23047_v45  ;;  %v2028_v20 = vpop.f32.mrb[16].mxu0 }
 0x350   : >> { %v2146_v24 = vmul.f32 0.5, %v17331_v3  ;;  %v17323_v21 = vadd.f32 %v2028_v20, %v23047_v45  ;;  %v2030_v27 = vpop.f32.mrb[17].mxu0 }
 0x351   : >> { %v2147_v28 = vmul.f32 0.5, %v17332_v0  ;;  %v17324_v29 = vadd.f32 %v2030_v27, %v23047_v45  ;;  %v2123_v30 = vpop.f32.mrb[18].mxu1 }
 0x352   : >> { %18826 = vtanh.f32 %v2146_v24  ;;  %v2144_v37 = vmul.f32 0.5, %v17323_v21  ;;  %v17333_v62 = vadd.f32 %v2123_v30, %v23048_v49  ;;  %v2125_v10 = vpop.f32.mrb[19].mxu1  ;;  %v18819_v54 = vpop.eup %18818 }
 0x353   : >> { %18828 = vtanh.f32 %v2147_v28  ;;  %v2145_v11 = vmul.f32 0.5, %v17324_v29  ;;  %v17334_v14 = vadd.f32 %v2125_v10, %v23048_v49  ;;  %v2034_v16 = vpop.f32.mrb[18].mxu0  ;;  %v18821_v52 = vpop.eup %18820 }
 0x354   : >> { %18830 = vtanh.f32 %v2144_v37  ;;  %v2150_v17 = vmul.f32 0.5, %v17333_v62  ;;  %v17325_v38 = vadd.f32 %v2034_v16, %v23048_v49  ;;  %v2036_v33 = vpop.f32.mrb[19].mxu0  ;;  %v18823_v61 = vpop.eup %18822 }
 0x355   : >> { %18832 = vtanh.f32 %v2145_v11  ;;  %v2151_v36 = vmul.f32 0.5, %v17334_v14  ;;  %v17326_v5 = vadd.f32 %v2036_v33, %v23048_v49  ;;  %v18825_v15 = vpop.eup %18824 }
 0x356   : >> { %18834 = vtanh.f32 %v2150_v17  ;;  %v2148_v31 = vmul.f32 0.5, %v17325_v38 }
 0x357   : >> { %18836 = vtanh.f32 %v2151_v36  ;;  %v2149_v56 = vmul.f32 0.5, %v17326_v5 }
 0x358   : >> { %18838 = vtanh.f32 %v2148_v31 }
 0x359   : >> { %18840 = vtanh.f32 %v2149_v56 }
 0x35a   : >> { %18842 = vtanh.f32 %v17329_v1 }
 0x35b   : >> { %18844 = vtanh.f32 %v17330_v42 }
 0x35c   : >> { %v18827_v43 = vpop.eup %18826  ;;  %18846 = vtanh.f32 %v17321_v2 }
 0x35d   : >> { %v18829_v39 = vpop.eup %18828  ;;  %18848 = vtanh.f32 %v17322_v63  ;;  %v2162_v7 = vmul.f32 0.5, %v18827_v43 }
 0x35e   : >> { %v18831_v40 = vpop.eup %18830  ;;  %v2163_v53 = vmul.f32 0.5, %v18829_v39 }
 0x35f   : >> { %v18833_v41 = vpop.eup %18832  ;;  %v2170_v26 = vadd.f32 0.5, %v2162_v7  ;;  %v2160_v46 = vmul.f32 0.5, %v18831_v40 }
 0x360   : >> { %v18835_v9 = vpop.eup %18834  ;;  %v2171_v48 = vadd.f32 0.5, %v2163_v53  ;;  %v2161_v8 = vmul.f32 0.5, %v18833_v41 }
 0x361   : >> { %v18837_v18 = vpop.eup %18836  ;;  %v2186_v51 = vmul.f32 %v18819_v54, %v2170_v26  ;;  %v2168_v12 = vadd.f32 0.5, %v2160_v46  ;;  %v2166_v23 = vmul.f32 0.5, %v18835_v9 }
 0x362   : >> { %v18839_v47 = vpop.eup %18838  ;;  %v2169_v50 = vadd.f32 0.5, %v2161_v8  ;;  %v2167_v45 = vmul.f32 0.5, %v18837_v18  ;;  %v2187_v3 = vmul.f32 %v18821_v52, %v2171_v48 }
 0x363   : >> { %v18841_v32 = vpop.eup %18840  ;;  %v2184_v0 = vmul.f32 %v18823_v61, %v2168_v12  ;;  %v2174_v20 = vadd.f32 0.5, %v2166_v23  ;;  %v2164_v24 = vmul.f32 0.5, %v18839_v47  ;;  %v20083_v47 = vld [vmem:[%s19649_s10 + $0x60] sm:$0xff] }
 0x364   : >> { %v18843_v21 = vpop.eup %18842  ;;  %v2175_v27 = vadd.f32 0.5, %v2167_v45  ;;  %v2165_v28 = vmul.f32 0.5, %v18841_v32  ;;  %v2185_v29 = vmul.f32 %v18825_v15, %v2169_v50 }
 0x365   : >> { %v18845_v30 = vpop.eup %18844  ;;  %v2190_v37 = vmul.f32 %v18843_v21, %v2174_v20  ;;  %v2172_v49 = vadd.f32 0.5, %v2164_v24 }
 0x366   : >> { %v18847_v62 = vpop.eup %18846  ;;  %v2173_v10 = vadd.f32 0.5, %v2165_v28  ;;  %v2191_v11 = vmul.f32 %v18845_v30, %v2175_v27 }
 0x367   : >> { %v18849_v14 = vpop.eup %18848  ;;  %v2188_v16 = vmul.f32 %v18847_v62, %v2172_v49  ;;  %v16837_v17 = vpack.c.bf16 %v2190_v37, %v2186_v51 }
 0x368   : >> { %v16835_v38 = vpack.c.bf16 %v2191_v11, %v2187_v3  ;;  %v2189_v33 = vmul.f32 %v18849_v14, %v2173_v10 }
 0x369   : >> { %v16833_v36 = vpack.c.bf16 %v2188_v16, %v2184_v0 }
 0x36a   : >> { %16836 = vmatprep.subr.bf16.mxu1 %v16835_v38  ;;  %v16831_v5 = vpack.c.bf16 %v2189_v33, %v2185_v29  ;;  %v20093_v29 = vld [vmem:[%s19649_s10 + $0x68] sm:$0xff]  ;;  %v16855_v33 = vpack.c.bf16 %v20027_v25, %v20007_v4 }
 0x36b   : >> { %16838 = vmatpush1.bf16.msra.mxu1 %v16837_v17 }
 0x36c   : >> { %16832 = vmatprep.subr.bf16.mxu0 %v16831_v5 }
 0x36d   : >> { %16834 = vmatpush1.bf16.msra.mxu0 %v16833_v36 }
 0x36e   : >> { %16107 = vmatmul.mubr.msk.f32.vlgmr.msra.gmra.mrb[20].mxu1 %vm560_vm2, %v19867_v6 }
 0x36f   : >> { %2339 = vmatprep.mubr.f32.mxu1 %v23035_v35 }
 0x370   : >> { %16105 = vmatmul.mubr.msk.f32.vlgmr.msra.gmra.mrb[20].mxu0 %vm560_vm2, %v19867_v6 }
 0x371   : >> { %2262 = vmatprep.mubr.f32.mxu0 %v23035_v35 }
 0x372   : >> { %16108 = vmatmul.mubr.msk.f32.gmra.mrb[22].mxu1 %vm560_vm2, %v19887_v44 }
 0x373   : >> { %2619 = vmatprep.mubr.f32.mxu1 %v23035_v35 }
 0x374   : >> { %16106 = vmatmul.mubr.msk.f32.gmra.mrb[22].mxu0 %vm560_vm2, %v19887_v44 }
 0x375   : >> { %2530 = vmatprep.mubr.f32.mxu0 %v23035_v35 }
 0x397   : >> { %v18243_v60 = vpop.permute.xlu0 %18242 }
 0x398   : >> { %v18245_v31 = vunpack.i.h.bf16 %v18243_v60  ;;  %v18244_v42 = vunpack.i.l.bf16 %v18243_v60  ;;  %v20108_v60 = vld [vmem:[%s19649_s10 + $0x70] sm:$0xff] }
 0x399   : >> { %v18238_v1 = vpop.permute.xlu1 %18237 }
 0x39a   : >> { %v18240_v54 = vunpack.i.h.bf16 %v18238_v1  ;;  %v18239_v6 = vunpack.i.l.bf16 %v18238_v1  ;;  %v2441_v43 = vsel %vm2437_vm3, %v18244_v42, %v18245_v31 }
 0x39b   : >> { %v18253_v56 = vpop.permute.xlu0 %18252 }
 0x39c   : >> { %v18255_v2 = vunpack.i.h.bf16 %v18253_v56  ;;  %v18254_v52 = vunpack.i.l.bf16 %v18253_v56  ;;  %v2440_v40 = vsel %vm2437_vm3, %v18240_v54, %v18244_v42  ;;  %v2439_v41 = vsel %vm2437_vm3, %v18239_v6, %v18240_v54 }
 0x39d   : >> { %v18248_v63 = vpop.permute.xlu1 %18247  ;;  %v16859_v54 = vpack.c.bf16 %v20017_v34, %v19999_v57 }
 0x39e   : >> { %v18250_v61 = vunpack.i.h.bf16 %v18248_v63  ;;  %v18249_v15 = vunpack.i.l.bf16 %v18248_v63  ;;  %v2445_v39 = vsel %vm2437_vm3, %v18254_v52, %v18255_v2  ;;  %v20130_v2 = vld [vmem:[%s19649_s10 + $0x80] sm:$0xff]  ;;  %v20141_v63 = vld [vmem:[%s19649_s10 + $0x88] sm:$0xff] }
 0x39f   : >> { %v18263_v44 = vpop.permute.xlu0 %18262  ;;  %v16843_v7 = vpack.c.bf16 %v2445_v39, %v2441_v43  ;;  %v20161_v43 = vld [vmem:[%s19649_s10 + $0x98] sm:$0xff]  ;;  %v20170_v39 = vld [vmem:[%s19649_s10 + $0xa0] sm:$0xff] }
 0x3a0   : >> { %v2444_v53 = vsel %vm2437_vm3, %v18250_v61, %v18254_v52  ;;  %v2443_v26 = vsel %vm2437_vm3, %v18249_v15, %v18250_v61  ;;  %v18265_v8 = vunpack.i.h.bf16 %v18263_v44  ;;  %v18264_v18 = vunpack.i.l.bf16 %v18263_v44  ;;  %v20179_v44 = vld [vmem:[%s19649_s10 + $0xa8] sm:$0xff] }
 0x3a1   : >> { %16844 = vmatprep.subr.bf16.mxu1 %v16843_v7  ;;  %v18258_v46 = vpop.permute.xlu1 %18257  ;;  %v16839_v9 = vpack.c.bf16 %v2443_v26, %v2439_v41  ;;  %v16845_v48 = vpack.c.bf16 %v2444_v53, %v2440_v40  ;;  %v16861_v52 = vpack.c.bf16 %v20013_v59, %v19993_v22  ;;  %v16857_v61 = vpack.c.bf16 %v20024_v58, %v20003_v13  ;;  %v20188_v7 = vld [vmem:[%s19649_s10 + $0xb0] sm:$0xff]  ;;  %v20197_v40 = vld [vmem:[%s19649_s10 + $0xb8] sm:$0xff] }
 0x3a2   : >> { %v18260_v51 = vunpack.i.h.bf16 %v18258_v46  ;;  %v18259_v12 = vunpack.i.l.bf16 %v18258_v46  ;;  %v2701_v24 = vsel %vm543_vm0, %v18264_v18, %v18265_v8 }
 0x3a3   : >> { %v18273_v23 = vpop.permute.xlu0 %18272  ;;  %16840 = vmatprep.subr.bf16.mxu0 %v16839_v9  ;;  %16846 = vmatpush1.bf16.msra.mxu1 %v16845_v48  ;;  %v19298_v48 = vld [vmem:[#allocation2 + $0x80] sm:$0xff] }
 0x3a4   : >> { %v2438_v50 = vsel %vm2437_vm3, %v18259_v12, %v18239_v6  ;;  %v2442_v45 = vsel %vm2437_vm3, %v18260_v51, %v18249_v15  ;;  %v18275_v3 = vunpack.i.h.bf16 %v18273_v23  ;;  %v18274_v32 = vunpack.i.l.bf16 %v18273_v23  ;;  %v20120_v6 = vld [vmem:[%s19649_s10 + $0x78] sm:$0xff]  ;;  %v20152_v15 = vld [vmem:[%s19649_s10 + $0x90] sm:$0xff]  ;;  %v19299_v12 = vld [vmem:[#allocation2 + $0x88] sm:$0xff] }
 0x3a5   : >> { %v18268_v0 = vpop.permute.xlu1 %18267  ;;  %v16841_v20 = vpack.c.bf16 %v2442_v45, %v2438_v50 }
 0x3a6   : >> { %16147 = vmatmul.mubr.msk.f32.vlgmr.msra.gmra.mrb[24].mxu1 %vm560_vm2, %v20083_v47  ;;  %v2705_v21 = vsel %vm543_vm0, %v18274_v32, %v18275_v3  ;;  %v18270_v30 = vunpack.i.h.bf16 %v18268_v0  ;;  %v18269_v37 = vunpack.i.l.bf16 %v18268_v0 }
 0x3a7   : >> { %v18283_v27 = vpop.permute.xlu0 %18282  ;;  %16842 = vmatpush1.bf16.msra.mxu0 %v16841_v20  ;;  %v16847_v28 = vpack.c.bf16 %v2705_v21, %v2701_v24  ;;  %2625 = vmatprep.mubr.f32.mxu1 %v23035_v35  ;;  %v19301_v24 = vld [vmem:[#allocation2 + $0x78] sm:$0xff] }
 0x3a8   : >> { %v18285_v49 = vunpack.i.h.bf16 %v18283_v27  ;;  %v18284_v62 = vunpack.i.l.bf16 %v18283_v27  ;;  %v2702_v36 = vsel %vm543_vm0, %v18265_v8, %v18269_v37  ;;  %v2703_v1 = vsel %vm543_vm0, %v18269_v37, %v18270_v30  ;;  %v19302_v37 = vld [vmem:[#allocation2 + $0xb0] sm:$0xff] }
 0x3a9   : >> { %16848 = vmatprep.subr.bf16.mxu0 %v16847_v28  ;;  %v18278_v10 = vpop.permute.xlu1 %18277 }
 0x3aa   : >> { %v2700_v11 = vsel %vm543_vm0, %v18284_v62, %v18264_v18  ;;  %v2704_v14 = vsel %vm543_vm0, %v18285_v49, %v18274_v32  ;;  %v18280_v16 = vunpack.i.h.bf16 %v18278_v10  ;;  %v18279_v17 = vunpack.i.l.bf16 %v18278_v10  ;;  %16143 = vmatmul.mubr.msk.f32.vlgmr.msra.gmra.mrb[24].mxu0 %vm560_vm2, %v20083_v47  ;;  %16148 = vmatmul.mubr.msk.f32.gmra.mrb[26].mxu1 %vm560_vm2, %v20093_v29  ;;  %v19303_v10 = vld [vmem:[#allocation2 + $0xb8] sm:$0xff] }
 0x3ab   : >> { %v16849_v38 = vpack.c.bf16 %v2704_v14, %v2700_v11  ;;  %2536 = vmatprep.mubr.f32.mxu0 %v23035_v35  ;;  %2631 = vmatprep.mubr.f32.mxu1 %v23035_v35 }
 0x3ac   : >> { %v2706_v5 = vsel %vm543_vm0, %v18275_v3, %v18279_v17  ;;  %v2707_v31 = vsel %vm543_vm0, %v18279_v17, %v18280_v16  ;;  %v19300_v3 = vld [vmem:[#allocation2 + $0x70] sm:$0xff]  ;;  %v19304_v17 = vld [vmem:[#allocation2 + $0xa0] sm:$0xff] }
 0x3ad   : >> { %16850 = vmatpush1.bf16.msra.mxu0 %v16849_v38  ;;  %v16851_v42 = vpack.c.bf16 %v2707_v31, %v2703_v1  ;;  %v16853_v56 = vpack.c.bf16 %v2706_v5, %v2702_v36  ;;  %v3362_v1 = vld [vmem:[#allocation2 + $0x68] sm:$0xff] }
 0x3ae   : >> { %16856 = vmatprep.subr.bf16.mxu0 %v16855_v33  ;;  %16144 = vmatmul.mubr.msk.f32.gmra.mrb[26].mxu0 %vm560_vm2, %v20093_v29  ;;  %v19305_v33 = vld [vmem:[#allocation2 + $0xa8] sm:$0xff] }
 0x3af   : >> { %16149 = vmatmul.mubr.msk.f32.gmra.mrb[28].mxu1 %vm560_vm2, %v20108_v60  ;;  %16852 = vmatprep.subr.bf16.mxu1 %v16851_v42 }
 0x3b0   : >> { %16854 = vmatpush1.bf16.msra.mxu1 %v16853_v56  ;;  %2542 = vmatprep.mubr.f32.mxu0 %v23035_v35  ;;  %v16142_v56 = vld [vmem:[%s19633_s23 + $0x18] sm:$0xff] }
 0x3b1   : >> { %2637 = vmatprep.mubr.f32.mxu1 %v23035_v35  ;;  %16860 = vmatprep.subr.bf16.mxu1 %v16859_v54  ;;  %v16141_v54 = vld [vmem:[%s19633_s23 + $0x10] sm:$0xff] }
 0x3b2   : >> { %16145 = vmatmul.mubr.msk.f32.gmra.mrb[28].mxu0 %vm560_vm2, %v20108_v60 }
 0x3b3   : >> { %16150 = vmatmul.mubr.msk.f32.gmra.mrb[30].mxu1 %vm560_vm2, %v20120_v6  ;;  %2548 = vmatprep.mubr.f32.mxu0 %v23035_v35 }
 0x3b4   : >> { %2881 = vmatprep.mubr.f32.mxu1 %v23035_v35 }
 0x3b6   : >> { %16146 = vmatmul.mubr.msk.f32.gmra.mrb[30].mxu0 %vm560_vm2, %v20120_v6 }
 0x3b7   : >> { %16155 = vmatmul.mubr.msk.f32.vlgmr.msra.gmra.mrb[24].mxu1 %vm560_vm2, %v20130_v2  ;;  %2792 = vmatprep.mubr.f32.mxu0 %v23035_v35 }
 0x3b8   : >> { %16862 = vmatpush1.bf16.msra.mxu1 %v16861_v52  ;;  %2887 = vmatprep.mubr.f32.mxu1 %v23035_v35 }
 0x3ba   : >> { %16151 = vmatmul.mubr.msk.f32.vlgmr.msra.gmra.mrb[24].mxu0 %vm560_vm2, %v20130_v2  ;;  %v20252_v52 = vpop.permute.xlu1 %2656 }
 0x3bb   : >> { %16156 = vmatmul.mubr.msk.f32.gmra.mrb[26].mxu1 %vm560_vm2, %v20141_v63  ;;  %16858 = vmatpush1.bf16.msra.mxu0 %v16857_v61 }
 0x3bc   : >> { %2798 = vmatprep.mubr.f32.mxu0 %v23035_v35  ;;  %2893 = vmatprep.mubr.f32.mxu1 %v23035_v35 }
 0x3be   : >> { %16152 = vmatmul.mubr.msk.f32.gmra.mrb[26].mxu0 %vm560_vm2, %v20141_v63 }
 0x3bf   : >> { %16157 = vmatmul.mubr.msk.f32.gmra.mrb[28].mxu1 %vm560_vm2, %v20152_v15  ;;  %2804 = vmatprep.mubr.f32.mxu0 %v23035_v35 }
 0x3c0   : >> { %2899 = vmatprep.mubr.f32.mxu1 %v23035_v35 }
 0x3c2   : >> { %16153 = vmatmul.mubr.msk.f32.gmra.mrb[28].mxu0 %vm560_vm2, %v20152_v15 }
 0x3c3   : >> { %16158 = vmatmul.mubr.msk.f32.gmra.mrb[30].mxu1 %vm560_vm2, %v20161_v43  ;;  %2810 = vmatprep.mubr.f32.mxu0 %v23035_v35 }
 0x3c4   : >> { %3087 = vmatprep.mubr.f32.mxu1 %v23035_v35 }
 0x3c6   : >> { %16154 = vmatmul.mubr.msk.f32.gmra.mrb[30].mxu0 %vm560_vm2, %v20161_v43 }
 0x3c7   : >> { %16163 = vmatmul.mubr.msk.f32.vlgmr.msra.gmra.mrb[24].mxu1 %vm560_vm2, %v20170_v39  ;;  %2998 = vmatprep.mubr.f32.mxu0 %v23035_v35 }
 0x3c8   : >> { %3093 = vmatprep.mubr.f32.mxu1 %v23035_v35 }
 0x3ca   : >> { %16159 = vmatmul.mubr.msk.f32.vlgmr.msra.gmra.mrb[24].mxu0 %vm560_vm2, %v20170_v39 }
 0x3cb   : >> { %16164 = vmatmul.mubr.msk.f32.gmra.mrb[26].mxu1 %vm560_vm2, %v20179_v44  ;;  %3004 = vmatprep.mubr.f32.mxu0 %v23035_v35 }
 0x3cc   : >> { %3099 = vmatprep.mubr.f32.mxu1 %v23035_v35 }
 0x3ce   : >> { %16160 = vmatmul.mubr.msk.f32.gmra.mrb[26].mxu0 %vm560_vm2, %v20179_v44 }
 0x3cf   : >> { %16165 = vmatmul.mubr.msk.f32.gmra.mrb[28].mxu1 %vm560_vm2, %v20188_v7  ;;  %3010 = vmatprep.mubr.f32.mxu0 %v23035_v35 }
 0x3d0   : >> { %3105 = vmatprep.mubr.f32.mxu1 %v23035_v35 }
 0x3d2   : >> { %16161 = vmatmul.mubr.msk.f32.gmra.mrb[28].mxu0 %vm560_vm2, %v20188_v7 }
 0x3d3   : >> { %16166 = vmatmul.mubr.msk.f32.gmra.mrb[30].mxu1 %vm560_vm2, %v20197_v40  ;;  %3016 = vmatprep.mubr.f32.mxu0 %v23035_v35 }
 0x3d4   : >> { %3333 = vmatprep.mubr.f32.mxu1 %v23035_v35 }
 0x3d6   : >> { %16162 = vmatmul.mubr.msk.f32.gmra.mrb[30].mxu0 %vm560_vm2, %v20197_v40 }
 0x3d7   : >> { %3256 = vmatprep.mubr.f32.mxu0 %v23035_v35 }
 0x441   : >> { %v2335_v53 = vpop.f32.mrb[20].mxu1 }
 0x442   : >> { %v2336_v41 = vadd.f32 %v2335_v53, %v19988_v19  ;;  %v2337_v26 = vpop.f32.mrb[21].mxu1 }
 0x443   : >> { %v2338_v46 = vadd.f32 %v2337_v26, %v19988_v19  ;;  %v2258_v9 = vpop.f32.mrb[20].mxu0 }
 0x444   : >> { %v20210_v8 = vadd.f32 %v19298_v48, %v2336_v41  ;;  %v2259_v18 = vadd.f32 %v2258_v9, %v19988_v19  ;;  %v2260_v51 = vpop.f32.mrb[21].mxu0  ;;  %v20254_v41 = vpop.permute.xlu0 %2661 }
 0x445   : >> { %v20213_v23 = vadd.f32 %v19299_v12, %v2338_v46  ;;  %v2261_v50 = vadd.f32 %v2260_v51, %v19988_v19  ;;  %v2341_v45 = vpop.f32.mrb[22].mxu1  ;;  %v20256_v48 = vpop.permute.xlu1 %2646 }
 0x446   : >> { %v20216_v32 = vadd.f32 %v19300_v3, %v2259_v18  ;;  %v2342_v0 = vadd.f32 %v2341_v45, %v19996_v55  ;;  %v2343_v20 = vpop.f32.mrb[23].mxu1 }
 0x447   : >> { %v20219_v21 = vadd.f32 %v19301_v24, %v2261_v50  ;;  %v2344_v27 = vadd.f32 %v2343_v20, %v19996_v55  ;;  %v2264_v28 = vpop.f32.mrb[22].mxu0  ;;  %v18291_v30 = vpack.i.bf16 %v20213_v23, %v20210_v8 }
 0x448   : >> { %v20224_v49 = vadd.f32 %v19302_v37, %v2342_v0  ;;  %v2265_v19 = vadd.f32 %v2264_v28, %v19996_v55  ;;  %v2266_v62 = vpop.f32.mrb[23].mxu0 }
 0x449   : >> { %v20227_v11 = vadd.f32 %v19303_v10, %v2344_v27  ;;  %v2267_v14 = vadd.f32 %v2266_v62, %v19996_v55  ;;  %18292 = vrot.lane.b32.xlu0 %v18291_v30, %s19385_s17  ;;  %v18286_v16 = vpack.i.bf16 %v20219_v21, %v20216_v32  ;;  %v3367_v55 = vld [vmem:[#allocation2 + $0x98] sm:$0xff]  ;;  %v20262_v27 = vpop.permute.xlu0 %2651 }
 0x44a   : >> { %v20233_v38 = vadd.f32 %v19304_v17, %v2265_v19  ;;  %v18306_v42 = vpack.i.bf16 %v3367_v55, %v3362_v1 }
 0x44b   : >> { %v20235_v36 = vadd.f32 %v19305_v33, %v2267_v14  ;;  %18287 = vrot.lane.b32.xlu1 %v18286_v16, %s19385_s17  ;;  %v18301_v5 = vpack.i.bf16 %v20227_v11, %v20224_v49 }
 0x44d   : >> { %18302 = vrot.lane.b32.xlu0 %v18301_v5, %s19385_s17  ;;  %v18296_v31 = vpack.i.bf16 %v20235_v36, %v20233_v38 }
 0x44f   : >> { %18297 = vrot.lane.b32.xlu1 %v18296_v31, %s19385_s17 }
 0x451   : >> { %18312 = vrot.lane.b32.xlu0 %v18286_v16, %s19381_s26 }
 0x453   : >> { %18307 = vrot.lane.b32.xlu1 %v18306_v42, %s19385_s17 }
 0x455   : >> { %18322 = vrot.lane.b32.xlu0 %v18296_v31, %s19381_s26 }
 0x457   : >> { %18317 = vrot.lane.b32.xlu1 %v18291_v30, %s19381_s26 }
 0x459   : >> { %18332 = vrot.lane.b32.xlu0 %v18306_v42, %s19381_s26 }
 0x45b   : >> { %18327 = vrot.lane.b32.xlu1 %v18301_v5, %s19381_s26  ;;  %s19386_s26 = smov 8  }
 0x45d   : >> { %3183 = vperm.xlu0 %18184, %v16142_v56  }
 0x45f   : >> { %3178 = vperm.xlu1 %18185, %v16141_v54  }
 0x49a   : >> { %v3089_v61 = vpop.f32.mrb[24].mxu1 }
 0x49b   : >> { %v3091_v53 = vpop.f32.mrb[25].mxu1  ;;  %v17343_v51 = vadd.f32 %v3089_v61, %v20256_v48 }
 0x49c   : >> { %v17344_v12 = vadd.f32 %v3091_v53, %v20256_v48 }
 0x49d   : >> { %v3000_v26 = vpop.f32.mrb[24].mxu0  ;;  %18850 = vtanh.f32 %v17343_v51 }
 0x49e   : >> { %v3095_v46 = vpop.f32.mrb[26].mxu1  ;;  %v3002_v9 = vpop.f32.mrb[25].mxu0  ;;  %v17335_v45 = vadd.f32 %v3000_v26, %v20256_v48  ;;  %18852 = vtanh.f32 %v17344_v12 }
 0x49f   : >> { %v3097_v18 = vpop.f32.mrb[27].mxu1  ;;  %v17345_v30 = vadd.f32 %v3095_v46, %v20262_v27  ;;  %v17336_v46 = vadd.f32 %v3002_v9, %v20256_v48 }
 0x4a0   : >> { %18854 = vtanh.f32 %v17335_v45  ;;  %v17346_v12 = vadd.f32 %v3097_v18, %v20262_v27 }
 0x4a1   : >> { %v3006_v50 = vpop.f32.mrb[26].mxu0 }
 0x4a2   : >> { %v3101_v3 = vpop.f32.mrb[28].mxu1  ;;  %v3008_v0 = vpop.f32.mrb[27].mxu0 }
 0x4a3   : >> { %v17347_v20 = vadd.f32 %v3101_v3, %v20252_v52  ;;  %v3103_v24 = vpop.f32.mrb[29].mxu1 }
 0x4a4   : >> { %v17348_v28 = vadd.f32 %v3103_v24, %v20252_v52 }
 0x4a5   : >> { %v3130_v37 = vmul.f32 0.5, %v17347_v20  ;;  %v3012_v19 = vpop.f32.mrb[28].mxu0  ;;  %v17337_v20 = vadd.f32 %v3006_v50, %v20262_v27 }
 0x4a6   : >> { %v3131_v62 = vmul.f32 0.5, %v17348_v28  ;;  %v17339_v10 = vadd.f32 %v3012_v19, %v20252_v52  ;;  %v3107_v14 = vpop.f32.mrb[30].mxu1  ;;  %v3014_v16 = vpop.f32.mrb[29].mxu0  ;;  %v17338_v28 = vadd.f32 %v3008_v0, %v20262_v27 }
 0x4a7   : >> { %18856 = vtanh.f32 %v3130_v37  ;;  %v17349_v17 = vadd.f32 %v3107_v14, %v20254_v41  ;;  %v17340_v33 = vadd.f32 %v3014_v16, %v20252_v52  ;;  %v3109_v5 = vpop.f32.mrb[31].mxu1  ;;  %v18851_v3 = vpop.eup %18850 }
 0x4a8   : >> { %18858 = vtanh.f32 %v3131_v62  ;;  %v3128_v1 = vmul.f32 0.5, %v17339_v10  ;;  %v17350_v55 = vadd.f32 %v3109_v5, %v20254_v41  ;;  %v18853_v24 = vpop.eup %18852 }
 0x4a9   : >> { %18860 = vtanh.f32 %v17345_v30  ;;  %v3134_v31 = vmul.f32 0.5, %v17349_v17  ;;  %v3129_v42 = vmul.f32 0.5, %v17340_v33  ;;  %v3018_v56 = vpop.f32.mrb[30].mxu0 }
 0x4aa   : >> { %18862 = vtanh.f32 %v3128_v1  ;;  %v3135_v54 = vmul.f32 0.5, %v17350_v55  ;;  %v17341_v61 = vadd.f32 %v3018_v56, %v20254_v41  ;;  %v3020_v53 = vpop.f32.mrb[31].mxu0  ;;  %v18855_v30 = vpop.eup %18854 }
 0x4ab   : >> { %18864 = vtanh.f32 %v3134_v31  ;;  %v17342_v26 = vadd.f32 %v3020_v53, %v20254_v41 }
 0x4ac   : >> { %18866 = vtanh.f32 %v3129_v42  ;;  %v3132_v51 = vmul.f32 0.5, %v17341_v61 }
 0x4ad   : >> { %18868 = vtanh.f32 %v3135_v54  ;;  %v3133_v45 = vmul.f32 0.5, %v17342_v26 }
 0x4ae   : >> { %18870 = vtanh.f32 %v3132_v51 }
 0x4af   : >> { %18872 = vtanh.f32 %v3133_v45 }
 0x4b0   : >> { %18874 = vtanh.f32 %v17336_v46 }
 0x4b1   : >> { %v18857_v37 = vpop.eup %18856  ;;  %18876 = vtanh.f32 %v17346_v12 }
 0x4b2   : >> { %v18859_v19 = vpop.eup %18858  ;;  %18878 = vtanh.f32 %v17337_v20  ;;  %v3146_v9 = vmul.f32 0.5, %v18857_v37 }
 0x4b3   : >> { %v18861_v62 = vpop.eup %18860  ;;  %18880 = vtanh.f32 %v17338_v28  ;;  %v3147_v18 = vmul.f32 0.5, %v18859_v19 }
 0x4b4   : >> { %v18863_v10 = vpop.eup %18862  ;;  %v3154_v14 = vadd.f32 0.5, %v3146_v9 }
 0x4b5   : >> { %v18865_v16 = vpop.eup %18864  ;;  %v3155_v17 = vadd.f32 0.5, %v3147_v18  ;;  %v3144_v50 = vmul.f32 0.5, %v18863_v10 }
 0x4b6   : >> { %v18867_v33 = vpop.eup %18866  ;;  %v3170_v5 = vmul.f32 %v18851_v3, %v3154_v14  ;;  %v3150_v1 = vmul.f32 0.5, %v18865_v16 }
 0x4b7   : >> { %v18869_v0 = vpop.eup %18868  ;;  %v3152_v55 = vadd.f32 0.5, %v3144_v50  ;;  %v3145_v31 = vmul.f32 0.5, %v18867_v33  ;;  %v3171_v42 = vmul.f32 %v18853_v24, %v3155_v17 }
 0x4b8   : >> { %v18871_v56 = vpop.eup %18870  ;;  %v3158_v54 = vadd.f32 0.5, %v3150_v1  ;;  %v3151_v61 = vmul.f32 0.5, %v18869_v0 }
 0x4b9   : >> { %v18873_v53 = vpop.eup %18872  ;;  %v3168_v26 = vmul.f32 %v18855_v30, %v3152_v55  ;;  %v3153_v46 = vadd.f32 0.5, %v3145_v31  ;;  %v3148_v51 = vmul.f32 0.5, %v18871_v56 }
 0x4ba   : >> { %v18875_v12 = vpop.eup %18874  ;;  %v3174_v45 = vmul.f32 %v18861_v62, %v3158_v54  ;;  %v3159_v20 = vadd.f32 0.5, %v3151_v61  ;;  %v3149_v28 = vmul.f32 0.5, %v18873_v53 }
 0x4bb   : >> { %v18877_v37 = vpop.eup %18876  ;;  %v3156_v19 = vadd.f32 0.5, %v3148_v51  ;;  %v18293_v9 = vpop.permute.xlu0 %18292  ;;  %v3169_v3 = vmul.f32 %v18875_v12, %v3153_v46  ;;  %v20277_v51 = vld [vmem:[%s19859_s27 + $0x10] sm:$0xff] }
 0x4bc   : >> { %v18879_v18 = vpop.eup %18878  ;;  %v3157_v10 = vadd.f32 0.5, %v3149_v28  ;;  %v3175_v14 = vmul.f32 %v18877_v37, %v3159_v20  ;;  %v16869_v50 = vpack.c.bf16 %v3174_v45, %v3170_v5  ;;  %v18295_v33 = vunpack.i.h.bf16 %v18293_v9 }
 0x4bd   : >> { %v18881_v16 = vpop.eup %18880  ;;  %v3172_v24 = vmul.f32 %v18879_v18, %v3156_v19  ;;  %v18288_v17 = vpop.permute.xlu1 %18287  ;;  %v18294_v30 = vunpack.i.l.bf16 %v18293_v9  ;;  %v20289_v18 = vld [vmem:[%s19859_s27 + $0x18] sm:$0xff] }
 0x4be   : >> { %v16867_v1 = vpack.c.bf16 %v3175_v14, %v3171_v42  ;;  %v3173_v0 = vmul.f32 %v18881_v16, %v3157_v10  ;;  %v18290_v55 = vunpack.i.h.bf16 %v18288_v17  ;;  %v18289_v56 = vunpack.i.l.bf16 %v18288_v17 }
 0x4bf   : >> { %v18303_v62 = vpop.permute.xlu0 %18302  ;;  %v16865_v31 = vpack.c.bf16 %v3172_v24, %v3168_v26  ;;  %v3405_v5 = vsel %vm2437_vm3, %v18294_v30, %v18295_v33 }
 0x4c0   : >> { %v18305_v54 = vunpack.i.h.bf16 %v18303_v62  ;;  %v18304_v61 = vunpack.i.l.bf16 %v18303_v62  ;;  %16868 = vmatprep.subr.bf16.mxu1 %v16867_v1  ;;  %v16863_v53 = vpack.c.bf16 %v3173_v0, %v3169_v3  ;;  %v3404_v28 = vsel %vm2437_vm3, %v18290_v55, %v18294_v30 }
 0x4c1   : >> { %16870 = vmatpush1.bf16.msra.mxu1 %v16869_v50  ;;  %v18298_v46 = vpop.permute.xlu1 %18297  ;;  %v3403_v19 = vsel %vm2437_vm3, %v18289_v56, %v18290_v55 }
 0x4c2   : >> { %v18300_v12 = vunpack.i.h.bf16 %v18298_v46  ;;  %v18299_v20 = vunpack.i.l.bf16 %v18298_v46  ;;  %16864 = vmatprep.subr.bf16.mxu0 %v16863_v53  ;;  %v3409_v42 = vsel %vm2437_vm3, %v18304_v61, %v18305_v54 }
 0x4c3   : >> { %v18313_v45 = vpop.permute.xlu0 %18312  ;;  %16866 = vmatpush1.bf16.msra.mxu0 %v16865_v31  ;;  %v16875_v26 = vpack.c.bf16 %v3409_v42, %v3405_v5 }
 0x4c4   : >> { %v3408_v37 = vsel %vm2437_vm3, %v18300_v12, %v18304_v61  ;;  %16169 = vmatmul.mubr.msk.f32.vlgmr.msra.gmra.mrb[32].mxu1 %vm560_vm2, %v20277_v51  ;;  %v3407_v9 = vsel %vm2437_vm3, %v18299_v20, %v18300_v12  ;;  %v18315_v16 = vunpack.i.h.bf16 %v18313_v45  ;;  %v18314_v24 = vunpack.i.l.bf16 %v18313_v45 }
 0x4c5   : >> { %16876 = vmatprep.subr.bf16.mxu1 %v16875_v26  ;;  %v18308_v3 = vpop.permute.xlu1 %18307  ;;  %3339 = vmatprep.mubr.f32.mxu1 %v23035_v35  ;;  %v16871_v10 = vpack.c.bf16 %v3407_v9, %v3403_v19  ;;  %v16877_v14 = vpack.c.bf16 %v3408_v37, %v3404_v28  ;;  %v16887_v9 = vpack.c.bf16 %v20235_v36, %v20219_v21 }
 0x4c6   : >> { %v18310_v17 = vunpack.i.h.bf16 %v18308_v3  ;;  %v18309_v50 = vunpack.i.l.bf16 %v18308_v3  ;;  %16167 = vmatmul.mubr.msk.f32.vlgmr.msra.gmra.mrb[32].mxu0 %vm560_vm2, %v20277_v51  ;;  %v3633_v54 = vsel %vm543_vm0, %v18314_v24, %v18315_v16 }
 0x4c7   : >> { %v18323_v33 = vpop.permute.xlu0 %18322  ;;  %16872 = vmatprep.subr.bf16.mxu0 %v16871_v10  ;;  %16878 = vmatpush1.bf16.msra.mxu1 %v16877_v14 }
 0x4c8   : >> { %v3402_v30 = vsel %vm2437_vm3, %v18309_v50, %v18289_v56  ;;  %v3406_v1 = vsel %vm2437_vm3, %v18310_v17, %v18299_v20  ;;  %v18325_v0 = vunpack.i.h.bf16 %v18323_v33  ;;  %v18324_v55 = vunpack.i.l.bf16 %v18323_v33  ;;  %16170 = vmatmul.mubr.msk.f32.gmra.mrb[34].mxu1 %vm560_vm2, %v20289_v18  ;;  %3262 = vmatprep.mubr.f32.mxu0 %v23035_v35 }
 0x4c9   : >> { %v18318_v62 = vpop.permute.xlu1 %18317  ;;  %3571 = vmatprep.mubr.f32.mxu1 %v23035_v35  ;;  %v16873_v31 = vpack.c.bf16 %v3406_v1, %v3402_v30 }
 0x4ca   : >> { %16168 = vmatmul.mubr.msk.f32.gmra.mrb[34].mxu0 %vm560_vm2, %v20289_v18  ;;  %v3637_v56 = vsel %vm543_vm0, %v18324_v55, %v18325_v0  ;;  %v18320_v46 = vunpack.i.h.bf16 %v18318_v62  ;;  %v18319_v12 = vunpack.i.l.bf16 %v18318_v62 }
 0x4cb   : >> { %v18333_v61 = vpop.permute.xlu0 %18332  ;;  %16874 = vmatpush1.bf16.msra.mxu0 %v16873_v31  ;;  %v16879_v53 = vpack.c.bf16 %v3637_v56, %v3633_v54  ;;  %3482 = vmatprep.mubr.f32.mxu0 %v23035_v35 }
 0x4cc   : >> { %v18335_v20 = vunpack.i.h.bf16 %v18333_v61  ;;  %v18334_v5 = vunpack.i.l.bf16 %v18333_v61  ;;  %16175 = vmatmul.mubr.msk.f32.vlgmr.msra.gmra.mrb[36].mxu1 %vm560_vm2, %v20083_v47  ;;  %v3634_v3 = vsel %vm543_vm0, %v18315_v16, %v18319_v12  ;;  %v3635_v14 = vsel %vm543_vm0, %v18319_v12, %v18320_v46 }
 0x4cd   : >> { %16880 = vmatprep.subr.bf16.mxu0 %v16879_v53  ;;  %v18328_v42 = vpop.permute.xlu1 %18327  ;;  %3577 = vmatprep.mubr.f32.mxu1 %v23035_v35  ;;  %v16891_v16 = vpack.c.bf16 %v20227_v11, %v20213_v23 }
 0x4ce   : >> { %v3632_v45 = vsel %vm543_vm0, %v18334_v5, %v18314_v24  ;;  %v3636_v26 = vsel %vm543_vm0, %v18335_v20, %v18324_v55  ;;  %v18330_v28 = vunpack.i.h.bf16 %v18328_v42  ;;  %v18329_v37 = vunpack.i.l.bf16 %v18328_v42  ;;  %16171 = vmatmul.mubr.msk.f32.vlgmr.msra.gmra.mrb[36].mxu0 %vm560_vm2, %v20083_v47  ;;  %v4289_v20 = vld [vmem:[#allocation2 + $0x8] sm:$0xff]  ;;  %v4294_v5 = vld [vmem:[#allocation2 + $0x38] sm:$0xff] }
 0x4cf   : >> { %v16881_v19 = vpack.c.bf16 %v3636_v26, %v3632_v45  ;;  %3488 = vmatprep.mubr.f32.mxu0 %v23035_v35  ;;  %v16223_v45 = vld [vmem:[%s19589_s15 + $0x50] sm:$0xff]  ;;  %v16222_v26 = vld [vmem:[%s19589_s15 + $0x48] sm:$0xff] }
 0x4d0   : >> { %v3638_v10 = vsel %vm543_vm0, %v18325_v0, %v18329_v37  ;;  %16176 = vmatmul.mubr.msk.f32.gmra.mrb[38].mxu1 %vm560_vm2, %v20093_v29  ;;  %v3639_v24 = vsel %vm543_vm0, %v18329_v37, %v18330_v28  ;;  %v16221_v28 = vld [vmem:[%s19589_s15 + $0x40] sm:$0xff] }
 0x4d1   : >> { %16882 = vmatpush1.bf16.msra.mxu0 %v16881_v19  ;;  %3583 = vmatprep.mubr.f32.mxu1 %v23035_v35  ;;  %v16883_v47 = vpack.c.bf16 %v3639_v24, %v3635_v14  ;;  %v16885_v17 = vpack.c.bf16 %v3638_v10, %v3634_v3 }
 0x4d2   : >> { %16888 = vmatprep.subr.bf16.mxu0 %v16887_v9  ;;  %16172 = vmatmul.mubr.msk.f32.gmra.mrb[38].mxu0 %vm560_vm2, %v20093_v29  ;;  %v16893_v29 = vpack.c.bf16 %v20224_v49, %v20210_v8 }
 0x4d3   : >> { %16884 = vmatprep.subr.bf16.mxu1 %v16883_v47  ;;  %3494 = vmatprep.mubr.f32.mxu0 %v23035_v35 }
 0x4d4   : >> { %16177 = vmatmul.mubr.msk.f32.gmra.mrb[40].mxu1 %vm560_vm2, %v20108_v60 }
 0x4d5   : >> { %16886 = vmatpush1.bf16.msra.mxu1 %v16885_v17  ;;  %3589 = vmatprep.mubr.f32.mxu1 %v23035_v35 }
 0x4d6   : >> { %16892 = vmatprep.subr.bf16.mxu1 %v16891_v16  ;;  %16173 = vmatmul.mubr.msk.f32.gmra.mrb[40].mxu0 %vm560_vm2, %v20108_v60  ;;  %v16889_v60 = vpack.c.bf16 %v20233_v38, %v20216_v32 }
 0x4d7   : >> { %3500 = vmatprep.mubr.f32.mxu0 %v23035_v35 }
 0x4d8   : >> { %16178 = vmatmul.mubr.msk.f32.gmra.mrb[42].mxu1 %vm560_vm2, %v20120_v6 }
 0x4d9   : >> { %3801 = vmatprep.mubr.f32.mxu1 %v23035_v35 }
 0x4da   : >> { %16174 = vmatmul.mubr.msk.f32.gmra.mrb[42].mxu0 %vm560_vm2, %v20120_v6 }
 0x4db   : >> { %3712 = vmatprep.mubr.f32.mxu0 %v23035_v35 }
 0x4dc   : >> { %16183 = vmatmul.mubr.msk.f32.vlgmr.msra.gmra.mrb[36].mxu1 %vm560_vm2, %v20130_v2  ;;  %v20398_v33 = vpop.permute.xlu0 %3183 }
 0x4dd   : >> { %16894 = vmatpush1.bf16.msra.mxu1 %v16893_v29  ;;  %3807 = vmatprep.mubr.f32.mxu1 %v23035_v35 }
 0x4de   : >> { %16179 = vmatmul.mubr.msk.f32.vlgmr.msra.gmra.mrb[36].mxu0 %vm560_vm2, %v20130_v2  ;;  %v20390_v6 = vpop.permute.xlu1 %3178 }
 0x4df   : >> { %16890 = vmatpush1.bf16.msra.mxu0 %v16889_v60  ;;  %3718 = vmatprep.mubr.f32.mxu0 %v23035_v35 }
 0x4e0   : >> { %16184 = vmatmul.mubr.msk.f32.gmra.mrb[38].mxu1 %vm560_vm2, %v20141_v63 }
 0x4e1   : >> { %3813 = vmatprep.mubr.f32.mxu1 %v23035_v35 }
 0x4e2   : >> { %16180 = vmatmul.mubr.msk.f32.gmra.mrb[38].mxu0 %vm560_vm2, %v20141_v63 }
 0x4e3   : >> { %3724 = vmatprep.mubr.f32.mxu0 %v23035_v35 }
 0x4e4   : >> { %16185 = vmatmul.mubr.msk.f32.gmra.mrb[40].mxu1 %vm560_vm2, %v20152_v15 }
 0x4e5   : >> { %3819 = vmatprep.mubr.f32.mxu1 %v23035_v35 }
 0x4e6   : >> { %16181 = vmatmul.mubr.msk.f32.gmra.mrb[40].mxu0 %vm560_vm2, %v20152_v15 }
 0x4e7   : >> { %3730 = vmatprep.mubr.f32.mxu0 %v23035_v35 }
 0x4e8   : >> { %16186 = vmatmul.mubr.msk.f32.gmra.mrb[42].mxu1 %vm560_vm2, %v20161_v43 }
 0x4e9   : >> { %3995 = vmatprep.mubr.f32.mxu1 %v23035_v35 }
 0x4ea   : >> { %16182 = vmatmul.mubr.msk.f32.gmra.mrb[42].mxu0 %vm560_vm2, %v20161_v43 }
 0x4eb   : >> { %3906 = vmatprep.mubr.f32.mxu0 %v23035_v35 }
 0x4ec   : >> { %16191 = vmatmul.mubr.msk.f32.vlgmr.msra.gmra.mrb[36].mxu1 %vm560_vm2, %v20170_v39 }
 0x4ed   : >> { %4001 = vmatprep.mubr.f32.mxu1 %v23035_v35 }
 0x4ee   : >> { %16187 = vmatmul.mubr.msk.f32.vlgmr.msra.gmra.mrb[36].mxu0 %vm560_vm2, %v20170_v39 }
 0x4ef   : >> { %3912 = vmatprep.mubr.f32.mxu0 %v23035_v35 }
 0x4f0   : >> { %16192 = vmatmul.mubr.msk.f32.gmra.mrb[38].mxu1 %vm560_vm2, %v20179_v44 }
 0x4f1   : >> { %4007 = vmatprep.mubr.f32.mxu1 %v23035_v35 }
 0x4f2   : >> { %16188 = vmatmul.mubr.msk.f32.gmra.mrb[38].mxu0 %vm560_vm2, %v20179_v44 }
 0x4f3   : >> { %3918 = vmatprep.mubr.f32.mxu0 %v23035_v35 }
 0x4f4   : >> { %16193 = vmatmul.mubr.msk.f32.gmra.mrb[40].mxu1 %vm560_vm2, %v20188_v7 }
 0x4f5   : >> { %4013 = vmatprep.mubr.f32.mxu1 %v23035_v35 }
 0x4f6   : >> { %16189 = vmatmul.mubr.msk.f32.gmra.mrb[40].mxu0 %vm560_vm2, %v20188_v7 }
 0x4f7   : >> { %3924 = vmatprep.mubr.f32.mxu0 %v23035_v35 }
 0x4f8   : >> { %16194 = vmatmul.mubr.msk.f32.gmra.mrb[42].mxu1 %vm560_vm2, %v20197_v40 }
 0x4f9   : >> { %4225 = vmatprep.mubr.f32.mxu1 %v23035_v35 }
 0x4fa   : >> { %16190 = vmatmul.mubr.msk.f32.gmra.mrb[42].mxu0 %vm560_vm2, %v20197_v40 }
 0x4fb   : >> { %4148 = vmatprep.mubr.f32.mxu0 %v23035_v35 }
 0x597   : >> { %v3335_v2 = vpop.f32.mrb[32].mxu1 }
 0x598   : >> { %v3336_v63 = vadd.f32 %v3335_v2, %v20390_v6  ;;  %v3337_v15 = vpop.f32.mrb[33].mxu1 }
 0x599   : >> { %v3338_v43 = vadd.f32 %v3337_v15, %v20390_v6  ;;  %v3258_v39 = vpop.f32.mrb[32].mxu0 }
 0x59a   : >> { %v20395_v44 = vadd.f32 %v3336_v63, %v19993_v22  ;;  %v3259_v7 = vadd.f32 %v3258_v39, %v20390_v6  ;;  %v3260_v50 = vpop.f32.mrb[33].mxu0 }
 0x59b   : >> { %v20401_v40 = vadd.f32 %v3338_v43, %v19999_v57  ;;  %v3341_v30 = vpop.f32.mrb[34].mxu1  ;;  %v3261_v1 = vadd.f32 %v3260_v50, %v20390_v6 }
 0x59c   : >> { %v20405_v0 = vadd.f32 %v3259_v7, %v20003_v13  ;;  %v3342_v55 = vadd.f32 %v3341_v30, %v20398_v33  ;;  %v3343_v62 = vpop.f32.mrb[35].mxu1 }
 0x59d   : >> { %v20409_v22 = vadd.f32 %v3261_v1, %v20007_v4  ;;  %v3344_v31 = vadd.f32 %v3343_v62, %v20398_v33  ;;  %v3264_v54 = vpop.f32.mrb[34].mxu0  ;;  %v18341_v56 = vpack.i.bf16 %v20401_v40, %v20395_v44 }
 0x59e   : >> { %v20415_v57 = vadd.f32 %v3342_v55, %v20013_v59  ;;  %v3265_v61 = vadd.f32 %v3264_v54, %v20398_v33  ;;  %v3266_v53 = vpop.f32.mrb[35].mxu0 }
 0x59f   : >> { %v20419_v13 = vadd.f32 %v3344_v31, %v20017_v34  ;;  %v3267_v46 = vadd.f32 %v3266_v53, %v20398_v33  ;;  %18342 = vrot.lane.b32.xlu0 %v18341_v56, %s19386_s26  ;;  %v18336_v4 = vpack.i.bf16 %v20409_v22, %v20405_v0 }
 0x5a0   : >> { %v20426_v12 = vadd.f32 %v3265_v61, %v20024_v58  ;;  %v18356_v58 = vpack.i.bf16 %v4294_v5, %v4289_v20 }
 0x5a1   : >> { %v20429_v59 = vadd.f32 %v3267_v46, %v20027_v25  ;;  %v18351_v34 = vpack.i.bf16 %v20419_v13, %v20415_v57  ;;  %18337 = vrot.lane.b32.xlu1 %v18336_v4, %s19386_s26  ;;  %v16224_v25 = vld [vmem:[%s19589_s15 + $0x58] sm:$0xff] }
 0x5a3   : >> { %18352 = vrot.lane.b32.xlu0 %v18351_v34, %s19386_s26  ;;  %v18346_v42 = vpack.i.bf16 %v20429_v59, %v20426_v12 }
 0x5a5   : >> { %18347 = vrot.lane.b32.xlu1 %v18346_v42, %s19386_s26 }
 0x5a7   : >> { %18362 = vrot.lane.b32.xlu0 %v18336_v4, %s19385_s17 }
 0x5a9   : >> { %18357 = vrot.lane.b32.xlu1 %v18356_v58, %s19386_s26 }
 0x5ab   : >> { %18372 = vrot.lane.b32.xlu0 %v18346_v42, %s19385_s17 }
 0x5ad   : >> { %18367 = vrot.lane.b32.xlu1 %v18341_v56, %s19385_s17 }
 0x5af   : >> { %18382 = vrot.lane.b32.xlu0 %v18356_v58, %s19385_s17 }
 0x5b1   : >> { %18377 = vrot.lane.b32.xlu1 %v18351_v34, %s19385_s17 }
 0x5b3   : >> { %4553 = vperm.xlu0 %18184, %v16224_v25  }
 0x5b5   : >> { %4548 = vperm.xlu1 %18185, %v16223_v45  }
 0x5b7   : >> { %4543 = vperm.xlu0 %18184, %v16222_v26  }
 0x5b9   : >> { %4538 = vperm.xlu1 %18185, %v16221_v28  }
 0x5bf   : >> { %v3997_v37 = vpop.f32.mrb[36].mxu1 }
 0x5c0   : >> { %v3999_v19 = vpop.f32.mrb[37].mxu1  ;;  %v17359_v14 = vadd.f32 %v3997_v37, %v20256_v48 }
 0x5c1   : >> { %v3908_v9 = vpop.f32.mrb[36].mxu0  ;;  %v17360_v47 = vadd.f32 %v3999_v19, %v20256_v48 }
 0x5c2   : >> { %v3910_v3 = vpop.f32.mrb[37].mxu0  ;;  %v17351_v16 = vadd.f32 %v3908_v9, %v20256_v48  ;;  %18882 = vtanh.f32 %v17359_v14 }
 0x5c3   : >> { %v4003_v10 = vpop.f32.mrb[38].mxu1  ;;  %v17352_v60 = vadd.f32 %v3910_v3, %v20256_v48  ;;  %18884 = vtanh.f32 %v17360_v47 }
 0x5c4   : >> { %v4005_v24 = vpop.f32.mrb[39].mxu1  ;;  %18886 = vtanh.f32 %v17351_v16 }
 0x5c5   : >> { %v3914_v17 = vpop.f32.mrb[38].mxu0  ;;  %18888 = vtanh.f32 %v17352_v60  ;;  %v17362_v58 = vadd.f32 %v4005_v24, %v20262_v27 }
 0x5c6   : >> { %v3916_v29 = vpop.f32.mrb[39].mxu0  ;;  %v17353_v26 = vadd.f32 %v3914_v17, %v20262_v27 }
 0x5c7   : >> { %v4009_v2 = vpop.f32.mrb[40].mxu1  ;;  %v17354_v37 = vadd.f32 %v3916_v29, %v20262_v27 }
 0x5c8   : >> { %v17363_v63 = vadd.f32 %v4009_v2, %v20252_v52  ;;  %v4011_v15 = vpop.f32.mrb[41].mxu1 }
 0x5c9   : >> { %v17364_v43 = vadd.f32 %v4011_v15, %v20252_v52  ;;  %v3920_v39 = vpop.f32.mrb[40].mxu0 }
 0x5ca   : >> { %v4038_v7 = vmul.f32 0.5, %v17363_v63  ;;  %v17355_v50 = vadd.f32 %v3920_v39, %v20252_v52  ;;  %v3922_v30 = vpop.f32.mrb[41].mxu0 }
 0x5cb   : >> { %v4039_v1 = vmul.f32 0.5, %v17364_v43  ;;  %v4015_v55 = vpop.f32.mrb[42].mxu1  ;;  %v17356_v62 = vadd.f32 %v3922_v30, %v20252_v52  ;;  %v17361_v52 = vadd.f32 %v4003_v10, %v20262_v27 }
 0x5cc   : >> { %18890 = vtanh.f32 %v4038_v7  ;;  %v4036_v48 = vmul.f32 0.5, %v17355_v50  ;;  %v17365_v31 = vadd.f32 %v4015_v55, %v20254_v41  ;;  %v4017_v54 = vpop.f32.mrb[43].mxu1  ;;  %v18883_v45 = vpop.eup %18882 }
 0x5cd   : >> { %18892 = vtanh.f32 %v4039_v1  ;;  %v4037_v56 = vmul.f32 0.5, %v17356_v62  ;;  %v17366_v61 = vadd.f32 %v4017_v54, %v20254_v41  ;;  %v3926_v53 = vpop.f32.mrb[42].mxu0  ;;  %v18885_v28 = vpop.eup %18884 }
 0x5ce   : >> { %18894 = vtanh.f32 %v4036_v48  ;;  %v4042_v46 = vmul.f32 0.5, %v17365_v31  ;;  %v17357_v4 = vadd.f32 %v3926_v53, %v20254_v41  ;;  %v3928_v34 = vpop.f32.mrb[43].mxu0  ;;  %v18887_v19 = vpop.eup %18886 }
 0x5cf   : >> { %18896 = vtanh.f32 %v4037_v56  ;;  %v4043_v20 = vmul.f32 0.5, %v17366_v61  ;;  %v17358_v5 = vadd.f32 %v3928_v34, %v20254_v41  ;;  %v18889_v9 = vpop.eup %18888 }
 0x5d0   : >> { %18898 = vtanh.f32 %v4042_v46  ;;  %v4040_v42 = vmul.f32 0.5, %v17357_v4 }
 0x5d1   : >> { %18900 = vtanh.f32 %v4043_v20  ;;  %v4041_v25 = vmul.f32 0.5, %v17358_v5 }
 0x5d2   : >> { %18902 = vtanh.f32 %v4040_v42 }
 0x5d3   : >> { %18904 = vtanh.f32 %v4041_v25 }
 0x5d4   : >> { %18906 = vtanh.f32 %v17361_v52 }
 0x5d5   : >> { %18908 = vtanh.f32 %v17362_v58 }
 0x5d6   : >> { %v18891_v41 = vpop.eup %18890  ;;  %18910 = vtanh.f32 %v17353_v26 }
 0x5d7   : >> { %v18893_v3 = vpop.eup %18892  ;;  %v4054_v10 = vmul.f32 0.5, %v18891_v41  ;;  %18912 = vtanh.f32 %v17354_v37 }
 0x5d8   : >> { %v18895_v14 = vpop.eup %18894  ;;  %v4055_v24 = vmul.f32 0.5, %v18893_v3 }
 0x5d9   : >> { %v18897_v47 = vpop.eup %18896  ;;  %v4062_v16 = vadd.f32 0.5, %v4054_v10  ;;  %v4052_v60 = vmul.f32 0.5, %v18895_v14 }
 0x5da   : >> { %v18899_v17 = vpop.eup %18898  ;;  %v4063_v2 = vadd.f32 0.5, %v4055_v24  ;;  %v4053_v63 = vmul.f32 0.5, %v18897_v47 }
 0x5db   : >> { %v18901_v15 = vpop.eup %18900  ;;  %v4078_v27 = vmul.f32 %v18883_v45, %v4062_v16  ;;  %v4060_v29 = vadd.f32 0.5, %v4052_v60  ;;  %v4058_v43 = vmul.f32 0.5, %v18899_v17 }
 0x5dc   : >> { %v18903_v39 = vpop.eup %18902  ;;  %v4061_v7 = vadd.f32 0.5, %v4053_v63  ;;  %v4059_v50 = vmul.f32 0.5, %v18901_v15  ;;  %v4079_v30 = vmul.f32 %v18885_v28, %v4063_v2 }
 0x5dd   : >> { %v18905_v1 = vpop.eup %18904  ;;  %v4076_v55 = vmul.f32 %v18887_v19, %v4060_v29  ;;  %v4066_v62 = vadd.f32 0.5, %v4058_v43  ;;  %v4056_v48 = vmul.f32 0.5, %v18903_v39 }
 0x5de   : >> { %v18907_v31 = vpop.eup %18906  ;;  %v4067_v54 = vadd.f32 0.5, %v4059_v50  ;;  %v4057_v56 = vmul.f32 0.5, %v18905_v1  ;;  %v4077_v61 = vmul.f32 %v18889_v9, %v4061_v7 }
 0x5df   : >> { %v18909_v53 = vpop.eup %18908  ;;  %v4082_v46 = vmul.f32 %v18907_v31, %v4066_v62  ;;  %v4064_v4 = vadd.f32 0.5, %v4056_v48  ;;  %v20483_v31 = vld [vmem:[%s19649_s10 + $0xc0] sm:$0xff] }
 0x5e0   : >> { %v18911_v34 = vpop.eup %18910  ;;  %v4065_v20 = vadd.f32 0.5, %v4057_v56  ;;  %v4083_v5 = vmul.f32 %v18909_v53, %v4067_v54 }
 0x5e1   : >> { %v18913_v52 = vpop.eup %18912  ;;  %v4080_v42 = vmul.f32 %v18911_v34, %v4064_v4  ;;  %v16901_v58 = vpack.c.bf16 %v4082_v46, %v4078_v27 }
 0x5e2   : >> { %v16899_v25 = vpack.c.bf16 %v4083_v5, %v4079_v30  ;;  %v4081_v45 = vmul.f32 %v18913_v52, %v4065_v20 }
 0x5e3   : >> { %v16897_v26 = vpack.c.bf16 %v4080_v42, %v4076_v55  ;;  %v20493_v42 = vld [vmem:[%s19649_s10 + $0xc8] sm:$0xff] }
 0x5e4   : >> { %16900 = vmatprep.subr.bf16.mxu1 %v16899_v25  ;;  %v16895_v28 = vpack.c.bf16 %v4081_v45, %v4077_v61 }
 0x5e5   : >> { %16902 = vmatpush1.bf16.msra.mxu1 %v16901_v58 }
 0x5e6   : >> { %16896 = vmatprep.subr.bf16.mxu0 %v16895_v28 }
 0x5e7   : >> { %16898 = vmatpush1.bf16.msra.mxu0 %v16897_v26 }
 0x5e8   : >> { %16197 = vmatmul.mubr.msk.f32.vlgmr.msra.gmra.mrb[44].mxu1 %vm560_vm2, %v20277_v51 }
 0x5e9   : >> { %4231 = vmatprep.mubr.f32.mxu1 %v23035_v35 }
 0x5ea   : >> { %16195 = vmatmul.mubr.msk.f32.vlgmr.msra.gmra.mrb[44].mxu0 %vm560_vm2, %v20277_v51 }
 0x5eb   : >> { %4154 = vmatprep.mubr.f32.mxu0 %v23035_v35 }
 0x5ec   : >> { %16198 = vmatmul.mubr.msk.f32.gmra.mrb[46].mxu1 %vm560_vm2, %v20289_v18 }
 0x5ed   : >> { %4511 = vmatprep.mubr.f32.mxu1 %v23035_v35 }
 0x5ee   : >> { %16196 = vmatmul.mubr.msk.f32.gmra.mrb[46].mxu0 %vm560_vm2, %v20289_v18 }
 0x5ef   : >> { %4422 = vmatprep.mubr.f32.mxu0 %v23035_v35 }
 0x611   : >> { %v18343_v37 = vpop.permute.xlu0 %18342 }
 0x612   : >> { %v18345_v9 = vunpack.i.h.bf16 %v18343_v37  ;;  %v18344_v41 = vunpack.i.l.bf16 %v18343_v37 }
 0x613   : >> { %v18338_v19 = vpop.permute.xlu1 %18337 }
 0x614   : >> { %v18340_v14 = vunpack.i.h.bf16 %v18338_v19  ;;  %v18339_v24 = vunpack.i.l.bf16 %v18338_v19  ;;  %v4333_v17 = vsel %vm4329_vm4, %v18344_v41, %v18345_v9 }
 0x615   : >> { %v18353_v3 = vpop.permute.xlu0 %18352 }
 0x616   : >> { %v18355_v10 = vunpack.i.h.bf16 %v18353_v3  ;;  %v18354_v51 = vunpack.i.l.bf16 %v18353_v3  ;;  %v4332_v15 = vsel %vm4329_vm4, %v18340_v14, %v18344_v41  ;;  %v4331_v29 = vsel %vm4329_vm4, %v18339_v24, %v18340_v14 }
 0x617   : >> { %v18348_v47 = vpop.permute.xlu1 %18347 }
 0x618   : >> { %v18350_v16 = vunpack.i.h.bf16 %v18348_v47  ;;  %v18349_v60 = vunpack.i.l.bf16 %v18348_v47  ;;  %v4337_v2 = vsel %vm4329_vm4, %v18354_v51, %v18355_v10  ;;  %v16919_v10 = vpack.c.bf16 %v20429_v59, %v20409_v22 }
 0x619   : >> { %v18363_v18 = vpop.permute.xlu0 %18362  ;;  %v16907_v63 = vpack.c.bf16 %v4337_v2, %v4333_v17  ;;  %v16923_v2 = vpack.c.bf16 %v20419_v13, %v20401_v40 }
 0x61a   : >> { %v4336_v27 = vsel %vm4329_vm4, %v18350_v16, %v18354_v51  ;;  %v4335_v43 = vsel %vm4329_vm4, %v18349_v60, %v18350_v16  ;;  %v18365_v30 = vunpack.i.h.bf16 %v18363_v18  ;;  %v18364_v1 = vunpack.i.l.bf16 %v18363_v18  ;;  %v20520_v18 = vld [vmem:[%s19649_s10 + $0xd8] sm:$0xff] }
 0x61b   : >> { %16908 = vmatprep.subr.bf16.mxu1 %v16907_v63  ;;  %v18358_v39 = vpop.permute.xlu1 %18357  ;;  %v16903_v7 = vpack.c.bf16 %v4335_v43, %v4331_v29  ;;  %v16909_v50 = vpack.c.bf16 %v4336_v27, %v4332_v15  ;;  %v20530_v63 = vld [vmem:[%s19649_s10 + $0xe0] sm:$0xff]  ;;  %v16925_v15 = vpack.c.bf16 %v20415_v57, %v20395_v44  ;;  %v20541_v27 = vld [vmem:[%s19649_s10 + $0xe8] sm:$0xff]  ;;  %v16921_v29 = vpack.c.bf16 %v20426_v12, %v20405_v0  ;;  %v20552_v43 = vld [vmem:[%s19649_s10 + $0xf0] sm:$0xff] }
 0x61c   : >> { %v18360_v55 = vunpack.i.h.bf16 %v18358_v39  ;;  %v18359_v62 = vunpack.i.l.bf16 %v18358_v39  ;;  %v4593_v34 = vsel %vm2437_vm3, %v18364_v1, %v18365_v30  ;;  %v20561_v39 = vld [vmem:[%s19649_s10 + $0xf8] sm:$0xff] }
 0x61d   : >> { %v18373_v48 = vpop.permute.xlu0 %18372  ;;  %16904 = vmatprep.subr.bf16.mxu0 %v16903_v7  ;;  %16910 = vmatpush1.bf16.msra.mxu1 %v16909_v50  ;;  %v20570_v7 = vld [vmem:[%s19649_s10 + $0x100] sm:$0xff]  ;;  %v20579_v50 = vld [vmem:[%s19649_s10 + $0x108] sm:$0xff] }
 0x61e   : >> { %v18375_v54 = vunpack.i.h.bf16 %v18373_v48  ;;  %v18374_v56 = vunpack.i.l.bf16 %v18373_v48  ;;  %v4330_v61 = vsel %vm4329_vm4, %v18359_v62, %v18339_v24  ;;  %v4334_v53 = vsel %vm4329_vm4, %v18360_v55, %v18349_v60  ;;  %v20508_v24 = vld [vmem:[%s19649_s10 + $0xd0] sm:$0xff] }
 0x61f   : >> { %v18368_v46 = vpop.permute.xlu1 %18367  ;;  %v16905_v4 = vpack.c.bf16 %v4334_v53, %v4330_v61 }
 0x620   : >> { %16237 = vmatmul.mubr.msk.f32.vlgmr.msra.gmra.mrb[48].mxu1 %vm560_vm2, %v20483_v31  ;;  %v4597_v20 = vsel %vm2437_vm3, %v18374_v56, %v18375_v54  ;;  %v18370_v45 = vunpack.i.h.bf16 %v18368_v46  ;;  %v18369_v26 = vunpack.i.l.bf16 %v18368_v46 }
 0x621   : >> { %v18383_v5 = vpop.permute.xlu0 %18382  ;;  %16906 = vmatpush1.bf16.msra.mxu0 %v16905_v4  ;;  %v16911_v52 = vpack.c.bf16 %v4597_v20, %v4593_v34  ;;  %4517 = vmatprep.mubr.f32.mxu1 %v23035_v35 }
 0x622   : >> { %v18385_v58 = vunpack.i.h.bf16 %v18383_v5  ;;  %v18384_v25 = vunpack.i.l.bf16 %v18383_v5  ;;  %v4594_v51 = vsel %vm2437_vm3, %v18365_v30, %v18369_v26  ;;  %v4595_v47 = vsel %vm2437_vm3, %v18369_v26, %v18370_v45  ;;  %v20588_v30 = vld [vmem:[%s19649_s10 + $0x110] sm:$0xff] }
 0x623   : >> { %16912 = vmatprep.subr.bf16.mxu0 %v16911_v52  ;;  %v18378_v28 = vpop.permute.xlu1 %18377 }
 0x624   : >> { %v4592_v37 = vsel %vm2437_vm3, %v18384_v25, %v18364_v1  ;;  %v4596_v19 = vsel %vm2437_vm3, %v18385_v58, %v18374_v56  ;;  %v18380_v9 = vunpack.i.h.bf16 %v18378_v28  ;;  %v18379_v41 = vunpack.i.l.bf16 %v18378_v28  ;;  %16233 = vmatmul.mubr.msk.f32.vlgmr.msra.gmra.mrb[48].mxu0 %vm560_vm2, %v20483_v31  ;;  %16238 = vmatmul.mubr.msk.f32.gmra.mrb[50].mxu1 %vm560_vm2, %v20493_v42  ;;  %v20597_v1 = vld [vmem:[%s19649_s10 + $0x118] sm:$0xff] }
 0x625   : >> { %v16913_v3 = vpack.c.bf16 %v4596_v19, %v4592_v37  ;;  %4428 = vmatprep.mubr.f32.mxu0 %v23035_v35  ;;  %4523 = vmatprep.mubr.f32.mxu1 %v23035_v35 }
 0x626   : >> { %v4598_v14 = vsel %vm2437_vm3, %v18375_v54, %v18379_v41  ;;  %v4599_v16 = vsel %vm2437_vm3, %v18379_v41, %v18380_v9 }
 0x627   : >> { %16914 = vmatpush1.bf16.msra.mxu0 %v16913_v3  ;;  %v16915_v60 = vpack.c.bf16 %v4599_v16, %v4595_v47  ;;  %v16917_v17 = vpack.c.bf16 %v4598_v14, %v4594_v51  ;;  %v16231_v3 = vld [vmem:[%s19633_s23 + $0x20] sm:$0xff] }
 0x628   : >> { %16920 = vmatprep.subr.bf16.mxu0 %v16919_v10  ;;  %16234 = vmatmul.mubr.msk.f32.gmra.mrb[50].mxu0 %vm560_vm2, %v20493_v42 }
 0x629   : >> { %16239 = vmatmul.mubr.msk.f32.gmra.mrb[52].mxu1 %vm560_vm2, %v20508_v24  ;;  %16916 = vmatprep.subr.bf16.mxu1 %v16915_v60 }
 0x62a   : >> { %16918 = vmatpush1.bf16.msra.mxu1 %v16917_v17  ;;  %4434 = vmatprep.mubr.f32.mxu0 %v23035_v35 }
 0x62b   : >> { %4529 = vmatprep.mubr.f32.mxu1 %v23035_v35  ;;  %16924 = vmatprep.subr.bf16.mxu1 %v16923_v2 }
 0x62c   : >> { %16235 = vmatmul.mubr.msk.f32.gmra.mrb[52].mxu0 %vm560_vm2, %v20508_v24 }
 0x62d   : >> { %16240 = vmatmul.mubr.msk.f32.gmra.mrb[54].mxu1 %vm560_vm2, %v20520_v18  ;;  %4440 = vmatprep.mubr.f32.mxu0 %v23035_v35 }
 0x62e   : >> { %4773 = vmatprep.mubr.f32.mxu1 %v23035_v35 }
 0x630   : >> { %16236 = vmatmul.mubr.msk.f32.gmra.mrb[54].mxu0 %vm560_vm2, %v20520_v18 }
 0x631   : >> { %16245 = vmatmul.mubr.msk.f32.vlgmr.msra.gmra.mrb[48].mxu1 %vm560_vm2, %v20530_v63  ;;  %4684 = vmatprep.mubr.f32.mxu0 %v23035_v35 }
 0x632   : >> { %16926 = vmatpush1.bf16.msra.mxu1 %v16925_v15  ;;  %4779 = vmatprep.mubr.f32.mxu1 %v23035_v35  ;;  %v20662_v47 = vpop.permute.xlu0 %4553 }
 0x634   : >> { %16241 = vmatmul.mubr.msk.f32.vlgmr.msra.gmra.mrb[48].mxu0 %vm560_vm2, %v20530_v63  ;;  %v20660_v10 = vpop.permute.xlu1 %4548 }
 0x635   : >> { %16246 = vmatmul.mubr.msk.f32.gmra.mrb[50].mxu1 %vm560_vm2, %v20541_v27  ;;  %16922 = vmatpush1.bf16.msra.mxu0 %v16921_v29 }
 0x636   : >> { %4690 = vmatprep.mubr.f32.mxu0 %v23035_v35  ;;  %4785 = vmatprep.mubr.f32.mxu1 %v23035_v35 }
 0x638   : >> { %16242 = vmatmul.mubr.msk.f32.gmra.mrb[50].mxu0 %vm560_vm2, %v20541_v27  ;;  %v20664_v2 = vpop.permute.xlu1 %4538 }
 0x639   : >> { %16247 = vmatmul.mubr.msk.f32.gmra.mrb[52].mxu1 %vm560_vm2, %v20552_v43  ;;  %4696 = vmatprep.mubr.f32.mxu0 %v23035_v35 }
 0x63a   : >> { %4791 = vmatprep.mubr.f32.mxu1 %v23035_v35 }
 0x63c   : >> { %16243 = vmatmul.mubr.msk.f32.gmra.mrb[52].mxu0 %vm560_vm2, %v20552_v43 }
 0x63d   : >> { %16248 = vmatmul.mubr.msk.f32.gmra.mrb[54].mxu1 %vm560_vm2, %v20561_v39  ;;  %4702 = vmatprep.mubr.f32.mxu0 %v23035_v35 }
 0x63e   : >> { %4979 = vmatprep.mubr.f32.mxu1 %v23035_v35 }
 0x640   : >> { %16244 = vmatmul.mubr.msk.f32.gmra.mrb[54].mxu0 %vm560_vm2, %v20561_v39 }
 0x641   : >> { %16253 = vmatmul.mubr.msk.f32.vlgmr.msra.gmra.mrb[48].mxu1 %vm560_vm2, %v20570_v7  ;;  %4890 = vmatprep.mubr.f32.mxu0 %v23035_v35 }
 0x642   : >> { %4985 = vmatprep.mubr.f32.mxu1 %v23035_v35 }
 0x644   : >> { %16249 = vmatmul.mubr.msk.f32.vlgmr.msra.gmra.mrb[48].mxu0 %vm560_vm2, %v20570_v7 }
 0x645   : >> { %16254 = vmatmul.mubr.msk.f32.gmra.mrb[50].mxu1 %vm560_vm2, %v20579_v50  ;;  %4896 = vmatprep.mubr.f32.mxu0 %v23035_v35 }
 0x646   : >> { %4991 = vmatprep.mubr.f32.mxu1 %v23035_v35 }
 0x648   : >> { %16250 = vmatmul.mubr.msk.f32.gmra.mrb[50].mxu0 %vm560_vm2, %v20579_v50 }
 0x649   : >> { %16255 = vmatmul.mubr.msk.f32.gmra.mrb[52].mxu1 %vm560_vm2, %v20588_v30  ;;  %4902 = vmatprep.mubr.f32.mxu0 %v23035_v35 }
 0x64a   : >> { %4997 = vmatprep.mubr.f32.mxu1 %v23035_v35 }
 0x64c   : >> { %16251 = vmatmul.mubr.msk.f32.gmra.mrb[52].mxu0 %vm560_vm2, %v20588_v30 }
 0x64d   : >> { %16256 = vmatmul.mubr.msk.f32.gmra.mrb[54].mxu1 %vm560_vm2, %v20597_v1  ;;  %4908 = vmatprep.mubr.f32.mxu0 %v23035_v35 }
 0x64e   : >> { %5225 = vmatprep.mubr.f32.mxu1 %v23035_v35 }
 0x650   : >> { %16252 = vmatmul.mubr.msk.f32.gmra.mrb[54].mxu0 %vm560_vm2, %v20597_v1 }
 0x651   : >> { %5148 = vmatprep.mubr.f32.mxu0 %v23035_v35 }
 0x6bb   : >> { %v4227_v55 = vpop.f32.mrb[44].mxu1 }
 0x6bc   : >> { %v4228_v62 = vadd.f32 %v4227_v55, %v20390_v6  ;;  %v4229_v48 = vpop.f32.mrb[45].mxu1 }
 0x6bd   : >> { %v4230_v54 = vadd.f32 %v4229_v48, %v20390_v6  ;;  %v4150_v56 = vpop.f32.mrb[44].mxu0 }
 0x6be   : >> { %v20611_v61 = vadd.f32 %v4228_v62, %v20210_v8  ;;  %v4151_v53 = vadd.f32 %v4150_v56, %v20390_v6  ;;  %v4152_v46 = vpop.f32.mrb[45].mxu0 }
 0x6bf   : >> { %v20615_v4 = vadd.f32 %v4230_v54, %v20213_v23  ;;  %v4233_v34 = vpop.f32.mrb[46].mxu1  ;;  %v4153_v20 = vadd.f32 %v4152_v46, %v20390_v6 }
 0x6c0   : >> { %v20619_v5 = vadd.f32 %v4151_v53, %v20216_v32  ;;  %v4234_v52 = vadd.f32 %v4233_v34, %v20398_v33  ;;  %v4235_v58 = vpop.f32.mrb[47].mxu1  ;;  %v20670_v34 = vpop.permute.xlu0 %4543 }
 0x6c1   : >> { %v20623_v25 = vadd.f32 %v4153_v20, %v20219_v21  ;;  %v4236_v8 = vadd.f32 %v4235_v58, %v20398_v33  ;;  %v4156_v45 = vpop.f32.mrb[46].mxu0  ;;  %v18391_v26 = vpack.i.bf16 %v20615_v4, %v20611_v61 }
 0x6c2   : >> { %v20629_v23 = vadd.f32 %v4234_v52, %v20224_v49  ;;  %v4157_v6 = vadd.f32 %v4156_v45, %v20398_v33  ;;  %v4158_v28 = vpop.f32.mrb[47].mxu0 }
 0x6c3   : >> { %v20633_v32 = vadd.f32 %v4236_v8, %v20227_v11  ;;  %v4159_v37 = vadd.f32 %v4158_v28, %v20398_v33  ;;  %18392 = vrot.lane.b32.xlu0 %v18391_v26, %s19386_s26  ;;  %v18386_v21 = vpack.i.bf16 %v20623_v25, %v20619_v5  ;;  %v5254_v11 = vld [vmem:[#allocation2 + $0x68] sm:$0xff]  ;;  %v5259_v33 = vld [vmem:[#allocation2 + $0x98] sm:$0xff] }
 0x6c4   : >> { %v20640_v19 = vadd.f32 %v4157_v6, %v20233_v38  ;;  %v18406_v38 = vpack.i.bf16 %v5259_v33, %v5254_v11 }
 0x6c5   : >> { %v20643_v49 = vadd.f32 %v4159_v37, %v20235_v36  ;;  %v18401_v9 = vpack.i.bf16 %v20633_v32, %v20629_v23  ;;  %18387 = vrot.lane.b32.xlu1 %v18386_v21, %s19386_s26  ;;  %v16232_v36 = vld [vmem:[%s19633_s23 + $0x28] sm:$0xff] }
 0x6c7   : >> { %18402 = vrot.lane.b32.xlu0 %v18401_v9, %s19386_s26  ;;  %v18396_v41 = vpack.i.bf16 %v20643_v49, %v20640_v19 }
 0x6c9   : >> { %18397 = vrot.lane.b32.xlu1 %v18396_v41, %s19386_s26 }
 0x6cb   : >> { %18412 = vrot.lane.b32.xlu0 %v18386_v21, %s19385_s17 }
 0x6cd   : >> { %18407 = vrot.lane.b32.xlu1 %v18406_v38, %s19386_s26 }
 0x6cf   : >> { %18422 = vrot.lane.b32.xlu0 %v18396_v41, %s19385_s17 }
 0x6d1   : >> { %18417 = vrot.lane.b32.xlu1 %v18391_v26, %s19385_s17 }
 0x6d3   : >> { %18432 = vrot.lane.b32.xlu0 %v18406_v38, %s19385_s17 }
 0x6d5   : >> { %18427 = vrot.lane.b32.xlu1 %v18401_v9, %s19385_s17 }
 0x6d7   : >> { %5075 = vperm.xlu0 %18184, %v16232_v36  }
 0x6d9   : >> { %5070 = vperm.xlu1 %18185, %v16231_v3  }
 0x714   : >> { %v4981_v51 = vpop.f32.mrb[48].mxu1 }
 0x715   : >> { %v4983_v14 = vpop.f32.mrb[49].mxu1  ;;  %v17375_v29 = vadd.f32 %v4981_v51, %v20664_v2 }
 0x716   : >> { %v17376_v55 = vadd.f32 %v4983_v14, %v20664_v2 }
 0x717   : >> { %v4892_v16 = vpop.f32.mrb[48].mxu0  ;;  %18914 = vtanh.f32 %v17375_v29 }
 0x718   : >> { %v4987_v60 = vpop.f32.mrb[50].mxu1  ;;  %v4894_v17 = vpop.f32.mrb[49].mxu0  ;;  %v17367_v48 = vadd.f32 %v4892_v16, %v20664_v2  ;;  %18916 = vtanh.f32 %v17376_v55 }
 0x719   : >> { %v4989_v15 = vpop.f32.mrb[51].mxu1  ;;  %v17377_v52 = vadd.f32 %v4987_v60, %v20670_v34  ;;  %v17368_v60 = vadd.f32 %v4894_v17, %v20664_v2 }
 0x71a   : >> { %18918 = vtanh.f32 %v17367_v48  ;;  %v17378_v55 = vadd.f32 %v4989_v15, %v20670_v34 }
 0x71b   : >> { %v4898_v62 = vpop.f32.mrb[50].mxu0 }
 0x71c   : >> { %v4993_v54 = vpop.f32.mrb[52].mxu1  ;;  %v4900_v56 = vpop.f32.mrb[51].mxu0 }
 0x71d   : >> { %v17379_v53 = vadd.f32 %v4993_v54, %v20660_v10  ;;  %v4995_v46 = vpop.f32.mrb[53].mxu1 }
 0x71e   : >> { %v17380_v20 = vadd.f32 %v4995_v46, %v20660_v10 }
 0x71f   : >> { %v5022_v58 = vmul.f32 0.5, %v17379_v53  ;;  %v4904_v8 = vpop.f32.mrb[52].mxu0  ;;  %v17369_v53 = vadd.f32 %v4898_v62, %v20670_v34 }
 0x720   : >> { %v5023_v45 = vmul.f32 0.5, %v17380_v20  ;;  %v17371_v26 = vadd.f32 %v4904_v8, %v20660_v10  ;;  %v4999_v6 = vpop.f32.mrb[54].mxu1  ;;  %v4906_v28 = vpop.f32.mrb[53].mxu0  ;;  %v17370_v20 = vadd.f32 %v4900_v56, %v20670_v34 }
 0x721   : >> { %18920 = vtanh.f32 %v5022_v58  ;;  %v17381_v37 = vadd.f32 %v4999_v6, %v20662_v47  ;;  %v17372_v21 = vadd.f32 %v4906_v28, %v20660_v10  ;;  %v5001_v9 = vpop.f32.mrb[55].mxu1  ;;  %v18915_v54 = vpop.eup %18914 }
 0x722   : >> { %18922 = vtanh.f32 %v5023_v45  ;;  %v5020_v11 = vmul.f32 0.5, %v17371_v26  ;;  %v17382_v33 = vadd.f32 %v5001_v9, %v20662_v47  ;;  %v18917_v46 = vpop.eup %18916 }
 0x723   : >> { %18924 = vtanh.f32 %v17377_v52  ;;  %v5026_v41 = vmul.f32 0.5, %v17381_v37  ;;  %v5021_v38 = vmul.f32 0.5, %v17372_v21  ;;  %v4910_v36 = vpop.f32.mrb[54].mxu0 }
 0x724   : >> { %18926 = vtanh.f32 %v5020_v11  ;;  %v5027_v3 = vmul.f32 0.5, %v17382_v33  ;;  %v17373_v51 = vadd.f32 %v4910_v36, %v20662_v47  ;;  %v4912_v14 = vpop.f32.mrb[55].mxu0  ;;  %v18919_v52 = vpop.eup %18918 }
 0x725   : >> { %18928 = vtanh.f32 %v5026_v41  ;;  %v17374_v16 = vadd.f32 %v4912_v14, %v20662_v47 }
 0x726   : >> { %18930 = vtanh.f32 %v5021_v38  ;;  %v5024_v29 = vmul.f32 0.5, %v17373_v51 }
 0x727   : >> { %18932 = vtanh.f32 %v5027_v3  ;;  %v5025_v48 = vmul.f32 0.5, %v17374_v16 }
 0x728   : >> { %18934 = vtanh.f32 %v5024_v29 }
 0x729   : >> { %18936 = vtanh.f32 %v5025_v48 }
 0x72a   : >> { %18938 = vtanh.f32 %v17368_v60 }
 0x72b   : >> { %v18921_v58 = vpop.eup %18920  ;;  %18940 = vtanh.f32 %v17378_v55 }
 0x72c   : >> { %v18923_v8 = vpop.eup %18922  ;;  %18942 = vtanh.f32 %v17369_v53  ;;  %v5038_v17 = vmul.f32 0.5, %v18921_v58 }
 0x72d   : >> { %v18925_v45 = vpop.eup %18924  ;;  %18944 = vtanh.f32 %v17370_v20  ;;  %v5039_v15 = vmul.f32 0.5, %v18923_v8 }
 0x72e   : >> { %v18927_v26 = vpop.eup %18926  ;;  %v5046_v6 = vadd.f32 0.5, %v5038_v17 }
 0x72f   : >> { %v18929_v28 = vpop.eup %18928  ;;  %v5047_v37 = vadd.f32 0.5, %v5039_v15  ;;  %v5036_v62 = vmul.f32 0.5, %v18927_v26 }
 0x730   : >> { %v18931_v21 = vpop.eup %18930  ;;  %v5062_v9 = vmul.f32 %v18915_v54, %v5046_v6  ;;  %v5042_v11 = vmul.f32 0.5, %v18929_v28 }
 0x731   : >> { %v18933_v56 = vpop.eup %18932  ;;  %v5044_v33 = vadd.f32 0.5, %v5036_v62  ;;  %v5037_v41 = vmul.f32 0.5, %v18931_v21  ;;  %v5063_v38 = vmul.f32 %v18917_v46, %v5047_v37 }
 0x732   : >> { %v18935_v36 = vpop.eup %18934  ;;  %v5050_v3 = vadd.f32 0.5, %v5042_v11  ;;  %v5043_v51 = vmul.f32 0.5, %v18933_v56 }
 0x733   : >> { %v18937_v14 = vpop.eup %18936  ;;  %v5060_v16 = vmul.f32 %v18919_v52, %v5044_v33  ;;  %v5045_v60 = vadd.f32 0.5, %v5037_v41  ;;  %v5040_v29 = vmul.f32 0.5, %v18935_v36 }
 0x734   : >> { %v18939_v55 = vpop.eup %18938  ;;  %v5066_v48 = vmul.f32 %v18925_v45, %v5050_v3  ;;  %v5051_v53 = vadd.f32 0.5, %v5043_v51  ;;  %v5041_v20 = vmul.f32 0.5, %v18937_v14 }
 0x735   : >> { %v18941_v58 = vpop.eup %18940  ;;  %v5048_v8 = vadd.f32 0.5, %v5040_v29  ;;  %v18393_v17 = vpop.permute.xlu0 %18392  ;;  %v5061_v54 = vmul.f32 %v18939_v55, %v5045_v60  ;;  %v20685_v29 = vld [vmem:[%s19859_s27 + $0x20] sm:$0xff] }
 0x736   : >> { %v18943_v15 = vpop.eup %18942  ;;  %v5049_v26 = vadd.f32 0.5, %v5041_v20  ;;  %v5067_v6 = vmul.f32 %v18941_v58, %v5051_v53  ;;  %v16933_v62 = vpack.c.bf16 %v5066_v48, %v5062_v9  ;;  %v18395_v21 = vunpack.i.h.bf16 %v18393_v17 }
 0x737   : >> { %v18945_v28 = vpop.eup %18944  ;;  %v5064_v46 = vmul.f32 %v18943_v15, %v5048_v8  ;;  %v18388_v37 = vpop.permute.xlu1 %18387  ;;  %v18394_v52 = vunpack.i.l.bf16 %v18393_v17  ;;  %v20697_v15 = vld [vmem:[%s19859_s27 + $0x28] sm:$0xff] }
 0x738   : >> { %v16931_v11 = vpack.c.bf16 %v5067_v6, %v5063_v38  ;;  %v5065_v56 = vmul.f32 %v18945_v28, %v5049_v26  ;;  %v18390_v45 = vunpack.i.h.bf16 %v18388_v37  ;;  %v18389_v51 = vunpack.i.l.bf16 %v18388_v37 }
 0x739   : >> { %v18403_v33 = vpop.permute.xlu0 %18402  ;;  %v16929_v41 = vpack.c.bf16 %v5064_v46, %v5060_v16  ;;  %v5297_v9 = vsel %vm4329_vm4, %v18394_v52, %v18395_v21 }
 0x73a   : >> { %v18405_v36 = vunpack.i.h.bf16 %v18403_v33  ;;  %v18404_v3 = vunpack.i.l.bf16 %v18403_v33  ;;  %16932 = vmatprep.subr.bf16.mxu1 %v16931_v11  ;;  %v16927_v14 = vpack.c.bf16 %v5065_v56, %v5061_v54  ;;  %v5296_v20 = vsel %vm4329_vm4, %v18390_v45, %v18394_v52 }
 0x73b   : >> { %16934 = vmatpush1.bf16.msra.mxu1 %v16933_v62  ;;  %v18398_v60 = vpop.permute.xlu1 %18397  ;;  %v5295_v8 = vsel %vm4329_vm4, %v18389_v51, %v18390_v45 }
 0x73c   : >> { %v18400_v55 = vunpack.i.h.bf16 %v18398_v60  ;;  %v18399_v53 = vunpack.i.l.bf16 %v18398_v60  ;;  %16928 = vmatprep.subr.bf16.mxu0 %v16927_v14  ;;  %v5301_v38 = vsel %vm4329_vm4, %v18404_v3, %v18405_v36 }
 0x73d   : >> { %v18413_v48 = vpop.permute.xlu0 %18412  ;;  %16930 = vmatpush1.bf16.msra.mxu0 %v16929_v41  ;;  %v16939_v16 = vpack.c.bf16 %v5301_v38, %v5297_v9 }
 0x73e   : >> { %v5300_v58 = vsel %vm4329_vm4, %v18400_v55, %v18404_v3  ;;  %16259 = vmatmul.mubr.msk.f32.vlgmr.msra.gmra.mrb[56].mxu1 %vm560_vm2, %v20685_v29  ;;  %v5299_v17 = vsel %vm4329_vm4, %v18399_v53, %v18400_v55  ;;  %v18415_v28 = vunpack.i.h.bf16 %v18413_v48  ;;  %v18414_v46 = vunpack.i.l.bf16 %v18413_v48 }
 0x73f   : >> { %16940 = vmatprep.subr.bf16.mxu1 %v16939_v16  ;;  %v18408_v54 = vpop.permute.xlu1 %18407  ;;  %5231 = vmatprep.mubr.f32.mxu1 %v23035_v35  ;;  %v16935_v26 = vpack.c.bf16 %v5299_v17, %v5295_v8  ;;  %v16941_v6 = vpack.c.bf16 %v5300_v58, %v5296_v20  ;;  %v16951_v17 = vpack.c.bf16 %v20643_v49, %v20623_v25 }
 0x740   : >> { %v18410_v37 = vunpack.i.h.bf16 %v18408_v54  ;;  %v18409_v62 = vunpack.i.l.bf16 %v18408_v54  ;;  %16257 = vmatmul.mubr.msk.f32.vlgmr.msra.gmra.mrb[56].mxu0 %vm560_vm2, %v20685_v29  ;;  %v5525_v36 = vsel %vm2437_vm3, %v18414_v46, %v18415_v28 }
 0x741   : >> { %v18423_v21 = vpop.permute.xlu0 %18422  ;;  %16936 = vmatprep.subr.bf16.mxu0 %v16935_v26  ;;  %16942 = vmatpush1.bf16.msra.mxu1 %v16941_v6 }
 0x742   : >> { %v18425_v52 = vunpack.i.h.bf16 %v18423_v21  ;;  %v18424_v11 = vunpack.i.l.bf16 %v18423_v21  ;;  %v5294_v56 = vsel %vm4329_vm4, %v18409_v62, %v18389_v51  ;;  %v5298_v33 = vsel %vm4329_vm4, %v18410_v37, %v18399_v53  ;;  %16260 = vmatmul.mubr.msk.f32.gmra.mrb[58].mxu1 %vm560_vm2, %v20697_v15  ;;  %5154 = vmatprep.mubr.f32.mxu0 %v23035_v35 }
 0x743   : >> { %v18418_v45 = vpop.permute.xlu1 %18417  ;;  %5463 = vmatprep.mubr.f32.mxu1 %v23035_v35  ;;  %v16937_v41 = vpack.c.bf16 %v5298_v33, %v5294_v56 }
 0x744   : >> { %16258 = vmatmul.mubr.msk.f32.gmra.mrb[58].mxu0 %vm560_vm2, %v20697_v15  ;;  %v5529_v3 = vsel %vm2437_vm3, %v18424_v11, %v18425_v52  ;;  %v18420_v53 = vunpack.i.h.bf16 %v18418_v45  ;;  %v18419_v9 = vunpack.i.l.bf16 %v18418_v45 }
 0x745   : >> { %v18433_v14 = vpop.permute.xlu0 %18432  ;;  %16938 = vmatpush1.bf16.msra.mxu0 %v16937_v41  ;;  %v16943_v51 = vpack.c.bf16 %v5529_v3, %v5525_v36  ;;  %5374 = vmatprep.mubr.f32.mxu0 %v23035_v35 }
 0x746   : >> { %v18435_v60 = vunpack.i.h.bf16 %v18433_v14  ;;  %v18434_v55 = vunpack.i.l.bf16 %v18433_v14  ;;  %16265 = vmatmul.mubr.msk.f32.vlgmr.msra.gmra.mrb[60].mxu1 %vm560_vm2, %v20483_v31  ;;  %v5526_v54 = vsel %vm2437_vm3, %v18415_v28, %v18419_v9  ;;  %v5527_v6 = vsel %vm2437_vm3, %v18419_v9, %v18420_v53  ;;  %v6181_v53 = vld [vmem:[#allocation2 + $0x8] sm:$0xff]  ;;  %v6186_v9 = vld [vmem:[#allocation2 + $0x38] sm:$0xff] }
 0x747   : >> { %16944 = vmatprep.subr.bf16.mxu0 %v16943_v51  ;;  %v18428_v38 = vpop.permute.xlu1 %18427  ;;  %5469 = vmatprep.mubr.f32.mxu1 %v23035_v35  ;;  %v16955_v28 = vpack.c.bf16 %v20633_v32, %v20615_v4 }
 0x748   : >> { %v5524_v48 = vsel %vm2437_vm3, %v18434_v55, %v18414_v46  ;;  %v5528_v16 = vsel %vm2437_vm3, %v18435_v60, %v18424_v11  ;;  %v18430_v20 = vunpack.i.h.bf16 %v18428_v38  ;;  %v18429_v58 = vunpack.i.l.bf16 %v18428_v38  ;;  %16261 = vmatmul.mubr.msk.f32.vlgmr.msra.gmra.mrb[60].mxu0 %vm560_vm2, %v20483_v31 }
 0x749   : >> { %v16945_v8 = vpack.c.bf16 %v5528_v16, %v5524_v48  ;;  %5380 = vmatprep.mubr.f32.mxu0 %v23035_v35  ;;  %v16313_v48 = vld [vmem:[%s19589_s15 + $0x70] sm:$0xff]  ;;  %v16312_v16 = vld [vmem:[%s19589_s15 + $0x68] sm:$0xff] }
 0x74a   : >> { %v5530_v26 = vsel %vm2437_vm3, %v18425_v52, %v18429_v58  ;;  %16266 = vmatmul.mubr.msk.f32.gmra.mrb[62].mxu1 %vm560_vm2, %v20493_v42  ;;  %v5531_v46 = vsel %vm2437_vm3, %v18429_v58, %v18430_v20  ;;  %v16311_v20 = vld [vmem:[%s19589_s15 + $0x60] sm:$0xff] }
 0x74b   : >> { %16946 = vmatpush1.bf16.msra.mxu0 %v16945_v8  ;;  %5475 = vmatprep.mubr.f32.mxu1 %v23035_v35  ;;  %v16947_v31 = vpack.c.bf16 %v5531_v46, %v5527_v6  ;;  %v16949_v37 = vpack.c.bf16 %v5530_v26, %v5526_v54 }
 0x74c   : >> { %16952 = vmatprep.subr.bf16.mxu0 %v16951_v17  ;;  %16262 = vmatmul.mubr.msk.f32.gmra.mrb[62].mxu0 %vm560_vm2, %v20493_v42  ;;  %v16957_v42 = vpack.c.bf16 %v20629_v23, %v20611_v61 }
 0x74d   : >> { %16948 = vmatprep.subr.bf16.mxu1 %v16947_v31  ;;  %5386 = vmatprep.mubr.f32.mxu0 %v23035_v35 }
 0x74e   : >> { %16267 = vmatmul.mubr.msk.f32.gmra.mrb[64].mxu1 %vm560_vm2, %v20508_v24 }
 0x74f   : >> { %16950 = vmatpush1.bf16.msra.mxu1 %v16949_v37  ;;  %5481 = vmatprep.mubr.f32.mxu1 %v23035_v35 }
 0x750   : >> { %16956 = vmatprep.subr.bf16.mxu1 %v16955_v28  ;;  %16263 = vmatmul.mubr.msk.f32.gmra.mrb[64].mxu0 %vm560_vm2, %v20508_v24  ;;  %v16953_v24 = vpack.c.bf16 %v20640_v19, %v20619_v5 }
 0x751   : >> { %5392 = vmatprep.mubr.f32.mxu0 %v23035_v35 }
 0x752   : >> { %16268 = vmatmul.mubr.msk.f32.gmra.mrb[66].mxu1 %vm560_vm2, %v20520_v18 }
 0x753   : >> { %5693 = vmatprep.mubr.f32.mxu1 %v23035_v35 }
 0x754   : >> { %16264 = vmatmul.mubr.msk.f32.gmra.mrb[66].mxu0 %vm560_vm2, %v20520_v18 }
 0x755   : >> { %5604 = vmatprep.mubr.f32.mxu0 %v23035_v35 }
 0x756   : >> { %16273 = vmatmul.mubr.msk.f32.vlgmr.msra.gmra.mrb[60].mxu1 %vm560_vm2, %v20530_v63  ;;  %v20806_v21 = vpop.permute.xlu0 %5075 }
 0x757   : >> { %16958 = vmatpush1.bf16.msra.mxu1 %v16957_v42  ;;  %5699 = vmatprep.mubr.f32.mxu1 %v23035_v35 }
 0x758   : >> { %16269 = vmatmul.mubr.msk.f32.vlgmr.msra.gmra.mrb[60].mxu0 %vm560_vm2, %v20530_v63  ;;  %v20798_v18 = vpop.permute.xlu1 %5070 }
 0x759   : >> { %16954 = vmatpush1.bf16.msra.mxu0 %v16953_v24  ;;  %5610 = vmatprep.mubr.f32.mxu0 %v23035_v35 }
 0x75a   : >> { %16274 = vmatmul.mubr.msk.f32.gmra.mrb[62].mxu1 %vm560_vm2, %v20541_v27 }
 0x75b   : >> { %5705 = vmatprep.mubr.f32.mxu1 %v23035_v35 }
 0x75c   : >> { %16270 = vmatmul.mubr.msk.f32.gmra.mrb[62].mxu0 %vm560_vm2, %v20541_v27 }
 0x75d   : >> { %5616 = vmatprep.mubr.f32.mxu0 %v23035_v35 }
 0x75e   : >> { %16275 = vmatmul.mubr.msk.f32.gmra.mrb[64].mxu1 %vm560_vm2, %v20552_v43 }
 0x75f   : >> { %5711 = vmatprep.mubr.f32.mxu1 %v23035_v35 }
 0x760   : >> { %16271 = vmatmul.mubr.msk.f32.gmra.mrb[64].mxu0 %vm560_vm2, %v20552_v43 }
 0x761   : >> { %5622 = vmatprep.mubr.f32.mxu0 %v23035_v35 }
 0x762   : >> { %16276 = vmatmul.mubr.msk.f32.gmra.mrb[66].mxu1 %vm560_vm2, %v20561_v39 }
 0x763   : >> { %5887 = vmatprep.mubr.f32.mxu1 %v23035_v35 }
 0x764   : >> { %16272 = vmatmul.mubr.msk.f32.gmra.mrb[66].mxu0 %vm560_vm2, %v20561_v39 }
 0x765   : >> { %5798 = vmatprep.mubr.f32.mxu0 %v23035_v35 }
 0x766   : >> { %16281 = vmatmul.mubr.msk.f32.vlgmr.msra.gmra.mrb[60].mxu1 %vm560_vm2, %v20570_v7 }
 0x767   : >> { %5893 = vmatprep.mubr.f32.mxu1 %v23035_v35 }
 0x768   : >> { %16277 = vmatmul.mubr.msk.f32.vlgmr.msra.gmra.mrb[60].mxu0 %vm560_vm2, %v20570_v7 }
 0x769   : >> { %5804 = vmatprep.mubr.f32.mxu0 %v23035_v35 }
 0x76a   : >> { %16282 = vmatmul.mubr.msk.f32.gmra.mrb[62].mxu1 %vm560_vm2, %v20579_v50 }
 0x76b   : >> { %5899 = vmatprep.mubr.f32.mxu1 %v23035_v35 }
 0x76c   : >> { %16278 = vmatmul.mubr.msk.f32.gmra.mrb[62].mxu0 %vm560_vm2, %v20579_v50 }
 0x76d   : >> { %5810 = vmatprep.mubr.f32.mxu0 %v23035_v35 }
 0x76e   : >> { %16283 = vmatmul.mubr.msk.f32.gmra.mrb[64].mxu1 %vm560_vm2, %v20588_v30 }
 0x76f   : >> { %5905 = vmatprep.mubr.f32.mxu1 %v23035_v35 }
 0x770   : >> { %16279 = vmatmul.mubr.msk.f32.gmra.mrb[64].mxu0 %vm560_vm2, %v20588_v30 }
 0x771   : >> { %5816 = vmatprep.mubr.f32.mxu0 %v23035_v35 }
 0x772   : >> { %16284 = vmatmul.mubr.msk.f32.gmra.mrb[66].mxu1 %vm560_vm2, %v20597_v1 }
 0x773   : >> { %6117 = vmatprep.mubr.f32.mxu1 %v23035_v35 }
 0x774   : >> { %16280 = vmatmul.mubr.msk.f32.gmra.mrb[66].mxu0 %vm560_vm2, %v20597_v1 }
 0x775   : >> { %6040 = vmatprep.mubr.f32.mxu0 %v23035_v35 }
 0x811   : >> { %v5227_v63 = vpop.f32.mrb[56].mxu1 }
 0x812   : >> { %v5228_v27 = vadd.f32 %v5227_v63, %v20798_v18  ;;  %v5229_v43 = vpop.f32.mrb[57].mxu1 }
 0x813   : >> { %v5230_v39 = vadd.f32 %v5229_v43, %v20798_v18  ;;  %v5150_v7 = vpop.f32.mrb[56].mxu0 }
 0x814   : >> { %v20803_v50 = vadd.f32 %v5228_v27, %v20395_v44  ;;  %v5151_v30 = vadd.f32 %v5150_v7, %v20798_v18  ;;  %v5152_v62 = vpop.f32.mrb[57].mxu0 }
 0x815   : >> { %v20809_v1 = vadd.f32 %v5230_v39, %v20401_v40  ;;  %v5233_v52 = vpop.f32.mrb[58].mxu1  ;;  %v5153_v11 = vadd.f32 %v5152_v62, %v20798_v18 }
 0x816   : >> { %v20813_v56 = vadd.f32 %v5151_v30, %v20405_v0  ;;  %v5234_v33 = vadd.f32 %v5233_v52, %v20806_v21  ;;  %v5235_v45 = vpop.f32.mrb[59].mxu1 }
 0x817   : >> { %v20817_v44 = vadd.f32 %v5153_v11, %v20409_v22  ;;  %v5236_v41 = vadd.f32 %v5235_v45, %v20806_v21  ;;  %v5156_v36 = vpop.f32.mrb[58].mxu0  ;;  %v18441_v3 = vpack.i.bf16 %v20809_v1, %v20803_v50 }
 0x818   : >> { %v20823_v40 = vadd.f32 %v5234_v33, %v20415_v57  ;;  %v5157_v14 = vadd.f32 %v5156_v36, %v20806_v21  ;;  %v5158_v51 = vpop.f32.mrb[59].mxu0 }
 0x819   : >> { %v20827_v0 = vadd.f32 %v5236_v41, %v20419_v13  ;;  %v5159_v60 = vadd.f32 %v5158_v51, %v20806_v21  ;;  %18442 = vrot.lane.b32.xlu0 %v18441_v3, %s19387_s28  ;;  %v18436_v22 = vpack.i.bf16 %v20817_v44, %v20813_v56 }
 0x81a   : >> { %v20834_v55 = vadd.f32 %v5157_v14, %v20426_v12  ;;  %v18456_v12 = vpack.i.bf16 %v6186_v9, %v6181_v53 }
 0x81b   : >> { %v20837_v57 = vadd.f32 %v5159_v60, %v20429_v59  ;;  %v18451_v13 = vpack.i.bf16 %v20827_v0, %v20823_v40  ;;  %18437 = vrot.lane.b32.xlu1 %v18436_v22, %s19387_s28  ;;  %v16314_v59 = vld [vmem:[%s19589_s15 + $0x78] sm:$0xff] }
 0x81d   : >> { %18452 = vrot.lane.b32.xlu0 %v18451_v13, %s19387_s28  ;;  %v18446_v38 = vpack.i.bf16 %v20837_v57, %v20834_v55 }
 0x81f   : >> { %18447 = vrot.lane.b32.xlu1 %v18446_v38, %s19387_s28 }
 0x821   : >> { %18462 = vrot.lane.b32.xlu0 %v18436_v22, %s19386_s26 }
 0x823   : >> { %18457 = vrot.lane.b32.xlu1 %v18456_v12, %s19387_s28 }
 0x825   : >> { %18472 = vrot.lane.b32.xlu0 %v18446_v38, %s19386_s26 }
 0x827   : >> { %18467 = vrot.lane.b32.xlu1 %v18441_v3, %s19386_s26 }
 0x829   : >> { %18482 = vrot.lane.b32.xlu0 %v18456_v12, %s19386_s26 }
 0x82b   : >> { %18477 = vrot.lane.b32.xlu1 %v18451_v13, %s19386_s26 }
 0x82d   : >> { %6444 = vperm.xlu0 %18184, %v16314_v59  }
 0x82f   : >> { %6439 = vperm.xlu1 %18185, %v16313_v48  }
 0x831   : >> { %6434 = vperm.xlu0 %18184, %v16312_v16  }
 0x833   : >> { %6429 = vperm.xlu1 %18185, %v16311_v20  }
 0x839   : >> { %v5889_v58 = vpop.f32.mrb[60].mxu1 }
 0x83a   : >> { %v5891_v8 = vpop.f32.mrb[61].mxu1  ;;  %v17391_v6 = vadd.f32 %v5889_v58, %v20664_v2 }
 0x83b   : >> { %v5800_v17 = vpop.f32.mrb[60].mxu0  ;;  %v17392_v31 = vadd.f32 %v5891_v8, %v20664_v2 }
 0x83c   : >> { %v5802_v54 = vpop.f32.mrb[61].mxu0  ;;  %v17383_v28 = vadd.f32 %v5800_v17, %v20664_v2  ;;  %18946 = vtanh.f32 %v17391_v6 }
 0x83d   : >> { %v5895_v26 = vpop.f32.mrb[62].mxu1  ;;  %v17384_v24 = vadd.f32 %v5802_v54, %v20664_v2  ;;  %18948 = vtanh.f32 %v17392_v31 }
 0x83e   : >> { %v5897_v46 = vpop.f32.mrb[63].mxu1  ;;  %18950 = vtanh.f32 %v17383_v28 }
 0x83f   : >> { %v5806_v37 = vpop.f32.mrb[62].mxu0  ;;  %18952 = vtanh.f32 %v17384_v24  ;;  %v17394_v12 = vadd.f32 %v5897_v46, %v20670_v34 }
 0x840   : >> { %v5808_v42 = vpop.f32.mrb[63].mxu0  ;;  %v17385_v16 = vadd.f32 %v5806_v37, %v20670_v34 }
 0x841   : >> { %v5901_v63 = vpop.f32.mrb[64].mxu1  ;;  %v17386_v58 = vadd.f32 %v5808_v42, %v20670_v34 }
 0x842   : >> { %v17395_v27 = vadd.f32 %v5901_v63, %v20660_v10  ;;  %v5903_v43 = vpop.f32.mrb[65].mxu1 }
 0x843   : >> { %v17396_v39 = vadd.f32 %v5903_v43, %v20660_v10  ;;  %v5812_v7 = vpop.f32.mrb[64].mxu0 }
 0x844   : >> { %v5930_v30 = vmul.f32 0.5, %v17395_v27  ;;  %v17387_v62 = vadd.f32 %v5812_v7, %v20660_v10  ;;  %v5814_v52 = vpop.f32.mrb[65].mxu0 }
 0x845   : >> { %v5931_v11 = vmul.f32 0.5, %v17396_v39  ;;  %v5907_v33 = vpop.f32.mrb[66].mxu1  ;;  %v17388_v45 = vadd.f32 %v5814_v52, %v20660_v10  ;;  %v17393_v10 = vadd.f32 %v5895_v26, %v20670_v34 }
 0x846   : >> { %18954 = vtanh.f32 %v5930_v30  ;;  %v5928_v2 = vmul.f32 0.5, %v17387_v62  ;;  %v17397_v41 = vadd.f32 %v5907_v33, %v20662_v47  ;;  %v5909_v36 = vpop.f32.mrb[67].mxu1  ;;  %v18947_v48 = vpop.eup %18946 }
 0x847   : >> { %18956 = vtanh.f32 %v5931_v11  ;;  %v5929_v3 = vmul.f32 0.5, %v17388_v45  ;;  %v17398_v14 = vadd.f32 %v5909_v36, %v20662_v47  ;;  %v5818_v51 = vpop.f32.mrb[66].mxu0  ;;  %v18949_v20 = vpop.eup %18948 }
 0x848   : >> { %18958 = vtanh.f32 %v5928_v2  ;;  %v5934_v60 = vmul.f32 0.5, %v17397_v41  ;;  %v17389_v22 = vadd.f32 %v5818_v51, %v20662_v47  ;;  %v5820_v13 = vpop.f32.mrb[67].mxu0  ;;  %v18951_v8 = vpop.eup %18950 }
 0x849   : >> { %18960 = vtanh.f32 %v5929_v3  ;;  %v5935_v53 = vmul.f32 0.5, %v17398_v14  ;;  %v17390_v9 = vadd.f32 %v5820_v13, %v20662_v47  ;;  %v18953_v17 = vpop.eup %18952 }
 0x84a   : >> { %18962 = vtanh.f32 %v5934_v60  ;;  %v5932_v38 = vmul.f32 0.5, %v17389_v22 }
 0x84b   : >> { %18964 = vtanh.f32 %v5935_v53  ;;  %v5933_v59 = vmul.f32 0.5, %v17390_v9 }
 0x84c   : >> { %18966 = vtanh.f32 %v5932_v38 }
 0x84d   : >> { %18968 = vtanh.f32 %v5933_v59 }
 0x84e   : >> { %18970 = vtanh.f32 %v17393_v10 }
 0x84f   : >> { %18972 = vtanh.f32 %v17394_v12 }
 0x850   : >> { %v18955_v47 = vpop.eup %18954  ;;  %18974 = vtanh.f32 %v17385_v16 }
 0x851   : >> { %v18957_v54 = vpop.eup %18956  ;;  %v5946_v26 = vmul.f32 0.5, %v18955_v47  ;;  %18976 = vtanh.f32 %v17386_v58 }
 0x852   : >> { %v18959_v6 = vpop.eup %18958  ;;  %v5947_v46 = vmul.f32 0.5, %v18957_v54 }
 0x853   : >> { %v18961_v31 = vpop.eup %18960  ;;  %v5954_v28 = vadd.f32 0.5, %v5946_v26  ;;  %v5944_v24 = vmul.f32 0.5, %v18959_v6 }
 0x854   : >> { %v18963_v37 = vpop.eup %18962  ;;  %v5955_v63 = vadd.f32 0.5, %v5947_v46  ;;  %v5945_v27 = vmul.f32 0.5, %v18961_v31 }
 0x855   : >> { %v18965_v43 = vpop.eup %18964  ;;  %v5970_v34 = vmul.f32 %v18947_v48, %v5954_v28  ;;  %v5952_v42 = vadd.f32 0.5, %v5944_v24  ;;  %v5950_v39 = vmul.f32 0.5, %v18963_v37 }
 0x856   : >> { %v18967_v7 = vpop.eup %18966  ;;  %v5953_v30 = vadd.f32 0.5, %v5945_v27  ;;  %v5951_v62 = vmul.f32 0.5, %v18965_v43  ;;  %v5971_v52 = vmul.f32 %v18949_v20, %v5955_v63 }
 0x857   : >> { %v18969_v11 = vpop.eup %18968  ;;  %v5968_v33 = vmul.f32 %v18951_v8, %v5952_v42  ;;  %v5958_v45 = vadd.f32 0.5, %v5950_v39  ;;  %v5948_v2 = vmul.f32 0.5, %v18967_v7 }
 0x858   : >> { %v18971_v41 = vpop.eup %18970  ;;  %v5959_v36 = vadd.f32 0.5, %v5951_v62  ;;  %v5949_v3 = vmul.f32 0.5, %v18969_v11  ;;  %v5969_v14 = vmul.f32 %v18953_v17, %v5953_v30 }
 0x859   : >> { %v18973_v51 = vpop.eup %18972  ;;  %v5974_v60 = vmul.f32 %v18971_v41, %v5958_v45  ;;  %v5956_v22 = vadd.f32 0.5, %v5948_v2  ;;  %v20891_v41 = vld [vmem:[%s19649_s10 + $0x120] sm:$0xff] }
 0x85a   : >> { %v18975_v13 = vpop.eup %18974  ;;  %v5957_v53 = vadd.f32 0.5, %v5949_v3  ;;  %v5975_v9 = vmul.f32 %v18973_v51, %v5959_v36 }
 0x85b   : >> { %v18977_v10 = vpop.eup %18976  ;;  %v5972_v38 = vmul.f32 %v18975_v13, %v5956_v22  ;;  %v16965_v12 = vpack.c.bf16 %v5974_v60, %v5970_v34 }
 0x85c   : >> { %v16963_v59 = vpack.c.bf16 %v5975_v9, %v5971_v52  ;;  %v5973_v48 = vmul.f32 %v18977_v10, %v5957_v53 }
 0x85d   : >> { %v16961_v16 = vpack.c.bf16 %v5972_v38, %v5968_v33  ;;  %v20901_v38 = vld [vmem:[%s19649_s10 + $0x128] sm:$0xff] }
 0x85e   : >> { %16964 = vmatprep.subr.bf16.mxu1 %v16963_v59  ;;  %v16959_v20 = vpack.c.bf16 %v5973_v48, %v5969_v14 }
 0x85f   : >> { %16966 = vmatpush1.bf16.msra.mxu1 %v16965_v12 }
 0x860   : >> { %16960 = vmatprep.subr.bf16.mxu0 %v16959_v20 }
 0x861   : >> { %16962 = vmatpush1.bf16.msra.mxu0 %v16961_v16 }
 0x862   : >> { %16287 = vmatmul.mubr.msk.f32.vlgmr.msra.gmra.mrb[68].mxu1 %vm560_vm2, %v20685_v29 }
 0x863   : >> { %6123 = vmatprep.mubr.f32.mxu1 %v23035_v35 }
 0x864   : >> { %16285 = vmatmul.mubr.msk.f32.vlgmr.msra.gmra.mrb[68].mxu0 %vm560_vm2, %v20685_v29 }
 0x865   : >> { %6046 = vmatprep.mubr.f32.mxu0 %v23035_v35 }
 0x866   : >> { %16288 = vmatmul.mubr.msk.f32.gmra.mrb[70].mxu1 %vm560_vm2, %v20697_v15 }
 0x867   : >> { %6402 = vmatprep.mubr.f32.mxu1 %v23035_v35 }
 0x868   : >> { %16286 = vmatmul.mubr.msk.f32.gmra.mrb[70].mxu0 %vm560_vm2, %v20697_v15 }
 0x869   : >> { %6313 = vmatprep.mubr.f32.mxu0 %v23035_v35 }
 0x88b   : >> { %v18443_v58 = vpop.permute.xlu0 %18442 }
 0x88c   : >> { %v18445_v17 = vunpack.i.h.bf16 %v18443_v58  ;;  %v18444_v47 = vunpack.i.l.bf16 %v18443_v58 }
 0x88d   : >> { %v18438_v8 = vpop.permute.xlu1 %18437 }
 0x88e   : >> { %v18440_v29 = vunpack.i.h.bf16 %v18438_v8  ;;  %v18439_v46 = vunpack.i.l.bf16 %v18438_v8  ;;  %v6224_v37 = vsel %vm560_vm2, %v18444_v47, %v18445_v17 }
 0x88f   : >> { %v18453_v54 = vpop.permute.xlu0 %18452 }
 0x890   : >> { %v18455_v26 = vunpack.i.h.bf16 %v18453_v54  ;;  %v18454_v6 = vunpack.i.l.bf16 %v18453_v54  ;;  %v6223_v43 = vsel %vm560_vm2, %v18440_v29, %v18444_v47  ;;  %v6222_v42 = vsel %vm560_vm2, %v18439_v46, %v18440_v29 }
 0x891   : >> { %v18448_v31 = vpop.permute.xlu1 %18447 }
 0x892   : >> { %v18450_v28 = vunpack.i.h.bf16 %v18448_v31  ;;  %v18449_v24 = vunpack.i.l.bf16 %v18448_v31  ;;  %v6228_v63 = vsel %vm560_vm2, %v18454_v6, %v18455_v26  ;;  %v16983_v26 = vpack.c.bf16 %v20837_v57, %v20817_v44 }
 0x893   : >> { %v18463_v27 = vpop.permute.xlu0 %18462  ;;  %v16971_v15 = vpack.c.bf16 %v6228_v63, %v6224_v37  ;;  %v16987_v63 = vpack.c.bf16 %v20827_v0, %v20809_v1 }
 0x894   : >> { %v6227_v34 = vsel %vm560_vm2, %v18450_v28, %v18454_v6  ;;  %v6226_v39 = vsel %vm560_vm2, %v18449_v24, %v18450_v28  ;;  %v18465_v52 = vunpack.i.h.bf16 %v18463_v27  ;;  %v18464_v11 = vunpack.i.l.bf16 %v18463_v27  ;;  %v20928_v27 = vld [vmem:[%s19649_s10 + $0x138] sm:$0xff] }
 0x895   : >> { %v16973_v7 = vpack.c.bf16 %v6227_v34, %v6223_v43  ;;  %16972 = vmatprep.subr.bf16.mxu1 %v16971_v15  ;;  %v18458_v30 = vpop.permute.xlu1 %18457  ;;  %v16967_v62 = vpack.c.bf16 %v6226_v39, %v6222_v42  ;;  %v20938_v15 = vld [vmem:[%s19649_s10 + $0x140] sm:$0xff]  ;;  %v16989_v43 = vpack.c.bf16 %v20823_v40, %v20803_v50  ;;  %v20949_v34 = vld [vmem:[%s19649_s10 + $0x148] sm:$0xff]  ;;  %v16985_v42 = vpack.c.bf16 %v20834_v55, %v20813_v56  ;;  %v20960_v39 = vld [vmem:[%s19649_s10 + $0x150] sm:$0xff] }
 0x896   : >> { %v18460_v33 = vunpack.i.h.bf16 %v18458_v30  ;;  %v18459_v45 = vunpack.i.l.bf16 %v18458_v30  ;;  %v6484_v13 = vsel %vm4329_vm4, %v18464_v11, %v18465_v52  ;;  %v20978_v30 = vld [vmem:[%s19649_s10 + $0x160] sm:$0xff] }
 0x897   : >> { %v18473_v2 = vpop.permute.xlu0 %18472  ;;  %16968 = vmatprep.subr.bf16.mxu0 %v16967_v62  ;;  %16974 = vmatpush1.bf16.msra.mxu1 %v16973_v7  ;;  %v20969_v7 = vld [vmem:[%s19649_s10 + $0x158] sm:$0xff]  ;;  %v20987_v62 = vld [vmem:[%s19649_s10 + $0x168] sm:$0xff] }
 0x898   : >> { %v18475_v36 = vunpack.i.h.bf16 %v18473_v2  ;;  %v18474_v3 = vunpack.i.l.bf16 %v18473_v2  ;;  %v6221_v14 = vsel %vm560_vm2, %v18459_v45, %v18439_v46  ;;  %v6225_v51 = vsel %vm560_vm2, %v18460_v33, %v18449_v24  ;;  %v20916_v46 = vld [vmem:[%s19649_s10 + $0x130] sm:$0xff] }
 0x899   : >> { %v16969_v60 = vpack.c.bf16 %v6225_v51, %v6221_v14  ;;  %v18468_v22 = vpop.permute.xlu1 %18467 }
 0x89a   : >> { %16327 = vmatmul.mubr.msk.f32.vlgmr.msra.gmra.mrb[72].mxu1 %vm560_vm2, %v20891_v41  ;;  %v6488_v53 = vsel %vm4329_vm4, %v18474_v3, %v18475_v36  ;;  %v18470_v48 = vunpack.i.h.bf16 %v18468_v22  ;;  %v18469_v16 = vunpack.i.l.bf16 %v18468_v22 }
 0x89b   : >> { %v18483_v9 = vpop.permute.xlu0 %18482  ;;  %16970 = vmatpush1.bf16.msra.mxu0 %v16969_v60  ;;  %v16975_v10 = vpack.c.bf16 %v6488_v53, %v6484_v13  ;;  %6408 = vmatprep.mubr.f32.mxu1 %v23035_v35 }
 0x89c   : >> { %v18485_v12 = vunpack.i.h.bf16 %v18483_v9  ;;  %v18484_v59 = vunpack.i.l.bf16 %v18483_v9  ;;  %v6485_v6 = vsel %vm4329_vm4, %v18465_v52, %v18469_v16  ;;  %v6486_v31 = vsel %vm4329_vm4, %v18469_v16, %v18470_v48  ;;  %v20996_v52 = vld [vmem:[%s19649_s10 + $0x170] sm:$0xff] }
 0x89d   : >> { %16976 = vmatprep.subr.bf16.mxu0 %v16975_v10  ;;  %v18478_v20 = vpop.permute.xlu1 %18477 }
 0x89e   : >> { %v6483_v58 = vsel %vm4329_vm4, %v18484_v59, %v18464_v11  ;;  %v6487_v8 = vsel %vm4329_vm4, %v18485_v12, %v18474_v3  ;;  %v18480_v17 = vunpack.i.h.bf16 %v18478_v20  ;;  %v18479_v47 = vunpack.i.l.bf16 %v18478_v20  ;;  %16323 = vmatmul.mubr.msk.f32.vlgmr.msra.gmra.mrb[72].mxu0 %vm560_vm2, %v20891_v41  ;;  %16328 = vmatmul.mubr.msk.f32.gmra.mrb[74].mxu1 %vm560_vm2, %v20901_v38  ;;  %v21005_v11 = vld [vmem:[%s19649_s10 + $0x178] sm:$0xff] }
 0x89f   : >> { %v16977_v54 = vpack.c.bf16 %v6487_v8, %v6483_v58  ;;  %6319 = vmatprep.mubr.f32.mxu0 %v23035_v35  ;;  %6414 = vmatprep.mubr.f32.mxu1 %v23035_v35 }
 0x8a0   : >> { %v6489_v29 = vsel %vm4329_vm4, %v18475_v36, %v18479_v47  ;;  %v6490_v28 = vsel %vm4329_vm4, %v18479_v47, %v18480_v17 }
 0x8a1   : >> { %v16981_v24 = vpack.c.bf16 %v6489_v29, %v6485_v6  ;;  %16978 = vmatpush1.bf16.msra.mxu0 %v16977_v54  ;;  %v16979_v37 = vpack.c.bf16 %v6490_v28, %v6486_v31  ;;  %v16321_v54 = vld [vmem:[%s19633_s23 + $0x30] sm:$0xff] }
 0x8a2   : >> { %16984 = vmatprep.subr.bf16.mxu0 %v16983_v26  ;;  %16324 = vmatmul.mubr.msk.f32.gmra.mrb[74].mxu0 %vm560_vm2, %v20901_v38 }
 0x8a3   : >> { %16329 = vmatmul.mubr.msk.f32.gmra.mrb[76].mxu1 %vm560_vm2, %v20916_v46  ;;  %16980 = vmatprep.subr.bf16.mxu1 %v16979_v37 }
 0x8a4   : >> { %16982 = vmatpush1.bf16.msra.mxu1 %v16981_v24  ;;  %6325 = vmatprep.mubr.f32.mxu0 %v23035_v35 }
 0x8a5   : >> { %6420 = vmatprep.mubr.f32.mxu1 %v23035_v35  ;;  %16988 = vmatprep.subr.bf16.mxu1 %v16987_v63 }
 0x8a6   : >> { %16325 = vmatmul.mubr.msk.f32.gmra.mrb[76].mxu0 %vm560_vm2, %v20916_v46 }
 0x8a7   : >> { %16330 = vmatmul.mubr.msk.f32.gmra.mrb[78].mxu1 %vm560_vm2, %v20928_v27  ;;  %6331 = vmatprep.mubr.f32.mxu0 %v23035_v35 }
 0x8a8   : >> { %6664 = vmatprep.mubr.f32.mxu1 %v23035_v35 }
 0x8aa   : >> { %16326 = vmatmul.mubr.msk.f32.gmra.mrb[78].mxu0 %vm560_vm2, %v20928_v27 }
 0x8ab   : >> { %16335 = vmatmul.mubr.msk.f32.vlgmr.msra.gmra.mrb[72].mxu1 %vm560_vm2, %v20938_v15  ;;  %6575 = vmatprep.mubr.f32.mxu0 %v23035_v35 }
 0x8ac   : >> { %16990 = vmatpush1.bf16.msra.mxu1 %v16989_v43  ;;  %6670 = vmatprep.mubr.f32.mxu1 %v23035_v35  ;;  %v21070_v31 = vpop.permute.xlu0 %6444 }
 0x8ae   : >> { %16331 = vmatmul.mubr.msk.f32.vlgmr.msra.gmra.mrb[72].mxu0 %vm560_vm2, %v20938_v15  ;;  %v21068_v26 = vpop.permute.xlu1 %6439 }
 0x8af   : >> { %16336 = vmatmul.mubr.msk.f32.gmra.mrb[74].mxu1 %vm560_vm2, %v20949_v34  ;;  %16986 = vmatpush1.bf16.msra.mxu0 %v16985_v42 }
 0x8b0   : >> { %6581 = vmatprep.mubr.f32.mxu0 %v23035_v35  ;;  %6676 = vmatprep.mubr.f32.mxu1 %v23035_v35 }
 0x8b2   : >> { %16332 = vmatmul.mubr.msk.f32.gmra.mrb[74].mxu0 %vm560_vm2, %v20949_v34  ;;  %v21072_v63 = vpop.permute.xlu1 %6429 }
 0x8b3   : >> { %16337 = vmatmul.mubr.msk.f32.gmra.mrb[76].mxu1 %vm560_vm2, %v20960_v39  ;;  %6587 = vmatprep.mubr.f32.mxu0 %v23035_v35 }
 0x8b4   : >> { %6682 = vmatprep.mubr.f32.mxu1 %v23035_v35 }
 0x8b6   : >> { %16333 = vmatmul.mubr.msk.f32.gmra.mrb[76].mxu0 %vm560_vm2, %v20960_v39 }
 0x8b7   : >> { %16338 = vmatmul.mubr.msk.f32.gmra.mrb[78].mxu1 %vm560_vm2, %v20969_v7  ;;  %6593 = vmatprep.mubr.f32.mxu0 %v23035_v35 }
 0x8b8   : >> { %6870 = vmatprep.mubr.f32.mxu1 %v23035_v35 }
 0x8ba   : >> { %16334 = vmatmul.mubr.msk.f32.gmra.mrb[78].mxu0 %vm560_vm2, %v20969_v7 }
 0x8bb   : >> { %16343 = vmatmul.mubr.msk.f32.vlgmr.msra.gmra.mrb[72].mxu1 %vm560_vm2, %v20978_v30  ;;  %6781 = vmatprep.mubr.f32.mxu0 %v23035_v35 }
 0x8bc   : >> { %6876 = vmatprep.mubr.f32.mxu1 %v23035_v35 }
 0x8be   : >> { %16339 = vmatmul.mubr.msk.f32.vlgmr.msra.gmra.mrb[72].mxu0 %vm560_vm2, %v20978_v30 }
 0x8bf   : >> { %16344 = vmatmul.mubr.msk.f32.gmra.mrb[74].mxu1 %vm560_vm2, %v20987_v62  ;;  %6787 = vmatprep.mubr.f32.mxu0 %v23035_v35 }
 0x8c0   : >> { %6882 = vmatprep.mubr.f32.mxu1 %v23035_v35 }
 0x8c2   : >> { %16340 = vmatmul.mubr.msk.f32.gmra.mrb[74].mxu0 %vm560_vm2, %v20987_v62 }
 0x8c3   : >> { %16345 = vmatmul.mubr.msk.f32.gmra.mrb[76].mxu1 %vm560_vm2, %v20996_v52  ;;  %6793 = vmatprep.mubr.f32.mxu0 %v23035_v35 }
 0x8c4   : >> { %6888 = vmatprep.mubr.f32.mxu1 %v23035_v35 }
 0x8c6   : >> { %16341 = vmatmul.mubr.msk.f32.gmra.mrb[76].mxu0 %vm560_vm2, %v20996_v52 }
 0x8c7   : >> { %16346 = vmatmul.mubr.msk.f32.gmra.mrb[78].mxu1 %vm560_vm2, %v21005_v11  ;;  %6799 = vmatprep.mubr.f32.mxu0 %v23035_v35 }
 0x8c8   : >> { %7116 = vmatprep.mubr.f32.mxu1 %v23035_v35 }
 0x8ca   : >> { %16342 = vmatmul.mubr.msk.f32.gmra.mrb[78].mxu0 %vm560_vm2, %v21005_v11 }
 0x8cb   : >> { %7039 = vmatprep.mubr.f32.mxu0 %v23035_v35 }
 0x935   : >> { %v6119_v33 = vpop.f32.mrb[68].mxu1 }
 0x936   : >> { %v6120_v45 = vadd.f32 %v6119_v33, %v20798_v18  ;;  %v6121_v2 = vpop.f32.mrb[69].mxu1 }
 0x937   : >> { %v6122_v36 = vadd.f32 %v6121_v2, %v20798_v18  ;;  %v6042_v3 = vpop.f32.mrb[68].mxu0 }
 0x938   : >> { %v21019_v14 = vadd.f32 %v6120_v45, %v20611_v61  ;;  %v6043_v51 = vadd.f32 %v6042_v3, %v20798_v18  ;;  %v6044_v60 = vpop.f32.mrb[69].mxu0 }
 0x939   : >> { %v21023_v22 = vadd.f32 %v6122_v36, %v20615_v4  ;;  %v6125_v13 = vpop.f32.mrb[70].mxu1  ;;  %v6045_v53 = vadd.f32 %v6044_v60, %v20798_v18 }
 0x93a   : >> { %v21027_v9 = vadd.f32 %v6043_v51, %v20619_v5  ;;  %v6126_v10 = vadd.f32 %v6125_v13, %v20806_v21  ;;  %v6127_v12 = vpop.f32.mrb[71].mxu1  ;;  %v21078_v13 = vpop.permute.xlu0 %6434 }
 0x93b   : >> { %v21031_v59 = vadd.f32 %v6045_v53, %v20623_v25  ;;  %v6128_v61 = vadd.f32 %v6127_v12, %v20806_v21  ;;  %v6048_v48 = vpop.f32.mrb[70].mxu0  ;;  %v18491_v16 = vpack.i.bf16 %v21023_v22, %v21019_v14 }
 0x93c   : >> { %v21037_v4 = vadd.f32 %v6126_v10, %v20629_v23  ;;  %v6049_v18 = vadd.f32 %v6048_v48, %v20806_v21  ;;  %v6050_v20 = vpop.f32.mrb[71].mxu0 }
 0x93d   : >> { %v21041_v5 = vadd.f32 %v6128_v61, %v20633_v32  ;;  %v6051_v58 = vadd.f32 %v6050_v20, %v20806_v21  ;;  %18492 = vrot.lane.b32.xlu0 %v18491_v16, %s19387_s28  ;;  %v18486_v25 = vpack.i.bf16 %v21031_v59, %v21027_v9  ;;  %v7145_v32 = vld [vmem:[#allocation2 + $0x68] sm:$0xff]  ;;  %v7150_v21 = vld [vmem:[#allocation2 + $0x98] sm:$0xff] }
 0x93e   : >> { %v21048_v8 = vadd.f32 %v6049_v18, %v20640_v19  ;;  %v18506_v19 = vpack.i.bf16 %v7150_v21, %v7145_v32 }
 0x93f   : >> { %v21051_v23 = vadd.f32 %v6051_v58, %v20643_v49  ;;  %v18501_v17 = vpack.i.bf16 %v21041_v5, %v21037_v4  ;;  %18487 = vrot.lane.b32.xlu1 %v18486_v25, %s19387_s28  ;;  %v16322_v49 = vld [vmem:[%s19633_s23 + $0x38] sm:$0xff] }
 0x941   : >> { %18502 = vrot.lane.b32.xlu0 %v18501_v17, %s19387_s28  ;;  %v18496_v47 = vpack.i.bf16 %v21051_v23, %v21048_v8 }
 0x943   : >> { %18497 = vrot.lane.b32.xlu1 %v18496_v47, %s19387_s28 }
 0x945   : >> { %18512 = vrot.lane.b32.xlu0 %v18486_v25, %s19386_s26 }
 0x947   : >> { %18507 = vrot.lane.b32.xlu1 %v18506_v19, %s19387_s28 }
 0x949   : >> { %18522 = vrot.lane.b32.xlu0 %v18496_v47, %s19386_s26 }
 0x94b   : >> { %18517 = vrot.lane.b32.xlu1 %v18491_v16, %s19386_s26 }
 0x94d   : >> { %18532 = vrot.lane.b32.xlu0 %v18506_v19, %s19386_s26 }
 0x94f   : >> { %18527 = vrot.lane.b32.xlu1 %v18501_v17, %s19386_s26  ;;  %s22925_s26 = scalar_lea.sflag (%p464_p11), [#allocation5], %s326_s30 }
 0x951   : >> { %6966 = vperm.xlu0 %18184, %v16322_v49  }
 0x953   : >> { %6961 = vperm.xlu1 %18185, %v16321_v54  }
 0x98e   : >> { %v6872_v6 = vpop.f32.mrb[72].mxu1 }
 0x98f   : >> { %v6874_v29 = vpop.f32.mrb[73].mxu1  ;;  %v17407_v42 = vadd.f32 %v6872_v6, %v21072_v63 }
 0x990   : >> { %v17408_v33 = vadd.f32 %v6874_v29, %v21072_v63 }
 0x991   : >> { %v6783_v28 = vpop.f32.mrb[72].mxu0  ;;  %18978 = vtanh.f32 %v17407_v42 }
 0x992   : >> { %v6878_v24 = vpop.f32.mrb[74].mxu1  ;;  %v6785_v37 = vpop.f32.mrb[73].mxu0  ;;  %v17399_v2 = vadd.f32 %v6783_v28, %v21072_v63  ;;  %18980 = vtanh.f32 %v17408_v33 }
 0x993   : >> { %v6880_v43 = vpop.f32.mrb[75].mxu1  ;;  %v17409_v10 = vadd.f32 %v6878_v24, %v21078_v13  ;;  %v17400_v24 = vadd.f32 %v6785_v37, %v21072_v63 }
 0x994   : >> { %18982 = vtanh.f32 %v17399_v2  ;;  %v17410_v33 = vadd.f32 %v6880_v43, %v21078_v13 }
 0x995   : >> { %v6789_v45 = vpop.f32.mrb[74].mxu0 }
 0x996   : >> { %v6884_v36 = vpop.f32.mrb[76].mxu1  ;;  %v6791_v3 = vpop.f32.mrb[75].mxu0 }
 0x997   : >> { %v17411_v51 = vadd.f32 %v6884_v36, %v21068_v26  ;;  %v6886_v60 = vpop.f32.mrb[77].mxu1 }
 0x998   : >> { %v17412_v53 = vadd.f32 %v6886_v60, %v21068_v26 }
 0x999   : >> { %v6913_v12 = vmul.f32 0.5, %v17411_v51  ;;  %v6795_v61 = vpop.f32.mrb[76].mxu0  ;;  %v17401_v51 = vadd.f32 %v6789_v45, %v21078_v13 }
 0x99a   : >> { %v6914_v48 = vmul.f32 0.5, %v17412_v53  ;;  %v17403_v16 = vadd.f32 %v6795_v61, %v21068_v26  ;;  %v6890_v18 = vpop.f32.mrb[78].mxu1  ;;  %v6797_v20 = vpop.f32.mrb[77].mxu0  ;;  %v17402_v53 = vadd.f32 %v6791_v3, %v21078_v13 }
 0x99b   : >> { %18984 = vtanh.f32 %v6913_v12  ;;  %v17413_v58 = vadd.f32 %v6890_v18, %v21070_v31  ;;  %v17404_v25 = vadd.f32 %v6797_v20, %v21068_v26  ;;  %v6892_v17 = vpop.f32.mrb[79].mxu1  ;;  %v18979_v36 = vpop.eup %18978 }
 0x99c   : >> { %18986 = vtanh.f32 %v6914_v48  ;;  %v6911_v32 = vmul.f32 0.5, %v17403_v16  ;;  %v17414_v21 = vadd.f32 %v6892_v17, %v21070_v31  ;;  %v18981_v60 = vpop.eup %18980 }
 0x99d   : >> { %18988 = vtanh.f32 %v17409_v10  ;;  %v6917_v47 = vmul.f32 0.5, %v17413_v58  ;;  %v6912_v19 = vmul.f32 0.5, %v17404_v25  ;;  %v6801_v49 = vpop.f32.mrb[78].mxu0 }
 0x99e   : >> { %18990 = vtanh.f32 %v6911_v32  ;;  %v6918_v54 = vmul.f32 0.5, %v17414_v21  ;;  %v17405_v6 = vadd.f32 %v6801_v49, %v21070_v31  ;;  %v6803_v29 = vpop.f32.mrb[79].mxu0  ;;  %v18983_v10 = vpop.eup %18982 }
 0x99f   : >> { %18992 = vtanh.f32 %v6917_v47  ;;  %v17406_v28 = vadd.f32 %v6803_v29, %v21070_v31 }
 0x9a0   : >> { %18994 = vtanh.f32 %v6912_v19  ;;  %v6915_v42 = vmul.f32 0.5, %v17405_v6 }
 0x9a1   : >> { %18996 = vtanh.f32 %v6918_v54  ;;  %v6916_v2 = vmul.f32 0.5, %v17406_v28 }
 0x9a2   : >> { %18998 = vtanh.f32 %v6915_v42 }
 0x9a3   : >> { %19000 = vtanh.f32 %v6916_v2 }
 0x9a4   : >> { %19002 = vtanh.f32 %v17400_v24 }
 0x9a5   : >> { %v18985_v12 = vpop.eup %18984  ;;  %19004 = vtanh.f32 %v17410_v33 }
 0x9a6   : >> { %v18987_v61 = vpop.eup %18986  ;;  %19006 = vtanh.f32 %v17401_v51  ;;  %v6929_v37 = vmul.f32 0.5, %v18985_v12 }
 0x9a7   : >> { %v18989_v48 = vpop.eup %18988  ;;  %19008 = vtanh.f32 %v17402_v53  ;;  %v6930_v43 = vmul.f32 0.5, %v18987_v61 }
 0x9a8   : >> { %v18991_v16 = vpop.eup %18990  ;;  %v6937_v18 = vadd.f32 0.5, %v6929_v37 }
 0x9a9   : >> { %v18993_v20 = vpop.eup %18992  ;;  %v6938_v58 = vadd.f32 0.5, %v6930_v43  ;;  %v6927_v45 = vmul.f32 0.5, %v18991_v16 }
 0x9aa   : >> { %v18995_v25 = vpop.eup %18994  ;;  %v6953_v17 = vmul.f32 %v18979_v36, %v6937_v18  ;;  %v6933_v32 = vmul.f32 0.5, %v18993_v20 }
 0x9ab   : >> { %v18997_v3 = vpop.eup %18996  ;;  %v6935_v21 = vadd.f32 0.5, %v6927_v45  ;;  %v6928_v47 = vmul.f32 0.5, %v18995_v25  ;;  %v6954_v19 = vmul.f32 %v18981_v60, %v6938_v58 }
 0x9ac   : >> { %v18999_v49 = vpop.eup %18998  ;;  %v6941_v54 = vadd.f32 0.5, %v6933_v32  ;;  %v6934_v6 = vmul.f32 0.5, %v18997_v3 }
 0x9ad   : >> { %v19001_v29 = vpop.eup %19000  ;;  %v6951_v28 = vmul.f32 %v18983_v10, %v6935_v21  ;;  %v6936_v24 = vadd.f32 0.5, %v6928_v47  ;;  %v6931_v42 = vmul.f32 0.5, %v18999_v49 }
 0x9ae   : >> { %v19003_v33 = vpop.eup %19002  ;;  %v6957_v2 = vmul.f32 %v18989_v48, %v6941_v54  ;;  %v6942_v51 = vadd.f32 0.5, %v6934_v6  ;;  %v6932_v53 = vmul.f32 0.5, %v19001_v29 }
 0x9af   : >> { %v19005_v12 = vpop.eup %19004  ;;  %v6939_v61 = vadd.f32 0.5, %v6931_v42  ;;  %v18493_v37 = vpop.permute.xlu0 %18492  ;;  %v6952_v36 = vmul.f32 %v19003_v33, %v6936_v24  ;;  %v21093_v42 = vld [vmem:[%s19859_s27 + $0x30] sm:$0xff] }
 0x9b0   : >> { %v19007_v43 = vpop.eup %19006  ;;  %v6940_v16 = vadd.f32 0.5, %v6932_v53  ;;  %v6958_v18 = vmul.f32 %v19005_v12, %v6942_v51  ;;  %v16997_v45 = vpack.c.bf16 %v6957_v2, %v6953_v17  ;;  %v18495_v25 = vunpack.i.h.bf16 %v18493_v37 }
 0x9b1   : >> { %v19009_v20 = vpop.eup %19008  ;;  %v6955_v60 = vmul.f32 %v19007_v43, %v6939_v61  ;;  %v18488_v58 = vpop.permute.xlu1 %18487  ;;  %v18494_v10 = vunpack.i.l.bf16 %v18493_v37 }
 0x9b2   : >> { %v16995_v32 = vpack.c.bf16 %v6958_v18, %v6954_v19  ;;  %v6956_v3 = vmul.f32 %v19009_v20, %v6940_v16  ;;  %v18490_v48 = vunpack.i.h.bf16 %v18488_v58  ;;  %v18489_v6 = vunpack.i.l.bf16 %v18488_v58  ;;  %v21105_v16 = vld [vmem:[%s19859_s27 + $0x38] sm:$0xff] }
 0x9b3   : >> { %v18503_v21 = vpop.permute.xlu0 %18502  ;;  %v16993_v47 = vpack.c.bf16 %v6955_v60, %v6951_v28  ;;  %v7188_v17 = vsel %vm560_vm2, %v18494_v10, %v18495_v25 }
 0x9b4   : >> { %v18505_v49 = vunpack.i.h.bf16 %v18503_v21  ;;  %v18504_v54 = vunpack.i.l.bf16 %v18503_v21  ;;  %16996 = vmatprep.subr.bf16.mxu1 %v16995_v32  ;;  %v16991_v29 = vpack.c.bf16 %v6956_v3, %v6952_v36  ;;  %v7187_v53 = vsel %vm560_vm2, %v18490_v48, %v18494_v10 }
 0x9b5   : >> { %16998 = vmatpush1.bf16.msra.mxu1 %v16997_v45  ;;  %v18498_v24 = vpop.permute.xlu1 %18497  ;;  %v7186_v61 = vsel %vm560_vm2, %v18489_v6, %v18490_v48 }
 0x9b6   : >> { %v18500_v33 = vunpack.i.h.bf16 %v18498_v24  ;;  %v18499_v51 = vunpack.i.l.bf16 %v18498_v24  ;;  %16992 = vmatprep.subr.bf16.mxu0 %v16991_v29  ;;  %v7192_v19 = vsel %vm560_vm2, %v18504_v54, %v18505_v49 }
 0x9b7   : >> { %v18513_v2 = vpop.permute.xlu0 %18512  ;;  %16994 = vmatpush1.bf16.msra.mxu0 %v16993_v47  ;;  %v17003_v28 = vpack.c.bf16 %v7192_v19, %v7188_v17 }
 0x9b8   : >> { %v7191_v12 = vsel %vm560_vm2, %v18500_v33, %v18504_v54  ;;  %16349 = vmatmul.mubr.msk.f32.vlgmr.msra.gmra.mrb[80].mxu1 %vm560_vm2, %v21093_v42  ;;  %v7190_v37 = vsel %vm560_vm2, %v18499_v51, %v18500_v33  ;;  %v18515_v20 = vunpack.i.h.bf16 %v18513_v2  ;;  %v18514_v60 = vunpack.i.l.bf16 %v18513_v2 }
 0x9b9   : >> { %v17005_v36 = vpack.c.bf16 %v7191_v12, %v7187_v53  ;;  %17004 = vmatprep.subr.bf16.mxu1 %v17003_v28  ;;  %v18508_v43 = vpop.permute.xlu1 %18507  ;;  %7122 = vmatprep.mubr.f32.mxu1 %v23035_v35  ;;  %v16999_v18 = vpack.c.bf16 %v7190_v37, %v7186_v61  ;;  %v17015_v37 = vpack.c.bf16 %v21051_v23, %v21031_v59 }
 0x9ba   : >> { %v18510_v58 = vunpack.i.h.bf16 %v18508_v43  ;;  %v18509_v45 = vunpack.i.l.bf16 %v18508_v43  ;;  %16347 = vmatmul.mubr.msk.f32.vlgmr.msra.gmra.mrb[80].mxu0 %vm560_vm2, %v21093_v42  ;;  %v7416_v49 = vsel %vm4329_vm4, %v18514_v60, %v18515_v20 }
 0x9bb   : >> { %v18523_v25 = vpop.permute.xlu0 %18522  ;;  %17000 = vmatprep.subr.bf16.mxu0 %v16999_v18  ;;  %17006 = vmatpush1.bf16.msra.mxu1 %v17005_v36 }
 0x9bc   : >> { %v18525_v10 = vunpack.i.h.bf16 %v18523_v25  ;;  %v18524_v32 = vunpack.i.l.bf16 %v18523_v25  ;;  %v7185_v3 = vsel %vm560_vm2, %v18509_v45, %v18489_v6  ;;  %v7189_v21 = vsel %vm560_vm2, %v18510_v58, %v18499_v51  ;;  %16350 = vmatmul.mubr.msk.f32.gmra.mrb[82].mxu1 %vm560_vm2, %v21105_v16  ;;  %7045 = vmatprep.mubr.f32.mxu0 %v23035_v35 }
 0x9bd   : >> { %v17001_v48 = vpack.c.bf16 %v7189_v21, %v7185_v3  ;;  %v18518_v47 = vpop.permute.xlu1 %18517  ;;  %7354 = vmatprep.mubr.f32.mxu1 %v23035_v35 }
 0x9be   : >> { %16348 = vmatmul.mubr.msk.f32.gmra.mrb[82].mxu0 %vm560_vm2, %v21105_v16  ;;  %v7420_v54 = vsel %vm4329_vm4, %v18524_v32, %v18525_v10  ;;  %v18520_v51 = vunpack.i.h.bf16 %v18518_v47  ;;  %v18519_v17 = vunpack.i.l.bf16 %v18518_v47 }
 0x9bf   : >> { %v18533_v29 = vpop.permute.xlu0 %18532  ;;  %17002 = vmatpush1.bf16.msra.mxu0 %v17001_v48  ;;  %v17007_v6 = vpack.c.bf16 %v7420_v54, %v7416_v49  ;;  %7265 = vmatprep.mubr.f32.mxu0 %v23035_v35 }
 0x9c0   : >> { %v18535_v24 = vunpack.i.h.bf16 %v18533_v29  ;;  %v18534_v33 = vunpack.i.l.bf16 %v18533_v29  ;;  %16355 = vmatmul.mubr.msk.f32.vlgmr.msra.gmra.mrb[84].mxu1 %vm560_vm2, %v20891_v41  ;;  %v7417_v36 = vsel %vm4329_vm4, %v18515_v20, %v18519_v17  ;;  %v7418_v18 = vsel %vm4329_vm4, %v18519_v17, %v18520_v51  ;;  %v8072_v51 = vld [vmem:[#allocation2 + $0x8] sm:$0xff]  ;;  %v8077_v17 = vld [vmem:[#allocation2 + $0x38] sm:$0xff] }
 0x9c1   : >> { %17008 = vmatprep.subr.bf16.mxu0 %v17007_v6  ;;  %v18528_v19 = vpop.permute.xlu1 %18527  ;;  %7360 = vmatprep.mubr.f32.mxu1 %v23035_v35  ;;  %v17019_v20 = vpack.c.bf16 %v21041_v5, %v21023_v22 }
 0x9c2   : >> { %v7415_v2 = vsel %vm4329_vm4, %v18534_v33, %v18514_v60  ;;  %v7419_v28 = vsel %vm4329_vm4, %v18535_v24, %v18524_v32  ;;  %v18530_v53 = vunpack.i.h.bf16 %v18528_v19  ;;  %v18529_v12 = vunpack.i.l.bf16 %v18528_v19  ;;  %16351 = vmatmul.mubr.msk.f32.vlgmr.msra.gmra.mrb[84].mxu0 %vm560_vm2, %v20891_v41 }
 0x9c3   : >> { %v17009_v61 = vpack.c.bf16 %v7419_v28, %v7415_v2  ;;  %7271 = vmatprep.mubr.f32.mxu0 %v23035_v35  ;;  %v16403_v2 = vld [vmem:[%s19589_s15 + $0x90] sm:$0xff]  ;;  %v16402_v28 = vld [vmem:[%s19589_s15 + $0x88] sm:$0xff] }
 0x9c4   : >> { %v7421_v43 = vsel %vm4329_vm4, %v18525_v10, %v18529_v12  ;;  %16356 = vmatmul.mubr.msk.f32.gmra.mrb[86].mxu1 %vm560_vm2, %v20901_v38  ;;  %v7422_v60 = vsel %vm4329_vm4, %v18529_v12, %v18530_v53  ;;  %v16401_v53 = vld [vmem:[%s19589_s15 + $0x80] sm:$0xff] }
 0x9c5   : >> { %v17013_v58 = vpack.c.bf16 %v7421_v43, %v7417_v36  ;;  %17010 = vmatpush1.bf16.msra.mxu0 %v17009_v61  ;;  %7366 = vmatprep.mubr.f32.mxu1 %v23035_v35  ;;  %v17011_v41 = vpack.c.bf16 %v7422_v60, %v7418_v18 }
 0x9c6   : >> { %17016 = vmatprep.subr.bf16.mxu0 %v17015_v37  ;;  %16352 = vmatmul.mubr.msk.f32.gmra.mrb[86].mxu0 %vm560_vm2, %v20901_v38  ;;  %v17021_v38 = vpack.c.bf16 %v21037_v4, %v21019_v14 }
 0x9c7   : >> { %17012 = vmatprep.subr.bf16.mxu1 %v17011_v41  ;;  %7277 = vmatprep.mubr.f32.mxu0 %v23035_v35 }
 0x9c8   : >> { %16357 = vmatmul.mubr.msk.f32.gmra.mrb[88].mxu1 %vm560_vm2, %v20916_v46 }
 0x9c9   : >> { %17014 = vmatpush1.bf16.msra.mxu1 %v17013_v58  ;;  %7372 = vmatprep.mubr.f32.mxu1 %v23035_v35 }
 0x9ca   : >> { %17020 = vmatprep.subr.bf16.mxu1 %v17019_v20  ;;  %16353 = vmatmul.mubr.msk.f32.gmra.mrb[88].mxu0 %vm560_vm2, %v20916_v46  ;;  %v17017_v46 = vpack.c.bf16 %v21048_v8, %v21027_v9 }
 0x9cb   : >> { %7283 = vmatprep.mubr.f32.mxu0 %v23035_v35 }
 0x9cc   : >> { %16358 = vmatmul.mubr.msk.f32.gmra.mrb[90].mxu1 %vm560_vm2, %v20928_v27 }
 0x9cd   : >> { %7584 = vmatprep.mubr.f32.mxu1 %v23035_v35 }
 0x9ce   : >> { %16354 = vmatmul.mubr.msk.f32.gmra.mrb[90].mxu0 %vm560_vm2, %v20928_v27 }
 0x9cf   : >> { %7495 = vmatprep.mubr.f32.mxu0 %v23035_v35 }
 0x9d0   : >> { %16363 = vmatmul.mubr.msk.f32.vlgmr.msra.gmra.mrb[84].mxu1 %vm560_vm2, %v20938_v15  ;;  %v21214_v25 = vpop.permute.xlu0 %6966 }
 0x9d1   : >> { %17022 = vmatpush1.bf16.msra.mxu1 %v17021_v38  ;;  %7590 = vmatprep.mubr.f32.mxu1 %v23035_v35 }
 0x9d2   : >> { %16359 = vmatmul.mubr.msk.f32.vlgmr.msra.gmra.mrb[84].mxu0 %vm560_vm2, %v20938_v15  ;;  %v21206_v27 = vpop.permute.xlu1 %6961 }
 0x9d3   : >> { %17018 = vmatpush1.bf16.msra.mxu0 %v17017_v46  ;;  %7501 = vmatprep.mubr.f32.mxu0 %v23035_v35 }
 0x9d4   : >> { %16364 = vmatmul.mubr.msk.f32.gmra.mrb[86].mxu1 %vm560_vm2, %v20949_v34 }
 0x9d5   : >> { %7596 = vmatprep.mubr.f32.mxu1 %v23035_v35 }
 0x9d6   : >> { %16360 = vmatmul.mubr.msk.f32.gmra.mrb[86].mxu0 %vm560_vm2, %v20949_v34 }
 0x9d7   : >> { %7507 = vmatprep.mubr.f32.mxu0 %v23035_v35 }
 0x9d8   : >> { %16365 = vmatmul.mubr.msk.f32.gmra.mrb[88].mxu1 %vm560_vm2, %v20960_v39 }
 0x9d9   : >> { %7602 = vmatprep.mubr.f32.mxu1 %v23035_v35 }
 0x9da   : >> { %16361 = vmatmul.mubr.msk.f32.gmra.mrb[88].mxu0 %vm560_vm2, %v20960_v39 }
 0x9db   : >> { %7513 = vmatprep.mubr.f32.mxu0 %v23035_v35 }
 0x9dc   : >> { %16366 = vmatmul.mubr.msk.f32.gmra.mrb[90].mxu1 %vm560_vm2, %v20969_v7 }
 0x9dd   : >> { %7778 = vmatprep.mubr.f32.mxu1 %v23035_v35 }
 0x9de   : >> { %16362 = vmatmul.mubr.msk.f32.gmra.mrb[90].mxu0 %vm560_vm2, %v20969_v7 }
 0x9df   : >> { %7689 = vmatprep.mubr.f32.mxu0 %v23035_v35 }
 0x9e0   : >> { %16371 = vmatmul.mubr.msk.f32.vlgmr.msra.gmra.mrb[84].mxu1 %vm560_vm2, %v20978_v30 }
 0x9e1   : >> { %7784 = vmatprep.mubr.f32.mxu1 %v23035_v35 }
 0x9e2   : >> { %16367 = vmatmul.mubr.msk.f32.vlgmr.msra.gmra.mrb[84].mxu0 %vm560_vm2, %v20978_v30 }
 0x9e3   : >> { %7695 = vmatprep.mubr.f32.mxu0 %v23035_v35 }
 0x9e4   : >> { %16372 = vmatmul.mubr.msk.f32.gmra.mrb[86].mxu1 %vm560_vm2, %v20987_v62 }
 0x9e5   : >> { %7790 = vmatprep.mubr.f32.mxu1 %v23035_v35 }
 0x9e6   : >> { %16368 = vmatmul.mubr.msk.f32.gmra.mrb[86].mxu0 %vm560_vm2, %v20987_v62 }
 0x9e7   : >> { %7701 = vmatprep.mubr.f32.mxu0 %v23035_v35 }
 0x9e8   : >> { %16373 = vmatmul.mubr.msk.f32.gmra.mrb[88].mxu1 %vm560_vm2, %v20996_v52 }
 0x9e9   : >> { %7796 = vmatprep.mubr.f32.mxu1 %v23035_v35 }
 0x9ea   : >> { %16369 = vmatmul.mubr.msk.f32.gmra.mrb[88].mxu0 %vm560_vm2, %v20996_v52 }
 0x9eb   : >> { %7707 = vmatprep.mubr.f32.mxu0 %v23035_v35 }
 0x9ec   : >> { %16374 = vmatmul.mubr.msk.f32.gmra.mrb[90].mxu1 %vm560_vm2, %v21005_v11 }
 0x9ed   : >> { %8008 = vmatprep.mubr.f32.mxu1 %v23035_v35 }
 0x9ee   : >> { %16370 = vmatmul.mubr.msk.f32.gmra.mrb[90].mxu0 %vm560_vm2, %v21005_v11 }
 0x9ef   : >> { %7931 = vmatprep.mubr.f32.mxu0 %v23035_v35 }
 0xa8b   : >> { %v7118_v15 = vpop.f32.mrb[80].mxu1 }
 0xa8c   : >> { %v7119_v34 = vadd.f32 %v7118_v15, %v21206_v27  ;;  %v7120_v39 = vpop.f32.mrb[81].mxu1 }
 0xa8d   : >> { %v7121_v7 = vadd.f32 %v7120_v39, %v21206_v27  ;;  %v7041_v30 = vpop.f32.mrb[80].mxu0 }
 0xa8e   : >> { %v21211_v62 = vadd.f32 %v7119_v34, %v20803_v50  ;;  %v7042_v52 = vadd.f32 %v7041_v30, %v21206_v27  ;;  %v7043_v45 = vpop.f32.mrb[81].mxu0 }
 0xa8f   : >> { %v21217_v11 = vadd.f32 %v7121_v7, %v20809_v1  ;;  %v7124_v10 = vpop.f32.mrb[82].mxu1  ;;  %v7044_v32 = vadd.f32 %v7043_v45, %v21206_v27 }
 0xa90   : >> { %v21221_v3 = vadd.f32 %v7042_v52, %v20813_v56  ;;  %v7125_v21 = vadd.f32 %v7124_v10, %v21214_v25  ;;  %v7126_v48 = vpop.f32.mrb[83].mxu1 }
 0xa91   : >> { %v21225_v50 = vadd.f32 %v7044_v32, %v20817_v44  ;;  %v7127_v47 = vadd.f32 %v7126_v48, %v21214_v25  ;;  %v7047_v49 = vpop.f32.mrb[82].mxu0  ;;  %v18541_v54 = vpack.i.bf16 %v21217_v11, %v21211_v62 }
 0xa92   : >> { %v21231_v1 = vadd.f32 %v7125_v21, %v20823_v40  ;;  %v7048_v29 = vadd.f32 %v7047_v49, %v21214_v25  ;;  %v7049_v6 = vpop.f32.mrb[83].mxu0 }
 0xa93   : >> { %v21235_v56 = vadd.f32 %v7127_v47, %v20827_v0  ;;  %v7050_v24 = vadd.f32 %v7049_v6, %v21214_v25  ;;  %18542 = vrot.lane.b32.xlu0 %v18541_v54, %s19388_s29  ;;  %v18536_v44 = vpack.i.bf16 %v21225_v50, %v21221_v3 }
 0xa94   : >> { %v21242_v33 = vadd.f32 %v7048_v29, %v20834_v55  ;;  %v18556_v55 = vpack.i.bf16 %v8077_v17, %v8072_v51 }
 0xa95   : >> { %v21245_v40 = vadd.f32 %v7050_v24, %v20837_v57  ;;  %v18551_v0 = vpack.i.bf16 %v21235_v56, %v21231_v1  ;;  %18537 = vrot.lane.b32.xlu1 %v18536_v44, %s19388_s29  ;;  %v16404_v57 = vld [vmem:[%s19589_s15 + $0x98] sm:$0xff] }
 0xa97   : >> { %18552 = vrot.lane.b32.xlu0 %v18551_v0, %s19388_s29  ;;  %v18546_v19 = vpack.i.bf16 %v21245_v40, %v21242_v33 }
 0xa99   : >> { %18547 = vrot.lane.b32.xlu1 %v18546_v19, %s19388_s29 }
 0xa9b   : >> { %18562 = vrot.lane.b32.xlu0 %v18536_v44, %s19387_s28 }
 0xa9d   : >> { %18557 = vrot.lane.b32.xlu1 %v18556_v55, %s19388_s29 }
 0xa9f   : >> { %18572 = vrot.lane.b32.xlu0 %v18546_v19, %s19387_s28 }
 0xaa1   : >> { %18567 = vrot.lane.b32.xlu1 %v18541_v54, %s19387_s28 }
 0xaa3   : >> { %18582 = vrot.lane.b32.xlu0 %v18556_v55, %s19387_s28 }
 0xaa5   : >> { %18577 = vrot.lane.b32.xlu1 %v18551_v0, %s19387_s28 }
 0xaa7   : >> { %8336 = vperm.xlu0 %18184, %v16404_v57  }
 0xaa9   : >> { %8331 = vperm.xlu1 %18185, %v16403_v2  }
 0xaab   : >> { %8326 = vperm.xlu0 %18184, %v16402_v28  }
 0xaad   : >> { %8321 = vperm.xlu1 %18185, %v16401_v53  }
 0xab3   : >> { %v7780_v12 = vpop.f32.mrb[84].mxu1 }
 0xab4   : >> { %v7782_v61 = vpop.f32.mrb[85].mxu1  ;;  %v17423_v18 = vadd.f32 %v7780_v12, %v21072_v63 }
 0xab5   : >> { %v7691_v37 = vpop.f32.mrb[84].mxu0  ;;  %v17424_v58 = vadd.f32 %v7782_v61, %v21072_v63 }
 0xab6   : >> { %v7693_v36 = vpop.f32.mrb[85].mxu0  ;;  %v17415_v20 = vadd.f32 %v7691_v37, %v21072_v63  ;;  %19010 = vtanh.f32 %v17423_v18 }
 0xab7   : >> { %v7786_v43 = vpop.f32.mrb[86].mxu1  ;;  %v17416_v46 = vadd.f32 %v7693_v36, %v21072_v63  ;;  %19012 = vtanh.f32 %v17424_v58 }
 0xab8   : >> { %v7788_v60 = vpop.f32.mrb[87].mxu1  ;;  %19014 = vtanh.f32 %v17415_v20 }
 0xab9   : >> { %v7697_v41 = vpop.f32.mrb[86].mxu0  ;;  %19016 = vtanh.f32 %v17416_v46  ;;  %v17426_v55 = vadd.f32 %v7788_v60, %v21078_v13 }
 0xaba   : >> { %v7699_v38 = vpop.f32.mrb[87].mxu0  ;;  %v17417_v28 = vadd.f32 %v7697_v41, %v21078_v13 }
 0xabb   : >> { %v7792_v15 = vpop.f32.mrb[88].mxu1  ;;  %v17418_v12 = vadd.f32 %v7699_v38, %v21078_v13 }
 0xabc   : >> { %v17427_v34 = vadd.f32 %v7792_v15, %v21068_v26  ;;  %v7794_v39 = vpop.f32.mrb[89].mxu1 }
 0xabd   : >> { %v17428_v7 = vadd.f32 %v7794_v39, %v21068_v26  ;;  %v7703_v30 = vpop.f32.mrb[88].mxu0 }
 0xabe   : >> { %v7821_v52 = vmul.f32 0.5, %v17427_v34  ;;  %v17419_v45 = vadd.f32 %v7703_v30, %v21068_v26  ;;  %v7705_v10 = vpop.f32.mrb[89].mxu0 }
 0xabf   : >> { %v7822_v32 = vmul.f32 0.5, %v17428_v7  ;;  %v7798_v21 = vpop.f32.mrb[90].mxu1  ;;  %v17420_v48 = vadd.f32 %v7705_v10, %v21068_v26  ;;  %v17425_v26 = vadd.f32 %v7786_v43, %v21078_v13 }
 0xac0   : >> { %19018 = vtanh.f32 %v7821_v52  ;;  %v7819_v63 = vmul.f32 0.5, %v17419_v45  ;;  %v17429_v47 = vadd.f32 %v7798_v21, %v21070_v31  ;;  %v7800_v49 = vpop.f32.mrb[91].mxu1  ;;  %v19011_v2 = vpop.eup %19010 }
 0xac1   : >> { %19020 = vtanh.f32 %v7822_v32  ;;  %v7820_v54 = vmul.f32 0.5, %v17420_v48  ;;  %v17430_v29 = vadd.f32 %v7800_v49, %v21070_v31  ;;  %v7709_v6 = vpop.f32.mrb[90].mxu0  ;;  %v19013_v53 = vpop.eup %19012 }
 0xac2   : >> { %19022 = vtanh.f32 %v7819_v63  ;;  %v7825_v24 = vmul.f32 0.5, %v17429_v47  ;;  %v17421_v44 = vadd.f32 %v7709_v6, %v21070_v31  ;;  %v7711_v0 = vpop.f32.mrb[91].mxu0  ;;  %v19015_v61 = vpop.eup %19014 }
 0xac3   : >> { %19024 = vtanh.f32 %v7820_v54  ;;  %v7826_v51 = vmul.f32 0.5, %v17430_v29  ;;  %v17422_v17 = vadd.f32 %v7711_v0, %v21070_v31  ;;  %v19017_v37 = vpop.eup %19016 }
 0xac4   : >> { %19026 = vtanh.f32 %v7825_v24  ;;  %v7823_v19 = vmul.f32 0.5, %v17421_v44 }
 0xac5   : >> { %19028 = vtanh.f32 %v7826_v51  ;;  %v7824_v57 = vmul.f32 0.5, %v17422_v17 }
 0xac6   : >> { %19030 = vtanh.f32 %v7823_v19 }
 0xac7   : >> { %19032 = vtanh.f32 %v7824_v57 }
 0xac8   : >> { %19034 = vtanh.f32 %v17425_v26 }
 0xac9   : >> { %19036 = vtanh.f32 %v17426_v55 }
 0xaca   : >> { %v19019_v31 = vpop.eup %19018  ;;  %19038 = vtanh.f32 %v17417_v28 }
 0xacb   : >> { %v19021_v36 = vpop.eup %19020  ;;  %v7837_v43 = vmul.f32 0.5, %v19019_v31  ;;  %19040 = vtanh.f32 %v17418_v12 }
 0xacc   : >> { %v19023_v18 = vpop.eup %19022  ;;  %v7838_v60 = vmul.f32 0.5, %v19021_v36 }
 0xacd   : >> { %v19025_v58 = vpop.eup %19024  ;;  %v7845_v20 = vadd.f32 0.5, %v7837_v43  ;;  %v7835_v46 = vmul.f32 0.5, %v19023_v18 }
 0xace   : >> { %v19027_v41 = vpop.eup %19026  ;;  %v7846_v15 = vadd.f32 0.5, %v7838_v60  ;;  %v7836_v34 = vmul.f32 0.5, %v19025_v58 }
 0xacf   : >> { %v19029_v39 = vpop.eup %19028  ;;  %v7861_v13 = vmul.f32 %v19011_v2, %v7845_v20  ;;  %v7843_v38 = vadd.f32 0.5, %v7835_v46  ;;  %v7841_v7 = vmul.f32 0.5, %v19027_v41 }
 0xad0   : >> { %v19031_v30 = vpop.eup %19030  ;;  %v7844_v52 = vadd.f32 0.5, %v7836_v34  ;;  %v7842_v45 = vmul.f32 0.5, %v19029_v39  ;;  %v7862_v10 = vmul.f32 %v19013_v53, %v7846_v15 }
 0xad1   : >> { %v19033_v32 = vpop.eup %19032  ;;  %v7859_v21 = vmul.f32 %v19015_v61, %v7843_v38  ;;  %v7849_v48 = vadd.f32 0.5, %v7841_v7  ;;  %v7839_v63 = vmul.f32 0.5, %v19031_v30 }
 0xad2   : >> { %v19035_v47 = vpop.eup %19034  ;;  %v7850_v49 = vadd.f32 0.5, %v7842_v45  ;;  %v7840_v54 = vmul.f32 0.5, %v19033_v32  ;;  %v7860_v29 = vmul.f32 %v19017_v37, %v7844_v52 }
 0xad3   : >> { %v19037_v6 = vpop.eup %19036  ;;  %v7865_v24 = vmul.f32 %v19035_v47, %v7849_v48  ;;  %v7847_v44 = vadd.f32 0.5, %v7839_v63  ;;  %v21299_v47 = vld [vmem:[%s19649_s10 + $0x180] sm:$0xff] }
 0xad4   : >> { %v19039_v0 = vpop.eup %19038  ;;  %v7848_v51 = vadd.f32 0.5, %v7840_v54  ;;  %v7866_v17 = vmul.f32 %v19037_v6, %v7850_v49 }
 0xad5   : >> { %v19041_v26 = vpop.eup %19040  ;;  %v7863_v19 = vmul.f32 %v19039_v0, %v7847_v44  ;;  %v17029_v55 = vpack.c.bf16 %v7865_v24, %v7861_v13 }
 0xad6   : >> { %v17027_v57 = vpack.c.bf16 %v7866_v17, %v7862_v10  ;;  %v7864_v2 = vmul.f32 %v19041_v26, %v7848_v51 }
 0xad7   : >> { %v17025_v28 = vpack.c.bf16 %v7863_v19, %v7859_v21  ;;  %v21309_v19 = vld [vmem:[%s19649_s10 + $0x188] sm:$0xff] }
 0xad8   : >> { %17028 = vmatprep.subr.bf16.mxu1 %v17027_v57  ;;  %v17023_v53 = vpack.c.bf16 %v7864_v2, %v7860_v29 }
 0xad9   : >> { %17030 = vmatpush1.bf16.msra.mxu1 %v17029_v55 }
 0xada   : >> { %17024 = vmatprep.subr.bf16.mxu0 %v17023_v53 }
 0xadb   : >> { %17026 = vmatpush1.bf16.msra.mxu0 %v17025_v28 }
 0xadc   : >> { %16377 = vmatmul.mubr.msk.f32.vlgmr.msra.gmra.mrb[92].mxu1 %vm560_vm2, %v21093_v42 }
 0xadd   : >> { %8014 = vmatprep.mubr.f32.mxu1 %v23035_v35 }
 0xade   : >> { %16375 = vmatmul.mubr.msk.f32.vlgmr.msra.gmra.mrb[92].mxu0 %vm560_vm2, %v21093_v42 }
 0xadf   : >> { %7937 = vmatprep.mubr.f32.mxu0 %v23035_v35 }
 0xae0   : >> { %16378 = vmatmul.mubr.msk.f32.gmra.mrb[94].mxu1 %vm560_vm2, %v21105_v16 }
 0xae1   : >> { %8294 = vmatprep.mubr.f32.mxu1 %v23035_v35 }
 0xae2   : >> { %16376 = vmatmul.mubr.msk.f32.gmra.mrb[94].mxu0 %vm560_vm2, %v21105_v16 }
 0xae3   : >> { %8205 = vmatprep.mubr.f32.mxu0 %v23035_v35 }
 0xb05   : >> { %v18543_v12 = vpop.permute.xlu0 %18542 }
 0xb06   : >> { %v18545_v37 = vunpack.i.h.bf16 %v18543_v12  ;;  %v18544_v31 = vunpack.i.l.bf16 %v18543_v12 }
 0xb07   : >> { %v18538_v61 = vpop.permute.xlu1 %18537 }
 0xb08   : >> { %v18540_v18 = vunpack.i.h.bf16 %v18538_v61  ;;  %v18539_v60 = vunpack.i.l.bf16 %v18538_v61  ;;  %v8116_v41 = vsel %vm8112_vm5, %v18544_v31, %v18545_v37 }
 0xb09   : >> { %v18553_v36 = vpop.permute.xlu0 %18552 }
 0xb0a   : >> { %v18555_v43 = vunpack.i.h.bf16 %v18553_v36  ;;  %v18554_v42 = vunpack.i.l.bf16 %v18553_v36  ;;  %v8115_v39 = vsel %vm8112_vm5, %v18540_v18, %v18544_v31  ;;  %v8114_v38 = vsel %vm8112_vm5, %v18539_v60, %v18540_v18 }
 0xb0b   : >> { %v18548_v58 = vpop.permute.xlu1 %18547 }
 0xb0c   : >> { %v18550_v20 = vunpack.i.h.bf16 %v18548_v58  ;;  %v18549_v46 = vunpack.i.l.bf16 %v18548_v58  ;;  %v8120_v15 = vsel %vm8112_vm5, %v18554_v42, %v18555_v43  ;;  %v17047_v43 = vpack.c.bf16 %v21245_v40, %v21225_v50 }
 0xb0d   : >> { %v18563_v16 = vpop.permute.xlu0 %18562  ;;  %v17035_v34 = vpack.c.bf16 %v8120_v15, %v8116_v41  ;;  %v17051_v15 = vpack.c.bf16 %v21235_v56, %v21217_v11 }
 0xb0e   : >> { %v8119_v13 = vsel %vm8112_vm5, %v18550_v20, %v18554_v42  ;;  %v8118_v7 = vsel %vm8112_vm5, %v18549_v46, %v18550_v20  ;;  %v18565_v10 = vunpack.i.h.bf16 %v18563_v16  ;;  %v18564_v32 = vunpack.i.l.bf16 %v18563_v16  ;;  %v21336_v16 = vld [vmem:[%s19649_s10 + $0x198] sm:$0xff] }
 0xb0f   : >> { %v17037_v30 = vpack.c.bf16 %v8119_v13, %v8115_v39  ;;  %17036 = vmatprep.subr.bf16.mxu1 %v17035_v34  ;;  %v18558_v52 = vpop.permute.xlu1 %18557  ;;  %v17031_v45 = vpack.c.bf16 %v8118_v7, %v8114_v38  ;;  %v21346_v34 = vld [vmem:[%s19649_s10 + $0x1a0] sm:$0xff]  ;;  %v17053_v39 = vpack.c.bf16 %v21231_v1, %v21211_v62  ;;  %v21357_v13 = vld [vmem:[%s19649_s10 + $0x1a8] sm:$0xff]  ;;  %v17049_v38 = vpack.c.bf16 %v21242_v33, %v21221_v3  ;;  %v21368_v7 = vld [vmem:[%s19649_s10 + $0x1b0] sm:$0xff] }
 0xb10   : >> { %v18560_v21 = vunpack.i.h.bf16 %v18558_v52  ;;  %v18559_v48 = vunpack.i.l.bf16 %v18558_v52  ;;  %v8376_v0 = vsel %vm560_vm2, %v18564_v32, %v18565_v10  ;;  %v21386_v52 = vld [vmem:[%s19649_s10 + $0x1c0] sm:$0xff] }
 0xb11   : >> { %v18573_v63 = vpop.permute.xlu0 %18572  ;;  %17032 = vmatprep.subr.bf16.mxu0 %v17031_v45  ;;  %17038 = vmatpush1.bf16.msra.mxu1 %v17037_v30  ;;  %v21377_v30 = vld [vmem:[%s19649_s10 + $0x1b8] sm:$0xff]  ;;  %v21395_v45 = vld [vmem:[%s19649_s10 + $0x1c8] sm:$0xff] }
 0xb12   : >> { %v18575_v49 = vunpack.i.h.bf16 %v18573_v63  ;;  %v18574_v54 = vunpack.i.l.bf16 %v18573_v63  ;;  %v8113_v29 = vsel %vm8112_vm5, %v18559_v48, %v18539_v60  ;;  %v8117_v6 = vsel %vm8112_vm5, %v18560_v21, %v18549_v46  ;;  %v21324_v60 = vld [vmem:[%s19649_s10 + $0x190] sm:$0xff] }
 0xb13   : >> { %v17033_v24 = vpack.c.bf16 %v8117_v6, %v8113_v29  ;;  %v18568_v44 = vpop.permute.xlu1 %18567 }
 0xb14   : >> { %16417 = vmatmul.mubr.msk.f32.vlgmr.msra.gmra.mrb[96].mxu1 %vm560_vm2, %v21299_v47  ;;  %v8380_v51 = vsel %vm560_vm2, %v18574_v54, %v18575_v49  ;;  %v18570_v2 = vunpack.i.h.bf16 %v18568_v44  ;;  %v18569_v28 = vunpack.i.l.bf16 %v18568_v44 }
 0xb15   : >> { %v18583_v17 = vpop.permute.xlu0 %18582  ;;  %17034 = vmatpush1.bf16.msra.mxu0 %v17033_v24  ;;  %v17039_v26 = vpack.c.bf16 %v8380_v51, %v8376_v0  ;;  %8300 = vmatprep.mubr.f32.mxu1 %v23035_v35 }
 0xb16   : >> { %v18585_v55 = vunpack.i.h.bf16 %v18583_v17  ;;  %v18584_v57 = vunpack.i.l.bf16 %v18583_v17  ;;  %v8377_v42 = vsel %vm560_vm2, %v18565_v10, %v18569_v28  ;;  %v8378_v58 = vsel %vm560_vm2, %v18569_v28, %v18570_v2  ;;  %v21404_v10 = vld [vmem:[%s19649_s10 + $0x1d0] sm:$0xff] }
 0xb17   : >> { %17040 = vmatprep.subr.bf16.mxu0 %v17039_v26  ;;  %v18578_v53 = vpop.permute.xlu1 %18577 }
 0xb18   : >> { %v8375_v12 = vsel %vm560_vm2, %v18584_v57, %v18564_v32  ;;  %v8379_v61 = vsel %vm560_vm2, %v18585_v55, %v18574_v54  ;;  %v18580_v37 = vunpack.i.h.bf16 %v18578_v53  ;;  %v18579_v31 = vunpack.i.l.bf16 %v18578_v53  ;;  %16413 = vmatmul.mubr.msk.f32.vlgmr.msra.gmra.mrb[96].mxu0 %vm560_vm2, %v21299_v47  ;;  %16418 = vmatmul.mubr.msk.f32.gmra.mrb[98].mxu1 %vm560_vm2, %v21309_v19  ;;  %v21413_v32 = vld [vmem:[%s19649_s10 + $0x1d8] sm:$0xff] }
 0xb19   : >> { %v17041_v36 = vpack.c.bf16 %v8379_v61, %v8375_v12  ;;  %8211 = vmatprep.mubr.f32.mxu0 %v23035_v35  ;;  %8306 = vmatprep.mubr.f32.mxu1 %v23035_v35 }
 0xb1a   : >> { %v8381_v18 = vsel %vm560_vm2, %v18575_v49, %v18579_v31  ;;  %v8382_v20 = vsel %vm560_vm2, %v18579_v31, %v18580_v37 }
 0xb1b   : >> { %v17045_v46 = vpack.c.bf16 %v8381_v18, %v8377_v42  ;;  %17042 = vmatpush1.bf16.msra.mxu0 %v17041_v36  ;;  %v17043_v41 = vpack.c.bf16 %v8382_v20, %v8378_v58  ;;  %v16411_v36 = vld [vmem:[%s19633_s23 + $0x40] sm:$0xff] }
 0xb1c   : >> { %17048 = vmatprep.subr.bf16.mxu0 %v17047_v43  ;;  %16414 = vmatmul.mubr.msk.f32.gmra.mrb[98].mxu0 %vm560_vm2, %v21309_v19 }
 0xb1d   : >> { %16419 = vmatmul.mubr.msk.f32.gmra.mrb[100].mxu1 %vm560_vm2, %v21324_v60  ;;  %17044 = vmatprep.subr.bf16.mxu1 %v17043_v41 }
 0xb1e   : >> { %17046 = vmatpush1.bf16.msra.mxu1 %v17045_v46  ;;  %8217 = vmatprep.mubr.f32.mxu0 %v23035_v35 }
 0xb1f   : >> { %8312 = vmatprep.mubr.f32.mxu1 %v23035_v35  ;;  %17052 = vmatprep.subr.bf16.mxu1 %v17051_v15 }
 0xb20   : >> { %16415 = vmatmul.mubr.msk.f32.gmra.mrb[100].mxu0 %vm560_vm2, %v21324_v60 }
 0xb21   : >> { %16420 = vmatmul.mubr.msk.f32.gmra.mrb[102].mxu1 %vm560_vm2, %v21336_v16  ;;  %8223 = vmatprep.mubr.f32.mxu0 %v23035_v35 }
 0xb22   : >> { %8556 = vmatprep.mubr.f32.mxu1 %v23035_v35 }
 0xb24   : >> { %16416 = vmatmul.mubr.msk.f32.gmra.mrb[102].mxu0 %vm560_vm2, %v21336_v16 }
 0xb25   : >> { %16425 = vmatmul.mubr.msk.f32.vlgmr.msra.gmra.mrb[96].mxu1 %vm560_vm2, %v21346_v34  ;;  %8467 = vmatprep.mubr.f32.mxu0 %v23035_v35 }
 0xb26   : >> { %17054 = vmatpush1.bf16.msra.mxu1 %v17053_v39  ;;  %8562 = vmatprep.mubr.f32.mxu1 %v23035_v35  ;;  %v21478_v58 = vpop.permute.xlu0 %8336 }
 0xb28   : >> { %16421 = vmatmul.mubr.msk.f32.vlgmr.msra.gmra.mrb[96].mxu0 %vm560_vm2, %v21346_v34  ;;  %v21476_v43 = vpop.permute.xlu1 %8331 }
 0xb29   : >> { %16426 = vmatmul.mubr.msk.f32.gmra.mrb[98].mxu1 %vm560_vm2, %v21357_v13  ;;  %17050 = vmatpush1.bf16.msra.mxu0 %v17049_v38 }
 0xb2a   : >> { %8473 = vmatprep.mubr.f32.mxu0 %v23035_v35  ;;  %8568 = vmatprep.mubr.f32.mxu1 %v23035_v35 }
 0xb2c   : >> { %16422 = vmatmul.mubr.msk.f32.gmra.mrb[98].mxu0 %vm560_vm2, %v21357_v13  ;;  %v21480_v15 = vpop.permute.xlu1 %8321 }
 0xb2d   : >> { %16427 = vmatmul.mubr.msk.f32.gmra.mrb[100].mxu1 %vm560_vm2, %v21368_v7  ;;  %8479 = vmatprep.mubr.f32.mxu0 %v23035_v35 }
 0xb2e   : >> { %8574 = vmatprep.mubr.f32.mxu1 %v23035_v35 }
 0xb30   : >> { %16423 = vmatmul.mubr.msk.f32.gmra.mrb[100].mxu0 %vm560_vm2, %v21368_v7 }
 0xb31   : >> { %16428 = vmatmul.mubr.msk.f32.gmra.mrb[102].mxu1 %vm560_vm2, %v21377_v30  ;;  %8485 = vmatprep.mubr.f32.mxu0 %v23035_v35 }
 0xb32   : >> { %8762 = vmatprep.mubr.f32.mxu1 %v23035_v35 }
 0xb34   : >> { %16424 = vmatmul.mubr.msk.f32.gmra.mrb[102].mxu0 %vm560_vm2, %v21377_v30 }
 0xb35   : >> { %16433 = vmatmul.mubr.msk.f32.vlgmr.msra.gmra.mrb[96].mxu1 %vm560_vm2, %v21386_v52  ;;  %8673 = vmatprep.mubr.f32.mxu0 %v23035_v35 }
 0xb36   : >> { %8768 = vmatprep.mubr.f32.mxu1 %v23035_v35 }
 0xb38   : >> { %16429 = vmatmul.mubr.msk.f32.vlgmr.msra.gmra.mrb[96].mxu0 %vm560_vm2, %v21386_v52 }
 0xb39   : >> { %16434 = vmatmul.mubr.msk.f32.gmra.mrb[98].mxu1 %vm560_vm2, %v21395_v45  ;;  %8679 = vmatprep.mubr.f32.mxu0 %v23035_v35 }
 0xb3a   : >> { %8774 = vmatprep.mubr.f32.mxu1 %v23035_v35 }
 0xb3c   : >> { %16430 = vmatmul.mubr.msk.f32.gmra.mrb[98].mxu0 %vm560_vm2, %v21395_v45 }
 0xb3d   : >> { %16435 = vmatmul.mubr.msk.f32.gmra.mrb[100].mxu1 %vm560_vm2, %v21404_v10  ;;  %8685 = vmatprep.mubr.f32.mxu0 %v23035_v35 }
 0xb3e   : >> { %8780 = vmatprep.mubr.f32.mxu1 %v23035_v35 }
 0xb40   : >> { %16431 = vmatmul.mubr.msk.f32.gmra.mrb[100].mxu0 %vm560_vm2, %v21404_v10 }
 0xb41   : >> { %16436 = vmatmul.mubr.msk.f32.gmra.mrb[102].mxu1 %vm560_vm2, %v21413_v32  ;;  %8691 = vmatprep.mubr.f32.mxu0 %v23035_v35 }
 0xb42   : >> { %9008 = vmatprep.mubr.f32.mxu1 %v23035_v35 }
 0xb44   : >> { %16432 = vmatmul.mubr.msk.f32.gmra.mrb[102].mxu0 %vm560_vm2, %v21413_v32 }
 0xb45   : >> { %8931 = vmatprep.mubr.f32.mxu0 %v23035_v35 }
 0xbaf   : >> { %v8010_v21 = vpop.f32.mrb[92].mxu1 }
 0xbb0   : >> { %v8011_v48 = vadd.f32 %v8010_v21, %v21206_v27  ;;  %v8012_v63 = vpop.f32.mrb[93].mxu1 }
 0xbb1   : >> { %v8013_v49 = vadd.f32 %v8012_v63, %v21206_v27  ;;  %v7933_v54 = vpop.f32.mrb[92].mxu0 }
 0xbb2   : >> { %v21427_v29 = vadd.f32 %v8011_v48, %v21019_v14  ;;  %v7934_v6 = vadd.f32 %v7933_v54, %v21206_v27  ;;  %v7935_v24 = vpop.f32.mrb[93].mxu0 }
 0xbb3   : >> { %v21431_v44 = vadd.f32 %v8013_v49, %v21023_v22  ;;  %v8016_v0 = vpop.f32.mrb[94].mxu1  ;;  %v7936_v51 = vadd.f32 %v7935_v24, %v21206_v27 }
 0xbb4   : >> { %v21435_v17 = vadd.f32 %v7934_v6, %v21027_v9  ;;  %v8017_v26 = vadd.f32 %v8016_v0, %v21214_v25  ;;  %v8018_v55 = vpop.f32.mrb[95].mxu1  ;;  %v21486_v0 = vpop.permute.xlu0 %8326 }
 0xbb5   : >> { %v21439_v57 = vadd.f32 %v7936_v51, %v21031_v59  ;;  %v8019_v14 = vadd.f32 %v8018_v55, %v21214_v25  ;;  %v7939_v2 = vpop.f32.mrb[94].mxu0  ;;  %v18591_v28 = vpack.i.bf16 %v21431_v44, %v21427_v29 }
 0xbb6   : >> { %v21445_v22 = vadd.f32 %v8017_v26, %v21037_v4  ;;  %v7940_v27 = vadd.f32 %v7939_v2, %v21214_v25  ;;  %v7941_v53 = vpop.f32.mrb[95].mxu0 }
 0xbb7   : >> { %v21449_v9 = vadd.f32 %v8019_v14, %v21041_v5  ;;  %v7942_v12 = vadd.f32 %v7941_v53, %v21214_v25  ;;  %18592 = vrot.lane.b32.xlu0 %v18591_v28, %s19388_s29  ;;  %v18586_v59 = vpack.i.bf16 %v21439_v57, %v21435_v17  ;;  %v9037_v5 = vld [vmem:[#allocation2 + $0x68] sm:$0xff]  ;;  %v9042_v25 = vld [vmem:[#allocation2 + $0x98] sm:$0xff] }
 0xbb8   : >> { %v21456_v61 = vadd.f32 %v7940_v27, %v21048_v8  ;;  %v18606_v8 = vpack.i.bf16 %v9042_v25, %v9037_v5 }
 0xbb9   : >> { %v21459_v4 = vadd.f32 %v7942_v12, %v21051_v23  ;;  %v18601_v37 = vpack.i.bf16 %v21449_v9, %v21445_v22  ;;  %18587 = vrot.lane.b32.xlu1 %v18586_v59, %s19388_s29  ;;  %v16412_v23 = vld [vmem:[%s19633_s23 + $0x48] sm:$0xff] }
 0xbbb   : >> { %18602 = vrot.lane.b32.xlu0 %v18601_v37, %s19388_s29  ;;  %v18596_v31 = vpack.i.bf16 %v21459_v4, %v21456_v61 }
 0xbbd   : >> { %18597 = vrot.lane.b32.xlu1 %v18596_v31, %s19388_s29 }
 0xbbf   : >> { %18612 = vrot.lane.b32.xlu0 %v18586_v59, %s19387_s28 }
 0xbc1   : >> { %18607 = vrot.lane.b32.xlu1 %v18606_v8, %s19388_s29 }
 0xbc3   : >> { %18622 = vrot.lane.b32.xlu0 %v18596_v31, %s19387_s28 }
 0xbc5   : >> { %18617 = vrot.lane.b32.xlu1 %v18591_v28, %s19387_s28 }
 0xbc7   : >> { %18632 = vrot.lane.b32.xlu0 %v18606_v8, %s19387_s28 }
 0xbc9   : >> { %18627 = vrot.lane.b32.xlu1 %v18601_v37, %s19387_s28 }
 0xbcb   : >> { %8858 = vperm.xlu0 %18184, %v16412_v23  }
 0xbcd   : >> { %8853 = vperm.xlu1 %18185, %v16411_v36  }
 0xc08   : >> { %v8764_v42 = vpop.f32.mrb[96].mxu1 }
 0xc09   : >> { %v8766_v18 = vpop.f32.mrb[97].mxu1  ;;  %v17439_v38 = vadd.f32 %v8764_v42, %v21480_v15 }
 0xc0a   : >> { %v17440_v21 = vadd.f32 %v8766_v18, %v21480_v15 }
 0xc0b   : >> { %v8675_v20 = vpop.f32.mrb[96].mxu0  ;;  %19042 = vtanh.f32 %v17439_v38 }
 0xc0c   : >> { %v8770_v46 = vpop.f32.mrb[98].mxu1  ;;  %v8677_v41 = vpop.f32.mrb[97].mxu0  ;;  %v17431_v63 = vadd.f32 %v8675_v20, %v21480_v15  ;;  %19044 = vtanh.f32 %v17440_v21 }
 0xc0d   : >> { %v8772_v39 = vpop.f32.mrb[99].mxu1  ;;  %v17441_v26 = vadd.f32 %v8770_v46, %v21486_v0  ;;  %v17432_v46 = vadd.f32 %v8677_v41, %v21480_v15 }
 0xc0e   : >> { %19046 = vtanh.f32 %v17431_v63  ;;  %v17442_v21 = vadd.f32 %v8772_v39, %v21486_v0 }
 0xc0f   : >> { %v8681_v48 = vpop.f32.mrb[98].mxu0 }
 0xc10   : >> { %v8776_v49 = vpop.f32.mrb[100].mxu1  ;;  %v8683_v54 = vpop.f32.mrb[99].mxu0 }
 0xc11   : >> { %v17443_v6 = vadd.f32 %v8776_v49, %v21476_v43  ;;  %v8778_v24 = vpop.f32.mrb[101].mxu1 }
 0xc12   : >> { %v17444_v51 = vadd.f32 %v8778_v24, %v21476_v43 }
 0xc13   : >> { %v8805_v55 = vmul.f32 0.5, %v17443_v6  ;;  %v8687_v14 = vpop.f32.mrb[100].mxu0  ;;  %v17433_v6 = vadd.f32 %v8681_v48, %v21486_v0 }
 0xc14   : >> { %v8806_v2 = vmul.f32 0.5, %v17444_v51  ;;  %v17435_v28 = vadd.f32 %v8687_v14, %v21476_v43  ;;  %v8782_v27 = vpop.f32.mrb[102].mxu1  ;;  %v8689_v53 = vpop.f32.mrb[101].mxu0  ;;  %v17434_v51 = vadd.f32 %v8683_v54, %v21486_v0 }
 0xc15   : >> { %19048 = vtanh.f32 %v8805_v55  ;;  %v17445_v12 = vadd.f32 %v8782_v27, %v21478_v58  ;;  %v17436_v59 = vadd.f32 %v8689_v53, %v21476_v43  ;;  %v8784_v37 = vpop.f32.mrb[103].mxu1  ;;  %v19043_v49 = vpop.eup %19042 }
 0xc16   : >> { %19050 = vtanh.f32 %v8806_v2  ;;  %v8803_v5 = vmul.f32 0.5, %v17435_v28  ;;  %v17446_v25 = vadd.f32 %v8784_v37, %v21478_v58  ;;  %v19045_v24 = vpop.eup %19044 }
 0xc17   : >> { %19052 = vtanh.f32 %v17441_v26  ;;  %v8809_v31 = vmul.f32 0.5, %v17445_v12  ;;  %v8804_v8 = vmul.f32 0.5, %v17436_v59  ;;  %v8693_v23 = vpop.f32.mrb[102].mxu0 }
 0xc18   : >> { %19054 = vtanh.f32 %v8803_v5  ;;  %v8810_v36 = vmul.f32 0.5, %v17446_v25  ;;  %v17437_v42 = vadd.f32 %v8693_v23, %v21478_v58  ;;  %v8695_v18 = vpop.f32.mrb[103].mxu0  ;;  %v19047_v26 = vpop.eup %19046 }
 0xc19   : >> { %19056 = vtanh.f32 %v8809_v31  ;;  %v17438_v20 = vadd.f32 %v8695_v18, %v21478_v58 }
 0xc1a   : >> { %19058 = vtanh.f32 %v8804_v8  ;;  %v8807_v38 = vmul.f32 0.5, %v17437_v42 }
 0xc1b   : >> { %19060 = vtanh.f32 %v8810_v36  ;;  %v8808_v63 = vmul.f32 0.5, %v17438_v20 }
 0xc1c   : >> { %19062 = vtanh.f32 %v8807_v38 }
 0xc1d   : >> { %19064 = vtanh.f32 %v8808_v63 }
 0xc1e   : >> { %19066 = vtanh.f32 %v17432_v46 }
 0xc1f   : >> { %v19049_v55 = vpop.eup %19048  ;;  %19068 = vtanh.f32 %v17442_v21 }
 0xc20   : >> { %v19051_v14 = vpop.eup %19050  ;;  %19070 = vtanh.f32 %v17433_v6  ;;  %v8821_v41 = vmul.f32 0.5, %v19049_v55 }
 0xc21   : >> { %v19053_v2 = vpop.eup %19052  ;;  %19072 = vtanh.f32 %v17434_v51  ;;  %v8822_v39 = vmul.f32 0.5, %v19051_v14 }
 0xc22   : >> { %v19055_v28 = vpop.eup %19054  ;;  %v8829_v27 = vadd.f32 0.5, %v8821_v41 }
 0xc23   : >> { %v19057_v53 = vpop.eup %19056  ;;  %v8830_v12 = vadd.f32 0.5, %v8822_v39  ;;  %v8819_v48 = vmul.f32 0.5, %v19055_v28 }
 0xc24   : >> { %v19059_v59 = vpop.eup %19058  ;;  %v8845_v37 = vmul.f32 %v19043_v49, %v8829_v27  ;;  %v8825_v5 = vmul.f32 0.5, %v19057_v53 }
 0xc25   : >> { %v19061_v54 = vpop.eup %19060  ;;  %v8827_v25 = vadd.f32 0.5, %v8819_v48  ;;  %v8820_v31 = vmul.f32 0.5, %v19059_v59  ;;  %v8846_v8 = vmul.f32 %v19045_v24, %v8830_v12 }
 0xc26   : >> { %v19063_v23 = vpop.eup %19062  ;;  %v8833_v36 = vadd.f32 0.5, %v8825_v5  ;;  %v8826_v42 = vmul.f32 0.5, %v19061_v54 }
 0xc27   : >> { %v19065_v18 = vpop.eup %19064  ;;  %v8843_v20 = vmul.f32 %v19047_v26, %v8827_v25  ;;  %v8828_v46 = vadd.f32 0.5, %v8820_v31  ;;  %v8823_v38 = vmul.f32 0.5, %v19063_v23 }
 0xc28   : >> { %v19067_v21 = vpop.eup %19066  ;;  %v8849_v63 = vmul.f32 %v19053_v2, %v8833_v36  ;;  %v8834_v6 = vadd.f32 0.5, %v8826_v42  ;;  %v8824_v51 = vmul.f32 0.5, %v19065_v18 }
 0xc29   : >> { %v19069_v55 = vpop.eup %19068  ;;  %v8831_v14 = vadd.f32 0.5, %v8823_v38  ;;  %v18593_v41 = vpop.permute.xlu0 %18592  ;;  %v8844_v49 = vmul.f32 %v19067_v21, %v8828_v46  ;;  %v21501_v38 = vld [vmem:[%s19859_s27 + $0x40] sm:$0xff] }
 0xc2a   : >> { %v19071_v39 = vpop.eup %19070  ;;  %v8832_v28 = vadd.f32 0.5, %v8824_v51  ;;  %v8850_v27 = vmul.f32 %v19069_v55, %v8834_v6  ;;  %v17061_v48 = vpack.c.bf16 %v8849_v63, %v8845_v37  ;;  %v18595_v59 = vunpack.i.h.bf16 %v18593_v41 }
 0xc2b   : >> { %v19073_v53 = vpop.eup %19072  ;;  %v8847_v24 = vmul.f32 %v19071_v39, %v8831_v14  ;;  %v18588_v12 = vpop.permute.xlu1 %18587  ;;  %v18594_v26 = vunpack.i.l.bf16 %v18593_v41 }
 0xc2c   : >> { %v17059_v5 = vpack.c.bf16 %v8850_v27, %v8846_v8  ;;  %v8848_v54 = vmul.f32 %v19073_v53, %v8832_v28  ;;  %v18590_v2 = vunpack.i.h.bf16 %v18588_v12  ;;  %v18589_v42 = vunpack.i.l.bf16 %v18588_v12  ;;  %v21513_v28 = vld [vmem:[%s19859_s27 + $0x48] sm:$0xff] }
 0xc2d   : >> { %v18603_v25 = vpop.permute.xlu0 %18602  ;;  %v17057_v31 = vpack.c.bf16 %v8847_v24, %v8843_v20  ;;  %v9080_v37 = vsel %vm8112_vm5, %v18594_v26, %v18595_v59 }
 0xc2e   : >> { %v18605_v23 = vunpack.i.h.bf16 %v18603_v25  ;;  %v18604_v36 = vunpack.i.l.bf16 %v18603_v25  ;;  %17060 = vmatprep.subr.bf16.mxu1 %v17059_v5  ;;  %v17055_v18 = vpack.c.bf16 %v8848_v54, %v8844_v49  ;;  %v9079_v51 = vsel %vm8112_vm5, %v18590_v2, %v18594_v26 }
 0xc2f   : >> { %17062 = vmatpush1.bf16.msra.mxu1 %v17061_v48  ;;  %v18598_v46 = vpop.permute.xlu1 %18597  ;;  %v9078_v14 = vsel %vm8112_vm5, %v18589_v42, %v18590_v2 }
 0xc30   : >> { %v18600_v21 = vunpack.i.h.bf16 %v18598_v46  ;;  %v18599_v6 = vunpack.i.l.bf16 %v18598_v46  ;;  %17056 = vmatprep.subr.bf16.mxu0 %v17055_v18  ;;  %v9084_v8 = vsel %vm8112_vm5, %v18604_v36, %v18605_v23 }
 0xc31   : >> { %v18613_v63 = vpop.permute.xlu0 %18612  ;;  %17058 = vmatpush1.bf16.msra.mxu0 %v17057_v31  ;;  %v17067_v20 = vpack.c.bf16 %v9084_v8, %v9080_v37 }
 0xc32   : >> { %v9083_v55 = vsel %vm8112_vm5, %v18600_v21, %v18604_v36  ;;  %16439 = vmatmul.mubr.msk.f32.vlgmr.msra.gmra.mrb[104].mxu1 %vm560_vm2, %v21501_v38  ;;  %v9082_v41 = vsel %vm8112_vm5, %v18599_v6, %v18600_v21  ;;  %v18615_v53 = vunpack.i.h.bf16 %v18613_v63  ;;  %v18614_v24 = vunpack.i.l.bf16 %v18613_v63 }
 0xc33   : >> { %v17069_v49 = vpack.c.bf16 %v9083_v55, %v9079_v51  ;;  %17068 = vmatprep.subr.bf16.mxu1 %v17067_v20  ;;  %v18608_v39 = vpop.permute.xlu1 %18607  ;;  %9014 = vmatprep.mubr.f32.mxu1 %v23035_v35  ;;  %v17063_v27 = vpack.c.bf16 %v9082_v41, %v9078_v14  ;;  %v17079_v41 = vpack.c.bf16 %v21459_v4, %v21439_v57 }
 0xc34   : >> { %v18610_v12 = vunpack.i.h.bf16 %v18608_v39  ;;  %v18609_v48 = vunpack.i.l.bf16 %v18608_v39  ;;  %16437 = vmatmul.mubr.msk.f32.vlgmr.msra.gmra.mrb[104].mxu0 %vm560_vm2, %v21501_v38  ;;  %v9308_v23 = vsel %vm560_vm2, %v18614_v24, %v18615_v53 }
 0xc35   : >> { %v18623_v59 = vpop.permute.xlu0 %18622  ;;  %17064 = vmatprep.subr.bf16.mxu0 %v17063_v27  ;;  %17070 = vmatpush1.bf16.msra.mxu1 %v17069_v49 }
 0xc36   : >> { %v18625_v26 = vunpack.i.h.bf16 %v18623_v59  ;;  %v18624_v5 = vunpack.i.l.bf16 %v18623_v59  ;;  %v9077_v54 = vsel %vm8112_vm5, %v18609_v48, %v18589_v42  ;;  %v9081_v25 = vsel %vm8112_vm5, %v18610_v12, %v18599_v6  ;;  %16440 = vmatmul.mubr.msk.f32.gmra.mrb[106].mxu1 %vm560_vm2, %v21513_v28  ;;  %8937 = vmatprep.mubr.f32.mxu0 %v23035_v35 }
 0xc37   : >> { %v17065_v2 = vpack.c.bf16 %v9081_v25, %v9077_v54  ;;  %v18618_v31 = vpop.permute.xlu1 %18617  ;;  %9246 = vmatprep.mubr.f32.mxu1 %v23035_v35 }
 0xc38   : >> { %16438 = vmatmul.mubr.msk.f32.gmra.mrb[106].mxu0 %vm560_vm2, %v21513_v28  ;;  %v9312_v36 = vsel %vm560_vm2, %v18624_v5, %v18625_v26  ;;  %v18620_v6 = vunpack.i.h.bf16 %v18618_v31  ;;  %v18619_v37 = vunpack.i.l.bf16 %v18618_v31 }
 0xc39   : >> { %v18633_v18 = vpop.permute.xlu0 %18632  ;;  %17066 = vmatpush1.bf16.msra.mxu0 %v17065_v2  ;;  %v17071_v42 = vpack.c.bf16 %v9312_v36, %v9308_v23  ;;  %9157 = vmatprep.mubr.f32.mxu0 %v23035_v35 }
 0xc3a   : >> { %v18635_v46 = vunpack.i.h.bf16 %v18633_v18  ;;  %v18634_v21 = vunpack.i.l.bf16 %v18633_v18  ;;  %16445 = vmatmul.mubr.msk.f32.vlgmr.msra.gmra.mrb[108].mxu1 %vm560_vm2, %v21299_v47  ;;  %v9309_v49 = vsel %vm560_vm2, %v18615_v53, %v18619_v37  ;;  %v9310_v27 = vsel %vm560_vm2, %v18619_v37, %v18620_v6  ;;  %v9964_v6 = vld [vmem:[#allocation2 + $0x8] sm:$0xff]  ;;  %v9969_v37 = vld [vmem:[#allocation2 + $0x38] sm:$0xff] }
 0xc3b   : >> { %17072 = vmatprep.subr.bf16.mxu0 %v17071_v42  ;;  %v18628_v8 = vpop.permute.xlu1 %18627  ;;  %9252 = vmatprep.mubr.f32.mxu1 %v23035_v35  ;;  %v17083_v53 = vpack.c.bf16 %v21449_v9, %v21431_v44 }
 0xc3c   : >> { %v9307_v63 = vsel %vm560_vm2, %v18634_v21, %v18614_v24  ;;  %v9311_v20 = vsel %vm560_vm2, %v18635_v46, %v18624_v5  ;;  %v18630_v51 = vunpack.i.h.bf16 %v18628_v8  ;;  %v18629_v55 = vunpack.i.l.bf16 %v18628_v8  ;;  %16441 = vmatmul.mubr.msk.f32.vlgmr.msra.gmra.mrb[108].mxu0 %vm560_vm2, %v21299_v47 }
 0xc3d   : >> { %v17073_v14 = vpack.c.bf16 %v9311_v20, %v9307_v63  ;;  %9163 = vmatprep.mubr.f32.mxu0 %v23035_v35  ;;  %v16493_v63 = vld [vmem:[%s19589_s15 + $0xb0] sm:$0xff]  ;;  %v16492_v20 = vld [vmem:[%s19589_s15 + $0xa8] sm:$0xff] }
 0xc3e   : >> { %v9313_v39 = vsel %vm560_vm2, %v18625_v26, %v18629_v55  ;;  %16446 = vmatmul.mubr.msk.f32.gmra.mrb[110].mxu1 %vm560_vm2, %v21309_v19  ;;  %v9314_v24 = vsel %vm560_vm2, %v18629_v55, %v18630_v51  ;;  %v16491_v51 = vld [vmem:[%s19589_s15 + $0xa0] sm:$0xff] }
 0xc3f   : >> { %v17077_v12 = vpack.c.bf16 %v9313_v39, %v9309_v49  ;;  %17074 = vmatpush1.bf16.msra.mxu0 %v17073_v14  ;;  %9258 = vmatprep.mubr.f32.mxu1 %v23035_v35  ;;  %v17075_v47 = vpack.c.bf16 %v9314_v24, %v9310_v27 }
 0xc40   : >> { %17080 = vmatprep.subr.bf16.mxu0 %v17079_v41  ;;  %16442 = vmatmul.mubr.msk.f32.gmra.mrb[110].mxu0 %vm560_vm2, %v21309_v19  ;;  %v17085_v19 = vpack.c.bf16 %v21445_v22, %v21427_v29 }
 0xc41   : >> { %17076 = vmatprep.subr.bf16.mxu1 %v17075_v47  ;;  %9169 = vmatprep.mubr.f32.mxu0 %v23035_v35 }
 0xc42   : >> { %16447 = vmatmul.mubr.msk.f32.gmra.mrb[112].mxu1 %vm560_vm2, %v21324_v60 }
 0xc43   : >> { %17078 = vmatpush1.bf16.msra.mxu1 %v17077_v12  ;;  %9264 = vmatprep.mubr.f32.mxu1 %v23035_v35 }
 0xc44   : >> { %17084 = vmatprep.subr.bf16.mxu1 %v17083_v53  ;;  %16443 = vmatmul.mubr.msk.f32.gmra.mrb[112].mxu0 %vm560_vm2, %v21324_v60  ;;  %v17081_v60 = vpack.c.bf16 %v21456_v61, %v21435_v17 }
 0xc45   : >> { %9175 = vmatprep.mubr.f32.mxu0 %v23035_v35 }
 0xc46   : >> { %16448 = vmatmul.mubr.msk.f32.gmra.mrb[114].mxu1 %vm560_vm2, %v21336_v16 }
 0xc47   : >> { %9476 = vmatprep.mubr.f32.mxu1 %v23035_v35 }
 0xc48   : >> { %16444 = vmatmul.mubr.msk.f32.gmra.mrb[114].mxu0 %vm560_vm2, %v21336_v16 }
 0xc49   : >> { %9387 = vmatprep.mubr.f32.mxu0 %v23035_v35 }
 0xc4a   : >> { %16453 = vmatmul.mubr.msk.f32.vlgmr.msra.gmra.mrb[108].mxu1 %vm560_vm2, %v21346_v34  ;;  %v21622_v59 = vpop.permute.xlu0 %8858 }
 0xc4b   : >> { %17086 = vmatpush1.bf16.msra.mxu1 %v17085_v19  ;;  %9482 = vmatprep.mubr.f32.mxu1 %v23035_v35 }
 0xc4c   : >> { %16449 = vmatmul.mubr.msk.f32.vlgmr.msra.gmra.mrb[108].mxu0 %vm560_vm2, %v21346_v34  ;;  %v21614_v16 = vpop.permute.xlu1 %8853 }
 0xc4d   : >> { %17082 = vmatpush1.bf16.msra.mxu0 %v17081_v60  ;;  %9393 = vmatprep.mubr.f32.mxu0 %v23035_v35 }
 0xc4e   : >> { %16454 = vmatmul.mubr.msk.f32.gmra.mrb[110].mxu1 %vm560_vm2, %v21357_v13 }
 0xc4f   : >> { %9488 = vmatprep.mubr.f32.mxu1 %v23035_v35 }
 0xc50   : >> { %16450 = vmatmul.mubr.msk.f32.gmra.mrb[110].mxu0 %vm560_vm2, %v21357_v13 }
 0xc51   : >> { %9399 = vmatprep.mubr.f32.mxu0 %v23035_v35 }
 0xc52   : >> { %16455 = vmatmul.mubr.msk.f32.gmra.mrb[112].mxu1 %vm560_vm2, %v21368_v7 }
 0xc53   : >> { %9494 = vmatprep.mubr.f32.mxu1 %v23035_v35 }
 0xc54   : >> { %16451 = vmatmul.mubr.msk.f32.gmra.mrb[112].mxu0 %vm560_vm2, %v21368_v7 }
 0xc55   : >> { %9405 = vmatprep.mubr.f32.mxu0 %v23035_v35 }
 0xc56   : >> { %16456 = vmatmul.mubr.msk.f32.gmra.mrb[114].mxu1 %vm560_vm2, %v21377_v30 }
 0xc57   : >> { %9670 = vmatprep.mubr.f32.mxu1 %v23035_v35 }
 0xc58   : >> { %16452 = vmatmul.mubr.msk.f32.gmra.mrb[114].mxu0 %vm560_vm2, %v21377_v30 }
 0xc59   : >> { %9581 = vmatprep.mubr.f32.mxu0 %v23035_v35 }
 0xc5a   : >> { %16461 = vmatmul.mubr.msk.f32.vlgmr.msra.gmra.mrb[108].mxu1 %vm560_vm2, %v21386_v52 }
 0xc5b   : >> { %9676 = vmatprep.mubr.f32.mxu1 %v23035_v35 }
 0xc5c   : >> { %16457 = vmatmul.mubr.msk.f32.vlgmr.msra.gmra.mrb[108].mxu0 %vm560_vm2, %v21386_v52 }
 0xc5d   : >> { %9587 = vmatprep.mubr.f32.mxu0 %v23035_v35 }
 0xc5e   : >> { %16462 = vmatmul.mubr.msk.f32.gmra.mrb[110].mxu1 %vm560_vm2, %v21395_v45 }
 0xc5f   : >> { %9682 = vmatprep.mubr.f32.mxu1 %v23035_v35 }
 0xc60   : >> { %16458 = vmatmul.mubr.msk.f32.gmra.mrb[110].mxu0 %vm560_vm2, %v21395_v45 }
 0xc61   : >> { %9593 = vmatprep.mubr.f32.mxu0 %v23035_v35 }
 0xc62   : >> { %16463 = vmatmul.mubr.msk.f32.gmra.mrb[112].mxu1 %vm560_vm2, %v21404_v10 }
 0xc63   : >> { %9688 = vmatprep.mubr.f32.mxu1 %v23035_v35 }
 0xc64   : >> { %16459 = vmatmul.mubr.msk.f32.gmra.mrb[112].mxu0 %vm560_vm2, %v21404_v10 }
 0xc65   : >> { %9599 = vmatprep.mubr.f32.mxu0 %v23035_v35 }
 0xc66   : >> { %16464 = vmatmul.mubr.msk.f32.gmra.mrb[114].mxu1 %vm560_vm2, %v21413_v32 }
 0xc67   : >> { %9900 = vmatprep.mubr.f32.mxu1 %v23035_v35 }
 0xc68   : >> { %16460 = vmatmul.mubr.msk.f32.gmra.mrb[114].mxu0 %vm560_vm2, %v21413_v32 }
 0xc69   : >> { %9823 = vmatprep.mubr.f32.mxu0 %v23035_v35 }
 0xd05   : >> { %v9010_v34 = vpop.f32.mrb[104].mxu1 }
 0xd06   : >> { %v9011_v13 = vadd.f32 %v9010_v34, %v21614_v16  ;;  %v9012_v7 = vpop.f32.mrb[105].mxu1 }
 0xd07   : >> { %v9013_v30 = vadd.f32 %v9012_v7, %v21614_v16  ;;  %v8933_v52 = vpop.f32.mrb[104].mxu0 }
 0xd08   : >> { %v21619_v45 = vadd.f32 %v9011_v13, %v21211_v62  ;;  %v8934_v10 = vadd.f32 %v8933_v52, %v21614_v16  ;;  %v8935_v48 = vpop.f32.mrb[105].mxu0 }
 0xd09   : >> { %v21625_v32 = vadd.f32 %v9013_v30, %v21217_v11  ;;  %v9016_v26 = vpop.f32.mrb[106].mxu1  ;;  %v8936_v5 = vadd.f32 %v8935_v48, %v21614_v16 }
 0xd0a   : >> { %v21629_v54 = vadd.f32 %v8934_v10, %v21221_v3  ;;  %v9017_v25 = vadd.f32 %v9016_v26, %v21622_v59  ;;  %v9018_v2 = vpop.f32.mrb[107].mxu1 }
 0xd0b   : >> { %v21633_v62 = vadd.f32 %v8936_v5, %v21225_v50  ;;  %v9019_v31 = vadd.f32 %v9018_v2, %v21622_v59  ;;  %v8939_v23 = vpop.f32.mrb[106].mxu0  ;;  %v18641_v36 = vpack.i.bf16 %v21625_v32, %v21619_v45 }
 0xd0c   : >> { %v21639_v11 = vadd.f32 %v9017_v25, %v21231_v1  ;;  %v8940_v18 = vadd.f32 %v8939_v23, %v21622_v59  ;;  %v8941_v42 = vpop.f32.mrb[107].mxu0 }
 0xd0d   : >> { %v21643_v3 = vadd.f32 %v9019_v31, %v21235_v56  ;;  %v8942_v46 = vadd.f32 %v8941_v42, %v21622_v59  ;;  %18642 = vrot.lane.b32.xlu0 %v18641_v36, %s19389_s18  ;;  %v18636_v50 = vpack.i.bf16 %v21633_v62, %v21629_v54 }
 0xd0e   : >> { %v21650_v21 = vadd.f32 %v8940_v18, %v21242_v33  ;;  %v18656_v33 = vpack.i.bf16 %v9969_v37, %v9964_v6 }
 0xd0f   : >> { %v21653_v1 = vadd.f32 %v8942_v46, %v21245_v40  ;;  %v18651_v56 = vpack.i.bf16 %v21643_v3, %v21639_v11  ;;  %18637 = vrot.lane.b32.xlu1 %v18636_v50, %s19389_s18  ;;  %v16494_v40 = vld [vmem:[%s19589_s15 + $0xb8] sm:$0xff] }
 0xd11   : >> { %18652 = vrot.lane.b32.xlu0 %v18651_v56, %s19389_s18  ;;  %v18646_v8 = vpack.i.bf16 %v21653_v1, %v21650_v21 }
 0xd13   : >> { %18647 = vrot.lane.b32.xlu1 %v18646_v8, %s19389_s18 }
 0xd15   : >> { %18662 = vrot.lane.b32.xlu0 %v18636_v50, %s19388_s29 }
 0xd17   : >> { %18657 = vrot.lane.b32.xlu1 %v18656_v33, %s19389_s18 }
 0xd19   : >> { %18672 = vrot.lane.b32.xlu0 %v18646_v8, %s19388_s29 }
 0xd1b   : >> { %18667 = vrot.lane.b32.xlu1 %v18641_v36, %s19388_s29 }
 0xd1d   : >> { %18682 = vrot.lane.b32.xlu0 %v18656_v33, %s19388_s29 }
 0xd1f   : >> { %18677 = vrot.lane.b32.xlu1 %v18651_v56, %s19388_s29 }
 0xd21   : >> { %10228 = vperm.xlu0 %18184, %v16494_v40  }
 0xd23   : >> { %10223 = vperm.xlu1 %18185, %v16493_v63  }
 0xd25   : >> { %10218 = vperm.xlu0 %18184, %v16492_v20  }
 0xd27   : >> { %10213 = vperm.xlu1 %18185, %v16491_v51  }
 0xd2d   : >> { %v9672_v55 = vpop.f32.mrb[108].mxu1 }
 0xd2e   : >> { %v9674_v14 = vpop.f32.mrb[109].mxu1  ;;  %v17455_v27 = vadd.f32 %v9672_v55, %v21480_v15 }
 0xd2f   : >> { %v9583_v41 = vpop.f32.mrb[108].mxu0  ;;  %v17456_v12 = vadd.f32 %v9674_v14, %v21480_v15 }
 0xd30   : >> { %v9585_v49 = vpop.f32.mrb[109].mxu0  ;;  %v17447_v53 = vadd.f32 %v9583_v41, %v21480_v15  ;;  %19074 = vtanh.f32 %v17455_v27 }
 0xd31   : >> { %v9678_v39 = vpop.f32.mrb[110].mxu1  ;;  %v17448_v60 = vadd.f32 %v9585_v49, %v21480_v15  ;;  %19076 = vtanh.f32 %v17456_v12 }
 0xd32   : >> { %v9680_v24 = vpop.f32.mrb[111].mxu1  ;;  %19078 = vtanh.f32 %v17447_v53 }
 0xd33   : >> { %v9589_v47 = vpop.f32.mrb[110].mxu0  ;;  %19080 = vtanh.f32 %v17448_v60  ;;  %v17458_v33 = vadd.f32 %v9680_v24, %v21486_v0 }
 0xd34   : >> { %v9591_v19 = vpop.f32.mrb[111].mxu0  ;;  %v17449_v20 = vadd.f32 %v9589_v47, %v21486_v0 }
 0xd35   : >> { %v9684_v34 = vpop.f32.mrb[112].mxu1  ;;  %v17450_v55 = vadd.f32 %v9591_v19, %v21486_v0 }
 0xd36   : >> { %v17459_v13 = vadd.f32 %v9684_v34, %v21476_v43  ;;  %v9686_v7 = vpop.f32.mrb[113].mxu1 }
 0xd37   : >> { %v17460_v30 = vadd.f32 %v9686_v7, %v21476_v43  ;;  %v9595_v52 = vpop.f32.mrb[112].mxu0 }
 0xd38   : >> { %v9713_v10 = vmul.f32 0.5, %v17459_v13  ;;  %v17451_v48 = vadd.f32 %v9595_v52, %v21476_v43  ;;  %v9597_v26 = vpop.f32.mrb[113].mxu0 }
 0xd39   : >> { %v9714_v5 = vmul.f32 0.5, %v17460_v30  ;;  %v9690_v25 = vpop.f32.mrb[114].mxu1  ;;  %v17452_v2 = vadd.f32 %v9597_v26, %v21476_v43  ;;  %v17457_v43 = vadd.f32 %v9678_v39, %v21486_v0 }
 0xd3a   : >> { %19082 = vtanh.f32 %v9713_v10  ;;  %v9711_v15 = vmul.f32 0.5, %v17451_v48  ;;  %v17461_v31 = vadd.f32 %v9690_v25, %v21478_v58  ;;  %v9692_v23 = vpop.f32.mrb[115].mxu1  ;;  %v19075_v63 = vpop.eup %19074 }
 0xd3b   : >> { %19084 = vtanh.f32 %v9714_v5  ;;  %v9712_v36 = vmul.f32 0.5, %v17452_v2  ;;  %v17462_v18 = vadd.f32 %v9692_v23, %v21478_v58  ;;  %v9601_v42 = vpop.f32.mrb[114].mxu0  ;;  %v19077_v51 = vpop.eup %19076 }
 0xd3c   : >> { %19086 = vtanh.f32 %v9711_v15  ;;  %v9717_v46 = vmul.f32 0.5, %v17461_v31  ;;  %v17453_v50 = vadd.f32 %v9601_v42, %v21478_v58  ;;  %v9603_v56 = vpop.f32.mrb[115].mxu0  ;;  %v19079_v14 = vpop.eup %19078 }
 0xd3d   : >> { %19088 = vtanh.f32 %v9712_v36  ;;  %v9718_v6 = vmul.f32 0.5, %v17462_v18  ;;  %v17454_v37 = vadd.f32 %v9603_v56, %v21478_v58  ;;  %v19081_v41 = vpop.eup %19080 }
 0xd3e   : >> { %19090 = vtanh.f32 %v9717_v46  ;;  %v9715_v8 = vmul.f32 0.5, %v17453_v50 }
 0xd3f   : >> { %19092 = vtanh.f32 %v9718_v6  ;;  %v9716_v40 = vmul.f32 0.5, %v17454_v37 }
 0xd40   : >> { %19094 = vtanh.f32 %v9715_v8 }
 0xd41   : >> { %19096 = vtanh.f32 %v9716_v40 }
 0xd42   : >> { %19098 = vtanh.f32 %v17457_v43 }
 0xd43   : >> { %19100 = vtanh.f32 %v17458_v33 }
 0xd44   : >> { %v19083_v58 = vpop.eup %19082  ;;  %19102 = vtanh.f32 %v17449_v20 }
 0xd45   : >> { %v19085_v49 = vpop.eup %19084  ;;  %v9729_v39 = vmul.f32 0.5, %v19083_v58  ;;  %19104 = vtanh.f32 %v17450_v55 }
 0xd46   : >> { %v19087_v27 = vpop.eup %19086  ;;  %v9730_v24 = vmul.f32 0.5, %v19085_v49 }
 0xd47   : >> { %v19089_v12 = vpop.eup %19088  ;;  %v9737_v53 = vadd.f32 0.5, %v9729_v39  ;;  %v9727_v60 = vmul.f32 0.5, %v19087_v27 }
 0xd48   : >> { %v19091_v47 = vpop.eup %19090  ;;  %v9738_v34 = vadd.f32 0.5, %v9730_v24  ;;  %v9728_v13 = vmul.f32 0.5, %v19089_v12 }
 0xd49   : >> { %v19093_v7 = vpop.eup %19092  ;;  %v9753_v0 = vmul.f32 %v19075_v63, %v9737_v53  ;;  %v9735_v19 = vadd.f32 0.5, %v9727_v60  ;;  %v9733_v30 = vmul.f32 0.5, %v19091_v47 }
 0xd4a   : >> { %v19095_v52 = vpop.eup %19094  ;;  %v9736_v10 = vadd.f32 0.5, %v9728_v13  ;;  %v9734_v48 = vmul.f32 0.5, %v19093_v7  ;;  %v9754_v26 = vmul.f32 %v19077_v51, %v9738_v34 }
 0xd4b   : >> { %v19097_v5 = vpop.eup %19096  ;;  %v9751_v25 = vmul.f32 %v19079_v14, %v9735_v19  ;;  %v9741_v2 = vadd.f32 0.5, %v9733_v30  ;;  %v9731_v15 = vmul.f32 0.5, %v19095_v52 }
 0xd4c   : >> { %v19099_v31 = vpop.eup %19098  ;;  %v9742_v23 = vadd.f32 0.5, %v9734_v48  ;;  %v9732_v36 = vmul.f32 0.5, %v19097_v5  ;;  %v9752_v18 = vmul.f32 %v19081_v41, %v9736_v10 }
 0xd4d   : >> { %v19101_v42 = vpop.eup %19100  ;;  %v9757_v46 = vmul.f32 %v19099_v31, %v9741_v2  ;;  %v9739_v50 = vadd.f32 0.5, %v9731_v15  ;;  %v21707_v31 = vld [vmem:[%s19649_s10 + $0x1e0] sm:$0xff] }
 0xd4e   : >> { %v19103_v56 = vpop.eup %19102  ;;  %v9740_v6 = vadd.f32 0.5, %v9732_v36  ;;  %v9758_v37 = vmul.f32 %v19101_v42, %v9742_v23 }
 0xd4f   : >> { %v19105_v43 = vpop.eup %19104  ;;  %v9755_v8 = vmul.f32 %v19103_v56, %v9739_v50  ;;  %v17093_v33 = vpack.c.bf16 %v9757_v46, %v9753_v0 }
 0xd50   : >> { %v17091_v40 = vpack.c.bf16 %v9758_v37, %v9754_v26  ;;  %v9756_v63 = vmul.f32 %v19105_v43, %v9740_v6 }
 0xd51   : >> { %v17089_v20 = vpack.c.bf16 %v9755_v8, %v9751_v25  ;;  %v21717_v8 = vld [vmem:[%s19649_s10 + $0x1e8] sm:$0xff] }
 0xd52   : >> { %17092 = vmatprep.subr.bf16.mxu1 %v17091_v40  ;;  %v17087_v51 = vpack.c.bf16 %v9756_v63, %v9752_v18 }
 0xd53   : >> { %17094 = vmatpush1.bf16.msra.mxu1 %v17093_v33 }
 0xd54   : >> { %17088 = vmatprep.subr.bf16.mxu0 %v17087_v51 }
 0xd55   : >> { %17090 = vmatpush1.bf16.msra.mxu0 %v17089_v20 }
 0xd56   : >> { %16467 = vmatmul.mubr.msk.f32.vlgmr.msra.gmra.mrb[116].mxu1 %vm560_vm2, %v21501_v38 }
 0xd57   : >> { %9906 = vmatprep.mubr.f32.mxu1 %v23035_v35 }
 0xd58   : >> { %16465 = vmatmul.mubr.msk.f32.vlgmr.msra.gmra.mrb[116].mxu0 %vm560_vm2, %v21501_v38 }
 0xd59   : >> { %9829 = vmatprep.mubr.f32.mxu0 %v23035_v35 }
 0xd5a   : >> { %16468 = vmatmul.mubr.msk.f32.gmra.mrb[118].mxu1 %vm560_vm2, %v21513_v28 }
 0xd5b   : >> { %10186 = vmatprep.mubr.f32.mxu1 %v23035_v35 }
 0xd5c   : >> { %16466 = vmatmul.mubr.msk.f32.gmra.mrb[118].mxu0 %vm560_vm2, %v21513_v28 }
 0xd5d   : >> { %10097 = vmatprep.mubr.f32.mxu0 %v23035_v35 }
 0xd7f   : >> { %v18643_v55 = vpop.permute.xlu0 %18642 }
 0xd80   : >> { %v18645_v41 = vunpack.i.h.bf16 %v18643_v55  ;;  %v18644_v58 = vunpack.i.l.bf16 %v18643_v55 }
 0xd81   : >> { %v18638_v14 = vpop.permute.xlu1 %18637 }
 0xd82   : >> { %v18640_v27 = vunpack.i.h.bf16 %v18638_v14  ;;  %v18639_v24 = vunpack.i.l.bf16 %v18638_v14  ;;  %v10008_v47 = vsel %vm10004_vm6, %v18644_v58, %v18645_v41 }
 0xd83   : >> { %v18653_v49 = vpop.permute.xlu0 %18652 }
 0xd84   : >> { %v18655_v39 = vunpack.i.h.bf16 %v18653_v49  ;;  %v18654_v38 = vunpack.i.l.bf16 %v18653_v49  ;;  %v10007_v7 = vsel %vm10004_vm6, %v18640_v27, %v18644_v58  ;;  %v10006_v19 = vsel %vm10004_vm6, %v18639_v24, %v18640_v27 }
 0xd85   : >> { %v18648_v12 = vpop.permute.xlu1 %18647 }
 0xd86   : >> { %v18650_v53 = vunpack.i.h.bf16 %v18648_v12  ;;  %v18649_v60 = vunpack.i.l.bf16 %v18648_v12  ;;  %v10012_v34 = vsel %vm10004_vm6, %v18654_v38, %v18655_v39  ;;  %v17111_v39 = vpack.c.bf16 %v21653_v1, %v21633_v62 }
 0xd87   : >> { %v18663_v28 = vpop.permute.xlu0 %18662  ;;  %v17099_v13 = vpack.c.bf16 %v10012_v34, %v10008_v47  ;;  %v17115_v34 = vpack.c.bf16 %v21643_v3, %v21625_v32 }
 0xd88   : >> { %v10011_v0 = vsel %vm10004_vm6, %v18650_v53, %v18654_v38  ;;  %v10010_v30 = vsel %vm10004_vm6, %v18649_v60, %v18650_v53  ;;  %v18665_v26 = vunpack.i.h.bf16 %v18663_v28  ;;  %v18664_v5 = vunpack.i.l.bf16 %v18663_v28  ;;  %v21744_v28 = vld [vmem:[%s19649_s10 + $0x1f8] sm:$0xff] }
 0xd89   : >> { %v17101_v52 = vpack.c.bf16 %v10011_v0, %v10007_v7  ;;  %17100 = vmatprep.subr.bf16.mxu1 %v17099_v13  ;;  %v18658_v10 = vpop.permute.xlu1 %18657  ;;  %v17095_v48 = vpack.c.bf16 %v10010_v30, %v10006_v19  ;;  %v21754_v13 = vld [vmem:[%s19649_s10 + $0x200] sm:$0xff]  ;;  %v17117_v7 = vpack.c.bf16 %v21639_v11, %v21619_v45  ;;  %v21765_v0 = vld [vmem:[%s19649_s10 + $0x208] sm:$0xff]  ;;  %v17113_v19 = vpack.c.bf16 %v21650_v21, %v21629_v54  ;;  %v21776_v30 = vld [vmem:[%s19649_s10 + $0x210] sm:$0xff] }
 0xd8a   : >> { %v18660_v25 = vunpack.i.h.bf16 %v18658_v10  ;;  %v18659_v2 = vunpack.i.l.bf16 %v18658_v10  ;;  %v10268_v56 = vsel %vm8112_vm5, %v18664_v5, %v18665_v26  ;;  %v21794_v10 = vld [vmem:[%s19649_s10 + $0x220] sm:$0xff] }
 0xd8b   : >> { %v18673_v15 = vpop.permute.xlu0 %18672  ;;  %17096 = vmatprep.subr.bf16.mxu0 %v17095_v48  ;;  %17102 = vmatpush1.bf16.msra.mxu1 %v17101_v52  ;;  %v21785_v52 = vld [vmem:[%s19649_s10 + $0x218] sm:$0xff]  ;;  %v21803_v48 = vld [vmem:[%s19649_s10 + $0x228] sm:$0xff] }
 0xd8c   : >> { %v18675_v23 = vunpack.i.h.bf16 %v18673_v15  ;;  %v18674_v36 = vunpack.i.l.bf16 %v18673_v15  ;;  %v10005_v18 = vsel %vm10004_vm6, %v18659_v2, %v18639_v24  ;;  %v10009_v42 = vsel %vm10004_vm6, %v18660_v25, %v18649_v60  ;;  %v21732_v24 = vld [vmem:[%s19649_s10 + $0x1f0] sm:$0xff] }
 0xd8d   : >> { %v17097_v46 = vpack.c.bf16 %v10009_v42, %v10005_v18  ;;  %v18668_v50 = vpop.permute.xlu1 %18667 }
 0xd8e   : >> { %16507 = vmatmul.mubr.msk.f32.vlgmr.msra.gmra.mrb[120].mxu1 %vm560_vm2, %v21707_v31  ;;  %v10272_v6 = vsel %vm8112_vm5, %v18674_v36, %v18675_v23  ;;  %v18670_v63 = vunpack.i.h.bf16 %v18668_v50  ;;  %v18669_v20 = vunpack.i.l.bf16 %v18668_v50 }
 0xd8f   : >> { %v18683_v37 = vpop.permute.xlu0 %18682  ;;  %17098 = vmatpush1.bf16.msra.mxu0 %v17097_v46  ;;  %v17103_v43 = vpack.c.bf16 %v10272_v6, %v10268_v56  ;;  %10192 = vmatprep.mubr.f32.mxu1 %v23035_v35 }
 0xd90   : >> { %v18685_v33 = vunpack.i.h.bf16 %v18683_v37  ;;  %v18684_v40 = vunpack.i.l.bf16 %v18683_v37  ;;  %v10269_v38 = vsel %vm8112_vm5, %v18665_v26, %v18669_v20  ;;  %v10270_v12 = vsel %vm8112_vm5, %v18669_v20, %v18670_v63  ;;  %v21812_v26 = vld [vmem:[%s19649_s10 + $0x230] sm:$0xff] }
 0xd91   : >> { %17104 = vmatprep.subr.bf16.mxu0 %v17103_v43  ;;  %v18678_v51 = vpop.permute.xlu1 %18677 }
 0xd92   : >> { %v10267_v55 = vsel %vm8112_vm5, %v18684_v40, %v18664_v5  ;;  %v10271_v14 = vsel %vm8112_vm5, %v18685_v33, %v18674_v36  ;;  %v18680_v41 = vunpack.i.h.bf16 %v18678_v51  ;;  %v18679_v58 = vunpack.i.l.bf16 %v18678_v51  ;;  %16503 = vmatmul.mubr.msk.f32.vlgmr.msra.gmra.mrb[120].mxu0 %vm560_vm2, %v21707_v31  ;;  %16508 = vmatmul.mubr.msk.f32.gmra.mrb[122].mxu1 %vm560_vm2, %v21717_v8  ;;  %v21821_v5 = vld [vmem:[%s19649_s10 + $0x238] sm:$0xff] }
 0xd93   : >> { %v17105_v49 = vpack.c.bf16 %v10271_v14, %v10267_v55  ;;  %10103 = vmatprep.mubr.f32.mxu0 %v23035_v35  ;;  %10198 = vmatprep.mubr.f32.mxu1 %v23035_v35 }
 0xd94   : >> { %v10273_v27 = vsel %vm8112_vm5, %v18675_v23, %v18679_v58  ;;  %v10274_v53 = vsel %vm8112_vm5, %v18679_v58, %v18680_v41 }
 0xd95   : >> { %v17109_v60 = vpack.c.bf16 %v10273_v27, %v10269_v38  ;;  %17106 = vmatpush1.bf16.msra.mxu0 %v17105_v49  ;;  %v17107_v47 = vpack.c.bf16 %v10274_v53, %v10270_v12  ;;  %v16501_v49 = vld [vmem:[%s19633_s23 + $0x50] sm:$0xff] }
 0xd96   : >> { %17112 = vmatprep.subr.bf16.mxu0 %v17111_v39  ;;  %16504 = vmatmul.mubr.msk.f32.gmra.mrb[122].mxu0 %vm560_vm2, %v21717_v8 }
 0xd97   : >> { %16509 = vmatmul.mubr.msk.f32.gmra.mrb[124].mxu1 %vm560_vm2, %v21732_v24  ;;  %17108 = vmatprep.subr.bf16.mxu1 %v17107_v47 }
 0xd98   : >> { %17110 = vmatpush1.bf16.msra.mxu1 %v17109_v60  ;;  %10109 = vmatprep.mubr.f32.mxu0 %v23035_v35 }
 0xd99   : >> { %10204 = vmatprep.mubr.f32.mxu1 %v23035_v35  ;;  %17116 = vmatprep.subr.bf16.mxu1 %v17115_v34 }
 0xd9a   : >> { %16505 = vmatmul.mubr.msk.f32.gmra.mrb[124].mxu0 %vm560_vm2, %v21732_v24 }
 0xd9b   : >> { %16510 = vmatmul.mubr.msk.f32.gmra.mrb[126].mxu1 %vm560_vm2, %v21744_v28  ;;  %10115 = vmatprep.mubr.f32.mxu0 %v23035_v35 }
 0xd9c   : >> { %10448 = vmatprep.mubr.f32.mxu1 %v23035_v35 }
 0xd9e   : >> { %16506 = vmatmul.mubr.msk.f32.gmra.mrb[126].mxu0 %vm560_vm2, %v21744_v28 }
 0xd9f   : >> { %16515 = vmatmul.mubr.msk.f32.vlgmr.msra.gmra.mrb[120].mxu1 %vm560_vm2, %v21754_v13  ;;  %10359 = vmatprep.mubr.f32.mxu0 %v23035_v35 }
 0xda0   : >> { %17118 = vmatpush1.bf16.msra.mxu1 %v17117_v7  ;;  %10454 = vmatprep.mubr.f32.mxu1 %v23035_v35  ;;  %v21886_v12 = vpop.permute.xlu0 %10228 }
 0xda2   : >> { %16511 = vmatmul.mubr.msk.f32.vlgmr.msra.gmra.mrb[120].mxu0 %vm560_vm2, %v21754_v13  ;;  %v21884_v39 = vpop.permute.xlu1 %10223 }
 0xda3   : >> { %16516 = vmatmul.mubr.msk.f32.gmra.mrb[122].mxu1 %vm560_vm2, %v21765_v0  ;;  %17114 = vmatpush1.bf16.msra.mxu0 %v17113_v19 }
 0xda4   : >> { %10365 = vmatprep.mubr.f32.mxu0 %v23035_v35  ;;  %10460 = vmatprep.mubr.f32.mxu1 %v23035_v35 }
 0xda6   : >> { %16512 = vmatmul.mubr.msk.f32.gmra.mrb[122].mxu0 %vm560_vm2, %v21765_v0  ;;  %v21888_v34 = vpop.permute.xlu1 %10213 }
 0xda7   : >> { %16517 = vmatmul.mubr.msk.f32.gmra.mrb[124].mxu1 %vm560_vm2, %v21776_v30  ;;  %10371 = vmatprep.mubr.f32.mxu0 %v23035_v35 }
 0xda8   : >> { %10466 = vmatprep.mubr.f32.mxu1 %v23035_v35 }
 0xdaa   : >> { %16513 = vmatmul.mubr.msk.f32.gmra.mrb[124].mxu0 %vm560_vm2, %v21776_v30 }
 0xdab   : >> { %16518 = vmatmul.mubr.msk.f32.gmra.mrb[126].mxu1 %vm560_vm2, %v21785_v52  ;;  %10377 = vmatprep.mubr.f32.mxu0 %v23035_v35 }
 0xdac   : >> { %10654 = vmatprep.mubr.f32.mxu1 %v23035_v35 }
 0xdae   : >> { %16514 = vmatmul.mubr.msk.f32.gmra.mrb[126].mxu0 %vm560_vm2, %v21785_v52 }
 0xdaf   : >> { %16523 = vmatmul.mubr.msk.f32.vlgmr.msra.gmra.mrb[120].mxu1 %vm560_vm2, %v21794_v10  ;;  %10565 = vmatprep.mubr.f32.mxu0 %v23035_v35 }
 0xdb0   : >> { %10660 = vmatprep.mubr.f32.mxu1 %v23035_v35 }
 0xdb2   : >> { %16519 = vmatmul.mubr.msk.f32.vlgmr.msra.gmra.mrb[120].mxu0 %vm560_vm2, %v21794_v10 }
 0xdb3   : >> { %16524 = vmatmul.mubr.msk.f32.gmra.mrb[122].mxu1 %vm560_vm2, %v21803_v48  ;;  %10571 = vmatprep.mubr.f32.mxu0 %v23035_v35 }
 0xdb4   : >> { %10666 = vmatprep.mubr.f32.mxu1 %v23035_v35 }
 0xdb6   : >> { %16520 = vmatmul.mubr.msk.f32.gmra.mrb[122].mxu0 %vm560_vm2, %v21803_v48 }
 0xdb7   : >> { %16525 = vmatmul.mubr.msk.f32.gmra.mrb[124].mxu1 %vm560_vm2, %v21812_v26  ;;  %10577 = vmatprep.mubr.f32.mxu0 %v23035_v35 }
 0xdb8   : >> { %10672 = vmatprep.mubr.f32.mxu1 %v23035_v35 }
 0xdba   : >> { %16521 = vmatmul.mubr.msk.f32.gmra.mrb[124].mxu0 %vm560_vm2, %v21812_v26 }
 0xdbb   : >> { %16526 = vmatmul.mubr.msk.f32.gmra.mrb[126].mxu1 %vm560_vm2, %v21821_v5  ;;  %10583 = vmatprep.mubr.f32.mxu0 %v23035_v35 }
 0xdbc   : >> { %10900 = vmatprep.mubr.f32.mxu1 %v23035_v35 }
 0xdbe   : >> { %16522 = vmatmul.mubr.msk.f32.gmra.mrb[126].mxu0 %vm560_vm2, %v21821_v5 }
 0xdbf   : >> { %10823 = vmatprep.mubr.f32.mxu0 %v23035_v35 }
 0xe29   : >> { %v9902_v25 = vpop.f32.mrb[116].mxu1 }
 0xe2a   : >> { %v9903_v2 = vadd.f32 %v9902_v25, %v21614_v16  ;;  %v9904_v15 = vpop.f32.mrb[117].mxu1 }
 0xe2b   : >> { %v9905_v23 = vadd.f32 %v9904_v15, %v21614_v16  ;;  %v9825_v36 = vpop.f32.mrb[116].mxu0 }
 0xe2c   : >> { %v21835_v18 = vadd.f32 %v9903_v2, %v21427_v29  ;;  %v9826_v42 = vadd.f32 %v9825_v36, %v21614_v16  ;;  %v9827_v46 = vpop.f32.mrb[117].mxu0 }
 0xe2d   : >> { %v21839_v50 = vadd.f32 %v9905_v23, %v21431_v44  ;;  %v9908_v56 = vpop.f32.mrb[118].mxu1  ;;  %v9828_v6 = vadd.f32 %v9827_v46, %v21614_v16 }
 0xe2e   : >> { %v21843_v37 = vadd.f32 %v9826_v42, %v21435_v17  ;;  %v9909_v43 = vadd.f32 %v9908_v56, %v21622_v59  ;;  %v9910_v33 = vpop.f32.mrb[119].mxu1  ;;  %v21894_v56 = vpop.permute.xlu0 %10218 }
 0xe2f   : >> { %v21847_v40 = vadd.f32 %v9828_v6, %v21439_v57  ;;  %v9911_v29 = vadd.f32 %v9910_v33, %v21622_v59  ;;  %v9831_v63 = vpop.f32.mrb[118].mxu0  ;;  %v18691_v20 = vpack.i.bf16 %v21839_v50, %v21835_v18 }
 0xe30   : >> { %v21853_v44 = vadd.f32 %v9909_v43, %v21445_v22  ;;  %v9832_v16 = vadd.f32 %v9831_v63, %v21622_v59  ;;  %v9833_v51 = vpop.f32.mrb[119].mxu0 }
 0xe31   : >> { %v21857_v17 = vadd.f32 %v9911_v29, %v21449_v9  ;;  %v9834_v55 = vadd.f32 %v9833_v51, %v21622_v59  ;;  %18692 = vrot.lane.b32.xlu0 %v18691_v20, %s19389_s18  ;;  %v18686_v57 = vpack.i.bf16 %v21847_v40, %v21843_v37  ;;  %v10929_v9 = vld [vmem:[#allocation2 + $0x68] sm:$0xff]  ;;  %v10934_v59 = vld [vmem:[#allocation2 + $0x98] sm:$0xff] }
 0xe32   : >> { %v21864_v14 = vadd.f32 %v9832_v16, %v21456_v61  ;;  %v18706_v61 = vpack.i.bf16 %v10934_v59, %v10929_v9 }
 0xe33   : >> { %v21867_v22 = vadd.f32 %v9834_v55, %v21459_v4  ;;  %v18701_v41 = vpack.i.bf16 %v21857_v17, %v21853_v44  ;;  %18687 = vrot.lane.b32.xlu1 %v18686_v57, %s19389_s18  ;;  %v16502_v4 = vld [vmem:[%s19633_s23 + $0x58] sm:$0xff] }
 0xe35   : >> { %18702 = vrot.lane.b32.xlu0 %v18701_v41, %s19389_s18  ;;  %v18696_v58 = vpack.i.bf16 %v21867_v22, %v21864_v14 }
 0xe37   : >> { %18697 = vrot.lane.b32.xlu1 %v18696_v58, %s19389_s18 }
 0xe39   : >> { %18712 = vrot.lane.b32.xlu0 %v18686_v57, %s19388_s29 }
 0xe3b   : >> { %18707 = vrot.lane.b32.xlu1 %v18706_v61, %s19389_s18 }
 0xe3d   : >> { %18722 = vrot.lane.b32.xlu0 %v18696_v58, %s19388_s29 }
 0xe3f   : >> { %18717 = vrot.lane.b32.xlu1 %v18691_v20, %s19388_s29 }
 0xe41   : >> { %18732 = vrot.lane.b32.xlu0 %v18706_v61, %s19388_s29 }
 0xe43   : >> { %18727 = vrot.lane.b32.xlu1 %v18701_v41, %s19388_s29 }
 0xe45   : >> { %10750 = vperm.xlu0 %18184, %v16502_v4  }
 0xe47   : >> { %10745 = vperm.xlu1 %18185, %v16501_v49  }
 0xe82   : >> { %v10656_v38 = vpop.f32.mrb[120].mxu1 }
 0xe83   : >> { %v10658_v27 = vpop.f32.mrb[121].mxu1  ;;  %v17471_v19 = vadd.f32 %v10656_v38, %v21888_v34 }
 0xe84   : >> { %v17472_v25 = vadd.f32 %v10658_v27, %v21888_v34 }
 0xe85   : >> { %v10567_v53 = vpop.f32.mrb[120].mxu0  ;;  %19106 = vtanh.f32 %v17471_v19 }
 0xe86   : >> { %v10662_v60 = vpop.f32.mrb[122].mxu1  ;;  %v10569_v47 = vpop.f32.mrb[121].mxu0  ;;  %v17463_v15 = vadd.f32 %v10567_v53, %v21888_v34  ;;  %19108 = vtanh.f32 %v17472_v25 }
 0xe87   : >> { %v10664_v7 = vpop.f32.mrb[123].mxu1  ;;  %v17473_v43 = vadd.f32 %v10662_v60, %v21894_v56  ;;  %v17464_v60 = vadd.f32 %v10569_v47, %v21888_v34 }
 0xe88   : >> { %19110 = vtanh.f32 %v17463_v15  ;;  %v17474_v25 = vadd.f32 %v10664_v7, %v21894_v56 }
 0xe89   : >> { %v10573_v2 = vpop.f32.mrb[122].mxu0 }
 0xe8a   : >> { %v10668_v23 = vpop.f32.mrb[124].mxu1  ;;  %v10575_v36 = vpop.f32.mrb[123].mxu0 }
 0xe8b   : >> { %v17475_v42 = vadd.f32 %v10668_v23, %v21884_v39  ;;  %v10670_v46 = vpop.f32.mrb[125].mxu1 }
 0xe8c   : >> { %v17476_v6 = vadd.f32 %v10670_v46, %v21884_v39 }
 0xe8d   : >> { %v10697_v33 = vmul.f32 0.5, %v17475_v42  ;;  %v10579_v29 = vpop.f32.mrb[124].mxu0  ;;  %v17465_v42 = vadd.f32 %v10573_v2, %v21894_v56 }
 0xe8e   : >> { %v10698_v63 = vmul.f32 0.5, %v17476_v6  ;;  %v17467_v20 = vadd.f32 %v10579_v29, %v21884_v39  ;;  %v10674_v16 = vpop.f32.mrb[126].mxu1  ;;  %v10581_v51 = vpop.f32.mrb[125].mxu0  ;;  %v17466_v6 = vadd.f32 %v10575_v36, %v21894_v56 }
 0xe8f   : >> { %19112 = vtanh.f32 %v10697_v33  ;;  %v17477_v55 = vadd.f32 %v10674_v16, %v21886_v12  ;;  %v17468_v57 = vadd.f32 %v10581_v51, %v21884_v39  ;;  %v10676_v41 = vpop.f32.mrb[127].mxu1  ;;  %v19107_v23 = vpop.eup %19106 }
 0xe90   : >> { %19114 = vtanh.f32 %v10698_v63  ;;  %v10695_v9 = vmul.f32 0.5, %v17467_v20  ;;  %v17478_v59 = vadd.f32 %v10676_v41, %v21886_v12  ;;  %v19109_v46 = vpop.eup %19108 }
 0xe91   : >> { %19116 = vtanh.f32 %v17473_v43  ;;  %v10701_v58 = vmul.f32 0.5, %v17477_v55  ;;  %v10696_v61 = vmul.f32 0.5, %v17468_v57  ;;  %v10585_v4 = vpop.f32.mrb[126].mxu0 }
 0xe92   : >> { %19118 = vtanh.f32 %v10695_v9  ;;  %v10702_v49 = vmul.f32 0.5, %v17478_v59  ;;  %v17469_v38 = vadd.f32 %v10585_v4, %v21886_v12  ;;  %v10587_v27 = vpop.f32.mrb[127].mxu0  ;;  %v19111_v43 = vpop.eup %19110 }
 0xe93   : >> { %19120 = vtanh.f32 %v10701_v58  ;;  %v17470_v53 = vadd.f32 %v10587_v27, %v21886_v12 }
 0xe94   : >> { %19122 = vtanh.f32 %v10696_v61  ;;  %v10699_v19 = vmul.f32 0.5, %v17469_v38 }
 0xe95   : >> { %19124 = vtanh.f32 %v10702_v49  ;;  %v10700_v15 = vmul.f32 0.5, %v17470_v53 }
 0xe96   : >> { %19126 = vtanh.f32 %v10699_v19 }
 0xe97   : >> { %19128 = vtanh.f32 %v10700_v15 }
 0xe98   : >> { %19130 = vtanh.f32 %v17464_v60 }
 0xe99   : >> { %v19113_v33 = vpop.eup %19112  ;;  %19132 = vtanh.f32 %v17474_v25 }
 0xe9a   : >> { %v19115_v29 = vpop.eup %19114  ;;  %19134 = vtanh.f32 %v17465_v42  ;;  %v10713_v47 = vmul.f32 0.5, %v19113_v33 }
 0xe9b   : >> { %v19117_v63 = vpop.eup %19116  ;;  %19136 = vtanh.f32 %v17466_v6  ;;  %v10714_v7 = vmul.f32 0.5, %v19115_v29 }
 0xe9c   : >> { %v19119_v20 = vpop.eup %19118  ;;  %v10721_v16 = vadd.f32 0.5, %v10713_v47 }
 0xe9d   : >> { %v19121_v51 = vpop.eup %19120  ;;  %v10722_v55 = vadd.f32 0.5, %v10714_v7  ;;  %v10711_v2 = vmul.f32 0.5, %v19119_v20 }
 0xe9e   : >> { %v19123_v57 = vpop.eup %19122  ;;  %v10737_v41 = vmul.f32 %v19107_v23, %v10721_v16  ;;  %v10717_v9 = vmul.f32 0.5, %v19121_v51 }
 0xe9f   : >> { %v19125_v36 = vpop.eup %19124  ;;  %v10719_v59 = vadd.f32 0.5, %v10711_v2  ;;  %v10712_v58 = vmul.f32 0.5, %v19123_v57  ;;  %v10738_v61 = vmul.f32 %v19109_v46, %v10722_v55 }
 0xea0   : >> { %v19127_v4 = vpop.eup %19126  ;;  %v10725_v49 = vadd.f32 0.5, %v10717_v9  ;;  %v10718_v38 = vmul.f32 0.5, %v19125_v36 }
 0xea1   : >> { %v19129_v27 = vpop.eup %19128  ;;  %v10735_v53 = vmul.f32 %v19111_v43, %v10719_v59  ;;  %v10720_v60 = vadd.f32 0.5, %v10712_v58  ;;  %v10715_v19 = vmul.f32 0.5, %v19127_v4 }
 0xea2   : >> { %v19131_v25 = vpop.eup %19130  ;;  %v10741_v15 = vmul.f32 %v19117_v63, %v10725_v49  ;;  %v10726_v42 = vadd.f32 0.5, %v10718_v38  ;;  %v10716_v6 = vmul.f32 0.5, %v19129_v27 }
 0xea3   : >> { %v19133_v33 = vpop.eup %19132  ;;  %v10723_v29 = vadd.f32 0.5, %v10715_v19  ;;  %v18693_v47 = vpop.permute.xlu0 %18692  ;;  %v10736_v23 = vmul.f32 %v19131_v25, %v10720_v60  ;;  %v21909_v19 = vld [vmem:[%s19859_s27 + $0x50] sm:$0xff] }
 0xea4   : >> { %v19135_v7 = vpop.eup %19134  ;;  %v10724_v20 = vadd.f32 0.5, %v10716_v6  ;;  %v10742_v16 = vmul.f32 %v19133_v33, %v10726_v42  ;;  %v17125_v2 = vpack.c.bf16 %v10741_v15, %v10737_v41  ;;  %v18695_v57 = vunpack.i.h.bf16 %v18693_v47 }
 0xea5   : >> { %v19137_v51 = vpop.eup %19136  ;;  %v10739_v46 = vmul.f32 %v19135_v7, %v10723_v29  ;;  %v18688_v55 = vpop.permute.xlu1 %18687  ;;  %v18694_v43 = vunpack.i.l.bf16 %v18693_v47 }
 0xea6   : >> { %v17123_v9 = vpack.c.bf16 %v10742_v16, %v10738_v61  ;;  %v10740_v36 = vmul.f32 %v19137_v51, %v10724_v20  ;;  %v18690_v63 = vunpack.i.h.bf16 %v18688_v55  ;;  %v18689_v38 = vunpack.i.l.bf16 %v18688_v55  ;;  %v21921_v20 = vld [vmem:[%s19859_s27 + $0x58] sm:$0xff] }
 0xea7   : >> { %v18703_v59 = vpop.permute.xlu0 %18702  ;;  %v17121_v58 = vpack.c.bf16 %v10739_v46, %v10735_v53  ;;  %v10972_v41 = vsel %vm10004_vm6, %v18694_v43, %v18695_v57 }
 0xea8   : >> { %v18705_v4 = vunpack.i.h.bf16 %v18703_v59  ;;  %v18704_v49 = vunpack.i.l.bf16 %v18703_v59  ;;  %17124 = vmatprep.subr.bf16.mxu1 %v17123_v9  ;;  %v17119_v27 = vpack.c.bf16 %v10740_v36, %v10736_v23  ;;  %v10971_v6 = vsel %vm10004_vm6, %v18690_v63, %v18694_v43 }
 0xea9   : >> { %17126 = vmatpush1.bf16.msra.mxu1 %v17125_v2  ;;  %v18698_v60 = vpop.permute.xlu1 %18697  ;;  %v10970_v29 = vsel %vm10004_vm6, %v18689_v38, %v18690_v63 }
 0xeaa   : >> { %v18700_v25 = vunpack.i.h.bf16 %v18698_v60  ;;  %v18699_v42 = vunpack.i.l.bf16 %v18698_v60  ;;  %17120 = vmatprep.subr.bf16.mxu0 %v17119_v27  ;;  %v10976_v61 = vsel %vm10004_vm6, %v18704_v49, %v18705_v4 }
 0xeab   : >> { %v18713_v15 = vpop.permute.xlu0 %18712  ;;  %17122 = vmatpush1.bf16.msra.mxu0 %v17121_v58  ;;  %v17131_v53 = vpack.c.bf16 %v10976_v61, %v10972_v41 }
 0xeac   : >> { %v10975_v33 = vsel %vm10004_vm6, %v18700_v25, %v18704_v49  ;;  %16529 = vmatmul.mubr.msk.f32.vlgmr.msra.gmra.mrb[128].mxu1 %vm560_vm2, %v21909_v19  ;;  %v10974_v47 = vsel %vm10004_vm6, %v18699_v42, %v18700_v25  ;;  %v18715_v51 = vunpack.i.h.bf16 %v18713_v15  ;;  %v18714_v46 = vunpack.i.l.bf16 %v18713_v15 }
 0xead   : >> { %v17133_v23 = vpack.c.bf16 %v10975_v33, %v10971_v6  ;;  %17132 = vmatprep.subr.bf16.mxu1 %v17131_v53  ;;  %v18708_v7 = vpop.permute.xlu1 %18707  ;;  %10906 = vmatprep.mubr.f32.mxu1 %v23035_v35  ;;  %v17127_v16 = vpack.c.bf16 %v10974_v47, %v10970_v29  ;;  %v17143_v47 = vpack.c.bf16 %v21867_v22, %v21847_v40 }
 0xeae   : >> { %v18710_v55 = vunpack.i.h.bf16 %v18708_v7  ;;  %v18709_v2 = vunpack.i.l.bf16 %v18708_v7  ;;  %16527 = vmatmul.mubr.msk.f32.vlgmr.msra.gmra.mrb[128].mxu0 %vm560_vm2, %v21909_v19  ;;  %v11200_v4 = vsel %vm8112_vm5, %v18714_v46, %v18715_v51 }
 0xeaf   : >> { %v18723_v57 = vpop.permute.xlu0 %18722  ;;  %17128 = vmatprep.subr.bf16.mxu0 %v17127_v16  ;;  %17134 = vmatpush1.bf16.msra.mxu1 %v17133_v23 }
 0xeb0   : >> { %v18725_v43 = vunpack.i.h.bf16 %v18723_v57  ;;  %v18724_v9 = vunpack.i.l.bf16 %v18723_v57  ;;  %v10969_v36 = vsel %vm10004_vm6, %v18709_v2, %v18689_v38  ;;  %v10973_v59 = vsel %vm10004_vm6, %v18710_v55, %v18699_v42  ;;  %16530 = vmatmul.mubr.msk.f32.gmra.mrb[130].mxu1 %vm560_vm2, %v21921_v20  ;;  %10829 = vmatprep.mubr.f32.mxu0 %v23035_v35 }
 0xeb1   : >> { %v17129_v63 = vpack.c.bf16 %v10973_v59, %v10969_v36  ;;  %v18718_v58 = vpop.permute.xlu1 %18717  ;;  %11138 = vmatprep.mubr.f32.mxu1 %v23035_v35 }
 0xeb2   : >> { %16528 = vmatmul.mubr.msk.f32.gmra.mrb[130].mxu0 %vm560_vm2, %v21921_v20  ;;  %v11204_v49 = vsel %vm8112_vm5, %v18724_v9, %v18725_v43  ;;  %v18720_v42 = vunpack.i.h.bf16 %v18718_v58  ;;  %v18719_v41 = vunpack.i.l.bf16 %v18718_v58 }
 0xeb3   : >> { %v18733_v27 = vpop.permute.xlu0 %18732  ;;  %17130 = vmatpush1.bf16.msra.mxu0 %v17129_v63  ;;  %v17135_v38 = vpack.c.bf16 %v11204_v49, %v11200_v4  ;;  %11049 = vmatprep.mubr.f32.mxu0 %v23035_v35 }
 0xeb4   : >> { %v18735_v60 = vunpack.i.h.bf16 %v18733_v27  ;;  %v18734_v25 = vunpack.i.l.bf16 %v18733_v27  ;;  %16535 = vmatmul.mubr.msk.f32.vlgmr.msra.gmra.mrb[132].mxu1 %vm560_vm2, %v21707_v31  ;;  %v11201_v23 = vsel %vm8112_vm5, %v18715_v51, %v18719_v41  ;;  %v11202_v16 = vsel %vm8112_vm5, %v18719_v41, %v18720_v42  ;;  %v22066_v42 = vld [vmem:[#allocation2 + $0x8] sm:$0xff]  ;;  %v22068_v41 = vld [vmem:[#allocation2 + $0x38] sm:$0xff] }
 0xeb5   : >> { %17136 = vmatprep.subr.bf16.mxu0 %v17135_v38  ;;  %v18728_v61 = vpop.permute.xlu1 %18727  ;;  %11144 = vmatprep.mubr.f32.mxu1 %v23035_v35  ;;  %v17147_v51 = vpack.c.bf16 %v21857_v17, %v21839_v50 }
 0xeb6   : >> { %v11199_v15 = vsel %vm8112_vm5, %v18734_v25, %v18714_v46  ;;  %v11203_v53 = vsel %vm8112_vm5, %v18735_v60, %v18724_v9  ;;  %v18730_v6 = vunpack.i.h.bf16 %v18728_v61  ;;  %v18729_v33 = vunpack.i.l.bf16 %v18728_v61  ;;  %16531 = vmatmul.mubr.msk.f32.vlgmr.msra.gmra.mrb[132].mxu0 %vm560_vm2, %v21707_v31 }
 0xeb7   : >> { %v17137_v29 = vpack.c.bf16 %v11203_v53, %v11199_v15  ;;  %11055 = vmatprep.mubr.f32.mxu0 %v23035_v35  ;;  %v16581_v15 = vld [vmem:[%s19589_s15 + $0xc0] sm:$0xff]  ;;  %v16584_v53 = vld [vmem:[%s19589_s15 + $0xd8] sm:$0xff] }
 0xeb8   : >> { %v11205_v7 = vsel %vm8112_vm5, %v18725_v43, %v18729_v33  ;;  %16536 = vmatmul.mubr.msk.f32.gmra.mrb[134].mxu1 %vm560_vm2, %v21717_v8  ;;  %v11206_v46 = vsel %vm8112_vm5, %v18729_v33, %v18730_v6  ;;  %v16582_v6 = vld [vmem:[%s19589_s15 + $0xc8] sm:$0xff] }
 0xeb9   : >> { %v17141_v55 = vpack.c.bf16 %v11205_v7, %v11201_v23  ;;  %17138 = vmatpush1.bf16.msra.mxu0 %v17137_v29  ;;  %11150 = vmatprep.mubr.f32.mxu1 %v23035_v35  ;;  %v17139_v31 = vpack.c.bf16 %v11206_v46, %v11202_v16 }
 0xeba   : >> { %17144 = vmatprep.subr.bf16.mxu0 %v17143_v47  ;;  %16532 = vmatmul.mubr.msk.f32.gmra.mrb[134].mxu0 %vm560_vm2, %v21717_v8  ;;  %v17149_v8 = vpack.c.bf16 %v21853_v44, %v21835_v18 }
 0xebb   : >> { %17140 = vmatprep.subr.bf16.mxu1 %v17139_v31  ;;  %11061 = vmatprep.mubr.f32.mxu0 %v23035_v35 }
 0xebc   : >> { %16537 = vmatmul.mubr.msk.f32.gmra.mrb[136].mxu1 %vm560_vm2, %v21732_v24 }
 0xebd   : >> { %17142 = vmatpush1.bf16.msra.mxu1 %v17141_v55  ;;  %11156 = vmatprep.mubr.f32.mxu1 %v23035_v35 }
 0xebe   : >> { %17148 = vmatprep.subr.bf16.mxu1 %v17147_v51  ;;  %16533 = vmatmul.mubr.msk.f32.gmra.mrb[136].mxu0 %vm560_vm2, %v21732_v24  ;;  %v17145_v24 = vpack.c.bf16 %v21864_v14, %v21843_v37 }
 0xebf   : >> { %11067 = vmatprep.mubr.f32.mxu0 %v23035_v35 }
 0xec0   : >> { %16538 = vmatmul.mubr.msk.f32.gmra.mrb[138].mxu1 %vm560_vm2, %v21744_v28 }
 0xec1   : >> { %11368 = vmatprep.mubr.f32.mxu1 %v23035_v35 }
 0xec2   : >> { %16534 = vmatmul.mubr.msk.f32.gmra.mrb[138].mxu0 %vm560_vm2, %v21744_v28 }
 0xec3   : >> { %11279 = vmatprep.mubr.f32.mxu0 %v23035_v35 }
 0xec4   : >> { %16543 = vmatmul.mubr.msk.f32.vlgmr.msra.gmra.mrb[132].mxu1 %vm560_vm2, %v21754_v13  ;;  %v22030_v57 = vpop.permute.xlu0 %10750 }
 0xec5   : >> { %17150 = vmatpush1.bf16.msra.mxu1 %v17149_v8  ;;  %11374 = vmatprep.mubr.f32.mxu1 %v23035_v35 }
 0xec6   : >> { %16539 = vmatmul.mubr.msk.f32.vlgmr.msra.gmra.mrb[132].mxu0 %vm560_vm2, %v21754_v13  ;;  %v22022_v28 = vpop.permute.xlu1 %10745 }
 0xec7   : >> { %17146 = vmatpush1.bf16.msra.mxu0 %v17145_v24  ;;  %11285 = vmatprep.mubr.f32.mxu0 %v23035_v35 }
 0xec8   : >> { %16544 = vmatmul.mubr.msk.f32.gmra.mrb[134].mxu1 %vm560_vm2, %v21765_v0 }
 0xec9   : >> { %11380 = vmatprep.mubr.f32.mxu1 %v23035_v35 }
 0xeca   : >> { %16540 = vmatmul.mubr.msk.f32.gmra.mrb[134].mxu0 %vm560_vm2, %v21765_v0 }
 0xecb   : >> { %11291 = vmatprep.mubr.f32.mxu0 %v23035_v35 }
 0xecc   : >> { %16545 = vmatmul.mubr.msk.f32.gmra.mrb[136].mxu1 %vm560_vm2, %v21776_v30 }
 0xecd   : >> { %11386 = vmatprep.mubr.f32.mxu1 %v23035_v35 }
 0xece   : >> { %16541 = vmatmul.mubr.msk.f32.gmra.mrb[136].mxu0 %vm560_vm2, %v21776_v30 }
 0xecf   : >> { %11297 = vmatprep.mubr.f32.mxu0 %v23035_v35 }
 0xed0   : >> { %16546 = vmatmul.mubr.msk.f32.gmra.mrb[138].mxu1 %vm560_vm2, %v21785_v52 }
 0xed1   : >> { %11562 = vmatprep.mubr.f32.mxu1 %v23035_v35 }
 0xed2   : >> { %16542 = vmatmul.mubr.msk.f32.gmra.mrb[138].mxu0 %vm560_vm2, %v21785_v52 }
 0xed3   : >> { %11473 = vmatprep.mubr.f32.mxu0 %v23035_v35 }
 0xed4   : >> { %16551 = vmatmul.mubr.msk.f32.vlgmr.msra.gmra.mrb[132].mxu1 %vm560_vm2, %v21794_v10 }
 0xed5   : >> { %11568 = vmatprep.mubr.f32.mxu1 %v23035_v35 }
 0xed6   : >> { %16547 = vmatmul.mubr.msk.f32.vlgmr.msra.gmra.mrb[132].mxu0 %vm560_vm2, %v21794_v10 }
 0xed7   : >> { %11479 = vmatprep.mubr.f32.mxu0 %v23035_v35 }
 0xed8   : >> { %16552 = vmatmul.mubr.msk.f32.gmra.mrb[134].mxu1 %vm560_vm2, %v21803_v48 }
 0xed9   : >> { %11574 = vmatprep.mubr.f32.mxu1 %v23035_v35 }
 0xeda   : >> { %16548 = vmatmul.mubr.msk.f32.gmra.mrb[134].mxu0 %vm560_vm2, %v21803_v48 }
 0xedb   : >> { %11485 = vmatprep.mubr.f32.mxu0 %v23035_v35 }
 0xedc   : >> { %16553 = vmatmul.mubr.msk.f32.gmra.mrb[136].mxu1 %vm560_vm2, %v21812_v26 }
 0xedd   : >> { %11580 = vmatprep.mubr.f32.mxu1 %v23035_v35 }
 0xede   : >> { %16549 = vmatmul.mubr.msk.f32.gmra.mrb[136].mxu0 %vm560_vm2, %v21812_v26 }
 0xedf   : >> { %11491 = vmatprep.mubr.f32.mxu0 %v23035_v35 }
 0xee0   : >> { %16554 = vmatmul.mubr.msk.f32.gmra.mrb[138].mxu1 %vm560_vm2, %v21821_v5 }
 0xee1   : >> { %11792 = vmatprep.mubr.f32.mxu1 %v23035_v35 }
 0xee2   : >> { %16550 = vmatmul.mubr.msk.f32.gmra.mrb[138].mxu0 %vm560_vm2, %v21821_v5 }
 0xee3   : >> { %11715 = vmatprep.mubr.f32.mxu0 %v23035_v35 }
 0xf7f   : >> { %v10902_v13 = vpop.f32.mrb[128].mxu1 }
 0xf80   : >> { %v10903_v0 = vadd.f32 %v10902_v13, %v22022_v28  ;;  %v10904_v30 = vpop.f32.mrb[129].mxu1 }
 0xf81   : >> { %v10905_v52 = vadd.f32 %v10904_v30, %v22022_v28  ;;  %v10825_v10 = vpop.f32.mrb[128].mxu0 }
 0xf82   : >> { %v22027_v48 = vadd.f32 %v10903_v0, %v21619_v45  ;;  %v10826_v26 = vadd.f32 %v10825_v10, %v22022_v28  ;;  %v10827_v2 = vpop.f32.mrb[129].mxu0 }
 0xf83   : >> { %v22033_v5 = vadd.f32 %v10905_v52, %v21625_v32  ;;  %v10908_v43 = vpop.f32.mrb[130].mxu1  ;;  %v10828_v9 = vadd.f32 %v10827_v2, %v22022_v28 }
 0xf84   : >> { %v22037_v36 = vadd.f32 %v10826_v26, %v21629_v54  ;;  %v10909_v59 = vadd.f32 %v10908_v43, %v22030_v57  ;;  %v10910_v63 = vpop.f32.mrb[131].mxu1 }
 0xf85   : >> { %v22041_v45 = vadd.f32 %v10828_v9, %v21633_v62  ;;  %v10911_v58 = vadd.f32 %v10910_v63, %v22030_v57  ;;  %v10831_v4 = vpop.f32.mrb[130].mxu0  ;;  %v18741_v49 = vpack.i.bf16 %v22033_v5, %v22027_v48 }
 0xf86   : >> { %v22047_v32 = vadd.f32 %v10909_v59, %v21639_v11  ;;  %v10832_v27 = vadd.f32 %v10831_v4, %v22030_v57  ;;  %v10833_v54 = vpop.f32.mrb[131].mxu0 }
 0xf87   : >> { %v22051_v38 = vadd.f32 %v10911_v58, %v21643_v3  ;;  %v10834_v62 = vadd.f32 %v10833_v54, %v22030_v57  ;;  %18742 = vrot.lane.b32.xlu0 %v18741_v49, %s19389_s18  ;;  %v18736_v60 = vpack.i.bf16 %v22041_v45, %v22037_v36 }
 0xf88   : >> { %v22058_v25 = vadd.f32 %v10832_v27, %v21650_v21  ;;  %v16583_v21 = vld [vmem:[%s19589_s15 + $0xd0] sm:$0xff] }
 0xf89   : >> { %v22061_v11 = vadd.f32 %v10834_v62, %v21653_v1  ;;  %v18751_v3 = vpack.i.bf16 %v22051_v38, %v22047_v32  ;;  %18737 = vrot.lane.b32.xlu1 %v18736_v60, %s19389_s18  ;;  %v18756_v1 = vpack.i.bf16 %v22068_v41, %v22066_v42 }
 0xf8b   : >> { %18752 = vrot.lane.b32.xlu0 %v18751_v3, %s19389_s18  ;;  %v18746_v61 = vpack.i.bf16 %v22061_v11, %v22058_v25 }
 0xf8d   : >> { %18747 = vrot.lane.b32.xlu1 %v18746_v61, %s19389_s18 }
 0xf8f   : >> { %12068 = vperm.xlu0 %18184, %v16583_v21  }
 0xf91   : >> { %18757 = vrot.lane.b32.xlu1 %v18756_v1, %s19389_s18 }
 0xf93   : >> { %12058 = vperm.xlu0 %18184, %v16581_v15  }
 0xf95   : >> { %12073 = vperm.xlu1 %18185, %v16584_v53  }
 0xf99   : >> { %12063 = vperm.xlu1 %18185, %v16582_v6  }
 0xfa7   : >> { %v11564_v33 = vpop.f32.mrb[132].mxu1 }
 0xfa8   : >> { %v11566_v29 = vpop.f32.mrb[133].mxu1  ;;  %v17487_v16 = vadd.f32 %v11564_v33, %v21888_v34 }
 0xfa9   : >> { %v11475_v47 = vpop.f32.mrb[132].mxu0  ;;  %v17488_v55 = vadd.f32 %v11566_v29, %v21888_v34 }
 0xfaa   : >> { %v11477_v23 = vpop.f32.mrb[133].mxu0  ;;  %v17479_v51 = vadd.f32 %v11475_v47, %v21888_v34  ;;  %19138 = vtanh.f32 %v17487_v16 }
 0xfab   : >> { %v11570_v7 = vpop.f32.mrb[134].mxu1  ;;  %v17480_v24 = vadd.f32 %v11477_v23, %v21888_v34  ;;  %19140 = vtanh.f32 %v17488_v55 }
 0xfac   : >> { %v11572_v46 = vpop.f32.mrb[135].mxu1  ;;  %19142 = vtanh.f32 %v17479_v51 }
 0xfad   : >> { %v11481_v31 = vpop.f32.mrb[134].mxu0  ;;  %19144 = vtanh.f32 %v17480_v24  ;;  %v17490_v15 = vadd.f32 %v11572_v46, %v21894_v56 }
 0xfae   : >> { %v11483_v8 = vpop.f32.mrb[135].mxu0  ;;  %v17481_v33 = vadd.f32 %v11481_v31, %v21894_v56 }
 0xfaf   : >> { %v11576_v13 = vpop.f32.mrb[136].mxu1  ;;  %v17482_v47 = vadd.f32 %v11483_v8, %v21894_v56 }
 0xfb0   : >> { %v17491_v0 = vadd.f32 %v11576_v13, %v21884_v39  ;;  %v11578_v30 = vpop.f32.mrb[137].mxu1 }
 0xfb1   : >> { %v17492_v52 = vadd.f32 %v11578_v30, %v21884_v39  ;;  %v11487_v10 = vpop.f32.mrb[136].mxu0 }
 0xfb2   : >> { %v11605_v26 = vmul.f32 0.5, %v17491_v0  ;;  %v17483_v2 = vadd.f32 %v11487_v10, %v21884_v39  ;;  %v11489_v43 = vpop.f32.mrb[137].mxu0 }
 0xfb3   : >> { %v11606_v9 = vmul.f32 0.5, %v17492_v52  ;;  %v11582_v59 = vpop.f32.mrb[138].mxu1  ;;  %v17484_v63 = vadd.f32 %v11489_v43, %v21884_v39  ;;  %v17489_v39 = vadd.f32 %v11570_v7, %v21894_v56 }
 0xfb4   : >> { %19146 = vtanh.f32 %v11605_v26  ;;  %v11603_v34 = vmul.f32 0.5, %v17483_v2  ;;  %v17493_v58 = vadd.f32 %v11582_v59, %v21886_v12  ;;  %v11584_v4 = vpop.f32.mrb[139].mxu1  ;;  %v19139_v6 = vpop.eup %19138 }
 0xfb5   : >> { %19148 = vtanh.f32 %v11606_v9  ;;  %v11604_v49 = vmul.f32 0.5, %v17484_v63  ;;  %v17494_v27 = vadd.f32 %v11584_v4, %v21886_v12  ;;  %v11493_v54 = vpop.f32.mrb[138].mxu0  ;;  %v19141_v29 = vpop.eup %19140 }
 0xfb6   : >> { %19150 = vtanh.f32 %v11603_v34  ;;  %v11609_v62 = vmul.f32 0.5, %v17493_v58  ;;  %v17485_v60 = vadd.f32 %v11493_v54, %v21886_v12  ;;  %v11495_v3 = vpop.f32.mrb[139].mxu0  ;;  %v19143_v23 = vpop.eup %19142 }
 0xfb7   : >> { %19152 = vtanh.f32 %v11604_v49  ;;  %v11610_v61 = vmul.f32 0.5, %v17494_v27  ;;  %v17486_v21 = vadd.f32 %v11495_v3, %v21886_v12  ;;  %v19145_v16 = vpop.eup %19144 }
 0xfb8   : >> { %19154 = vtanh.f32 %v11609_v62  ;;  %v11607_v1 = vmul.f32 0.5, %v17485_v60 }
 0xfb9   : >> { %19156 = vtanh.f32 %v11610_v61  ;;  %v11608_v53 = vmul.f32 0.5, %v17486_v21 }
 0xfba   : >> { %19158 = vtanh.f32 %v11607_v1 }
 0xfbb   : >> { %19160 = vtanh.f32 %v11608_v53 }
 0xfbc   : >> { %19162 = vtanh.f32 %v17489_v39 }
 0xfbd   : >> { %19164 = vtanh.f32 %v17490_v15 }
 0xfbe   : >> { %v19147_v12 = vpop.eup %19146  ;;  %19166 = vtanh.f32 %v17481_v33 }
 0xfbf   : >> { %v19149_v7 = vpop.eup %19148  ;;  %v11621_v55 = vmul.f32 0.5, %v19147_v12  ;;  %19168 = vtanh.f32 %v17482_v47 }
 0xfc0   : >> { %v19151_v46 = vpop.eup %19150  ;;  %v11622_v51 = vmul.f32 0.5, %v19149_v7  ;;  %v22108_v7 = vpack.c.bf16 %v22061_v11, %v22041_v45 }
 0xfc1   : >> { %v19153_v24 = vpop.eup %19152  ;;  %v11629_v13 = vadd.f32 0.5, %v11621_v55  ;;  %v11619_v0 = vmul.f32 0.5, %v19151_v46  ;;  %v17161_v55 = vpack.c.bf16 %v22068_v41, %v22066_v42  ;;  %v22124_v42 = vld [vmem:[%s19649_s10 + $0x240] sm:$0xff]  ;;  %v22151_v41 = vld [vmem:[%s19649_s10 + $0x258] sm:$0xff] }
 0xfc2   : >> { %v19155_v31 = vpop.eup %19154  ;;  %v11630_v30 = vadd.f32 0.5, %v11622_v51  ;;  %v11620_v52 = vmul.f32 0.5, %v19153_v24 }
 0xfc3   : >> { %v19157_v10 = vpop.eup %19156  ;;  %v11645_v56 = vmul.f32 %v19139_v6, %v11629_v13  ;;  %v11627_v8 = vadd.f32 0.5, %v11619_v0  ;;  %v11625_v26 = vmul.f32 0.5, %v19155_v31 }
 0xfc4   : >> { %v19159_v2 = vpop.eup %19158  ;;  %v11628_v43 = vadd.f32 0.5, %v11620_v52  ;;  %v11626_v9 = vmul.f32 0.5, %v19157_v10  ;;  %v11646_v59 = vmul.f32 %v19141_v29, %v11630_v30 }
 0xfc5   : >> { %v19161_v63 = vpop.eup %19160  ;;  %v11643_v34 = vmul.f32 %v19143_v23, %v11627_v8  ;;  %v11633_v58 = vadd.f32 0.5, %v11625_v26  ;;  %v11623_v4 = vmul.f32 0.5, %v19159_v2  ;;  %v22099_v23 = vpack.c.bf16 %v22047_v32, %v22027_v48 }
 0xfc6   : >> { %v19163_v49 = vpop.eup %19162  ;;  %v11634_v27 = vadd.f32 0.5, %v11626_v9  ;;  %v11624_v54 = vmul.f32 0.5, %v19161_v63  ;;  %v11644_v62 = vmul.f32 %v19145_v16, %v11628_v43  ;;  %v22104_v16 = vpack.c.bf16 %v22058_v25, %v22037_v36 }
 0xfc7   : >> { %v19165_v60 = vpop.eup %19164  ;;  %v11649_v3 = vmul.f32 %v19163_v49, %v11633_v58  ;;  %v11631_v61 = vadd.f32 0.5, %v11623_v4 }
 0xfc8   : >> { %v19167_v21 = vpop.eup %19166  ;;  %v11632_v39 = vadd.f32 0.5, %v11624_v54  ;;  %v11650_v1 = vmul.f32 %v19165_v60, %v11634_v27  ;;  %v17179_v60 = vpack.c.bf16 %v22051_v38, %v22033_v5 }
 0xfc9   : >> { %v19169_v15 = vpop.eup %19168  ;;  %v11647_v53 = vmul.f32 %v19167_v21, %v11631_v61  ;;  %v17157_v6 = vpack.c.bf16 %v11649_v3, %v11645_v56  ;;  %v22171_v3 = vld [vmem:[%s19649_s10 + $0x260] sm:$0xff] }
 0xfca   : >> { %v17155_v33 = vpack.c.bf16 %v11650_v1, %v11646_v59  ;;  %v11648_v47 = vmul.f32 %v19169_v15, %v11632_v39  ;;  %v22179_v1 = vld [vmem:[%s19649_s10 + $0x268] sm:$0xff]  ;;  %v22190_v15 = vld [vmem:[%s19649_s10 + $0x270] sm:$0xff] }
 0xfcb   : >> { %v17153_v29 = vpack.c.bf16 %v11647_v53, %v11643_v34  ;;  %v22200_v53 = vld [vmem:[%s19649_s10 + $0x278] sm:$0xff] }
 0xfcc   : >> { %17156 = vmatprep.subr.bf16.mxu1 %v17155_v33  ;;  %v17151_v12 = vpack.c.bf16 %v11648_v47, %v11644_v62  ;;  %v22218_v33 = vld [vmem:[%s19649_s10 + $0x288] sm:$0xff]  ;;  %v22227_v47 = vld [vmem:[%s19649_s10 + $0x290] sm:$0xff] }
 0xfcd   : >> { %17158 = vmatpush1.bf16.msra.mxu1 %v17157_v6  ;;  %v22209_v6 = vld [vmem:[%s19649_s10 + $0x280] sm:$0xff] }
 0xfce   : >> { %17164 = vmatprep.subr.bf16.mxu1 %v22099_v23  ;;  %17152 = vmatprep.subr.bf16.mxu0 %v17151_v12 }
 0xfcf   : >> { %17154 = vmatpush1.bf16.msra.mxu0 %v17153_v29  ;;  %v22236_v29 = vld [vmem:[%s19649_s10 + $0x298] sm:$0xff] }
 0xfd0   : >> { %16557 = vmatmul.mubr.msk.f32.vlgmr.msra.gmra.mrb[140].mxu1 %vm560_vm2, %v21909_v19  ;;  %17160 = vmatprep.subr.bf16.mxu0 %v22104_v16 }
 0xfd1   : >> { %17166 = vmatpush1.bf16.msra.mxu1 %v22108_v7  ;;  %11798 = vmatprep.mubr.f32.mxu1 %v23035_v35 }
 0xfd2   : >> { %16555 = vmatmul.mubr.msk.f32.vlgmr.msra.gmra.mrb[140].mxu0 %vm560_vm2, %v21909_v19  ;;  %v22133_v19 = vld [vmem:[%s19649_s10 + $0x248] sm:$0xff] }
 0xfd3   : >> { %11721 = vmatprep.mubr.f32.mxu0 %v23035_v35  ;;  %17162 = vmatpush1.bf16.msra.mxu0 %v17161_v55 }
 0xfd4   : >> { %16558 = vmatmul.mubr.msk.f32.gmra.mrb[142].mxu1 %vm560_vm2, %v21921_v20 }
 0xfd5   : >> { %12031 = vmatprep.mubr.f32.mxu1 %v23035_v35 }
 0xfd6   : >> { %16556 = vmatmul.mubr.msk.f32.gmra.mrb[142].mxu0 %vm560_vm2, %v21921_v20  ;;  %v22142_v20 = vld [vmem:[%s19649_s10 + $0x250] sm:$0xff] }
 0xfd7   : >> { %11942 = vmatprep.mubr.f32.mxu0 %v23035_v35 }
 0xfd8   : >> { %16597 = vmatmul.mubr.msk.f32.vlgmr.msra.gmra.mrb[144].mxu1 %vm560_vm2, %v22124_v42 }
 0xfd9   : >> { %12037 = vmatprep.mubr.f32.mxu1 %v23035_v35 }
 0xfda   : >> { %16593 = vmatmul.mubr.msk.f32.vlgmr.msra.gmra.mrb[144].mxu0 %vm560_vm2, %v22124_v42 }
 0xfdb   : >> { %11948 = vmatprep.mubr.f32.mxu0 %v23035_v35 }
 0xfdc   : >> { %16598 = vmatmul.mubr.msk.f32.gmra.mrb[146].mxu1 %vm560_vm2, %v22133_v19 }
 0xfdd   : >> { %12043 = vmatprep.mubr.f32.mxu1 %v23035_v35 }
 0xfde   : >> { %16594 = vmatmul.mubr.msk.f32.gmra.mrb[146].mxu0 %vm560_vm2, %v22133_v19 }
 0xfdf   : >> { %11954 = vmatprep.mubr.f32.mxu0 %v23035_v35 }
 0xfe0   : >> { %16599 = vmatmul.mubr.msk.f32.gmra.mrb[148].mxu1 %vm560_vm2, %v22142_v20 }
 0xfe1   : >> { %12049 = vmatprep.mubr.f32.mxu1 %v23035_v35 }
 0xfe2   : >> { %16595 = vmatmul.mubr.msk.f32.gmra.mrb[148].mxu0 %vm560_vm2, %v22142_v20 }
 0xfe3   : >> { %11960 = vmatprep.mubr.f32.mxu0 %v23035_v35 }
 0xfe4   : >> { %16600 = vmatmul.mubr.msk.f32.gmra.mrb[150].mxu1 %vm560_vm2, %v22151_v41 }
 0xfe5   : >> { %12303 = vmatprep.mubr.f32.mxu1 %v23035_v35 }
 0xfe6   : >> { %16596 = vmatmul.mubr.msk.f32.gmra.mrb[150].mxu0 %vm560_vm2, %v22151_v41 }
 0xfe7   : >> { %12214 = vmatprep.mubr.f32.mxu0 %v23035_v35 }
 0xff9   : >> { %v18743_v46 = vpop.permute.xlu0 %18742 }
 0xffa   : >> { %v18745_v24 = vunpack.i.h.bf16 %v18743_v46  ;;  %v18744_v13 = vunpack.i.l.bf16 %v18743_v46 }
 0xffb   : >> { %v18738_v51 = vpop.permute.xlu1 %18737 }
 0xffc   : >> { %v18740_v52 = vunpack.i.h.bf16 %v18738_v51  ;;  %v18739_v10 = vunpack.i.l.bf16 %v18738_v51  ;;  %v12125_v2 = vsel %vm10004_vm6, %v18744_v13, %v18745_v24 }
 0xffd   : >> { %v18753_v0 = vpop.permute.xlu0 %18752 }
 0xffe   : >> { %v18755_v31 = vunpack.i.h.bf16 %v18753_v0  ;;  %v18754_v30 = vunpack.i.l.bf16 %v18753_v0  ;;  %v12124_v59 = vsel %vm10004_vm6, %v18740_v52, %v18744_v13  ;;  %v12123_v34 = vsel %vm10004_vm6, %v18739_v10, %v18740_v52 }
 0xfff   : >> { %v18748_v56 = vpop.permute.xlu1 %18747 }
0x1000   : >> { %v18750_v8 = vunpack.i.h.bf16 %v18748_v56  ;;  %v18749_v26 = vunpack.i.l.bf16 %v18748_v56  ;;  %v12129_v43 = vsel %vm10004_vm6, %v18754_v30, %v18755_v31 }
0x1001   : >> { %v17171_v9 = vpack.c.bf16 %v12129_v43, %v12125_v2 }
0x1002   : >> { %v12128_v63 = vsel %vm10004_vm6, %v18750_v8, %v18754_v30  ;;  %v12127_v58 = vsel %vm10004_vm6, %v18749_v26, %v18750_v8 }
0x1003   : >> { %v17173_v4 = vpack.c.bf16 %v12128_v63, %v12124_v59  ;;  %17172 = vmatprep.subr.bf16.mxu1 %v17171_v9  ;;  %v18758_v49 = vpop.permute.xlu1 %18757  ;;  %v17167_v27 = vpack.c.bf16 %v12127_v58, %v12123_v34  ;;  %v22289_v59 = vld [vmem:[#allocation2 + $0x98] sm:$0xff]  ;;  %v16591_v63 = vld [vmem:[%s19633_s23 + $0x60] sm:$0xff]  ;;  %v16673_v34 = vld [vmem:[%s19589_s15 + $0xf0] sm:$0xff] }
0x1004   : >> { %v18760_v54 = vunpack.i.h.bf16 %v18758_v49  ;;  %v18759_v62 = vunpack.i.l.bf16 %v18758_v49  ;;  %v16592_v58 = vld [vmem:[%s19633_s23 + $0x68] sm:$0xff]  ;;  %v16674_v49 = vld [vmem:[%s19589_s15 + $0xf8] sm:$0xff] }
0x1005   : >> { %17168 = vmatprep.subr.bf16.mxu0 %v17167_v27  ;;  %17174 = vmatpush1.bf16.msra.mxu1 %v17173_v4  ;;  %v16671_v4 = vld [vmem:[%s19589_s15 + $0xe0] sm:$0xff]  ;;  %v16681_v27 = vld [vmem:[%s19633_s23 + $0x70] sm:$0xff] }
0x1006   : >> { %v12122_v61 = vsel %vm10004_vm6, %v18759_v62, %v18739_v10  ;;  %v12126_v21 = vsel %vm10004_vm6, %v18760_v54, %v18749_v26  ;;  %17180 = vmatprep.subr.bf16.mxu1 %v17179_v60  ;;  %v16672_v54 = vld [vmem:[%s19589_s15 + $0xe8] sm:$0xff]  ;;  %v16682_v62 = vld [vmem:[%s19633_s23 + $0x78] sm:$0xff]  ;;  %s16774_s23 = sshll.u32 (%p464_p11), %s19468_s8, 7  ;;  %s19391_s8 = smov (%p464_p11), [#allocation4]  }
0x1007   : >> { %v17169_v39 = vpack.c.bf16 %v12126_v21, %v12122_v61  ;;  %s22918_s17 = scalar_lea.hbm (%p464_p11), %s22975_s9, %s16774_s23  ;;  %s19311_s29 = sshll.u32 (%p464_p11), %s19391_s8, 4  ;;  %s19312_s29 = int_to_ptr.vmem [resolvable:$false] %s19311_s29 }
0x1008   : >> { %16605 = vmatmul.mubr.msk.f32.vlgmr.msra.gmra.mrb[144].mxu1 %vm560_vm2, %v22171_v3 }
0x1009   : >> { %17170 = vmatpush1.bf16.msra.mxu0 %v17169_v39  ;;  %17182 = vmatpush1.bf16.msra.mxu1 %v22099_v23 }
0x100a   : >> { %17176 = vmatprep.subr.bf16.mxu0 %v22108_v7  ;;  %12309 = vmatprep.mubr.f32.mxu1 %v23035_v35 }
0x100c   : >> { %16601 = vmatmul.mubr.msk.f32.vlgmr.msra.gmra.mrb[144].mxu0 %vm560_vm2, %v22171_v3  ;;  %16606 = vmatmul.mubr.msk.f32.gmra.mrb[146].mxu1 %vm560_vm2, %v22179_v1 }
0x100d   : >> { %17178 = vmatpush1.bf16.msra.mxu0 %v22104_v16  ;;  %12220 = vmatprep.mubr.f32.mxu0 %v23035_v35 }
0x100e   : >> { %12315 = vmatprep.mubr.f32.mxu1 %v23035_v35  ;;  %v22306_v60 = vpop.permute.xlu0 %12068 }
0x1010   : >> { %16602 = vmatmul.mubr.msk.f32.gmra.mrb[146].mxu0 %vm560_vm2, %v22179_v1  ;;  %16607 = vmatmul.mubr.msk.f32.gmra.mrb[148].mxu1 %vm560_vm2, %v22190_v15 }
0x1011   : >> { %12226 = vmatprep.mubr.f32.mxu0 %v23035_v35  ;;  %12321 = vmatprep.mubr.f32.mxu1 %v23035_v35 }
0x1014   : >> { %16603 = vmatmul.mubr.msk.f32.gmra.mrb[148].mxu0 %vm560_vm2, %v22190_v15  ;;  %16608 = vmatmul.mubr.msk.f32.gmra.mrb[150].mxu1 %vm560_vm2, %v22200_v53  ;;  %v22308_v39 = vpop.permute.xlu1 %12073 }
0x1015   : >> { %12232 = vmatprep.mubr.f32.mxu0 %v23035_v35  ;;  %12509 = vmatprep.mubr.f32.mxu1 %v23035_v35 }
0x1018   : >> { %16604 = vmatmul.mubr.msk.f32.gmra.mrb[150].mxu0 %vm560_vm2, %v22200_v53  ;;  %16613 = vmatmul.mubr.msk.f32.vlgmr.msra.gmra.mrb[144].mxu1 %vm560_vm2, %v22209_v6 }
0x1019   : >> { %12420 = vmatprep.mubr.f32.mxu0 %v23035_v35  ;;  %12515 = vmatprep.mubr.f32.mxu1 %v23035_v35 }
0x101c   : >> { %16609 = vmatmul.mubr.msk.f32.vlgmr.msra.gmra.mrb[144].mxu0 %vm560_vm2, %v22209_v6  ;;  %16614 = vmatmul.mubr.msk.f32.gmra.mrb[146].mxu1 %vm560_vm2, %v22218_v33 }
0x101d   : >> { %12426 = vmatprep.mubr.f32.mxu0 %v23035_v35  ;;  %12521 = vmatprep.mubr.f32.mxu1 %v23035_v35 }
0x1020   : >> { %16610 = vmatmul.mubr.msk.f32.gmra.mrb[146].mxu0 %vm560_vm2, %v22218_v33  ;;  %16615 = vmatmul.mubr.msk.f32.gmra.mrb[148].mxu1 %vm560_vm2, %v22227_v47 }
0x1021   : >> { %12432 = vmatprep.mubr.f32.mxu0 %v23035_v35  ;;  %12527 = vmatprep.mubr.f32.mxu1 %v23035_v35 }
0x1024   : >> { %16611 = vmatmul.mubr.msk.f32.gmra.mrb[148].mxu0 %vm560_vm2, %v22227_v47  ;;  %16616 = vmatmul.mubr.msk.f32.gmra.mrb[150].mxu1 %vm560_vm2, %v22236_v29 }
0x1025   : >> { %12438 = vmatprep.mubr.f32.mxu0 %v23035_v35  ;;  %12755 = vmatprep.mubr.f32.mxu1 %v23035_v35 }
0x1028   : >> { %16612 = vmatmul.mubr.msk.f32.gmra.mrb[150].mxu0 %vm560_vm2, %v22236_v29 }
0x1029   : >> { %12678 = vmatprep.mubr.f32.mxu0 %v23035_v35 }
0x10a3   : >> { %v11794_v23 = vpop.f32.mrb[140].mxu1 }
0x10a4   : >> { %v11795_v12 = vadd.f32 %v11794_v23, %v22022_v28  ;;  %v11796_v16 = vpop.f32.mrb[141].mxu1 }
0x10a5   : >> { %v11797_v7 = vadd.f32 %v11796_v16, %v22022_v28  ;;  %v11717_v55 = vpop.f32.mrb[140].mxu0 }
0x10a6   : >> { %v22250_v46 = vadd.f32 %v11795_v12, %v21835_v18  ;;  %v11718_v51 = vadd.f32 %v11717_v55, %v22022_v28  ;;  %v11719_v24 = vpop.f32.mrb[141].mxu0  ;;  %v22310_v55 = vpop.permute.xlu0 %12058 }
0x10a7   : >> { %v22254_v13 = vadd.f32 %v11797_v7, %v21839_v50  ;;  %v11800_v0 = vpop.f32.mrb[142].mxu1  ;;  %v11720_v31 = vadd.f32 %v11719_v24, %v22022_v28 }
0x10a8   : >> { %v22258_v30 = vadd.f32 %v11718_v51, %v21843_v37  ;;  %v11801_v52 = vadd.f32 %v11800_v0, %v22030_v57  ;;  %v11802_v10 = vpop.f32.mrb[143].mxu1 }
0x10a9   : >> { %v22262_v56 = vadd.f32 %v11720_v31, %v21847_v40  ;;  %v11803_v18 = vadd.f32 %v11802_v10, %v22030_v57  ;;  %v11723_v8 = vpop.f32.mrb[142].mxu0  ;;  %v18766_v26 = vpack.i.bf16 %v22254_v13, %v22250_v46 }
0x10aa   : >> { %v22268_v50 = vadd.f32 %v11801_v52, %v21853_v44  ;;  %v11724_v28 = vadd.f32 %v11723_v8, %v22030_v57  ;;  %v11725_v37 = vpop.f32.mrb[143].mxu0 }
0x10ab   : >> { %v22272_v2 = vadd.f32 %v11803_v18, %v21857_v17  ;;  %v11726_v40 = vadd.f32 %v11725_v37, %v22030_v57  ;;  %18767 = vrot.lane.b32.xlu1 %v18766_v26, %s19389_s18  ;;  %v18761_v43 = vpack.i.bf16 %v22262_v56, %v22258_v30  ;;  %v22287_v57 = vld [vmem:[#allocation2 + $0x68] sm:$0xff]  ;;  %v22316_v26 = vpop.permute.xlu1 %12063 }
0x10ac   : >> { %v22279_v9 = vadd.f32 %v11724_v28, %v21864_v14 }
0x10ad   : >> { %v22282_v44 = vadd.f32 %v11726_v40, %v21867_v22  ;;  %18762 = vrot.lane.b32.xlu0 %v18761_v43, %s19389_s18  ;;  %v18776_v17 = vpack.i.bf16 %v22272_v2, %v22268_v50  ;;  %v18781_v22 = vpack.i.bf16 %v22289_v59, %v22287_v57 }
0x10af   : >> { %18777 = vrot.lane.b32.xlu1 %v18776_v17, %s19389_s18  ;;  %v18771_v14 = vpack.i.bf16 %v22282_v44, %v22279_v9 }
0x10b1   : >> { %18772 = vrot.lane.b32.xlu0 %v18771_v14, %s19389_s18 }
0x10b3   : >> { %12600 = vperm.xlu1 %18185, %v16591_v63  }
0x10b5   : >> { %18782 = vrot.lane.b32.xlu0 %v18781_v22, %s19389_s18  ;;  %s19313_s18 = scalar_lea.vmem (%p464_p11), %s19312_s29, 256 }
0x10b7   : >> { %13889 = vperm.xlu1 %18185, %v16673_v34  }
0x10b9   : >> { %12605 = vperm.xlu0 %18184, %v16592_v58  }
0x10bb   : >> { %13879 = vperm.xlu1 %18185, %v16671_v4  }
0x10bd   : >> { %13894 = vperm.xlu0 %18184, %v16674_v49  }
0x10bf   : >> { %14375 = vperm.xlu1 %18185, %v16681_v27  }
0x10c1   : >> { %13884 = vperm.xlu0 %18184, %v16672_v54  }
0x10c5   : >> { %14380 = vperm.xlu0 %18184, %v16682_v62  }
0x10eb   : >> { %v12511_v61 = vpop.f32.mrb[144].mxu1 }
0x10ec   : >> { %v12513_v21 = vpop.f32.mrb[145].mxu1  ;;  %v17503_v51 = vadd.f32 %v12511_v61, %v22310_v55 }
0x10ed   : >> { %v17504_v24 = vadd.f32 %v12513_v21, %v22310_v55 }
0x10ee   : >> { %19170 = vtanh.f32 %v17503_v51 }
0x10ef   : >> { %v12422_v23 = vpop.f32.mrb[144].mxu0  ;;  %v12517_v12 = vpop.f32.mrb[146].mxu1  ;;  %19172 = vtanh.f32 %v17504_v24 }
0x10f0   : >> { %v12424_v16 = vpop.f32.mrb[145].mxu0  ;;  %v12519_v7 = vpop.f32.mrb[147].mxu1  ;;  %v17495_v28 = vadd.f32 %v12422_v23, %v22310_v55  ;;  %v17505_v40 = vadd.f32 %v12517_v12, %v22316_v26 }
0x10f1   : >> { %v17496_v24 = vadd.f32 %v12424_v16, %v22310_v55 }
0x10f3   : >> { %v12428_v0 = vpop.f32.mrb[146].mxu0  ;;  %v12523_v31 = vpop.f32.mrb[148].mxu1 }
0x10f4   : >> { %v17507_v52 = vadd.f32 %v12523_v31, %v22306_v60  ;;  %v12430_v10 = vpop.f32.mrb[147].mxu0  ;;  %v12525_v18 = vpop.f32.mrb[149].mxu1 }
0x10f5   : >> { %v17508_v8 = vadd.f32 %v12525_v18, %v22306_v60 }
0x10f6   : >> { %v12552_v37 = vmul.f32 0.5, %v17507_v52  ;;  %v17506_v52 = vadd.f32 %v12519_v7, %v22316_v26 }
0x10f7   : >> { %v12553_v43 = vmul.f32 0.5, %v17508_v8  ;;  %v12434_v17 = vpop.f32.mrb[148].mxu0  ;;  %v12529_v14 = vpop.f32.mrb[150].mxu1 }
0x10f8   : >> { %19174 = vtanh.f32 %v12552_v37  ;;  %v17499_v63 = vadd.f32 %v12434_v17, %v22306_v60  ;;  %v17509_v22 = vadd.f32 %v12529_v14, %v22308_v39  ;;  %v12436_v34 = vpop.f32.mrb[149].mxu0  ;;  %v12531_v58 = vpop.f32.mrb[151].mxu1 }
0x10f9   : >> { %19176 = vtanh.f32 %v12553_v43  ;;  %v17500_v4 = vadd.f32 %v12436_v34, %v22306_v60  ;;  %v17510_v49 = vadd.f32 %v12531_v58, %v22308_v39  ;;  %v19171_v8 = vpop.eup %19170 }
0x10fa   : >> { %19178 = vtanh.f32 %v17495_v28  ;;  %v12550_v27 = vmul.f32 0.5, %v17499_v63  ;;  %v12556_v54 = vmul.f32 0.5, %v17509_v22  ;;  %v17497_v28 = vadd.f32 %v12428_v0, %v22316_v26  ;;  %v19173_v37 = vpop.eup %19172 }
0x10fb   : >> { %19180 = vtanh.f32 %v17505_v40  ;;  %v12551_v62 = vmul.f32 0.5, %v17500_v4  ;;  %v12557_v61 = vmul.f32 0.5, %v17510_v49  ;;  %v12440_v21 = vpop.f32.mrb[150].mxu0  ;;  %v17498_v40 = vadd.f32 %v12430_v10, %v22316_v26 }
0x10fc   : >> { %19182 = vtanh.f32 %v12550_v27  ;;  %v17501_v23 = vadd.f32 %v12440_v21, %v22308_v39  ;;  %v12442_v12 = vpop.f32.mrb[151].mxu0 }
0x10fd   : >> { %19184 = vtanh.f32 %v12556_v54  ;;  %v17502_v51 = vadd.f32 %v12442_v12, %v22308_v39 }
0x10fe   : >> { %19186 = vtanh.f32 %v12551_v62  ;;  %v12554_v31 = vmul.f32 0.5, %v17501_v23 }
0x10ff   : >> { %19188 = vtanh.f32 %v12557_v61  ;;  %v12555_v18 = vmul.f32 0.5, %v17502_v51 }
0x1100   : >> { %19190 = vtanh.f32 %v12554_v31 }
0x1101   : >> { %19192 = vtanh.f32 %v12555_v18 }
0x1102   : >> { %v19175_v43 = vpop.eup %19174  ;;  %19194 = vtanh.f32 %v17496_v24 }
0x1103   : >> { %v19177_v17 = vpop.eup %19176  ;;  %19196 = vtanh.f32 %v17506_v52  ;;  %v12568_v14 = vmul.f32 0.5, %v19175_v43 }
0x1104   : >> { %v19179_v16 = vpop.eup %19178  ;;  %19198 = vtanh.f32 %v17497_v28  ;;  %v12569_v63 = vmul.f32 0.5, %v19177_v17 }
0x1105   : >> { %v19181_v22 = vpop.eup %19180  ;;  %v12576_v7 = vadd.f32 0.5, %v12568_v14  ;;  %19200 = vtanh.f32 %v17498_v40 }
0x1106   : >> { %v19183_v34 = vpop.eup %19182  ;;  %v12577_v58 = vadd.f32 0.5, %v12569_v63 }
0x1107   : >> { %v19185_v4 = vpop.eup %19184  ;;  %v12592_v0 = vmul.f32 %v19171_v8, %v12576_v7  ;;  %v12566_v49 = vmul.f32 0.5, %v19183_v34 }
0x1108   : >> { %v19187_v27 = vpop.eup %19186  ;;  %v12572_v54 = vmul.f32 0.5, %v19185_v4  ;;  %v12593_v10 = vmul.f32 %v19173_v37, %v12577_v58 }
0x1109   : >> { %v19189_v62 = vpop.eup %19188  ;;  %v12574_v61 = vadd.f32 0.5, %v12566_v49  ;;  %v12567_v21 = vmul.f32 0.5, %v19187_v27 }
0x110a   : >> { %v19191_v23 = vpop.eup %19190  ;;  %v12580_v12 = vadd.f32 0.5, %v12572_v54  ;;  %v12573_v51 = vmul.f32 0.5, %v19189_v62 }
0x110b   : >> { %v19193_v24 = vpop.eup %19192  ;;  %v12590_v31 = vmul.f32 %v19179_v16, %v12574_v61  ;;  %v12575_v52 = vadd.f32 0.5, %v12567_v21  ;;  %v12570_v18 = vmul.f32 0.5, %v19191_v23  ;;  %v22332_v16 = vpack.c.bf16 %v22268_v50, %v22250_v46  ;;  %v22335_v61 = vld [vmem:[%s19859_s27 + $0x60] sm:$0xff]  ;;  %v22354_v23 = vld [vmem:[%s19859_s27 + $0x68] sm:$0xff] }
0x110c   : >> { %v19195_v28 = vpop.eup %19194  ;;  %v12596_v40 = vmul.f32 %v19181_v22, %v12580_v12  ;;  %v12581_v43 = vadd.f32 0.5, %v12573_v51  ;;  %v12571_v17 = vmul.f32 0.5, %v19193_v24  ;;  %v17193_v21 = vpack.c.bf16 %v22289_v59, %v22287_v57 }
0x110d   : >> { %v19197_v14 = vpop.eup %19196  ;;  %v12578_v8 = vadd.f32 0.5, %v12570_v18  ;;  %v12591_v63 = vmul.f32 %v19195_v28, %v12575_v52 }
0x110e   : >> { %v19199_v7 = vpop.eup %19198  ;;  %v12579_v37 = vadd.f32 0.5, %v12571_v17  ;;  %v12597_v34 = vmul.f32 %v19197_v14, %v12581_v43  ;;  %v17189_v58 = vpack.c.bf16 %v12596_v40, %v12592_v0  ;;  %v22340_v0 = vpack.c.bf16 %v22279_v9, %v22258_v30 }
0x110f   : >> { %v19201_v4 = vpop.eup %19200  ;;  %v12594_v49 = vmul.f32 %v19199_v7, %v12578_v8 }
0x1110   : >> { %v17187_v27 = vpack.c.bf16 %v12597_v34, %v12593_v10  ;;  %v12595_v54 = vmul.f32 %v19201_v4, %v12579_v37  ;;  %v22344_v10 = vpack.c.bf16 %v22282_v44, %v22262_v56 }
0x1111   : >> { %v17185_v62 = vpack.c.bf16 %v12594_v49, %v12590_v31 }
0x1112   : >> { %17188 = vmatprep.subr.bf16.mxu1 %v17187_v27  ;;  %v17183_v22 = vpack.c.bf16 %v12595_v54, %v12591_v63  ;;  %v17211_v54 = vpack.c.bf16 %v22272_v2, %v22254_v13 }
0x1113   : >> { %17190 = vmatpush1.bf16.msra.mxu1 %v17189_v58 }
0x1114   : >> { %17196 = vmatprep.subr.bf16.mxu1 %v22332_v16  ;;  %17184 = vmatprep.subr.bf16.mxu0 %v17183_v22 }
0x1115   : >> { %17186 = vmatpush1.bf16.msra.mxu0 %v17185_v62 }
0x1116   : >> { %16619 = vmatmul.mubr.msk.f32.vlgmr.msra.gmra.mrb[152].mxu1 %vm560_vm2, %v22335_v61  ;;  %17192 = vmatprep.subr.bf16.mxu0 %v22340_v0 }
0x1117   : >> { %17198 = vmatpush1.bf16.msra.mxu1 %v22344_v10  ;;  %12761 = vmatprep.mubr.f32.mxu1 %v23035_v35 }
0x1118   : >> { %16617 = vmatmul.mubr.msk.f32.vlgmr.msra.gmra.mrb[152].mxu0 %vm560_vm2, %v22335_v61 }
0x1119   : >> { %12684 = vmatprep.mubr.f32.mxu0 %v23035_v35  ;;  %17194 = vmatpush1.bf16.msra.mxu0 %v17193_v21 }
0x111a   : >> { %16620 = vmatmul.mubr.msk.f32.gmra.mrb[154].mxu1 %vm560_vm2, %v22354_v23 }
0x111b   : >> { %12947 = vmatprep.mubr.f32.mxu1 %v23035_v35 }
0x111c   : >> { %16618 = vmatmul.mubr.msk.f32.gmra.mrb[154].mxu0 %vm560_vm2, %v22354_v23 }
0x111d   : >> { %v18768_v57 = vpop.permute.xlu1 %18767  ;;  %12858 = vmatprep.mubr.f32.mxu0 %v23035_v35 }
0x111e   : >> { %16625 = vmatmul.mubr.msk.f32.vlgmr.msra.gmra.mrb[156].mxu1 %vm560_vm2, %v22124_v42  ;;  %v18770_v12 = vunpack.i.h.bf16 %v18768_v57  ;;  %v18769_v51 = vunpack.i.l.bf16 %v18768_v57 }
0x111f   : >> { %v18763_v59 = vpop.permute.xlu0 %18762  ;;  %12953 = vmatprep.mubr.f32.mxu1 %v23035_v35 }
0x1120   : >> { %16621 = vmatmul.mubr.msk.f32.vlgmr.msra.gmra.mrb[156].mxu0 %vm560_vm2, %v22124_v42  ;;  %v18765_v31 = vunpack.i.h.bf16 %v18763_v59  ;;  %v18764_v52 = vunpack.i.l.bf16 %v18763_v59  ;;  %v13021_v42 = vsel %vm10004_vm6, %v18769_v51, %v18770_v12 }
0x1121   : >> { %v18778_v24 = vpop.permute.xlu1 %18777  ;;  %12864 = vmatprep.mubr.f32.mxu0 %v23035_v35 }
0x1122   : >> { %v18780_v18 = vunpack.i.h.bf16 %v18778_v24  ;;  %v18779_v28 = vunpack.i.l.bf16 %v18778_v24  ;;  %16626 = vmatmul.mubr.msk.f32.gmra.mrb[158].mxu1 %vm560_vm2, %v22133_v19  ;;  %v13020_v63 = vsel %vm10004_vm6, %v18765_v31, %v18769_v51  ;;  %v13019_v37 = vsel %vm10004_vm6, %v18764_v52, %v18765_v31 }
0x1123   : >> { %v18773_v40 = vpop.permute.xlu0 %18772  ;;  %12959 = vmatprep.mubr.f32.mxu1 %v23035_v35 }
0x1124   : >> { %v18775_v43 = vunpack.i.h.bf16 %v18773_v40  ;;  %v18774_v17 = vunpack.i.l.bf16 %v18773_v40  ;;  %16622 = vmatmul.mubr.msk.f32.gmra.mrb[158].mxu0 %vm560_vm2, %v22133_v19  ;;  %v13025_v14 = vsel %vm10004_vm6, %v18779_v28, %v18780_v18 }
0x1125   : >> { %v17203_v8 = vpack.c.bf16 %v13025_v14, %v13021_v42  ;;  %12870 = vmatprep.mubr.f32.mxu0 %v23035_v35 }
0x1126   : >> { %v13024_v7 = vsel %vm10004_vm6, %v18775_v43, %v18779_v28  ;;  %16627 = vmatmul.mubr.msk.f32.gmra.mrb[160].mxu1 %vm560_vm2, %v22142_v20  ;;  %v13023_v34 = vsel %vm10004_vm6, %v18774_v17, %v18775_v43 }
0x1127   : >> { %v17205_v58 = vpack.c.bf16 %v13024_v7, %v13020_v63  ;;  %17204 = vmatprep.subr.bf16.mxu1 %v17203_v8  ;;  %v18783_v19 = vpop.permute.xlu0 %18782  ;;  %12965 = vmatprep.mubr.f32.mxu1 %v23035_v35  ;;  %v17199_v4 = vpack.c.bf16 %v13023_v34, %v13019_v37 }
0x1128   : >> { %v18785_v49 = vunpack.i.h.bf16 %v18783_v19  ;;  %v18784_v27 = vunpack.i.l.bf16 %v18783_v19  ;;  %16623 = vmatmul.mubr.msk.f32.gmra.mrb[160].mxu0 %vm560_vm2, %v22142_v20 }
0x1129   : >> { %17200 = vmatprep.subr.bf16.mxu0 %v17199_v4  ;;  %17206 = vmatpush1.bf16.msra.mxu1 %v17205_v58 }
0x112a   : >> { %v13018_v62 = vsel %vm10004_vm6, %v18784_v27, %v18764_v52  ;;  %v13022_v22 = vsel %vm10004_vm6, %v18785_v49, %v18774_v17  ;;  %16628 = vmatmul.mubr.msk.f32.gmra.mrb[162].mxu1 %vm560_vm2, %v22151_v41  ;;  %17212 = vmatprep.subr.bf16.mxu1 %v17211_v54 }
0x112b   : >> { %v17201_v21 = vpack.c.bf16 %v13022_v22, %v13018_v62  ;;  %12876 = vmatprep.mubr.f32.mxu0 %v23035_v35  ;;  %13187 = vmatprep.mubr.f32.mxu1 %v23035_v35 }
0x112c   : >> { %16624 = vmatmul.mubr.msk.f32.gmra.mrb[162].mxu0 %vm560_vm2, %v22151_v41 }
0x112d   : >> { %17202 = vmatpush1.bf16.msra.mxu0 %v17201_v21  ;;  %13098 = vmatprep.mubr.f32.mxu0 %v23035_v35 }
0x112e   : >> { %16633 = vmatmul.mubr.msk.f32.vlgmr.msra.gmra.mrb[156].mxu1 %vm560_vm2, %v22171_v3  ;;  %17208 = vmatprep.subr.bf16.mxu0 %v22344_v10 }
0x112f   : >> { %17214 = vmatpush1.bf16.msra.mxu1 %v22332_v16  ;;  %13193 = vmatprep.mubr.f32.mxu1 %v23035_v35 }
0x1130   : >> { %16629 = vmatmul.mubr.msk.f32.vlgmr.msra.gmra.mrb[156].mxu0 %vm560_vm2, %v22171_v3 }
0x1131   : >> { %17210 = vmatpush1.bf16.msra.mxu0 %v22340_v0  ;;  %13104 = vmatprep.mubr.f32.mxu0 %v23035_v35 }
0x1132   : >> { %16634 = vmatmul.mubr.msk.f32.gmra.mrb[158].mxu1 %vm560_vm2, %v22179_v1 }
0x1133   : >> { %13199 = vmatprep.mubr.f32.mxu1 %v23035_v35 }
0x1134   : >> { %16630 = vmatmul.mubr.msk.f32.gmra.mrb[158].mxu0 %vm560_vm2, %v22179_v1 }
0x1135   : >> { %13110 = vmatprep.mubr.f32.mxu0 %v23035_v35 }
0x1136   : >> { %16635 = vmatmul.mubr.msk.f32.gmra.mrb[160].mxu1 %vm560_vm2, %v22190_v15 }
0x1137   : >> { %13205 = vmatprep.mubr.f32.mxu1 %v23035_v35 }
0x1138   : >> { %16631 = vmatmul.mubr.msk.f32.gmra.mrb[160].mxu0 %vm560_vm2, %v22190_v15 }
0x1139   : >> { %13116 = vmatprep.mubr.f32.mxu0 %v23035_v35 }
0x113a   : >> { %16636 = vmatmul.mubr.msk.f32.gmra.mrb[162].mxu1 %vm560_vm2, %v22200_v53 }
0x113b   : >> { %13381 = vmatprep.mubr.f32.mxu1 %v23035_v35 }
0x113c   : >> { %16632 = vmatmul.mubr.msk.f32.gmra.mrb[162].mxu0 %vm560_vm2, %v22200_v53 }
0x113d   : >> { %13292 = vmatprep.mubr.f32.mxu0 %v23035_v35 }
0x113e   : >> { %16641 = vmatmul.mubr.msk.f32.vlgmr.msra.gmra.mrb[156].mxu1 %vm560_vm2, %v22209_v6 }
0x113f   : >> { %13387 = vmatprep.mubr.f32.mxu1 %v23035_v35 }
0x1140   : >> { %16637 = vmatmul.mubr.msk.f32.vlgmr.msra.gmra.mrb[156].mxu0 %vm560_vm2, %v22209_v6 }
0x1141   : >> { %13298 = vmatprep.mubr.f32.mxu0 %v23035_v35 }
0x1142   : >> { %16642 = vmatmul.mubr.msk.f32.gmra.mrb[158].mxu1 %vm560_vm2, %v22218_v33 }
0x1143   : >> { %13393 = vmatprep.mubr.f32.mxu1 %v23035_v35 }
0x1144   : >> { %16638 = vmatmul.mubr.msk.f32.gmra.mrb[158].mxu0 %vm560_vm2, %v22218_v33 }
0x1145   : >> { %13304 = vmatprep.mubr.f32.mxu0 %v23035_v35 }
0x1146   : >> { %16643 = vmatmul.mubr.msk.f32.gmra.mrb[160].mxu1 %vm560_vm2, %v22227_v47 }
0x1147   : >> { %13399 = vmatprep.mubr.f32.mxu1 %v23035_v35 }
0x1148   : >> { %16639 = vmatmul.mubr.msk.f32.gmra.mrb[160].mxu0 %vm560_vm2, %v22227_v47 }
0x1149   : >> { %13310 = vmatprep.mubr.f32.mxu0 %v23035_v35 }
0x114a   : >> { %16644 = vmatmul.mubr.msk.f32.gmra.mrb[162].mxu1 %vm560_vm2, %v22236_v29 }
0x114b   : >> { %13611 = vmatprep.mubr.f32.mxu1 %v23035_v35 }
0x114c   : >> { %16640 = vmatmul.mubr.msk.f32.gmra.mrb[162].mxu0 %vm560_vm2, %v22236_v29 }
0x114d   : >> { %13534 = vmatprep.mubr.f32.mxu0 %v23035_v35 }
0x11e9   : >> { %v22450_v20 = vpop.f32.mrb[152].mxu1 }
0x11ea   : >> { %v22452_v41 = vpop.f32.mrb[153].mxu1 }
0x11eb   : >> { %v22454_v3 = vpop.f32.mrb[152].mxu0 }
0x11ec   : >> { %v22456_v1 = vpop.f32.mrb[153].mxu0 }
0x11ed   : >> { %v22458_v15 = vpop.f32.mrb[154].mxu1 }
0x11ee   : >> { %v22460_v53 = vpop.f32.mrb[155].mxu1 }
0x11ef   : >> { %v22462_v6 = vpop.f32.mrb[154].mxu0 }
0x11f0   : >> { %v22464_v33 = vpop.f32.mrb[155].mxu0 }
0x1211   : >> { %v13383_v47 = vpop.f32.mrb[156].mxu1 }
0x1212   : >> { %v13385_v29 = vpop.f32.mrb[157].mxu1  ;;  %v17519_v57 = vadd.f32 %v13383_v47, %v22310_v55 }
0x1213   : >> { %v13294_v16 = vpop.f32.mrb[156].mxu0  ;;  %v17520_v12 = vadd.f32 %v13385_v29, %v22310_v55 }
0x1214   : >> { %v13296_v0 = vpop.f32.mrb[157].mxu0  ;;  %v17511_v24 = vadd.f32 %v13294_v16, %v22310_v55  ;;  %19202 = vtanh.f32 %v17519_v57 }
0x1215   : >> { %v13389_v10 = vpop.f32.mrb[158].mxu1  ;;  %v17512_v52 = vadd.f32 %v13296_v0, %v22310_v55  ;;  %19204 = vtanh.f32 %v17520_v12 }
0x1216   : >> { %v13391_v59 = vpop.f32.mrb[159].mxu1  ;;  %19206 = vtanh.f32 %v17511_v24 }
0x1217   : >> { %v13300_v51 = vpop.f32.mrb[158].mxu0  ;;  %19208 = vtanh.f32 %v17512_v52  ;;  %v17522_v29 = vadd.f32 %v13391_v59, %v22316_v26 }
0x1218   : >> { %v13302_v31 = vpop.f32.mrb[159].mxu0  ;;  %v17513_v57 = vadd.f32 %v13300_v51, %v22316_v26 }
0x1219   : >> { %v13395_v18 = vpop.f32.mrb[160].mxu1  ;;  %v17514_v24 = vadd.f32 %v13302_v31, %v22316_v26 }
0x121a   : >> { %v17523_v28 = vadd.f32 %v13395_v18, %v22306_v60  ;;  %v13397_v40 = vpop.f32.mrb[161].mxu1 }
0x121b   : >> { %v17524_v43 = vadd.f32 %v13397_v40, %v22306_v60  ;;  %v13306_v17 = vpop.f32.mrb[160].mxu0 }
0x121c   : >> { %v13424_v42 = vmul.f32 0.5, %v17523_v28  ;;  %v17515_v14 = vadd.f32 %v13306_v17, %v22306_v60  ;;  %v13308_v8 = vpop.f32.mrb[161].mxu0 }
0x121d   : >> { %v13425_v63 = vmul.f32 0.5, %v17524_v43  ;;  %v13401_v7 = vpop.f32.mrb[162].mxu1  ;;  %v17516_v37 = vadd.f32 %v13308_v8, %v22306_v60  ;;  %v17521_v60 = vadd.f32 %v13389_v10, %v22316_v26  ;;  %v22482_v26 = vpop.permute.xlu0 %12605 }
0x121e   : >> { %19210 = vtanh.f32 %v13424_v42  ;;  %v13422_v55 = vmul.f32 0.5, %v17515_v14  ;;  %v17525_v34 = vadd.f32 %v13401_v7, %v22308_v39  ;;  %v13403_v58 = vpop.f32.mrb[163].mxu1  ;;  %v19203_v0 = vpop.eup %19202 }
0x121f   : >> { %19212 = vtanh.f32 %v13425_v63  ;;  %v13423_v19 = vmul.f32 0.5, %v17516_v37  ;;  %v17526_v4 = vadd.f32 %v13403_v58, %v22308_v39  ;;  %v13312_v49 = vpop.f32.mrb[162].mxu0  ;;  %v19205_v12 = vpop.eup %19204 }
0x1220   : >> { %19214 = vtanh.f32 %v13422_v55  ;;  %v13428_v27 = vmul.f32 0.5, %v17525_v34  ;;  %v17517_v54 = vadd.f32 %v13312_v49, %v22308_v39  ;;  %v13314_v62 = vpop.f32.mrb[163].mxu0  ;;  %v19207_v52 = vpop.eup %19206  ;;  %v12689_v34 = vadd.f32 %v22464_v33, %v22482_v26 }
0x1221   : >> { %19216 = vtanh.f32 %v13423_v19  ;;  %v13429_v22 = vmul.f32 0.5, %v17526_v4  ;;  %v17518_v21 = vadd.f32 %v13314_v62, %v22308_v39  ;;  %v19209_v18 = vpop.eup %19208  ;;  %v12687_v33 = vadd.f32 %v22462_v6, %v22482_v26 }
0x1222   : >> { %19218 = vtanh.f32 %v13428_v27  ;;  %v13426_v47 = vmul.f32 0.5, %v17517_v54  ;;  %v22486_v27 = vpop.permute.xlu1 %12600 }
0x1223   : >> { %19220 = vtanh.f32 %v13429_v22  ;;  %v13427_v16 = vmul.f32 0.5, %v17518_v21  ;;  %v12758_v6 = vadd.f32 %v22450_v20, %v22486_v27  ;;  %v13681_v20 = vld [vmem:[#allocation2 + $0x30] sm:$0xff] }
0x1224   : >> { %19222 = vtanh.f32 %v13426_v47 }
0x1225   : >> { %19224 = vtanh.f32 %v13427_v16 }
0x1226   : >> { %19226 = vtanh.f32 %v17521_v60  ;;  %v12683_v60 = vadd.f32 %v22456_v1, %v22486_v27  ;;  %v12681_v1 = vadd.f32 %v22454_v3, %v22486_v27 }
0x1227   : >> { %19228 = vtanh.f32 %v17522_v29 }
0x1228   : >> { %v19211_v39 = vpop.eup %19210  ;;  %19230 = vtanh.f32 %v17513_v57 }
0x1229   : >> { %v19213_v10 = vpop.eup %19212  ;;  %v13440_v28 = vmul.f32 0.5, %v19211_v39  ;;  %19232 = vtanh.f32 %v17514_v24  ;;  %v12764_v39 = vadd.f32 %v22458_v15, %v22482_v26 }
0x122a   : >> { %v19215_v59 = vpop.eup %19214  ;;  %v13441_v40 = vmul.f32 0.5, %v19213_v10 }
0x122b   : >> { %v19217_v43 = vpop.eup %19216  ;;  %v13448_v17 = vadd.f32 0.5, %v13440_v28  ;;  %v13438_v42 = vmul.f32 0.5, %v19215_v59 }
0x122c   : >> { %v19219_v51 = vpop.eup %19218  ;;  %v13449_v14 = vadd.f32 0.5, %v13441_v40  ;;  %v13439_v8 = vmul.f32 0.5, %v19217_v43  ;;  %v13676_v43 = vld [vmem:[#allocation2 + $0x8] sm:$0xff] }
0x122d   : >> { %v19221_v63 = vpop.eup %19220  ;;  %v13464_v31 = vmul.f32 %v19203_v0, %v13448_v17  ;;  %v13446_v7 = vadd.f32 0.5, %v13438_v42  ;;  %v13444_v37 = vmul.f32 0.5, %v19219_v51  ;;  %v13682_v17 = vld [vmem:[#allocation2 + $0x38] sm:$0xff]  ;;  %v22502_v42 = vadd.f32 %v12683_v60, %v22041_v45 }
0x122e   : >> { %v19223_v55 = vpop.eup %19222  ;;  %v13447_v58 = vadd.f32 0.5, %v13439_v8  ;;  %v13445_v19 = vmul.f32 0.5, %v19221_v63  ;;  %v13465_v4 = vmul.f32 %v19205_v12, %v13449_v14  ;;  %v22508_v8 = vadd.f32 %v12764_v39, %v22047_v32 }
0x122f   : >> { %v19225_v49 = vpop.eup %19224  ;;  %v13462_v54 = vmul.f32 %v19207_v52, %v13446_v7  ;;  %v13452_v62 = vadd.f32 0.5, %v13444_v37  ;;  %v13442_v22 = vmul.f32 0.5, %v19223_v55  ;;  %v22495_v52 = vadd.f32 %v12689_v34, %v22061_v11  ;;  %v13675_v7 = vld [vmem:[#allocation2] sm:$0xff] }
0x1230   : >> { %v19227_v21 = vpop.eup %19226  ;;  %v13453_v47 = vadd.f32 0.5, %v13445_v19  ;;  %v13443_v29 = vmul.f32 0.5, %v19225_v49  ;;  %v13463_v16 = vmul.f32 %v19209_v18, %v13447_v58  ;;  %v22505_v11 = vadd.f32 %v12687_v33, %v22058_v25  ;;  %v22539_v34 = vld [vmem:[%s19649_s10 + $0x2a0] sm:$0xff]  ;;  %v22589_v19 = vld [vmem:[%s19649_s10 + $0x2c8] sm:$0xff]  ;;  %v22607_v49 = vld [vmem:[%s19649_s10 + $0x2d8] sm:$0xff] }
0x1231   : >> { %v19229_v0 = vpop.eup %19228  ;;  %v13468_v57 = vmul.f32 %v19227_v21, %v13452_v62  ;;  %v13450_v24 = vadd.f32 0.5, %v13442_v22  ;;  %23050 = vst [vmem:[#allocation11_spill] sm:$0xff] %v22495_v52  ;;  %v17227_v3 = vpack.c.bf16 %v22495_v52, %v22502_v42  ;;  %v22513_v45 = vadd.f32 %v12681_v1, %v22037_v36  ;;  %v22580_v58 = vld [vmem:[%s19649_s10 + $0x2c0] sm:$0xff]  ;;  %v22625_v62 = vld [vmem:[%s19649_s10 + $0x2e8] sm:$0xff]  ;;  %v22634_v22 = vld [vmem:[%s19649_s10 + $0x2f0] sm:$0xff] }
0x1232   : >> { %v19231_v12 = vpop.eup %19230  ;;  %v13451_v10 = vadd.f32 0.5, %v13443_v29  ;;  %v13469_v28 = vmul.f32 %v19229_v0, %v13453_v47  ;;  %v22516_v37 = vadd.f32 %v12758_v6, %v22027_v48  ;;  %v17225_v25 = vpack.c.bf16 %v13681_v20, %v13675_v7  ;;  %v22643_v21 = vld [vmem:[%s19649_s10 + $0x2f8] sm:$0xff]  ;;  %v22679_v7 = vpop.permute.xlu0 %13894 }
0x1233   : >> { %v19233_v59 = vpop.eup %19232  ;;  %v13466_v18 = vmul.f32 %v19231_v12, %v13450_v24  ;;  %v17221_v40 = vpack.c.bf16 %v13468_v57, %v13464_v31  ;;  %v17223_v31 = vpack.c.bf16 %v13682_v17, %v13676_v43  ;;  %v17229_v32 = vpack.c.bf16 %v22505_v11, %v22513_v45  ;;  %v22670_v12 = vpop.permute.xlu1 %13889  ;;  %23053 = vst [vmem:[#allocation14_spill] sm:$0xff] %v22679_v7 }
0x1234   : >> { %v17219_v15 = vpack.c.bf16 %v13469_v28, %v13465_v4  ;;  %v13467_v51 = vmul.f32 %v19233_v59, %v13451_v10  ;;  %v12766_v55 = vadd.f32 %v22460_v53, %v22482_v26  ;;  %v17235_v36 = vpack.c.bf16 %v22508_v8, %v22516_v37  ;;  %v22598_v4 = vld [vmem:[%s19649_s10 + $0x2d0] sm:$0xff]  ;;  %23051 = vst [vmem:[#allocation12_spill] sm:$0xff] %v22670_v12 }
0x1235   : >> { %v17217_v14 = vpack.c.bf16 %v13466_v18, %v13462_v54  ;;  %v12760_v48 = vadd.f32 %v22452_v41, %v22486_v27  ;;  %v22616_v54 = vld [vmem:[%s19649_s10 + $0x2e0] sm:$0xff] }
0x1236   : >> { %17220 = vmatprep.subr.bf16.mxu1 %v17219_v15  ;;  %v17215_v63 = vpack.c.bf16 %v13467_v51, %v13463_v16  ;;  %v22533_v53 = vadd.f32 %v12766_v55, %v22051_v38 }
0x1237   : >> { %17222 = vmatpush1.bf16.msra.mxu1 %v17221_v40  ;;  %v22542_v41 = vadd.f32 %v12760_v48, %v22033_v5  ;;  %v22562_v5 = vld [vmem:[%s19649_s10 + $0x2b0] sm:$0xff]  ;;  %v22672_v1 = vpop.permute.xlu1 %13879 }
0x1238   : >> { %17228 = vmatprep.subr.bf16.mxu1 %v17227_v3  ;;  %17216 = vmatprep.subr.bf16.mxu0 %v17215_v63  ;;  %23052 = vst [vmem:[#allocation13_spill] sm:$0xff] %v22672_v1 }
0x1239   : >> { %17218 = vmatpush1.bf16.msra.mxu0 %v17217_v14  ;;  %v17243_v38 = vpack.c.bf16 %v22533_v53, %v22542_v41 }
0x123a   : >> { %16647 = vmatmul.mubr.msk.f32.vlgmr.msra.gmra.mrb[164].mxu1 %vm560_vm2, %v22335_v61  ;;  %17224 = vmatprep.subr.bf16.mxu0 %v17223_v31 }
0x123b   : >> { %17230 = vmatpush1.bf16.msra.mxu1 %v17229_v32  ;;  %13617 = vmatprep.mubr.f32.mxu1 %v23035_v35 }
0x123c   : >> { %17236 = vmatprep.subr.bf16.mxu1 %v17235_v36  ;;  %16645 = vmatmul.mubr.msk.f32.vlgmr.msra.gmra.mrb[164].mxu0 %vm560_vm2, %v22335_v61  ;;  %v22553_v61 = vld [vmem:[%s19649_s10 + $0x2a8] sm:$0xff] }
0x123d   : >> { %17226 = vmatpush1.bf16.msra.mxu0 %v17225_v25  ;;  %13540 = vmatprep.mubr.f32.mxu0 %v23035_v35 }
0x123e   : >> { %16648 = vmatmul.mubr.msk.f32.gmra.mrb[166].mxu1 %vm560_vm2, %v22354_v23  ;;  %17232 = vmatprep.subr.bf16.mxu0 %v17229_v32 }
0x123f   : >> { %13852 = vmatprep.mubr.f32.mxu1 %v23035_v35 }
0x1240   : >> { %16646 = vmatmul.mubr.msk.f32.gmra.mrb[166].mxu0 %vm560_vm2, %v22354_v23  ;;  %v22571_v23 = vld [vmem:[%s19649_s10 + $0x2b8] sm:$0xff]  ;;  %s15766_s10 = sshll.u32 (%p464_p11), %s19538_s24, 4  ;;  %s22920_s10 = int_to_ptr.vmem [resolvable:$true] %s15766_s10 }
0x1241   : >> { %13763 = vmatprep.mubr.f32.mxu0 %v23035_v35  ;;  %s19307_s28 = scalar_lea.vmem (%p464_p11), %s22920_s10, 128  ;;  %p19314_p1 = scmp.lt.s32.totalorder (%p464_p11), %s22920_s10, %s19312_s29 }
0x1242   : >> { %16687 = vmatmul.mubr.msk.f32.vlgmr.msra.gmra.mrb[168].mxu1 %vm560_vm2, %v22539_v34  ;;  %p19308_p12 = scmp.ne.s32.totalorder (%p464_p11), %s22920_s10, %s19307_s28  ;;  %p19315_p2 = scmp.lt.s32.totalorder (%p464_p11), %s19313_s18, %s19307_s28 }
0x1243   : >> { %17238 = vmatpush1.bf16.msra.mxu1 %v17227_v3  ;;  %13858 = vmatprep.mubr.f32.mxu1 %v23035_v35 }
0x1244   : >> { %17244 = vmatprep.subr.bf16.mxu1 %v17243_v38  ;;  %16683 = vmatmul.mubr.msk.f32.vlgmr.msra.gmra.mrb[168].mxu0 %vm560_vm2, %v22539_v34  ;;  %p19309_p13 = pnand (%p464_p11), %p19308_p12, %p19485_p5  ;;  %p19316_p3 = por (%p464_p11), %p19315_p2, %p19314_p1 }
0x1245   : >> { %17234 = vmatpush1.bf16.msra.mxu0 %v17223_v31  ;;  %13769 = vmatprep.mubr.f32.mxu0 %v23035_v35 }
0x1246   : >> { %16688 = vmatmul.mubr.msk.f32.gmra.mrb[170].mxu1 %vm560_vm2, %v22553_v61  ;;  %17240 = vmatprep.subr.bf16.mxu0 %v17227_v3  ;;  %p19310_p0 = pneg (%p464_p11), %p19309_p13 }
0x1247   : >> { %13864 = vmatprep.mubr.f32.mxu1 %v23035_v35 }
0x1248   : >> { %16684 = vmatmul.mubr.msk.f32.gmra.mrb[170].mxu0 %vm560_vm2, %v22553_v61  ;;  %p19317_p4 = pnand (%p464_p11), %p19316_p3, %p19310_p0 }
0x1249   : >> { %13775 = vmatprep.mubr.f32.mxu0 %v23035_v35 }
0x124a   : >> { %16689 = vmatmul.mubr.msk.f32.gmra.mrb[172].mxu1 %vm560_vm2, %v22562_v5 }
0x124b   : >> { %13870 = vmatprep.mubr.f32.mxu1 %v23035_v35 }
0x124c   : >> { %16685 = vmatmul.mubr.msk.f32.gmra.mrb[172].mxu0 %vm560_vm2, %v22562_v5 }
0x124d   : >> { %13781 = vmatprep.mubr.f32.mxu0 %v23035_v35 }
0x124e   : >> { %16690 = vmatmul.mubr.msk.f32.gmra.mrb[174].mxu1 %vm560_vm2, %v22571_v23 }
0x124f   : >> { %14078 = vmatprep.mubr.f32.mxu1 %v23035_v35 }
0x1250   : >> { %16686 = vmatmul.mubr.msk.f32.gmra.mrb[174].mxu0 %vm560_vm2, %v22571_v23 }
0x1251   : >> { %13989 = vmatprep.mubr.f32.mxu0 %v23035_v35 }
0x1252   : >> { %16695 = vmatmul.mubr.msk.f32.vlgmr.msra.gmra.mrb[168].mxu1 %vm560_vm2, %v22580_v58 }
0x1253   : >> { %17246 = vmatpush1.bf16.msra.mxu1 %v17235_v36  ;;  %14084 = vmatprep.mubr.f32.mxu1 %v23035_v35 }
0x1254   : >> { %16691 = vmatmul.mubr.msk.f32.vlgmr.msra.gmra.mrb[168].mxu0 %vm560_vm2, %v22580_v58 }
0x1255   : >> { %17242 = vmatpush1.bf16.msra.mxu0 %v17229_v32  ;;  %13995 = vmatprep.mubr.f32.mxu0 %v23035_v35 }
0x1256   : >> { %16696 = vmatmul.mubr.msk.f32.gmra.mrb[170].mxu1 %vm560_vm2, %v22589_v19 }
0x1257   : >> { %14090 = vmatprep.mubr.f32.mxu1 %v23035_v35 }
0x1258   : >> { %16692 = vmatmul.mubr.msk.f32.gmra.mrb[170].mxu0 %vm560_vm2, %v22589_v19 }
0x1259   : >> { %14001 = vmatprep.mubr.f32.mxu0 %v23035_v35 }
0x125a   : >> { %16697 = vmatmul.mubr.msk.f32.gmra.mrb[172].mxu1 %vm560_vm2, %v22598_v4 }
0x125b   : >> { %14096 = vmatprep.mubr.f32.mxu1 %v23035_v35 }
0x125c   : >> { %16693 = vmatmul.mubr.msk.f32.gmra.mrb[172].mxu0 %vm560_vm2, %v22598_v4 }
0x125d   : >> { %14007 = vmatprep.mubr.f32.mxu0 %v23035_v35 }
0x125e   : >> { %16698 = vmatmul.mubr.msk.f32.gmra.mrb[174].mxu1 %vm560_vm2, %v22607_v49 }
0x125f   : >> { %14284 = vmatprep.mubr.f32.mxu1 %v23035_v35 }
0x1260   : >> { %16694 = vmatmul.mubr.msk.f32.gmra.mrb[174].mxu0 %vm560_vm2, %v22607_v49 }
0x1261   : >> { %14195 = vmatprep.mubr.f32.mxu0 %v23035_v35 }
0x1262   : >> { %16703 = vmatmul.mubr.msk.f32.vlgmr.msra.gmra.mrb[168].mxu1 %vm560_vm2, %v22616_v54 }
0x1263   : >> { %14290 = vmatprep.mubr.f32.mxu1 %v23035_v35 }
0x1264   : >> { %16699 = vmatmul.mubr.msk.f32.vlgmr.msra.gmra.mrb[168].mxu0 %vm560_vm2, %v22616_v54 }
0x1265   : >> { %14201 = vmatprep.mubr.f32.mxu0 %v23035_v35 }
0x1266   : >> { %16704 = vmatmul.mubr.msk.f32.gmra.mrb[170].mxu1 %vm560_vm2, %v22625_v62 }
0x1267   : >> { %14296 = vmatprep.mubr.f32.mxu1 %v23035_v35 }
0x1268   : >> { %16700 = vmatmul.mubr.msk.f32.gmra.mrb[170].mxu0 %vm560_vm2, %v22625_v62 }
0x1269   : >> { %14207 = vmatprep.mubr.f32.mxu0 %v23035_v35 }
0x126a   : >> { %16705 = vmatmul.mubr.msk.f32.gmra.mrb[172].mxu1 %vm560_vm2, %v22634_v22 }
0x126b   : >> { %14302 = vmatprep.mubr.f32.mxu1 %v23035_v35 }
0x126c   : >> { %16701 = vmatmul.mubr.msk.f32.gmra.mrb[172].mxu0 %vm560_vm2, %v22634_v22 }
0x126d   : >> { %14213 = vmatprep.mubr.f32.mxu0 %v23035_v35 }
0x126e   : >> { %16706 = vmatmul.mubr.msk.f32.gmra.mrb[174].mxu1 %vm560_vm2, %v22643_v21 }
0x126f   : >> { %14530 = vmatprep.mubr.f32.mxu1 %v23035_v35 }
0x1270   : >> { %16702 = vmatmul.mubr.msk.f32.gmra.mrb[174].mxu0 %vm560_vm2, %v22643_v21 }
0x1271   : >> { %14453 = vmatprep.mubr.f32.mxu0 %v23035_v35 }
0x130d   : >> { %v22654_v60 = vpop.f32.mrb[164].mxu1 }
0x130e   : >> { %v22656_v47 = vpop.f32.mrb[165].mxu1 }
0x130f   : >> { %v22658_v29 = vpop.f32.mrb[164].mxu0 }
0x1310   : >> { %v22660_v16 = vpop.f32.mrb[165].mxu0 }
0x1311   : >> { %v22662_v0 = vpop.f32.mrb[166].mxu1 }
0x1312   : >> { %v22664_v33 = vpop.f32.mrb[167].mxu1 }
0x1313   : >> { %v22666_v57 = vpop.f32.mrb[166].mxu0 }
0x1314   : >> { %v22668_v24 = vpop.f32.mrb[167].mxu0 }
0x1335   : >> { %v14286_v39 = vpop.f32.mrb[168].mxu1 }
0x1336   : >> { %v14288_v10 = vpop.f32.mrb[169].mxu1  ;;  %v17535_v40 = vadd.f32 %v14286_v39, %v22672_v1 }
0x1337   : >> { %v14197_v28 = vpop.f32.mrb[168].mxu0  ;;  %v17536_v17 = vadd.f32 %v14288_v10, %v22672_v1 }
0x1338   : >> { %v14199_v59 = vpop.f32.mrb[169].mxu0  ;;  %v17527_v15 = vadd.f32 %v14197_v28, %v22672_v1  ;;  %19234 = vtanh.f32 %v17535_v40 }
0x1339   : >> { %v14292_v18 = vpop.f32.mrb[170].mxu1  ;;  %v17528_v14 = vadd.f32 %v14199_v59, %v22672_v1  ;;  %19236 = vtanh.f32 %v17536_v17 }
0x133a   : >> { %v14294_v43 = vpop.f32.mrb[171].mxu1  ;;  %19238 = vtanh.f32 %v17527_v15 }
0x133b   : >> { %v14203_v6 = vpop.f32.mrb[170].mxu0  ;;  %19240 = vtanh.f32 %v17528_v14  ;;  %v22687_v14 = vpop.permute.xlu0 %13884 }
0x133c   : >> { %v14205_v51 = vpop.f32.mrb[171].mxu0  ;;  %23054 = vst [vmem:[#allocation9_spill] sm:$0xff] %v22687_v14 }
0x133d   : >> { %v14298_v3 = vpop.f32.mrb[172].mxu1 }
0x133e   : >> { %v17539_v63 = vadd.f32 %v14298_v3, %v22670_v12  ;;  %v14300_v31 = vpop.f32.mrb[173].mxu1 }
0x133f   : >> { %v17540_v20 = vadd.f32 %v14300_v31, %v22670_v12  ;;  %v14209_v32 = vpop.f32.mrb[172].mxu0 }
0x1340   : >> { %v14327_v25 = vmul.f32 0.5, %v17539_v63  ;;  %v17531_v55 = vadd.f32 %v14209_v32, %v22670_v12  ;;  %v14211_v36 = vpop.f32.mrb[173].mxu0 }
0x1341   : >> { %v14328_v48 = vmul.f32 0.5, %v17540_v20  ;;  %v14304_v38 = vpop.f32.mrb[174].mxu1  ;;  %v17532_v39 = vadd.f32 %v14211_v36, %v22670_v12  ;;  %v17538_v36 = vadd.f32 %v14294_v43, %v22687_v14 }
0x1342   : >> { %19242 = vtanh.f32 %v14327_v25  ;;  %v14325_v10 = vmul.f32 0.5, %v17531_v55  ;;  %v17541_v28 = vadd.f32 %v14304_v38, %v22679_v7  ;;  %v14306_v59 = vpop.f32.mrb[175].mxu1  ;;  %v17537_v25 = vadd.f32 %v14292_v18, %v22687_v14  ;;  %v19235_v38 = vpop.eup %19234 }
0x1343   : >> { %19244 = vtanh.f32 %v14328_v48  ;;  %v14326_v40 = vmul.f32 0.5, %v17532_v39  ;;  %v17542_v17 = vadd.f32 %v14306_v59, %v22679_v7  ;;  %v14215_v3 = vpop.f32.mrb[174].mxu0  ;;  %v17529_v39 = vadd.f32 %v14203_v6, %v22687_v14 }
0x1344   : >> { %19246 = vtanh.f32 %v14325_v10  ;;  %v14331_v15 = vmul.f32 0.5, %v17541_v28  ;;  %v17533_v63 = vadd.f32 %v14215_v3, %v22679_v7  ;;  %v14217_v31 = vpop.f32.mrb[175].mxu0  ;;  %v19237_v10 = vpop.eup %19236  ;;  %v17530_v28 = vadd.f32 %v14205_v51, %v22687_v14 }
0x1345   : >> { %19248 = vtanh.f32 %v14326_v40  ;;  %v14332_v20 = vmul.f32 0.5, %v17542_v17  ;;  %v17534_v32 = vadd.f32 %v14217_v31, %v22679_v7  ;;  %v19239_v59 = vpop.eup %19238 }
0x1346   : >> { %19250 = vtanh.f32 %v14331_v15  ;;  %v14329_v55 = vmul.f32 0.5, %v17533_v63  ;;  %v19241_v40 = vpop.eup %19240 }
0x1347   : >> { %19252 = vtanh.f32 %v14332_v20  ;;  %v14330_v48 = vmul.f32 0.5, %v17534_v32 }
0x1348   : >> { %19254 = vtanh.f32 %v14329_v55 }
0x1349   : >> { %19256 = vtanh.f32 %v14330_v48 }
0x134a   : >> { %19258 = vtanh.f32 %v17537_v25 }
0x134b   : >> { %19260 = vtanh.f32 %v17538_v36  ;;  %v13545_v36 = vadd.f32 %v22668_v24, %v22482_v26 }
0x134c   : >> { %v19243_v17 = vpop.eup %19242  ;;  %19262 = vtanh.f32 %v17529_v39 }
0x134d   : >> { %v19245_v18 = vpop.eup %19244  ;;  %v14343_v3 = vmul.f32 0.5, %v19243_v17  ;;  %19264 = vtanh.f32 %v17530_v28 }
0x134e   : >> { %v19247_v43 = vpop.eup %19246  ;;  %v14344_v15 = vmul.f32 0.5, %v19245_v18 }
0x134f   : >> { %v19249_v63 = vpop.eup %19248  ;;  %v14351_v31 = vadd.f32 0.5, %v14343_v3  ;;  %v14341_v20 = vmul.f32 0.5, %v19247_v43  ;;  %v13539_v43 = vadd.f32 %v22660_v16, %v22486_v27  ;;  %v13537_v16 = vadd.f32 %v22658_v29, %v22486_v27 }
0x1350   : >> { %v19251_v6 = vpop.eup %19250  ;;  %v14352_v32 = vadd.f32 0.5, %v14344_v15  ;;  %v14342_v55 = vmul.f32 0.5, %v19249_v63 }
0x1351   : >> { %v19253_v7 = vpop.eup %19252  ;;  %v14367_v51 = vmul.f32 %v19235_v38, %v14351_v31  ;;  %v14349_v48 = vadd.f32 0.5, %v14341_v20  ;;  %v14347_v14 = vmul.f32 0.5, %v19251_v6  ;;  %v13543_v20 = vadd.f32 %v22666_v57, %v22482_v26 }
0x1352   : >> { %v19255_v25 = vpop.eup %19254  ;;  %v14350_v39 = vadd.f32 0.5, %v14342_v55  ;;  %v14348_v12 = vmul.f32 0.5, %v19253_v7  ;;  %v14368_v17 = vmul.f32 %v19237_v10, %v14352_v32  ;;  %v13620_v7 = vadd.f32 %v22662_v0, %v22482_v26 }
0x1353   : >> { %v19257_v28 = vpop.eup %19256  ;;  %v14365_v1 = vmul.f32 %v19239_v59, %v14349_v48  ;;  %v14355_v18 = vadd.f32 0.5, %v14347_v14  ;;  %v14345_v52 = vmul.f32 0.5, %v19255_v25  ;;  %v22703_v14 = vadd.f32 %v13545_v36, %v22282_v44  ;;  %v14560_v48 = vld [vmem:[#allocation2 + $0x68] sm:$0xff]  ;;  %v14566_v25 = vld [vmem:[#allocation2 + $0x98] sm:$0xff] }
0x1354   : >> { %v19259_v3 = vpop.eup %19258  ;;  %v14356_v15 = vadd.f32 0.5, %v14348_v12  ;;  %v14346_v63 = vmul.f32 0.5, %v19257_v28  ;;  %v14366_v38 = vmul.f32 %v19241_v40, %v14350_v39  ;;  %v22710_v57 = vadd.f32 %v13539_v43, %v22262_v56 }
0x1355   : >> { %v19261_v31 = vpop.eup %19260  ;;  %v14371_v6 = vmul.f32 %v19259_v3, %v14355_v18  ;;  %v14353_v24 = vadd.f32 0.5, %v14345_v52  ;;  %v13614_v52 = vadd.f32 %v22654_v60, %v22486_v27  ;;  %v22713_v36 = vadd.f32 %v13543_v20, %v22279_v9  ;;  %v14559_v3 = vld [vmem:[#allocation2 + $0x60] sm:$0xff]  ;;  %v14565_v60 = vld [vmem:[#allocation2 + $0x90] sm:$0xff] }
0x1356   : >> { %v19263_v55 = vpop.eup %19262  ;;  %v14354_v10 = vadd.f32 0.5, %v14346_v63  ;;  %v14372_v59 = vmul.f32 %v19261_v31, %v14356_v15  ;;  %v22716_v28 = vadd.f32 %v13620_v7, %v22268_v50  ;;  %v17259_v29 = vpack.c.bf16 %v22703_v14, %v22710_v57  ;;  %v23055_v7 = vld [vmem:[#allocation11_spill] sm:$0xff] }
0x1357   : >> { %v19265_v32 = vpop.eup %19264  ;;  %v14369_v12 = vmul.f32 %v19263_v55, %v14353_v24  ;;  %v17253_v40 = vpack.c.bf16 %v14371_v6, %v14367_v51  ;;  %v17255_v18 = vpack.c.bf16 %v14566_v25, %v14560_v48  ;;  %v22721_v56 = vadd.f32 %v13537_v16, %v22258_v30 }
0x1358   : >> { %v17251_v0 = vpack.c.bf16 %v14372_v59, %v14368_v17  ;;  %v14370_v44 = vmul.f32 %v19265_v32, %v14354_v10  ;;  %v22724_v17 = vld [vmem:[%s19859_s27 + $0x70] sm:$0xff]  ;;  %v22727_v9 = vadd.f32 %v13614_v52, %v22250_v46  ;;  %v13622_v43 = vadd.f32 %v22664_v33, %v22482_v26  ;;  %v22739_v46 = vld [vmem:[%s19859_s27 + $0x78] sm:$0xff] }
0x1359   : >> { %v17249_v39 = vpack.c.bf16 %v14369_v12, %v14365_v1  ;;  %v17261_v50 = vpack.c.bf16 %v22713_v36, %v22721_v56  ;;  %v17257_v1 = vpack.c.bf16 %v14565_v60, %v14559_v3  ;;  %v13616_v15 = vadd.f32 %v22656_v47, %v22486_v27  ;;  %v23056_v12 = vld [vmem:[#allocation13_spill] sm:$0xff] }
0x135a   : >> { %17252 = vmatprep.subr.bf16.mxu1 %v17251_v0  ;;  %v17247_v51 = vpack.c.bf16 %v14370_v44, %v14366_v38  ;;  %v17267_v30 = vpack.c.bf16 %v22716_v28, %v22727_v9  ;;  %v22747_v26 = vadd.f32 %v13622_v43, %v22272_v2 }
0x135b   : >> { %17254 = vmatpush1.bf16.msra.mxu1 %v17253_v40  ;;  %v22753_v33 = vadd.f32 %v13616_v15, %v22254_v13  ;;  %v22832_v13 = vpop.permute.xlu1 %14375 }
0x135c   : >> { %17260 = vmatprep.subr.bf16.mxu1 %v17259_v29  ;;  %17248 = vmatprep.subr.bf16.mxu0 %v17247_v51 }
0x135d   : >> { %17250 = vmatpush1.bf16.msra.mxu0 %v17249_v39  ;;  %v17275_v2 = vpack.c.bf16 %v22747_v26, %v22753_v33  ;;  %v23057_v39 = vld [vmem:[#allocation12_spill] sm:$0xff] }
0x135e   : >> { %16709 = vmatmul.mubr.msk.f32.vlgmr.msra.gmra.mrb[176].mxu1 %vm560_vm2, %v22724_v17  ;;  %17256 = vmatprep.subr.bf16.mxu0 %v17255_v18 }
0x135f   : >> { %17262 = vmatpush1.bf16.msra.mxu1 %v17261_v50  ;;  %14536 = vmatprep.mubr.f32.mxu1 %v23035_v35 }
0x1360   : >> { %17268 = vmatprep.subr.bf16.mxu1 %v17267_v30  ;;  %16707 = vmatmul.mubr.msk.f32.vlgmr.msra.gmra.mrb[176].mxu0 %vm560_vm2, %v22724_v17 }
0x1361   : >> { %17258 = vmatpush1.bf16.msra.mxu0 %v17257_v1  ;;  %14459 = vmatprep.mubr.f32.mxu0 %v23035_v35 }
0x1362   : >> { %16710 = vmatmul.mubr.msk.f32.gmra.mrb[178].mxu1 %vm560_vm2, %v22739_v46  ;;  %17264 = vmatprep.subr.bf16.mxu0 %v17261_v50 }
0x1363   : >> { %14724 = vmatprep.mubr.f32.mxu1 %v23035_v35 }
0x1364   : >> { %16708 = vmatmul.mubr.msk.f32.gmra.mrb[178].mxu0 %vm560_vm2, %v22739_v46 }
0x1365   : >> { %14635 = vmatprep.mubr.f32.mxu0 %v23035_v35 }
0x1366   : >> { %16715 = vmatmul.mubr.msk.f32.vlgmr.msra.gmra.mrb[180].mxu1 %vm560_vm2, %v22539_v34 }
0x1367   : >> { %17270 = vmatpush1.bf16.msra.mxu1 %v17259_v29  ;;  %14730 = vmatprep.mubr.f32.mxu1 %v23035_v35 }
0x1368   : >> { %17276 = vmatprep.subr.bf16.mxu1 %v17275_v2  ;;  %16711 = vmatmul.mubr.msk.f32.vlgmr.msra.gmra.mrb[180].mxu0 %vm560_vm2, %v22539_v34 }
0x1369   : >> { %17266 = vmatpush1.bf16.msra.mxu0 %v17255_v18  ;;  %14641 = vmatprep.mubr.f32.mxu0 %v23035_v35 }
0x136a   : >> { %16716 = vmatmul.mubr.msk.f32.gmra.mrb[182].mxu1 %vm560_vm2, %v22553_v61  ;;  %17272 = vmatprep.subr.bf16.mxu0 %v17259_v29 }
0x136b   : >> { %14736 = vmatprep.mubr.f32.mxu1 %v23035_v35 }
0x136c   : >> { %16712 = vmatmul.mubr.msk.f32.gmra.mrb[182].mxu0 %vm560_vm2, %v22553_v61 }
0x136d   : >> { %14647 = vmatprep.mubr.f32.mxu0 %v23035_v35 }
0x136e   : >> { %16717 = vmatmul.mubr.msk.f32.gmra.mrb[184].mxu1 %vm560_vm2, %v22562_v5 }
0x136f   : >> { %14742 = vmatprep.mubr.f32.mxu1 %v23035_v35 }
0x1370   : >> { %16713 = vmatmul.mubr.msk.f32.gmra.mrb[184].mxu0 %vm560_vm2, %v22562_v5 }
0x1371   : >> { %14653 = vmatprep.mubr.f32.mxu0 %v23035_v35 }
0x1372   : >> { %16718 = vmatmul.mubr.msk.f32.gmra.mrb[186].mxu1 %vm560_vm2, %v22571_v23 }
0x1373   : >> { %14918 = vmatprep.mubr.f32.mxu1 %v23035_v35 }
0x1374   : >> { %16714 = vmatmul.mubr.msk.f32.gmra.mrb[186].mxu0 %vm560_vm2, %v22571_v23 }
0x1375   : >> { %14829 = vmatprep.mubr.f32.mxu0 %v23035_v35 }
0x1376   : >> { %16723 = vmatmul.mubr.msk.f32.vlgmr.msra.gmra.mrb[180].mxu1 %vm560_vm2, %v22580_v58 }
0x1377   : >> { %17278 = vmatpush1.bf16.msra.mxu1 %v17267_v30  ;;  %14924 = vmatprep.mubr.f32.mxu1 %v23035_v35 }
0x1378   : >> { %16719 = vmatmul.mubr.msk.f32.vlgmr.msra.gmra.mrb[180].mxu0 %vm560_vm2, %v22580_v58 }
0x1379   : >> { %17274 = vmatpush1.bf16.msra.mxu0 %v17261_v50  ;;  %14835 = vmatprep.mubr.f32.mxu0 %v23035_v35 }
0x137a   : >> { %16724 = vmatmul.mubr.msk.f32.gmra.mrb[182].mxu1 %vm560_vm2, %v22589_v19 }
0x137b   : >> { %14930 = vmatprep.mubr.f32.mxu1 %v23035_v35 }
0x137c   : >> { %16720 = vmatmul.mubr.msk.f32.gmra.mrb[182].mxu0 %vm560_vm2, %v22589_v19 }
0x137d   : >> { %14841 = vmatprep.mubr.f32.mxu0 %v23035_v35 }
0x137e   : >> { %16725 = vmatmul.mubr.msk.f32.gmra.mrb[184].mxu1 %vm560_vm2, %v22598_v4 }
0x137f   : >> { %14936 = vmatprep.mubr.f32.mxu1 %v23035_v35 }
0x1380   : >> { %16721 = vmatmul.mubr.msk.f32.gmra.mrb[184].mxu0 %vm560_vm2, %v22598_v4 }
0x1381   : >> { %14847 = vmatprep.mubr.f32.mxu0 %v23035_v35 }
0x1382   : >> { %16726 = vmatmul.mubr.msk.f32.gmra.mrb[186].mxu1 %vm560_vm2, %v22607_v49 }
0x1383   : >> { %15112 = vmatprep.mubr.f32.mxu1 %v23035_v35 }
0x1384   : >> { %16722 = vmatmul.mubr.msk.f32.gmra.mrb[186].mxu0 %vm560_vm2, %v22607_v49  ;;  %v22838_v49 = vpop.permute.xlu0 %14380 }
0x1385   : >> { %15023 = vmatprep.mubr.f32.mxu0 %v23035_v35 }
0x1386   : >> { %16731 = vmatmul.mubr.msk.f32.vlgmr.msra.gmra.mrb[180].mxu1 %vm560_vm2, %v22616_v54 }
0x1387   : >> { %15118 = vmatprep.mubr.f32.mxu1 %v23035_v35 }
0x1388   : >> { %16727 = vmatmul.mubr.msk.f32.vlgmr.msra.gmra.mrb[180].mxu0 %vm560_vm2, %v22616_v54 }
0x1389   : >> { %15029 = vmatprep.mubr.f32.mxu0 %v23035_v35 }
0x138a   : >> { %16732 = vmatmul.mubr.msk.f32.gmra.mrb[182].mxu1 %vm560_vm2, %v22625_v62 }
0x138b   : >> { %15124 = vmatprep.mubr.f32.mxu1 %v23035_v35 }
0x138c   : >> { %16728 = vmatmul.mubr.msk.f32.gmra.mrb[182].mxu0 %vm560_vm2, %v22625_v62 }
0x138d   : >> { %15035 = vmatprep.mubr.f32.mxu0 %v23035_v35 }
0x138e   : >> { %16733 = vmatmul.mubr.msk.f32.gmra.mrb[184].mxu1 %vm560_vm2, %v22634_v22 }
0x138f   : >> { %15130 = vmatprep.mubr.f32.mxu1 %v23035_v35 }
0x1390   : >> { %16729 = vmatmul.mubr.msk.f32.gmra.mrb[184].mxu0 %vm560_vm2, %v22634_v22 }
0x1391   : >> { %15041 = vmatprep.mubr.f32.mxu0 %v23035_v35 }
0x1392   : >> { %16734 = vmatmul.mubr.msk.f32.gmra.mrb[186].mxu1 %vm560_vm2, %v22643_v21 }
0x1393   : >> { %15342 = vmatprep.mubr.f32.mxu1 %v23035_v35 }
0x1394   : >> { %16730 = vmatmul.mubr.msk.f32.gmra.mrb[186].mxu0 %vm560_vm2, %v22643_v21 }
0x1395   : >> { %15265 = vmatprep.mubr.f32.mxu0 %v23035_v35 }
0x1431   : >> { %v14532_v27 = vpop.f32.mrb[176].mxu1 }
0x1432   : >> { %v14533_v34 = vadd.f32 %v14532_v27, %v22832_v13  ;;  %v14534_v61 = vpop.f32.mrb[177].mxu1  ;;  %v23058_v27 = vld [vmem:[#allocation14_spill] sm:$0xff] }
0x1433   : >> { %v14535_v5 = vadd.f32 %v14534_v61, %v22832_v13  ;;  %v14455_v23 = vpop.f32.mrb[176].mxu0 }
0x1434   : >> { %v14545_v58 = vadd.f32 %v14533_v34, %v22516_v37  ;;  %v14456_v19 = vadd.f32 %v14455_v23, %v22832_v13  ;;  %v14457_v4 = vpop.f32.mrb[177].mxu0 }
0x1435   : >> { %v14546_v54 = vadd.f32 %v14535_v5, %v22542_v41  ;;  %v14538_v62 = vpop.f32.mrb[178].mxu1  ;;  %v14458_v22 = vadd.f32 %v14457_v4, %v22832_v13 }
0x1436   : >> { %14553 = vst [vmem:[#allocation2 + $0x20] sm:$0xff] %v14545_v58  ;;  %v14543_v21 = vadd.f32 %v14456_v19, %v22513_v45  ;;  %v14539_v47 = vadd.f32 %v14538_v62, %v22838_v49  ;;  %v14540_v63 = vpop.f32.mrb[179].mxu1 }
0x1437   : >> { %14554 = vst [vmem:[#allocation2 + $0x28] sm:$0xff] %v14546_v54  ;;  %v14544_v38 = vadd.f32 %v14458_v22, %v22502_v42  ;;  %v14541_v37 = vadd.f32 %v14540_v63, %v22838_v49  ;;  %v14461_v31 = vpop.f32.mrb[178].mxu0 }
0x1438   : >> { %14551 = vst [vmem:[#allocation2 + $0x10] sm:$0xff] %v14543_v21  ;;  %v14549_v20 = vadd.f32 %v14539_v47, %v22508_v8  ;;  %v14462_v41 = vadd.f32 %v14461_v31, %v22838_v49  ;;  %v14463_v6 = vpop.f32.mrb[179].mxu0  ;;  %v23059_v21 = vld [vmem:[#allocation9_spill] sm:$0xff] }
0x1439   : >> { %14552 = vst [vmem:[#allocation2 + $0x18] sm:$0xff] %v14544_v38  ;;  %v14550_v24 = vadd.f32 %v14541_v37, %v22533_v53  ;;  %v14464_v45 = vadd.f32 %v14463_v6, %v22838_v49 }
0x143a   : >> { %14557 = vst [vmem:[#allocation2 + $0x50] sm:$0xff] %v14549_v20  ;;  %v14547_v55 = vadd.f32 %v14462_v41, %v22505_v11 }
0x143b   : >> { %14558 = vst [vmem:[#allocation2 + $0x58] sm:$0xff] %v14550_v24  ;;  %v14548_v42 = vadd.f32 %v14464_v45, %v23055_v7 }
0x143c   : >> { %14555 = vst [vmem:[#allocation2 + $0x40] sm:$0xff] %v14547_v55 }
0x143d   : >> { %14556 = vst [vmem:[#allocation2 + $0x48] sm:$0xff] %v14548_v42 }
0x1459   : >> { %v15114_v10 = vpop.f32.mrb[180].mxu1 }
0x145a   : >> { %v15116_v59 = vpop.f32.mrb[181].mxu1  ;;  %v17551_v40 = vadd.f32 %v15114_v10, %v23056_v12 }
0x145b   : >> { %v15025_v32 = vpop.f32.mrb[180].mxu0  ;;  %v17552_v53 = vadd.f32 %v15116_v59, %v23056_v12 }
0x145c   : >> { %v15027_v8 = vpop.f32.mrb[181].mxu0  ;;  %v17543_v52 = vadd.f32 %v15025_v32, %v23056_v12  ;;  %19266 = vtanh.f32 %v17551_v40 }
0x145d   : >> { %v15120_v16 = vpop.f32.mrb[182].mxu1  ;;  %v17544_v11 = vadd.f32 %v15027_v8, %v23056_v12  ;;  %19268 = vtanh.f32 %v17552_v53 }
0x145e   : >> { %v15122_v48 = vpop.f32.mrb[183].mxu1  ;;  %19270 = vtanh.f32 %v17543_v52  ;;  %v17553_v47 = vadd.f32 %v15120_v16, %v23059_v21 }
0x145f   : >> { %v15031_v25 = vpop.f32.mrb[182].mxu0  ;;  %19272 = vtanh.f32 %v17544_v11  ;;  %v17554_v38 = vadd.f32 %v15122_v48, %v23059_v21 }
0x1460   : >> { %v15033_v0 = vpop.f32.mrb[183].mxu0  ;;  %v17545_v20 = vadd.f32 %v15031_v25, %v23059_v21 }
0x1461   : >> { %v15126_v44 = vpop.f32.mrb[184].mxu1  ;;  %v17546_v6 = vadd.f32 %v15033_v0, %v23059_v21 }
0x1462   : >> { %v17555_v29 = vadd.f32 %v15126_v44, %v23057_v39  ;;  %v15128_v51 = vpop.f32.mrb[185].mxu1 }
0x1463   : >> { %v17556_v18 = vadd.f32 %v15128_v51, %v23057_v39  ;;  %v15037_v3 = vpop.f32.mrb[184].mxu0 }
0x1464   : >> { %v15155_v60 = vmul.f32 0.5, %v17555_v29  ;;  %v17547_v50 = vadd.f32 %v15037_v3, %v23057_v39  ;;  %v15039_v1 = vpop.f32.mrb[185].mxu0 }
0x1465   : >> { %v15156_v43 = vmul.f32 0.5, %v17556_v18  ;;  %v15132_v30 = vpop.f32.mrb[186].mxu1  ;;  %v17548_v15 = vadd.f32 %v15039_v1, %v23057_v39 }
0x1466   : >> { %19274 = vtanh.f32 %v15155_v60  ;;  %v15153_v2 = vmul.f32 0.5, %v17547_v50  ;;  %v17557_v34 = vadd.f32 %v15132_v30, %v23058_v27  ;;  %v15134_v61 = vpop.f32.mrb[187].mxu1  ;;  %v19267_v31 = vpop.eup %19266 }
0x1467   : >> { %19276 = vtanh.f32 %v15156_v43  ;;  %v15154_v5 = vmul.f32 0.5, %v17548_v15  ;;  %v17558_v23 = vadd.f32 %v15134_v61, %v23058_v27  ;;  %v15043_v58 = vpop.f32.mrb[186].mxu0  ;;  %v19269_v41 = vpop.eup %19268 }
0x1468   : >> { %19278 = vtanh.f32 %v15153_v2  ;;  %v15159_v19 = vmul.f32 0.5, %v17557_v34  ;;  %v17549_v4 = vadd.f32 %v15043_v58, %v23058_v27  ;;  %v15045_v54 = vpop.f32.mrb[187].mxu0  ;;  %v19271_v24 = vpop.eup %19270 }
0x1469   : >> { %19280 = vtanh.f32 %v15154_v5  ;;  %v15160_v62 = vmul.f32 0.5, %v17558_v23  ;;  %v17550_v22 = vadd.f32 %v15045_v54, %v23058_v27  ;;  %v19273_v45 = vpop.eup %19272 }
0x146a   : >> { %19282 = vtanh.f32 %v15159_v19  ;;  %v15157_v63 = vmul.f32 0.5, %v17549_v4 }
0x146b   : >> { %19284 = vtanh.f32 %v15160_v62  ;;  %v15158_v37 = vmul.f32 0.5, %v17550_v22 }
0x146c   : >> { %19286 = vtanh.f32 %v15157_v63 }
0x146d   : >> { %19288 = vtanh.f32 %v15158_v37 }
0x146e   : >> { %19290 = vtanh.f32 %v17553_v47 }
0x146f   : >> { %19292 = vtanh.f32 %v17554_v38 }
0x1470   : >> { %v19275_v55 = vpop.eup %19274  ;;  %19294 = vtanh.f32 %v17545_v20 }
0x1471   : >> { %v19277_v7 = vpop.eup %19276  ;;  %v15171_v42 = vmul.f32 0.5, %v19275_v55  ;;  %19296 = vtanh.f32 %v17546_v6 }
0x1472   : >> { %v19279_v10 = vpop.eup %19278  ;;  %v15172_v59 = vmul.f32 0.5, %v19277_v7 }
0x1473   : >> { %v19281_v32 = vpop.eup %19280  ;;  %v15179_v8 = vadd.f32 0.5, %v15171_v42  ;;  %v15169_v16 = vmul.f32 0.5, %v19279_v10 }
0x1474   : >> { %v19283_v12 = vpop.eup %19282  ;;  %v15180_v40 = vadd.f32 0.5, %v15172_v59  ;;  %v15170_v48 = vmul.f32 0.5, %v19281_v32  ;;  %v15378_v32 = vld [vmem:[#allocation2 + $0x48] sm:$0xff] (%p464_p11) }
0x1475   : >> { %v19285_v53 = vpop.eup %19284  ;;  %v15195_v25 = vmul.f32 %v19267_v31, %v15179_v8  ;;  %v15177_v52 = vadd.f32 0.5, %v15169_v16  ;;  %v15175_v0 = vmul.f32 0.5, %v19283_v12  ;;  %v15376_v8 = vld [vmem:[#allocation2 + $0x28] sm:$0xff] (%p464_p11)  ;;  %v15373_v16 = vld [vmem:[#allocation2 + $0x10] sm:$0xff] (%p464_p11)  ;;  %v15377_v12 = vld [vmem:[#allocation2 + $0x40] sm:$0xff] (%p464_p11) }
0x1476   : >> { %v19287_v11 = vpop.eup %19286  ;;  %v15178_v44 = vadd.f32 0.5, %v15170_v48  ;;  %v15176_v39 = vmul.f32 0.5, %v19285_v53  ;;  %v15196_v29 = vmul.f32 %v19269_v41, %v15180_v40  ;;  %v17289_v48 = vpack.c.bf16 (%p464_p11), %v15377_v12, %v15373_v16  ;;  %v15375_v53 = vld [vmem:[#allocation2 + $0x20] sm:$0xff] (%p464_p11) }
0x1477   : >> { %v19289_v51 = vpop.eup %19288  ;;  %v15193_v18 = vmul.f32 %v19271_v24, %v15177_v52  ;;  %v15183_v3 = vadd.f32 0.5, %v15175_v0  ;;  %v15173_v60 = vmul.f32 0.5, %v19287_v11  ;;  %v15371_v52 = vld [vmem:[%s22973_s7] sm:$0x1] (%p464_p11) }
0x1478   : >> { %v19291_v50 = vpop.eup %19290  ;;  %v15184_v1 = vadd.f32 0.5, %v15176_v39  ;;  %v15174_v43 = vmul.f32 0.5, %v19289_v51  ;;  %v15194_v30 = vmul.f32 %v19273_v45, %v15178_v44 }
0x1479   : >> { %v19293_v15 = vpop.eup %19292  ;;  %v15199_v2 = vmul.f32 %v19291_v50, %v15183_v3  ;;  %v15181_v27 = vadd.f32 0.5, %v15173_v60 }
0x147a   : >> { %v19295_v34 = vpop.eup %19294  ;;  %v15182_v61 = vadd.f32 0.5, %v15174_v43  ;;  %v15200_v5 = vmul.f32 %v19293_v15, %v15184_v1 }
0x147b   : >> { %v19297_v23 = vpop.eup %19296  ;;  %v15197_v58 = vmul.f32 %v19295_v34, %v15181_v27  ;;  %v17285_v19 = vpack.c.bf16 %v15199_v2, %v15195_v25  ;;  %v15379_v25 = vld [vmem:[#allocation2 + $0x50] sm:$0xff] (%p464_p11)  ;;  %v19390_v27 = vmov (%p464_p11), 1966171168  }
0x147c   : >> { %v17283_v4 = vpack.c.bf16 %v15200_v5, %v15196_v29  ;;  %v15198_v54 = vmul.f32 %v19297_v23, %v15182_v61  ;;  %v17293_v0 = vpack.c.bf16 (%p464_p11), %v15379_v25, %v15375_v53  ;;  %v15543_v34 = vunpack.c.l.s4 (%p464_p11), %v19390_v27  ;;  %v23062_v61 = vld [vmem:[#allocation8_spill] sm:$0xff] (%p464_p11) }
0x147d   : >> { %v17281_v62 = vpack.c.bf16 %v15197_v58, %v15193_v18 }
0x147e   : >> { %17284 = vmatprep.subr.bf16.mxu1 %v17283_v4  ;;  %v17279_v22 = vpack.c.bf16 %v15198_v54, %v15194_v30  ;;  %v15372_v30 = vld [vmem:[#allocation3] sm:$0x1] (%p464_p11)  ;;  %v15544_v23 = vunpack.c.0.s8 (%p464_p11), %v15543_v34 }
0x147f   : >> { %17286 = vmatpush1.bf16.msra.mxu1 %v17285_v19 }
0x1480   : >> { %17280 = vmatprep.subr.bf16.mxu0 %v17279_v22 }
0x1481   : >> { %17282 = vmatpush1.bf16.msra.mxu0 %v17281_v62 }
0x1482   : >> { %16737 = vmatmul.mubr.msk.f32.vlgmr.msra.gmra.mrb[188].mxu1 %vm560_vm2, %v22724_v17 }
0x1483   : >> { %15348 = vmatprep.mubr.f32.mxu1 %v23035_v35 }
0x1484   : >> { %16735 = vmatmul.mubr.msk.f32.vlgmr.msra.gmra.mrb[188].mxu0 %vm560_vm2, %v22724_v17 }
0x1485   : >> { %15271 = vmatprep.mubr.f32.mxu0 %v23035_v35 }
0x1486   : >> { %16738 = vmatmul.mubr.msk.f32.gmra.mrb[190].mxu1 %vm560_vm2, %v22739_v46 }
0x1488   : >> { %16736 = vmatmul.mubr.msk.f32.gmra.mrb[190].mxu0 %vm560_vm2, %v22739_v46 }
0x1555   : >> { %v15344_v21 = vpop.f32.mrb[188].mxu1 }
0x1556   : >> { %v15345_v47 = vadd.f32 %v15344_v21, %v22832_v13  ;;  %v15346_v63 = vpop.f32.mrb[189].mxu1  ;;  %v23063_v21 = vld [vmem:[#allocation7_spill] sm:$0xff] (%p464_p11) }
0x1557   : >> { %v15347_v38 = vadd.f32 %v15346_v63, %v22832_v13  ;;  %v15267_v37 = vpop.f32.mrb[188].mxu0 }
0x1558   : >> { %v15357_v31 = vadd.f32 %v15345_v47, %v22727_v9  ;;  %v15268_v20 = vadd.f32 %v15267_v37, %v22832_v13  ;;  %v15269_v17 = vpop.f32.mrb[189].mxu0  ;;  %v15547_v47 = vsub.s32 (%p464_p11), %v15544_v23, %v23063_v21 }
0x1559   : >> { %v15358_v35 = vadd.f32 %v15347_v38, %v22753_v33  ;;  %v15350_v41 = vpop.f32.mrb[190].mxu1  ;;  %v15270_v6 = vadd.f32 %v15269_v17, %v22832_v13 }
0x155a   : >> { %15365 = vst [vmem:[#allocation2 + $0x80] sm:$0xff] %v15357_v31  ;;  %v15355_v46 = vadd.f32 %v15268_v20, %v22721_v56  ;;  %v15351_v24 = vadd.f32 %v15350_v41, %v22838_v49  ;;  %v15352_v45 = vpop.f32.mrb[191].mxu1 }
0x155b   : >> { %15366 = vst [vmem:[#allocation2 + $0x88] sm:$0xff] %v15358_v35  ;;  %v15356_v55 = vadd.f32 %v15270_v6, %v22710_v57  ;;  %v15353_v7 = vadd.f32 %v15352_v45, %v22838_v49  ;;  %v15273_v9 = vpop.f32.mrb[190].mxu0 }
0x155c   : >> { %15363 = vst [vmem:[#allocation2 + $0x70] sm:$0xff] %v15355_v46  ;;  %v15361_v42 = vadd.f32 %v15351_v24, %v22716_v28  ;;  %v15274_v33 = vadd.f32 %v15273_v9, %v22838_v49  ;;  %v15275_v10 = vpop.f32.mrb[191].mxu0  ;;  %v15374_v28 = vld [vmem:[#allocation2 + $0x18] sm:$0xff] (%p464_p11) }
0x155d   : >> { %15364 = vst [vmem:[#allocation2 + $0x78] sm:$0xff] %v15356_v55  ;;  %v15362_v13 = vadd.f32 %v15353_v7, %v22747_v26  ;;  %v15276_v56 = vadd.f32 %v15275_v10, %v22838_v49  ;;  %v23060_v26 = vmov (%p464_p11), 0.0   ;;  %v17287_v49 = vpack.c.bf16 (%p464_p11), %v15378_v32, %v15374_v28 }
0x155e   : >> { %15369 = vst [vmem:[#allocation2 + $0xb0] sm:$0xff] %v15361_v42  ;;  %v15359_v59 = vadd.f32 %v15274_v33, %v22713_v36  ;;  %15458 = vmatprep.mubr.f32.mxu0 (%p464_p11), %v23060_v26  ;;  %15529 = vmatprep.mubr.f32.mxu1 (%p464_p11), %v23060_v26  ;;  %v15380_v36 = vld [vmem:[#allocation2 + $0x58] sm:$0xff] (%p464_p11)  ;;  %v23064_v10 = vlaneseq (%p464_p11) }
0x155f   : >> { %15370 = vst [vmem:[#allocation2 + $0xb8] sm:$0xff] %v15362_v13  ;;  %v15360_v57 = vadd.f32 %v15276_v56, %v22703_v14  ;;  %466 = sbr.rel (!%p464_p11) target bundleno = 167 (0xa7), region = 149  ;;  %v23061_v14 = vmov (%p464_p11), 0   ;;  %v17291_v40 = vpack.c.bf16 (%p464_p11), %v15380_v36, %v15376_v8  ;;  %17288 = vmatprep.subr.bf16.mxu0 (%p464_p11), %v17287_v49 }
0x1560   : >> { %15367 = vst [vmem:[#allocation2 + $0xa0] sm:$0xff] %v15359_v59  ;;  %19306 = vset.pattern.permute.xlu0 (%p464_p11), %v23061_v14  ;;  %17290 = vmatpush1.bf16.msra.mxu0 (%p464_p11), %v17289_v48  ;;  %vm15567_vm7 = vcmp.lt.s32.totalorder (%p464_p11), %v23064_v10, 512 }
0x1561   : >> { %15368 = vst [vmem:[#allocation2 + $0xa8] sm:$0xff] %v15360_v57  ;;  %17292 = vmatprep.subr.bf16.mxu1 (%p464_p11), %v17291_v40  ;;  %v15572_v1 = vld [vmem:[#allocation2 + $0x80] sm:$0xff] (%p464_p11)  ;;  %15383 = vperm.xlu0 (%p464_p11), %19306, %v15372_v30  }
0x1562   : > { %v15573_v39 = vld [vmem:[#allocation2 + $0x88] sm:$0xff] (%p464_p11)  ;;  %17294 = vmatpush1.bf16.msra.mxu1 (%p464_p11), %v17293_v0 }
0x1563   : > { %v15570_v18 = vld [vmem:[#allocation2 + $0x70] sm:$0xff] (%p464_p11)  ;;  %16739 = vmatmul.mubr.msk.f32.vlgmr.msra.gmra.mrb[0].mxu0 (%p464_p11), %vm560_vm2, %v15371_v52 }
0x1564   : > { %v15571_v11 = vld [vmem:[#allocation2 + $0x78] sm:$0xff] (%p464_p11)  ;;  %15642 = vmatprep.mubr.f32.mxu0 (%p464_p11), %v23060_v26 }
0x1565   : > { %v15576_v43 = vld [vmem:[#allocation2 + $0xb0] sm:$0xff] (%p464_p11)  ;;  %16740 = vmatmul.mubr.msk.f32.vlgmr.msra.gmra.mrb[0].mxu1 (%p464_p11), %vm560_vm2, %v15371_v52 }
0x1566   : > { %v15577_v51 = vld [vmem:[#allocation2 + $0xb8] sm:$0xff]  ;;  %v17301_v15 = vpack.c.bf16 %v15576_v43, %v15572_v1  ;;  %15713 = vmatprep.mubr.f32.mxu1 %v23060_v26 }
0x1567   : > { %v15574_v3 = vld [vmem:[#allocation2 + $0xa0] sm:$0xff]  ;;  %v17299_v60 = vpack.c.bf16 %v15577_v51, %v15573_v39 }
0x1568   : > { %v15575_v44 = vld [vmem:[#allocation2 + $0xa8] sm:$0xff]  ;;  %v17297_v50 = vpack.c.bf16 %v15574_v3, %v15570_v18 }
0x1569   : > { %v17295_v29 = vpack.c.bf16 %v15575_v44, %v15571_v11  ;;  %17300 = vmatprep.subr.bf16.mxu1 %v17299_v60 }
0x156a   : > { %17302 = vmatpush1.bf16.msra.mxu1 %v17301_v15 }
0x156b   : > { %17296 = vmatprep.subr.bf16.mxu0 %v17295_v29 }
0x156c   : > { %17298 = vmatpush1.bf16.msra.mxu0 %v17297_v50 }
0x156d   : > { %16742 = vmatmul.mubr.msk.f32.vlgmr.msra.gmra.mrb[2].mxu1 %vm560_vm2, %v15371_v52 }
0x156f   : > { %16741 = vmatmul.mubr.msk.f32.vlgmr.msra.gmra.mrb[2].mxu0 %vm560_vm2, %v15371_v52 }
0x15e0   : > { %v15384_v2 = vpop.permute.xlu0 %15383 }
0x15e1   : > { %v15389_v5 = vrot.slane %v15384_v2, %v23062_v61 }
0x1636   : > { %v15460_v58 = vpop.f32.mrb[0].mxu0 }
0x1637   : > { %v15461_v19 = vadd.f32 %v15460_v58, %v15389_v5  ;;  %v15462_v54 = vpop.f32.mrb[1].mxu0 }
0x1638   : > { %v15531_v4 = vpop.f32.mrb[0].mxu1  ;;  %v15463_v22 = vadd.f32 %v15462_v54, %v15389_v5 }
0x1639   : > { %v15532_v62 = vadd.f32 %v15531_v4, %v15389_v5  ;;  %v15533_v63 = vpop.f32.mrb[1].mxu1 }
0x163a   : > { %v15534_v38 = vadd.f32 %v15533_v63, %v15389_v5  ;;  %v15540_v37 = vcombine.low %v15461_v19, %v15463_v22 }
0x163c   : > { %v15541_v20 = vcombine.low %v15532_v62, %v15534_v38  ;;  %v15548_v6 = vrot.slane %v15540_v37, %v15547_v47 }
0x163e   : > { %v15555_v55 = vrot.slane %v15541_v20, %v15547_v47 }
0x1640   : > { %v15715_v35 = vpop.f32.mrb[2].mxu1  ;;  %v15556_v42 = vcombine.low %v15548_v6, %v15555_v55 }
0x1641   : > { %v15716_v46 = vadd.f32 %v15715_v35, %v15389_v5  ;;  %v15717_v45 = vpop.f32.mrb[3].mxu1 }
0x1642   : > { %v15644_v31 = vpop.f32.mrb[2].mxu0  ;;  %v15718_v7 = vadd.f32 %v15717_v45, %v15389_v5  ;;  %v15563_v56 = vrot.slane %v15556_v42, %v15547_v47 }
0x1643   : > { %v15645_v17 = vadd.f32 %v15644_v31, %v15389_v5  ;;  %v15646_v41 = vpop.f32.mrb[3].mxu0 }
0x1644   : > { %v15647_v24 = vadd.f32 %v15646_v41, %v15389_v5  ;;  %v15725_v33 = vcombine.low %v15716_v46, %v15718_v7  ;;  %15569 = vst.msk [vmem:[%s19538_s24] sm:$0xf] %vm15567_vm7, %v15563_v56 }
0x1646   : > { %v15724_v9 = vcombine.low %v15645_v17, %v15647_v24  ;;  %v15739_v59 = vrot.slane %v15725_v33, %v15547_v47 }
0x1648   : > { %v15732_v13 = vrot.slane %v15724_v9, %v15547_v47 }
0x164a   : > { %v15740_v57 = vcombine.low %v15732_v13, %v15739_v59 }
0x164c   : > { %v15747_v28 = vrot.slane %v15740_v57, %v15547_v47 }
0x164e   : > { %16743 = vst.msk [vmem:[%s19538_s24 + $0x4] sm:$0xf] %vm15567_vm7, %v15747_v28 }
0x164f   : > { %19320 = shalt.err (!%p19317_p4)
}
0x1650   : > { %s19321_s30 = scalar_lea.hbm %s22918_s17, 128  ;;  %s19325_s25 = scalar_lea.hbm %s22975_s9, 256 }
0x1651   : > { %p19322_p7 = scmp.ne.s32.totalorder %s22918_s17, %s19321_s30  ;;  %p19326_p10 = scmp.lt.u32.totalorder %s22918_s17, %s22975_s9 }
0x1652   : > { %p19327_p11 = scmp.lt.u32.totalorder %s19325_s25, %s19321_s30  ;;  %p19329_p13 = scmp.lt.u32.totalorder %s19321_s30, %s22918_s17 }
0x1653   : > { %p19323_p8 = pnand %p19322_p7, %p19485_p5 }
0x1654   : > { %p19328_p12 = por %p19327_p11, %p19326_p10 }
0x1655   : > { %p19324_p9 = pneg %p19323_p8 }
0x1656   : > { %p19330_p0 = por %p19329_p13, %p19328_p12 }
0x1658   : > { %p19331_p1 = pnand %p19330_p0, %p19324_p9 }
0x165a   : > { %19334 = shalt.err (!%p19331_p1)
}
0x165b   : > { %s19392_s27 = smov 64   ;;  %s19393_s28 = smov 4  }
0x165c   : > { %18071 = dma.vmem_to_hbm [thread:$0]  (%p19485_p5), %s22920_s10, 128, %s22918_s17, %s22925_s26, %s19392_s27, %s19392_s27, %s19393_s28  }
0x165d PF: > { %p18077_p2 = scmp.ge.s32.totalorder %s19373_s14, 2  ;;  %s15781_s8 = sand.u32 1, %s19361_s11  }
0x165e   : > { %s15782_s29 = scalar_lea.sflag [#allocation5], %s15781_s8 }
0x165f   : > { %p18074_p3 = pnand %p18077_p2, %p19489_p6 }
0x1661   : > { %19356 = dma.done.wait (!%p18074_p3), %s15782_s29, 128  }
0x1662   : > { %19358 = vsyncadd (!%p18074_p3), %s15782_s29, 4294967168  ;;  %p21_p4 = scmp.ge.s32.totalorder %s19472_s16, 4   ;;  %s23065_s11 = smov %s19365_s12 }
0x1663   : > { %s23066_s12 = smov %s19369_s13  ;;  %s23067_s13 = smov %s19483_s19 }
0x1664   : > { %s23068_s14 = smov %s19472_s16  ;;  %23 = sbr.rel (!%p21_p4) target bundleno = 6 (0x6), region = 160 }
0x166b   :  { %15787 = vsyncpa [#allocation5], 1 }
0x166c   :  { %15789 = vsyncpa [#allocation5 + $0x1], 1 }

</bundles_post_ra>
